<compile_context>
chip_gen: v6e
topology: v6e:2x2x1
jax: 0.10.0
libtpu: 0.0.40
codegen_flags: <defaults>
</compile_context>

<pallas_src>
import jax
import jax.numpy as jnp
from jax import lax
from jax.experimental import pallas as pl
from jax.experimental.pallas import tpu as pltpu

EPS = 1e-5

H = W = 16                      # patch_size (spatial)
HP = WP = H + 2                 # padded spatial extent (SAME, 3x3)
S_PAD = HP * WP                 # 324 flattened padded spatial positions
WIN = 384                       # matmul N-dim / stored lane width (>=324, %128==0)
MARGIN = 128                    # aligned lane offset where layer outputs are stored
READ_BASE = MARGIN - (WP + 1)   # 109: padded position p lives at lane READ_BASE + p
LANES = 640                     # activation buffer lane width (>= READ_BASE + 38 + WIN)


def _fused_kernel(x_ref, w1_ref, w2_ref, w3_ref, w4_ref,
                  b1_ref, b2_ref, b3_ref, b4_ref, mask_ref,
                  o_ref, buf_a, buf_b):
    """One batch element: conv1..conv4 fully in VMEM.

    x_ref  : (1, cin, LANES)  padded input, padded pos p at lane READ_BASE+p
    wK_ref : (9, coutK, cinK) per-tap weights (BN scale folded), tap = dy*3+dx
    bK_ref : (coutK, 1)       folded bias column
    mask   : (1, WIN)         1.0 at valid output lanes s0 = h*WP + w, else 0
    o_ref  : (1, 8, WIN)      final layer output (row 0 is the real channel)
    buf_*  : (64, LANES)      ping-pong activation scratch
    """
    mask = mask_ref[...]                                     # (1, WIN)

    def conv(read, w_ref, b_ref, relu):
        acc = None
        for dy in range(3):
            for dx in range(3):
                off = READ_BASE + dy * WP + dx               # static lane offset
                rhs = read(off)                              # (cin, WIN)
                d = jnp.dot(w_ref[dy * 3 + dx], rhs,
                            preferred_element_type=jnp.float32)
                acc = d if acc is None else acc + d
            # end dx
        y = acc + b_ref[...]                                 # (cout,1) bcast
        if relu:
            y = jnp.maximum(y, 0.0)
        return y

    # Zero the pad-margin lanes of both scratch buffers (aligned 128-wide stores).
    for buf in (buf_a, buf_b):
        buf[:, 0:MARGIN] = jnp.zeros((64, MARGIN), jnp.float32)
        buf[:, MARGIN + WIN:LANES] = jnp.zeros(
            (64, LANES - MARGIN - WIN), jnp.float32)

    # layer 1: cin -> 64  (reads the pre-laid-out input directly)
    y = conv(lambda o: x_ref[0, :, o:o + WIN], w1_ref, b1_ref, True)
    buf_a[0:64, MARGIN:MARGIN + WIN] = y * mask
    # layer 2: 64 -> 64
    y = conv(lambda o: buf_a[0:64, o:o + WIN], w2_ref, b2_ref, True)
    buf_b[0:64, MARGIN:MARGIN + WIN] = y * mask
    # layer 3: 64 -> 32
    y = conv(lambda o: buf_b[0:64, o:o + WIN], w3_ref, b3_ref, True)
    buf_a[0:32, MARGIN:MARGIN + WIN] = y * mask
    # layer 4: 32 -> 1 (cout zero-padded to 8 sublanes), no BN / no ReLU
    y = conv(lambda o: buf_a[0:32, o:o + WIN], w4_ref, b4_ref, False)
    o_ref[...] = y.reshape(1, 8, WIN)


def _fold_bn(conv_b, gamma, beta, mean, var):
    s = gamma * lax.rsqrt(var + EPS)
    return s, (conv_b - mean) * s + beta


def _prep_w(w_hwio, scale):
    """(3,3,cin,cout) HWIO -> (9, cout, cin) with BN scale folded into weights."""
    wf = w_hwio * scale[None, None, None, :]
    wf = jnp.transpose(wf, (0, 1, 3, 2))                     # (3,3,cout,cin)
    return wf.reshape(9, wf.shape[2], wf.shape[3])


@jax.jit
def prelim_nn_forward(x_nchw, p):
    """Matches PrelimNN.forward (inference-mode BN). x: (N, patch_depth, 16, 16)."""
    N, cin, hh, ww = x_nchw.shape
    assert (hh, ww) == (H, W)

    s1, b1 = _fold_bn(p["b1"], p["g64"], p["be64"], p["mu64"], p["va64"])
    s2, b2 = _fold_bn(p["b2"], p["g64"], p["be64"], p["mu64"], p["va64"])
    s3, b3 = _fold_bn(p["b3"], p["g32"], p["be32"], p["mu32"], p["va32"])

    wt1 = _prep_w(p["w1"], s1)                               # (9, 64, cin)
    wt2 = _prep_w(p["w2"], s2)                               # (9, 64, 64)
    wt3 = _prep_w(p["w3"], s3)                               # (9, 32, 64)
    wt4 = _prep_w(p["w4"], jnp.ones((1,), jnp.float32))      # (9, 1, 32)
    wt4 = jnp.pad(wt4, ((0, 0), (0, 7), (0, 0)))             # (9, 8, 32)

    b1c = b1.reshape(64, 1)
    b2c = b2.reshape(64, 1)
    b3c = b3.reshape(32, 1)
    b4c = jnp.pad(p["b4"].reshape(1, 1), ((0, 7), (0, 0)))   # (8, 1)

    # One tiny wrapper-side pad of the *input only*, into the channels-first
    # flattened lane layout (padded position p -> lane READ_BASE + p).
    xp = jnp.pad(x_nchw, ((0, 0), (0, 0), (1, 1), (1, 1)))   # (N,cin,18,18)
    xp = xp.reshape(N, cin, S_PAD)
    xp = jnp.pad(xp, ((0, 0), (0, 0),
                      (READ_BASE, LANES - READ_BASE - S_PAD)))  # (N,cin,LANES)

    idx = jnp.arange(WIN)
    mask = (((idx % WP) < W) & (idx < H * WP)).astype(jnp.float32)
    mask = mask.reshape(1, WIN)

    out = pl.pallas_call(
        _fused_kernel,
        out_shape=jax.ShapeDtypeStruct((N, 8, WIN), jnp.float32),
        grid_spec=pltpu.PrefetchScalarGridSpec(
            num_scalar_prefetch=0,
            grid=(N,),
            in_specs=[
                pl.BlockSpec((1, cin, LANES), lambda n: (n, 0, 0)),
                pl.BlockSpec(wt1.shape, lambda n: (0, 0, 0)),
                pl.BlockSpec(wt2.shape, lambda n: (0, 0, 0)),
                pl.BlockSpec(wt3.shape, lambda n: (0, 0, 0)),
                pl.BlockSpec(wt4.shape, lambda n: (0, 0, 0)),
                pl.BlockSpec((64, 1), lambda n: (0, 0)),
                pl.BlockSpec((64, 1), lambda n: (0, 0)),
                pl.BlockSpec((32, 1), lambda n: (0, 0)),
                pl.BlockSpec((8, 1), lambda n: (0, 0)),
                pl.BlockSpec((1, WIN), lambda n: (0, 0)),
            ],
            out_specs=pl.BlockSpec((1, 8, WIN), lambda n: (n, 0, 0)),
            scratch_shapes=[pltpu.VMEM((64, LANES), jnp.float32),
                            pltpu.VMEM((64, LANES), jnp.float32)],
        ),
        compiler_params=pltpu.CompilerParams(
            dimension_semantics=("parallel",)),
    )(xp, wt1, wt2, wt3, wt4, b1c, b2c, b3c, b4c, mask)

    # Extract the valid output lanes s0 = h*WP + w (row 0 = the single channel).
    y = out[:, 0, :H * WP].reshape(N, H, WP)[:, :, :W]       # (N, 16, 16)
    return y[:, None, :, :]                                  # (N, 1, 16, 16)


def init_params(key, patch_depth):
    ks = jax.random.split(key, 16)
    p = {}
    p["w1"] = 0.1 * jax.random.normal(ks[0], (3, 3, patch_depth, 64), jnp.float32)
    p["b1"] = 0.05 * jax.random.normal(ks[1], (64,), jnp.float32)
    p["w2"] = 0.1 * jax.random.normal(ks[2], (3, 3, 64, 64), jnp.float32)
    p["b2"] = 0.05 * jax.random.normal(ks[3], (64,), jnp.float32)
    p["w3"] = 0.1 * jax.random.normal(ks[4], (3, 3, 64, 32), jnp.float32)
    p["b3"] = 0.05 * jax.random.normal(ks[5], (32,), jnp.float32)
    p["w4"] = 0.1 * jax.random.normal(ks[6], (3, 3, 32, 1), jnp.float32)
    p["b4"] = 0.05 * jax.random.normal(ks[7], (1,), jnp.float32)
    # BatchNorm2d(64) -- shared (used after conv1 and conv2), inference stats.
    p["g64"] = 1.0 + 0.1 * jax.random.normal(ks[8], (64,), jnp.float32)
    p["be64"] = 0.1 * jax.random.normal(ks[9], (64,), jnp.float32)
    p["mu64"] = 0.1 * jax.random.normal(ks[10], (64,), jnp.float32)
    p["va64"] = 0.5 + jax.random.uniform(ks[11], (64,), jnp.float32)
    # BatchNorm2d(32)
    p["g32"] = 1.0 + 0.1 * jax.random.normal(ks[12], (32,), jnp.float32)
    p["be32"] = 0.1 * jax.random.normal(ks[13], (32,), jnp.float32)
    p["mu32"] = 0.1 * jax.random.normal(ks[14], (32,), jnp.float32)
    p["va32"] = 0.5 + jax.random.uniform(ks[15], (32,), jnp.float32)
    return p


def _ref_forward(x_nchw, p):
    """Pure-JAX/XLA reference for correctness checking."""
    def conv(x, w):
        return lax.conv_general_dilated(
            x, w, (1, 1), "SAME",
            dimension_numbers=("NHWC", "HWIO", "NHWC"))

    x = jnp.transpose(x_nchw, (0, 2, 3, 1))
    s1, b1 = _fold_bn(p["b1"], p["g64"], p["be64"], p["mu64"], p["va64"])
    s2, b2 = _fold_bn(p["b2"], p["g64"], p["be64"], p["mu64"], p["va64"])
    s3, b3 = _fold_bn(p["b3"], p["g32"], p["be32"], p["mu32"], p["va32"])
    y = jnp.maximum(conv(x, p["w1"]) * s1 + b1, 0.0)
    y = jnp.maximum(conv(y, p["w2"]) * s2 + b2, 0.0)
    y = jnp.maximum(conv(y, p["w3"]) * s3 + b3, 0.0)
    y = conv(y, p["w4"]) + p["b4"]
    return jnp.transpose(y, (0, 3, 1, 2))


if __name__ == "__main__":
    batch, patch_depth, patch_size = 2, 4, 16
    key = jax.random.PRNGKey(0)
    kx, kp = jax.random.split(key)
    x = jax.random.normal(kx, (batch, patch_depth, patch_size, patch_size),
                          jnp.float32)
    params = init_params(kp, patch_depth)

    out = jax.block_until_ready(prelim_nn_forward(x, params))
    assert out.shape == (batch, 1, patch_size, patch_size), out.shape

    ref = jax.block_until_ready(_ref_forward(x, params))
    err = float(jnp.max(jnp.abs(out - ref)))
    assert jnp.allclose(out, ref, rtol=1e-4, atol=1e-4), err

    print("KERNEL_OK")
</pallas_src>

<mosaic_0001>
module attributes {stable_mosaic.version = 11 : i64} {
  func.func @_fused_kernel(%arg0: i32, %arg1: memref<1x4x640xf32, #tpu.memory_space<vmem>>, %arg2: memref<9x64x4xf32, #tpu.memory_space<vmem>>, %arg3: memref<9x64x64xf32, #tpu.memory_space<vmem>>, %arg4: memref<9x32x64xf32, #tpu.memory_space<vmem>>, %arg5: memref<9x8x32xf32, #tpu.memory_space<vmem>>, %arg6: memref<64x1xf32, #tpu.memory_space<vmem>>, %arg7: memref<64x1xf32, #tpu.memory_space<vmem>>, %arg8: memref<32x1xf32, #tpu.memory_space<vmem>>, %arg9: memref<8x1xf32, #tpu.memory_space<vmem>>, %arg10: memref<1x384xf32, #tpu.memory_space<vmem>>, %arg11: memref<1x8x384xf32, #tpu.memory_space<vmem>>, %arg12: memref<64x640xf32, #tpu.memory_space<vmem>>, %arg13: memref<64x640xf32, #tpu.memory_space<vmem>>) attributes {dimension_semantics = [#tpu.dimension_semantics<parallel>], iteration_bounds = array<i64: 2>, scalar_prefetch = 0 : i64, scratch_operands = 2 : i64, tpu.core_type = #tpu.core_type<tc>, window_params = [{transform_indices = @transform_0, window_bounds = array<i64: 1, 4, 640>}, {pipeline_mode = #tpu.pipeline_mode<synchronous>, transform_indices = @transform_1, window_bounds = array<i64: 9, 64, 4>}, {pipeline_mode = #tpu.pipeline_mode<synchronous>, transform_indices = @transform_2, window_bounds = array<i64: 9, 64, 64>}, {pipeline_mode = #tpu.pipeline_mode<synchronous>, transform_indices = @transform_3, window_bounds = array<i64: 9, 32, 64>}, {pipeline_mode = #tpu.pipeline_mode<synchronous>, transform_indices = @transform_4, window_bounds = array<i64: 9, 8, 32>}, {pipeline_mode = #tpu.pipeline_mode<synchronous>, transform_indices = @transform_5, window_bounds = array<i64: 64, 1>}, {pipeline_mode = #tpu.pipeline_mode<synchronous>, transform_indices = @transform_6, window_bounds = array<i64: 64, 1>}, {pipeline_mode = #tpu.pipeline_mode<synchronous>, transform_indices = @transform_7, window_bounds = array<i64: 32, 1>}, {pipeline_mode = #tpu.pipeline_mode<synchronous>, transform_indices = @transform_8, window_bounds = array<i64: 8, 1>}, {pipeline_mode = #tpu.pipeline_mode<synchronous>, transform_indices = @transform_9, window_bounds = array<i64: 1, 384>}, {transform_indices = @transform_10, window_bounds = array<i64: 1, 8, 384>}]} {
    %c0 = arith.constant 0 : index
    %c0_0 = arith.constant 0 : index
    %0 = vector.load %arg10[%c0, %c0_0] : memref<1x384xf32, #tpu.memory_space<vmem>>, vector<1x384xf32>
    %cst = arith.constant 0.000000e+00 : f32
    %1 = vector.broadcast %cst : f32 to vector<64x128xf32>
    %c0_1 = arith.constant 0 : index
    %c0_2 = arith.constant 0 : index
    %2 = vector.load %arg12[%c0_1, %c0_2] : memref<64x640xf32, #tpu.memory_space<vmem>>, vector<64x128xf32>
    tpu.vector_store %arg12[%c0_1, %c0_2], %1 {strides = array<i32>} : memref<64x640xf32, #tpu.memory_space<vmem>>, vector<64x128xf32>,
    %cst_3 = arith.constant 0.000000e+00 : f32
    %3 = vector.broadcast %cst_3 : f32 to vector<64x128xf32>
    %c0_4 = arith.constant 0 : index
    %c512 = arith.constant 512 : index
    %4 = vector.load %arg12[%c0_4, %c512] : memref<64x640xf32, #tpu.memory_space<vmem>>, vector<64x128xf32>
    tpu.vector_store %arg12[%c0_4, %c512], %3 {strides = array<i32>} : memref<64x640xf32, #tpu.memory_space<vmem>>, vector<64x128xf32>,
    %cst_5 = arith.constant 0.000000e+00 : f32
    %5 = vector.broadcast %cst_5 : f32 to vector<64x128xf32>
    %c0_6 = arith.constant 0 : index
    %c0_7 = arith.constant 0 : index
    %6 = vector.load %arg13[%c0_6, %c0_7] : memref<64x640xf32, #tpu.memory_space<vmem>>, vector<64x128xf32>
    tpu.vector_store %arg13[%c0_6, %c0_7], %5 {strides = array<i32>} : memref<64x640xf32, #tpu.memory_space<vmem>>, vector<64x128xf32>,
    %cst_8 = arith.constant 0.000000e+00 : f32
    %7 = vector.broadcast %cst_8 : f32 to vector<64x128xf32>
    %c0_9 = arith.constant 0 : index
    %c512_10 = arith.constant 512 : index
    %8 = vector.load %arg13[%c0_9, %c512_10] : memref<64x640xf32, #tpu.memory_space<vmem>>, vector<64x128xf32>
    tpu.vector_store %arg13[%c0_9, %c512_10], %7 {strides = array<i32>} : memref<64x640xf32, #tpu.memory_space<vmem>>, vector<64x128xf32>,
    %c0_11 = arith.constant 0 : index
    %c0_12 = arith.constant 0 : index
    %c109 = arith.constant 109 : index
    %9 = vector.load %arg1[%c0_11, %c0_12, %c109] : memref<1x4x640xf32, #tpu.memory_space<vmem>>, vector<1x4x384xf32>
    %10 = vector.shape_cast %9 : vector<1x4x384xf32> to vector<4x384xf32>
    %c0_13 = arith.constant 0 : index
    %c0_14 = arith.constant 0 : index
    %c0_15 = arith.constant 0 : index
    %11 = vector.load %arg2[%c0_13, %c0_14, %c0_15] : memref<9x64x4xf32, #tpu.memory_space<vmem>>, vector<1x64x4xf32>
    %12 = vector.shape_cast %11 : vector<1x64x4xf32> to vector<64x4xf32>
    %cst_16 = arith.constant dense<0.000000e+00> : vector<64x384xf32>
    %13 = tpu.matmul %12, %10, %cst_16 {dimension_numbers = #tpu.dot_dimension_numbers<[1], [0], [0], [1], [0, 0, 1, 1], [], []>} : vector<64x4xf32>, vector<4x384xf32>, vector<64x384xf32> -> vector<64x384xf32>
    %c0_17 = arith.constant 0 : index
    %c0_18 = arith.constant 0 : index
    %c110 = arith.constant 110 : index
    %14 = vector.load %arg1[%c0_17, %c0_18, %c110] : memref<1x4x640xf32, #tpu.memory_space<vmem>>, vector<1x4x384xf32>
    %15 = vector.shape_cast %14 : vector<1x4x384xf32> to vector<4x384xf32>
    %c1 = arith.constant 1 : index
    %c0_19 = arith.constant 0 : index
    %c0_20 = arith.constant 0 : index
    %16 = vector.load %arg2[%c1, %c0_19, %c0_20] : memref<9x64x4xf32, #tpu.memory_space<vmem>>, vector<1x64x4xf32>
    %17 = vector.shape_cast %16 : vector<1x64x4xf32> to vector<64x4xf32>
    %cst_21 = arith.constant dense<0.000000e+00> : vector<64x384xf32>
    %18 = tpu.matmul %17, %15, %cst_21 {dimension_numbers = #tpu.dot_dimension_numbers<[1], [0], [0], [1], [0, 0, 1, 1], [], []>} : vector<64x4xf32>, vector<4x384xf32>, vector<64x384xf32> -> vector<64x384xf32>
    %19 = arith.addf %13, %18 : vector<64x384xf32>
    %c0_22 = arith.constant 0 : index
    %c0_23 = arith.constant 0 : index
    %c111 = arith.constant 111 : index
    %20 = vector.load %arg1[%c0_22, %c0_23, %c111] : memref<1x4x640xf32, #tpu.memory_space<vmem>>, vector<1x4x384xf32>
    %21 = vector.shape_cast %20 : vector<1x4x384xf32> to vector<4x384xf32>
    %c2 = arith.constant 2 : index
    %c0_24 = arith.constant 0 : index
    %c0_25 = arith.constant 0 : index
    %22 = vector.load %arg2[%c2, %c0_24, %c0_25] : memref<9x64x4xf32, #tpu.memory_space<vmem>>, vector<1x64x4xf32>
    %23 = vector.shape_cast %22 : vector<1x64x4xf32> to vector<64x4xf32>
    %cst_26 = arith.constant dense<0.000000e+00> : vector<64x384xf32>
    %24 = tpu.matmul %23, %21, %cst_26 {dimension_numbers = #tpu.dot_dimension_numbers<[1], [0], [0], [1], [0, 0, 1, 1], [], []>} : vector<64x4xf32>, vector<4x384xf32>, vector<64x384xf32> -> vector<64x384xf32>
    %25 = arith.addf %19, %24 : vector<64x384xf32>
    %c0_27 = arith.constant 0 : index
    %c0_28 = arith.constant 0 : index
    %c127 = arith.constant 127 : index
    %26 = vector.load %arg1[%c0_27, %c0_28, %c127] : memref<1x4x640xf32, #tpu.memory_space<vmem>>, vector<1x4x384xf32>
    %27 = vector.shape_cast %26 : vector<1x4x384xf32> to vector<4x384xf32>
    %c3 = arith.constant 3 : index
    %c0_29 = arith.constant 0 : index
    %c0_30 = arith.constant 0 : index
    %28 = vector.load %arg2[%c3, %c0_29, %c0_30] : memref<9x64x4xf32, #tpu.memory_space<vmem>>, vector<1x64x4xf32>
    %29 = vector.shape_cast %28 : vector<1x64x4xf32> to vector<64x4xf32>
    %cst_31 = arith.constant dense<0.000000e+00> : vector<64x384xf32>
    %30 = tpu.matmul %29, %27, %cst_31 {dimension_numbers = #tpu.dot_dimension_numbers<[1], [0], [0], [1], [0, 0, 1, 1], [], []>} : vector<64x4xf32>, vector<4x384xf32>, vector<64x384xf32> -> vector<64x384xf32>
    %31 = arith.addf %25, %30 : vector<64x384xf32>
    %c0_32 = arith.constant 0 : index
    %c0_33 = arith.constant 0 : index
    %c128 = arith.constant 128 : index
    %32 = vector.load %arg1[%c0_32, %c0_33, %c128] : memref<1x4x640xf32, #tpu.memory_space<vmem>>, vector<1x4x384xf32>
    %33 = vector.shape_cast %32 : vector<1x4x384xf32> to vector<4x384xf32>
    %c4 = arith.constant 4 : index
    %c0_34 = arith.constant 0 : index
    %c0_35 = arith.constant 0 : index
    %34 = vector.load %arg2[%c4, %c0_34, %c0_35] : memref<9x64x4xf32, #tpu.memory_space<vmem>>, vector<1x64x4xf32>
    %35 = vector.shape_cast %34 : vector<1x64x4xf32> to vector<64x4xf32>
    %cst_36 = arith.constant dense<0.000000e+00> : vector<64x384xf32>
    %36 = tpu.matmul %35, %33, %cst_36 {dimension_numbers = #tpu.dot_dimension_numbers<[1], [0], [0], [1], [0, 0, 1, 1], [], []>} : vector<64x4xf32>, vector<4x384xf32>, vector<64x384xf32> -> vector<64x384xf32>
    %37 = arith.addf %31, %36 : vector<64x384xf32>
    %c0_37 = arith.constant 0 : index
    %c0_38 = arith.constant 0 : index
    %c129 = arith.constant 129 : index
    %38 = vector.load %arg1[%c0_37, %c0_38, %c129] : memref<1x4x640xf32, #tpu.memory_space<vmem>>, vector<1x4x384xf32>
    %39 = vector.shape_cast %38 : vector<1x4x384xf32> to vector<4x384xf32>
    %c5 = arith.constant 5 : index
    %c0_39 = arith.constant 0 : index
    %c0_40 = arith.constant 0 : index
    %40 = vector.load %arg2[%c5, %c0_39, %c0_40] : memref<9x64x4xf32, #tpu.memory_space<vmem>>, vector<1x64x4xf32>
    %41 = vector.shape_cast %40 : vector<1x64x4xf32> to vector<64x4xf32>
    %cst_41 = arith.constant dense<0.000000e+00> : vector<64x384xf32>
    %42 = tpu.matmul %41, %39, %cst_41 {dimension_numbers = #tpu.dot_dimension_numbers<[1], [0], [0], [1], [0, 0, 1, 1], [], []>} : vector<64x4xf32>, vector<4x384xf32>, vector<64x384xf32> -> vector<64x384xf32>
    %43 = arith.addf %37, %42 : vector<64x384xf32>
    %c0_42 = arith.constant 0 : index
    %c0_43 = arith.constant 0 : index
    %c145 = arith.constant 145 : index
    %44 = vector.load %arg1[%c0_42, %c0_43, %c145] : memref<1x4x640xf32, #tpu.memory_space<vmem>>, vector<1x4x384xf32>
    %45 = vector.shape_cast %44 : vector<1x4x384xf32> to vector<4x384xf32>
    %c6 = arith.constant 6 : index
    %c0_44 = arith.constant 0 : index
    %c0_45 = arith.constant 0 : index
    %46 = vector.load %arg2[%c6, %c0_44, %c0_45] : memref<9x64x4xf32, #tpu.memory_space<vmem>>, vector<1x64x4xf32>
    %47 = vector.shape_cast %46 : vector<1x64x4xf32> to vector<64x4xf32>
    %cst_46 = arith.constant dense<0.000000e+00> : vector<64x384xf32>
    %48 = tpu.matmul %47, %45, %cst_46 {dimension_numbers = #tpu.dot_dimension_numbers<[1], [0], [0], [1], [0, 0, 1, 1], [], []>} : vector<64x4xf32>, vector<4x384xf32>, vector<64x384xf32> -> vector<64x384xf32>
    %49 = arith.addf %43, %48 : vector<64x384xf32>
    %c0_47 = arith.constant 0 : index
    %c0_48 = arith.constant 0 : index
    %c146 = arith.constant 146 : index
    %50 = vector.load %arg1[%c0_47, %c0_48, %c146] : memref<1x4x640xf32, #tpu.memory_space<vmem>>, vector<1x4x384xf32>
    %51 = vector.shape_cast %50 : vector<1x4x384xf32> to vector<4x384xf32>
    %c7 = arith.constant 7 : index
    %c0_49 = arith.constant 0 : index
    %c0_50 = arith.constant 0 : index
    %52 = vector.load %arg2[%c7, %c0_49, %c0_50] : memref<9x64x4xf32, #tpu.memory_space<vmem>>, vector<1x64x4xf32>
    %53 = vector.shape_cast %52 : vector<1x64x4xf32> to vector<64x4xf32>
    %cst_51 = arith.constant dense<0.000000e+00> : vector<64x384xf32>
    %54 = tpu.matmul %53, %51, %cst_51 {dimension_numbers = #tpu.dot_dimension_numbers<[1], [0], [0], [1], [0, 0, 1, 1], [], []>} : vector<64x4xf32>, vector<4x384xf32>, vector<64x384xf32> -> vector<64x384xf32>
    %55 = arith.addf %49, %54 : vector<64x384xf32>
    %c0_52 = arith.constant 0 : index
    %c0_53 = arith.constant 0 : index
    %c147 = arith.constant 147 : index
    %56 = vector.load %arg1[%c0_52, %c0_53, %c147] : memref<1x4x640xf32, #tpu.memory_space<vmem>>, vector<1x4x384xf32>
    %57 = vector.shape_cast %56 : vector<1x4x384xf32> to vector<4x384xf32>
    %c8 = arith.constant 8 : index
    %c0_54 = arith.constant 0 : index
    %c0_55 = arith.constant 0 : index
    %58 = vector.load %arg2[%c8, %c0_54, %c0_55] : memref<9x64x4xf32, #tpu.memory_space<vmem>>, vector<1x64x4xf32>
    %59 = vector.shape_cast %58 : vector<1x64x4xf32> to vector<64x4xf32>
    %cst_56 = arith.constant dense<0.000000e+00> : vector<64x384xf32>
    %60 = tpu.matmul %59, %57, %cst_56 {dimension_numbers = #tpu.dot_dimension_numbers<[1], [0], [0], [1], [0, 0, 1, 1], [], []>} : vector<64x4xf32>, vector<4x384xf32>, vector<64x384xf32> -> vector<64x384xf32>
    %61 = arith.addf %55, %60 : vector<64x384xf32>
    %c0_57 = arith.constant 0 : index
    %c0_58 = arith.constant 0 : index
    %62 = vector.load %arg6[%c0_57, %c0_58] : memref<64x1xf32, #tpu.memory_space<vmem>>, vector<64x1xf32>
    %63 = vector.broadcast %62 : vector<64x1xf32> to vector<64x384xf32>
    %64 = arith.addf %61, %63 : vector<64x384xf32>
    %cst_59 = arith.constant 0.000000e+00 : f32
    %65 = vector.broadcast %cst_59 : f32 to vector<64x384xf32>
    %66 = arith.maximumf %64, %65 : vector<64x384xf32>
    %67 = vector.broadcast %0 : vector<1x384xf32> to vector<64x384xf32>
    %68 = arith.mulf %66, %67 : vector<64x384xf32>
    %c0_60 = arith.constant 0 : index
    %c128_61 = arith.constant 128 : index
    %69 = vector.load %arg12[%c0_60, %c128_61] : memref<64x640xf32, #tpu.memory_space<vmem>>, vector<64x384xf32>
    tpu.vector_store %arg12[%c0_60, %c128_61], %68 {strides = array<i32>} : memref<64x640xf32, #tpu.memory_space<vmem>>, vector<64x384xf32>,
    %c0_62 = arith.constant 0 : index
    %c109_63 = arith.constant 109 : index
    %70 = vector.load %arg12[%c0_62, %c109_63] : memref<64x640xf32, #tpu.memory_space<vmem>>, vector<64x384xf32>
    %c0_64 = arith.constant 0 : index
    %c0_65 = arith.constant 0 : index
    %c0_66 = arith.constant 0 : index
    %71 = vector.load %arg3[%c0_64, %c0_65, %c0_66] : memref<9x64x64xf32, #tpu.memory_space<vmem>>, vector<1x64x64xf32>
    %72 = vector.shape_cast %71 : vector<1x64x64xf32> to vector<64x64xf32>
    %cst_67 = arith.constant dense<0.000000e+00> : vector<64x384xf32>
    %73 = tpu.matmul %72, %70, %cst_67 {dimension_numbers = #tpu.dot_dimension_numbers<[1], [0], [0], [1], [0, 0, 1, 1], [], []>} : vector<64x64xf32>, vector<64x384xf32>, vector<64x384xf32> -> vector<64x384xf32>
    %c0_68 = arith.constant 0 : index
    %c110_69 = arith.constant 110 : index
    %74 = vector.load %arg12[%c0_68, %c110_69] : memref<64x640xf32, #tpu.memory_space<vmem>>, vector<64x384xf32>
    %c1_70 = arith.constant 1 : index
    %c0_71 = arith.constant 0 : index
    %c0_72 = arith.constant 0 : index
    %75 = vector.load %arg3[%c1_70, %c0_71, %c0_72] : memref<9x64x64xf32, #tpu.memory_space<vmem>>, vector<1x64x64xf32>
    %76 = vector.shape_cast %75 : vector<1x64x64xf32> to vector<64x64xf32>
    %cst_73 = arith.constant dense<0.000000e+00> : vector<64x384xf32>
    %77 = tpu.matmul %76, %74, %cst_73 {dimension_numbers = #tpu.dot_dimension_numbers<[1], [0], [0], [1], [0, 0, 1, 1], [], []>} : vector<64x64xf32>, vector<64x384xf32>, vector<64x384xf32> -> vector<64x384xf32>
    %78 = arith.addf %73, %77 : vector<64x384xf32>
    %c0_74 = arith.constant 0 : index
    %c111_75 = arith.constant 111 : index
    %79 = vector.load %arg12[%c0_74, %c111_75] : memref<64x640xf32, #tpu.memory_space<vmem>>, vector<64x384xf32>
    %c2_76 = arith.constant 2 : index
    %c0_77 = arith.constant 0 : index
    %c0_78 = arith.constant 0 : index
    %80 = vector.load %arg3[%c2_76, %c0_77, %c0_78] : memref<9x64x64xf32, #tpu.memory_space<vmem>>, vector<1x64x64xf32>
    %81 = vector.shape_cast %80 : vector<1x64x64xf32> to vector<64x64xf32>
    %cst_79 = arith.constant dense<0.000000e+00> : vector<64x384xf32>
    %82 = tpu.matmul %81, %79, %cst_79 {dimension_numbers = #tpu.dot_dimension_numbers<[1], [0], [0], [1], [0, 0, 1, 1], [], []>} : vector<64x64xf32>, vector<64x384xf32>, vector<64x384xf32> -> vector<64x384xf32>
    %83 = arith.addf %78, %82 : vector<64x384xf32>
    %c0_80 = arith.constant 0 : index
    %c127_81 = arith.constant 127 : index
    %84 = vector.load %arg12[%c0_80, %c127_81] : memref<64x640xf32, #tpu.memory_space<vmem>>, vector<64x384xf32>
    %c3_82 = arith.constant 3 : index
    %c0_83 = arith.constant 0 : index
    %c0_84 = arith.constant 0 : index
    %85 = vector.load %arg3[%c3_82, %c0_83, %c0_84] : memref<9x64x64xf32, #tpu.memory_space<vmem>>, vector<1x64x64xf32>
    %86 = vector.shape_cast %85 : vector<1x64x64xf32> to vector<64x64xf32>
    %cst_85 = arith.constant dense<0.000000e+00> : vector<64x384xf32>
    %87 = tpu.matmul %86, %84, %cst_85 {dimension_numbers = #tpu.dot_dimension_numbers<[1], [0], [0], [1], [0, 0, 1, 1], [], []>} : vector<64x64xf32>, vector<64x384xf32>, vector<64x384xf32> -> vector<64x384xf32>
    %88 = arith.addf %83, %87 : vector<64x384xf32>
    %c0_86 = arith.constant 0 : index
    %c128_87 = arith.constant 128 : index
    %89 = vector.load %arg12[%c0_86, %c128_87] : memref<64x640xf32, #tpu.memory_space<vmem>>, vector<64x384xf32>
    %c4_88 = arith.constant 4 : index
    %c0_89 = arith.constant 0 : index
    %c0_90 = arith.constant 0 : index
    %90 = vector.load %arg3[%c4_88, %c0_89, %c0_90] : memref<9x64x64xf32, #tpu.memory_space<vmem>>, vector<1x64x64xf32>
    %91 = vector.shape_cast %90 : vector<1x64x64xf32> to vector<64x64xf32>
    %cst_91 = arith.constant dense<0.000000e+00> : vector<64x384xf32>
    %92 = tpu.matmul %91, %89, %cst_91 {dimension_numbers = #tpu.dot_dimension_numbers<[1], [0], [0], [1], [0, 0, 1, 1], [], []>} : vector<64x64xf32>, vector<64x384xf32>, vector<64x384xf32> -> vector<64x384xf32>
    %93 = arith.addf %88, %92 : vector<64x384xf32>
    %c0_92 = arith.constant 0 : index
    %c129_93 = arith.constant 129 : index
    %94 = vector.load %arg12[%c0_92, %c129_93] : memref<64x640xf32, #tpu.memory_space<vmem>>, vector<64x384xf32>
    %c5_94 = arith.constant 5 : index
    %c0_95 = arith.constant 0 : index
    %c0_96 = arith.constant 0 : index
    %95 = vector.load %arg3[%c5_94, %c0_95, %c0_96] : memref<9x64x64xf32, #tpu.memory_space<vmem>>, vector<1x64x64xf32>
    %96 = vector.shape_cast %95 : vector<1x64x64xf32> to vector<64x64xf32>
    %cst_97 = arith.constant dense<0.000000e+00> : vector<64x384xf32>
    %97 = tpu.matmul %96, %94, %cst_97 {dimension_numbers = #tpu.dot_dimension_numbers<[1], [0], [0], [1], [0, 0, 1, 1], [], []>} : vector<64x64xf32>, vector<64x384xf32>, vector<64x384xf32> -> vector<64x384xf32>
    %98 = arith.addf %93, %97 : vector<64x384xf32>
    %c0_98 = arith.constant 0 : index
    %c145_99 = arith.constant 145 : index
    %99 = vector.load %arg12[%c0_98, %c145_99] : memref<64x640xf32, #tpu.memory_space<vmem>>, vector<64x384xf32>
    %c6_100 = arith.constant 6 : index
    %c0_101 = arith.constant 0 : index
    %c0_102 = arith.constant 0 : index
    %100 = vector.load %arg3[%c6_100, %c0_101, %c0_102] : memref<9x64x64xf32, #tpu.memory_space<vmem>>, vector<1x64x64xf32>
    %101 = vector.shape_cast %100 : vector<1x64x64xf32> to vector<64x64xf32>
    %cst_103 = arith.constant dense<0.000000e+00> : vector<64x384xf32>
    %102 = tpu.matmul %101, %99, %cst_103 {dimension_numbers = #tpu.dot_dimension_numbers<[1], [0], [0], [1], [0, 0, 1, 1], [], []>} : vector<64x64xf32>, vector<64x384xf32>, vector<64x384xf32> -> vector<64x384xf32>
    %103 = arith.addf %98, %102 : vector<64x384xf32>
    %c0_104 = arith.constant 0 : index
    %c146_105 = arith.constant 146 : index
    %104 = vector.load %arg12[%c0_104, %c146_105] : memref<64x640xf32, #tpu.memory_space<vmem>>, vector<64x384xf32>
    %c7_106 = arith.constant 7 : index
    %c0_107 = arith.constant 0 : index
    %c0_108 = arith.constant 0 : index
    %105 = vector.load %arg3[%c7_106, %c0_107, %c0_108] : memref<9x64x64xf32, #tpu.memory_space<vmem>>, vector<1x64x64xf32>
    %106 = vector.shape_cast %105 : vector<1x64x64xf32> to vector<64x64xf32>
    %cst_109 = arith.constant dense<0.000000e+00> : vector<64x384xf32>
    %107 = tpu.matmul %106, %104, %cst_109 {dimension_numbers = #tpu.dot_dimension_numbers<[1], [0], [0], [1], [0, 0, 1, 1], [], []>} : vector<64x64xf32>, vector<64x384xf32>, vector<64x384xf32> -> vector<64x384xf32>
    %108 = arith.addf %103, %107 : vector<64x384xf32>
    %c0_110 = arith.constant 0 : index
    %c147_111 = arith.constant 147 : index
    %109 = vector.load %arg12[%c0_110, %c147_111] : memref<64x640xf32, #tpu.memory_space<vmem>>, vector<64x384xf32>
    %c8_112 = arith.constant 8 : index
    %c0_113 = arith.constant 0 : index
    %c0_114 = arith.constant 0 : index
    %110 = vector.load %arg3[%c8_112, %c0_113, %c0_114] : memref<9x64x64xf32, #tpu.memory_space<vmem>>, vector<1x64x64xf32>
    %111 = vector.shape_cast %110 : vector<1x64x64xf32> to vector<64x64xf32>
    %cst_115 = arith.constant dense<0.000000e+00> : vector<64x384xf32>
    %112 = tpu.matmul %111, %109, %cst_115 {dimension_numbers = #tpu.dot_dimension_numbers<[1], [0], [0], [1], [0, 0, 1, 1], [], []>} : vector<64x64xf32>, vector<64x384xf32>, vector<64x384xf32> -> vector<64x384xf32>
    %113 = arith.addf %108, %112 : vector<64x384xf32>
    %c0_116 = arith.constant 0 : index
    %c0_117 = arith.constant 0 : index
    %114 = vector.load %arg7[%c0_116, %c0_117] : memref<64x1xf32, #tpu.memory_space<vmem>>, vector<64x1xf32>
    %115 = vector.broadcast %114 : vector<64x1xf32> to vector<64x384xf32>
    %116 = arith.addf %113, %115 : vector<64x384xf32>
    %cst_118 = arith.constant 0.000000e+00 : f32
    %117 = vector.broadcast %cst_118 : f32 to vector<64x384xf32>
    %118 = arith.maximumf %116, %117 : vector<64x384xf32>
    %119 = vector.broadcast %0 : vector<1x384xf32> to vector<64x384xf32>
    %120 = arith.mulf %118, %119 : vector<64x384xf32>
    %c0_119 = arith.constant 0 : index
    %c128_120 = arith.constant 128 : index
    %121 = vector.load %arg13[%c0_119, %c128_120] : memref<64x640xf32, #tpu.memory_space<vmem>>, vector<64x384xf32>
    tpu.vector_store %arg13[%c0_119, %c128_120], %120 {strides = array<i32>} : memref<64x640xf32, #tpu.memory_space<vmem>>, vector<64x384xf32>,
    %c0_121 = arith.constant 0 : index
    %c109_122 = arith.constant 109 : index
    %122 = vector.load %arg13[%c0_121, %c109_122] : memref<64x640xf32, #tpu.memory_space<vmem>>, vector<64x384xf32>
    %c0_123 = arith.constant 0 : index
    %c0_124 = arith.constant 0 : index
    %c0_125 = arith.constant 0 : index
    %123 = vector.load %arg4[%c0_123, %c0_124, %c0_125] : memref<9x32x64xf32, #tpu.memory_space<vmem>>, vector<1x32x64xf32>
    %124 = vector.shape_cast %123 : vector<1x32x64xf32> to vector<32x64xf32>
    %cst_126 = arith.constant dense<0.000000e+00> : vector<32x384xf32>
    %125 = tpu.matmul %124, %122, %cst_126 {dimension_numbers = #tpu.dot_dimension_numbers<[1], [0], [0], [1], [0, 0, 1, 1], [], []>} : vector<32x64xf32>, vector<64x384xf32>, vector<32x384xf32> -> vector<32x384xf32>
    %c0_127 = arith.constant 0 : index
    %c110_128 = arith.constant 110 : index
    %126 = vector.load %arg13[%c0_127, %c110_128] : memref<64x640xf32, #tpu.memory_space<vmem>>, vector<64x384xf32>
    %c1_129 = arith.constant 1 : index
    %c0_130 = arith.constant 0 : index
    %c0_131 = arith.constant 0 : index
    %127 = vector.load %arg4[%c1_129, %c0_130, %c0_131] : memref<9x32x64xf32, #tpu.memory_space<vmem>>, vector<1x32x64xf32>
    %128 = vector.shape_cast %127 : vector<1x32x64xf32> to vector<32x64xf32>
    %cst_132 = arith.constant dense<0.000000e+00> : vector<32x384xf32>
    %129 = tpu.matmul %128, %126, %cst_132 {dimension_numbers = #tpu.dot_dimension_numbers<[1], [0], [0], [1], [0, 0, 1, 1], [], []>} : vector<32x64xf32>, vector<64x384xf32>, vector<32x384xf32> -> vector<32x384xf32>
    %130 = arith.addf %125, %129 : vector<32x384xf32>
    %c0_133 = arith.constant 0 : index
    %c111_134 = arith.constant 111 : index
    %131 = vector.load %arg13[%c0_133, %c111_134] : memref<64x640xf32, #tpu.memory_space<vmem>>, vector<64x384xf32>
    %c2_135 = arith.constant 2 : index
    %c0_136 = arith.constant 0 : index
    %c0_137 = arith.constant 0 : index
    %132 = vector.load %arg4[%c2_135, %c0_136, %c0_137] : memref<9x32x64xf32, #tpu.memory_space<vmem>>, vector<1x32x64xf32>
    %133 = vector.shape_cast %132 : vector<1x32x64xf32> to vector<32x64xf32>
    %cst_138 = arith.constant dense<0.000000e+00> : vector<32x384xf32>
    %134 = tpu.matmul %133, %131, %cst_138 {dimension_numbers = #tpu.dot_dimension_numbers<[1], [0], [0], [1], [0, 0, 1, 1], [], []>} : vector<32x64xf32>, vector<64x384xf32>, vector<32x384xf32> -> vector<32x384xf32>
    %135 = arith.addf %130, %134 : vector<32x384xf32>
    %c0_139 = arith.constant 0 : index
    %c127_140 = arith.constant 127 : index
    %136 = vector.load %arg13[%c0_139, %c127_140] : memref<64x640xf32, #tpu.memory_space<vmem>>, vector<64x384xf32>
    %c3_141 = arith.constant 3 : index
    %c0_142 = arith.constant 0 : index
    %c0_143 = arith.constant 0 : index
    %137 = vector.load %arg4[%c3_141, %c0_142, %c0_143] : memref<9x32x64xf32, #tpu.memory_space<vmem>>, vector<1x32x64xf32>
    %138 = vector.shape_cast %137 : vector<1x32x64xf32> to vector<32x64xf32>
    %cst_144 = arith.constant dense<0.000000e+00> : vector<32x384xf32>
    %139 = tpu.matmul %138, %136, %cst_144 {dimension_numbers = #tpu.dot_dimension_numbers<[1], [0], [0], [1], [0, 0, 1, 1], [], []>} : vector<32x64xf32>, vector<64x384xf32>, vector<32x384xf32> -> vector<32x384xf32>
    %140 = arith.addf %135, %139 : vector<32x384xf32>
    %c0_145 = arith.constant 0 : index
    %c128_146 = arith.constant 128 : index
    %141 = vector.load %arg13[%c0_145, %c128_146] : memref<64x640xf32, #tpu.memory_space<vmem>>, vector<64x384xf32>
    %c4_147 = arith.constant 4 : index
    %c0_148 = arith.constant 0 : index
    %c0_149 = arith.constant 0 : index
    %142 = vector.load %arg4[%c4_147, %c0_148, %c0_149] : memref<9x32x64xf32, #tpu.memory_space<vmem>>, vector<1x32x64xf32>
    %143 = vector.shape_cast %142 : vector<1x32x64xf32> to vector<32x64xf32>
    %cst_150 = arith.constant dense<0.000000e+00> : vector<32x384xf32>
    %144 = tpu.matmul %143, %141, %cst_150 {dimension_numbers = #tpu.dot_dimension_numbers<[1], [0], [0], [1], [0, 0, 1, 1], [], []>} : vector<32x64xf32>, vector<64x384xf32>, vector<32x384xf32> -> vector<32x384xf32>
    %145 = arith.addf %140, %144 : vector<32x384xf32>
    %c0_151 = arith.constant 0 : index
    %c129_152 = arith.constant 129 : index
    %146 = vector.load %arg13[%c0_151, %c129_152] : memref<64x640xf32, #tpu.memory_space<vmem>>, vector<64x384xf32>
    %c5_153 = arith.constant 5 : index
    %c0_154 = arith.constant 0 : index
    %c0_155 = arith.constant 0 : index
    %147 = vector.load %arg4[%c5_153, %c0_154, %c0_155] : memref<9x32x64xf32, #tpu.memory_space<vmem>>, vector<1x32x64xf32>
    %148 = vector.shape_cast %147 : vector<1x32x64xf32> to vector<32x64xf32>
    %cst_156 = arith.constant dense<0.000000e+00> : vector<32x384xf32>
    %149 = tpu.matmul %148, %146, %cst_156 {dimension_numbers = #tpu.dot_dimension_numbers<[1], [0], [0], [1], [0, 0, 1, 1], [], []>} : vector<32x64xf32>, vector<64x384xf32>, vector<32x384xf32> -> vector<32x384xf32>
    %150 = arith.addf %145, %149 : vector<32x384xf32>
    %c0_157 = arith.constant 0 : index
    %c145_158 = arith.constant 145 : index
    %151 = vector.load %arg13[%c0_157, %c145_158] : memref<64x640xf32, #tpu.memory_space<vmem>>, vector<64x384xf32>
    %c6_159 = arith.constant 6 : index
    %c0_160 = arith.constant 0 : index
    %c0_161 = arith.constant 0 : index
    %152 = vector.load %arg4[%c6_159, %c0_160, %c0_161] : memref<9x32x64xf32, #tpu.memory_space<vmem>>, vector<1x32x64xf32>
    %153 = vector.shape_cast %152 : vector<1x32x64xf32> to vector<32x64xf32>
    %cst_162 = arith.constant dense<0.000000e+00> : vector<32x384xf32>
    %154 = tpu.matmul %153, %151, %cst_162 {dimension_numbers = #tpu.dot_dimension_numbers<[1], [0], [0], [1], [0, 0, 1, 1], [], []>} : vector<32x64xf32>, vector<64x384xf32>, vector<32x384xf32> -> vector<32x384xf32>
    %155 = arith.addf %150, %154 : vector<32x384xf32>
    %c0_163 = arith.constant 0 : index
    %c146_164 = arith.constant 146 : index
    %156 = vector.load %arg13[%c0_163, %c146_164] : memref<64x640xf32, #tpu.memory_space<vmem>>, vector<64x384xf32>
    %c7_165 = arith.constant 7 : index
    %c0_166 = arith.constant 0 : index
    %c0_167 = arith.constant 0 : index
    %157 = vector.load %arg4[%c7_165, %c0_166, %c0_167] : memref<9x32x64xf32, #tpu.memory_space<vmem>>, vector<1x32x64xf32>
    %158 = vector.shape_cast %157 : vector<1x32x64xf32> to vector<32x64xf32>
    %cst_168 = arith.constant dense<0.000000e+00> : vector<32x384xf32>
    %159 = tpu.matmul %158, %156, %cst_168 {dimension_numbers = #tpu.dot_dimension_numbers<[1], [0], [0], [1], [0, 0, 1, 1], [], []>} : vector<32x64xf32>, vector<64x384xf32>, vector<32x384xf32> -> vector<32x384xf32>
    %160 = arith.addf %155, %159 : vector<32x384xf32>
    %c0_169 = arith.constant 0 : index
    %c147_170 = arith.constant 147 : index
    %161 = vector.load %arg13[%c0_169, %c147_170] : memref<64x640xf32, #tpu.memory_space<vmem>>, vector<64x384xf32>
    %c8_171 = arith.constant 8 : index
    %c0_172 = arith.constant 0 : index
    %c0_173 = arith.constant 0 : index
    %162 = vector.load %arg4[%c8_171, %c0_172, %c0_173] : memref<9x32x64xf32, #tpu.memory_space<vmem>>, vector<1x32x64xf32>
    %163 = vector.shape_cast %162 : vector<1x32x64xf32> to vector<32x64xf32>
    %cst_174 = arith.constant dense<0.000000e+00> : vector<32x384xf32>
    %164 = tpu.matmul %163, %161, %cst_174 {dimension_numbers = #tpu.dot_dimension_numbers<[1], [0], [0], [1], [0, 0, 1, 1], [], []>} : vector<32x64xf32>, vector<64x384xf32>, vector<32x384xf32> -> vector<32x384xf32>
    %165 = arith.addf %160, %164 : vector<32x384xf32>
    %c0_175 = arith.constant 0 : index
    %c0_176 = arith.constant 0 : index
    %166 = vector.load %arg8[%c0_175, %c0_176] : memref<32x1xf32, #tpu.memory_space<vmem>>, vector<32x1xf32>
    %167 = vector.broadcast %166 : vector<32x1xf32> to vector<32x384xf32>
    %168 = arith.addf %165, %167 : vector<32x384xf32>
    %cst_177 = arith.constant 0.000000e+00 : f32
    %169 = vector.broadcast %cst_177 : f32 to vector<32x384xf32>
    %170 = arith.maximumf %168, %169 : vector<32x384xf32>
    %171 = vector.broadcast %0 : vector<1x384xf32> to vector<32x384xf32>
    %172 = arith.mulf %170, %171 : vector<32x384xf32>
    %c0_178 = arith.constant 0 : index
    %c128_179 = arith.constant 128 : index
    %173 = vector.load %arg12[%c0_178, %c128_179] : memref<64x640xf32, #tpu.memory_space<vmem>>, vector<32x384xf32>
    tpu.vector_store %arg12[%c0_178, %c128_179], %172 {strides = array<i32>} : memref<64x640xf32, #tpu.memory_space<vmem>>, vector<32x384xf32>,
    %c0_180 = arith.constant 0 : index
    %c109_181 = arith.constant 109 : index
    %174 = vector.load %arg12[%c0_180, %c109_181] : memref<64x640xf32, #tpu.memory_space<vmem>>, vector<32x384xf32>
    %c0_182 = arith.constant 0 : index
    %c0_183 = arith.constant 0 : index
    %c0_184 = arith.constant 0 : index
    %175 = vector.load %arg5[%c0_182, %c0_183, %c0_184] : memref<9x8x32xf32, #tpu.memory_space<vmem>>, vector<1x8x32xf32>
    %176 = vector.shape_cast %175 : vector<1x8x32xf32> to vector<8x32xf32>
    %cst_185 = arith.constant dense<0.000000e+00> : vector<8x384xf32>
    %177 = tpu.matmul %176, %174, %cst_185 {dimension_numbers = #tpu.dot_dimension_numbers<[1], [0], [0], [1], [0, 0, 1, 1], [], []>} : vector<8x32xf32>, vector<32x384xf32>, vector<8x384xf32> -> vector<8x384xf32>
    %c0_186 = arith.constant 0 : index
    %c110_187 = arith.constant 110 : index
    %178 = vector.load %arg12[%c0_186, %c110_187] : memref<64x640xf32, #tpu.memory_space<vmem>>, vector<32x384xf32>
    %c1_188 = arith.constant 1 : index
    %c0_189 = arith.constant 0 : index
    %c0_190 = arith.constant 0 : index
    %179 = vector.load %arg5[%c1_188, %c0_189, %c0_190] : memref<9x8x32xf32, #tpu.memory_space<vmem>>, vector<1x8x32xf32>
    %180 = vector.shape_cast %179 : vector<1x8x32xf32> to vector<8x32xf32>
    %cst_191 = arith.constant dense<0.000000e+00> : vector<8x384xf32>
    %181 = tpu.matmul %180, %178, %cst_191 {dimension_numbers = #tpu.dot_dimension_numbers<[1], [0], [0], [1], [0, 0, 1, 1], [], []>} : vector<8x32xf32>, vector<32x384xf32>, vector<8x384xf32> -> vector<8x384xf32>
    %182 = arith.addf %177, %181 : vector<8x384xf32>
    %c0_192 = arith.constant 0 : index
    %c111_193 = arith.constant 111 : index
    %183 = vector.load %arg12[%c0_192, %c111_193] : memref<64x640xf32, #tpu.memory_space<vmem>>, vector<32x384xf32>
    %c2_194 = arith.constant 2 : index
    %c0_195 = arith.constant 0 : index
    %c0_196 = arith.constant 0 : index
    %184 = vector.load %arg5[%c2_194, %c0_195, %c0_196] : memref<9x8x32xf32, #tpu.memory_space<vmem>>, vector<1x8x32xf32>
    %185 = vector.shape_cast %184 : vector<1x8x32xf32> to vector<8x32xf32>
    %cst_197 = arith.constant dense<0.000000e+00> : vector<8x384xf32>
    %186 = tpu.matmul %185, %183, %cst_197 {dimension_numbers = #tpu.dot_dimension_numbers<[1], [0], [0], [1], [0, 0, 1, 1], [], []>} : vector<8x32xf32>, vector<32x384xf32>, vector<8x384xf32> -> vector<8x384xf32>
    %187 = arith.addf %182, %186 : vector<8x384xf32>
    %c0_198 = arith.constant 0 : index
    %c127_199 = arith.constant 127 : index
    %188 = vector.load %arg12[%c0_198, %c127_199] : memref<64x640xf32, #tpu.memory_space<vmem>>, vector<32x384xf32>
    %c3_200 = arith.constant 3 : index
    %c0_201 = arith.constant 0 : index
    %c0_202 = arith.constant 0 : index
    %189 = vector.load %arg5[%c3_200, %c0_201, %c0_202] : memref<9x8x32xf32, #tpu.memory_space<vmem>>, vector<1x8x32xf32>
    %190 = vector.shape_cast %189 : vector<1x8x32xf32> to vector<8x32xf32>
    %cst_203 = arith.constant dense<0.000000e+00> : vector<8x384xf32>
    %191 = tpu.matmul %190, %188, %cst_203 {dimension_numbers = #tpu.dot_dimension_numbers<[1], [0], [0], [1], [0, 0, 1, 1], [], []>} : vector<8x32xf32>, vector<32x384xf32>, vector<8x384xf32> -> vector<8x384xf32>
    %192 = arith.addf %187, %191 : vector<8x384xf32>
    %c0_204 = arith.constant 0 : index
    %c128_205 = arith.constant 128 : index
    %193 = vector.load %arg12[%c0_204, %c128_205] : memref<64x640xf32, #tpu.memory_space<vmem>>, vector<32x384xf32>
    %c4_206 = arith.constant 4 : index
    %c0_207 = arith.constant 0 : index
    %c0_208 = arith.constant 0 : index
    %194 = vector.load %arg5[%c4_206, %c0_207, %c0_208] : memref<9x8x32xf32, #tpu.memory_space<vmem>>, vector<1x8x32xf32>
    %195 = vector.shape_cast %194 : vector<1x8x32xf32> to vector<8x32xf32>
    %cst_209 = arith.constant dense<0.000000e+00> : vector<8x384xf32>
    %196 = tpu.matmul %195, %193, %cst_209 {dimension_numbers = #tpu.dot_dimension_numbers<[1], [0], [0], [1], [0, 0, 1, 1], [], []>} : vector<8x32xf32>, vector<32x384xf32>, vector<8x384xf32> -> vector<8x384xf32>
    %197 = arith.addf %192, %196 : vector<8x384xf32>
    %c0_210 = arith.constant 0 : index
    %c129_211 = arith.constant 129 : index
    %198 = vector.load %arg12[%c0_210, %c129_211] : memref<64x640xf32, #tpu.memory_space<vmem>>, vector<32x384xf32>
    %c5_212 = arith.constant 5 : index
    %c0_213 = arith.constant 0 : index
    %c0_214 = arith.constant 0 : index
    %199 = vector.load %arg5[%c5_212, %c0_213, %c0_214] : memref<9x8x32xf32, #tpu.memory_space<vmem>>, vector<1x8x32xf32>
    %200 = vector.shape_cast %199 : vector<1x8x32xf32> to vector<8x32xf32>
    %cst_215 = arith.constant dense<0.000000e+00> : vector<8x384xf32>
    %201 = tpu.matmul %200, %198, %cst_215 {dimension_numbers = #tpu.dot_dimension_numbers<[1], [0], [0], [1], [0, 0, 1, 1], [], []>} : vector<8x32xf32>, vector<32x384xf32>, vector<8x384xf32> -> vector<8x384xf32>
    %202 = arith.addf %197, %201 : vector<8x384xf32>
    %c0_216 = arith.constant 0 : index
    %c145_217 = arith.constant 145 : index
    %203 = vector.load %arg12[%c0_216, %c145_217] : memref<64x640xf32, #tpu.memory_space<vmem>>, vector<32x384xf32>
    %c6_218 = arith.constant 6 : index
    %c0_219 = arith.constant 0 : index
    %c0_220 = arith.constant 0 : index
    %204 = vector.load %arg5[%c6_218, %c0_219, %c0_220] : memref<9x8x32xf32, #tpu.memory_space<vmem>>, vector<1x8x32xf32>
    %205 = vector.shape_cast %204 : vector<1x8x32xf32> to vector<8x32xf32>
    %cst_221 = arith.constant dense<0.000000e+00> : vector<8x384xf32>
    %206 = tpu.matmul %205, %203, %cst_221 {dimension_numbers = #tpu.dot_dimension_numbers<[1], [0], [0], [1], [0, 0, 1, 1], [], []>} : vector<8x32xf32>, vector<32x384xf32>, vector<8x384xf32> -> vector<8x384xf32>
    %207 = arith.addf %202, %206 : vector<8x384xf32>
    %c0_222 = arith.constant 0 : index
    %c146_223 = arith.constant 146 : index
    %208 = vector.load %arg12[%c0_222, %c146_223] : memref<64x640xf32, #tpu.memory_space<vmem>>, vector<32x384xf32>
    %c7_224 = arith.constant 7 : index
    %c0_225 = arith.constant 0 : index
    %c0_226 = arith.constant 0 : index
    %209 = vector.load %arg5[%c7_224, %c0_225, %c0_226] : memref<9x8x32xf32, #tpu.memory_space<vmem>>, vector<1x8x32xf32>
    %210 = vector.shape_cast %209 : vector<1x8x32xf32> to vector<8x32xf32>
    %cst_227 = arith.constant dense<0.000000e+00> : vector<8x384xf32>
    %211 = tpu.matmul %210, %208, %cst_227 {dimension_numbers = #tpu.dot_dimension_numbers<[1], [0], [0], [1], [0, 0, 1, 1], [], []>} : vector<8x32xf32>, vector<32x384xf32>, vector<8x384xf32> -> vector<8x384xf32>
    %212 = arith.addf %207, %211 : vector<8x384xf32>
    %c0_228 = arith.constant 0 : index
    %c147_229 = arith.constant 147 : index
    %213 = vector.load %arg12[%c0_228, %c147_229] : memref<64x640xf32, #tpu.memory_space<vmem>>, vector<32x384xf32>
    %c8_230 = arith.constant 8 : index
    %c0_231 = arith.constant 0 : index
    %c0_232 = arith.constant 0 : index
    %214 = vector.load %arg5[%c8_230, %c0_231, %c0_232] : memref<9x8x32xf32, #tpu.memory_space<vmem>>, vector<1x8x32xf32>
    %215 = vector.shape_cast %214 : vector<1x8x32xf32> to vector<8x32xf32>
    %cst_233 = arith.constant dense<0.000000e+00> : vector<8x384xf32>
    %216 = tpu.matmul %215, %213, %cst_233 {dimension_numbers = #tpu.dot_dimension_numbers<[1], [0], [0], [1], [0, 0, 1, 1], [], []>} : vector<8x32xf32>, vector<32x384xf32>, vector<8x384xf32> -> vector<8x384xf32>
    %217 = arith.addf %212, %216 : vector<8x384xf32>
    %c0_234 = arith.constant 0 : index
    %c0_235 = arith.constant 0 : index
    %218 = vector.load %arg9[%c0_234, %c0_235] : memref<8x1xf32, #tpu.memory_space<vmem>>, vector<8x1xf32>
    %219 = vector.broadcast %218 : vector<8x1xf32> to vector<8x384xf32>
    %220 = arith.addf %217, %219 : vector<8x384xf32>
    %221 = vector.shape_cast %220 : vector<8x384xf32> to vector<1x8x384xf32>
    %c0_236 = arith.constant 0 : index
    %c0_237 = arith.constant 0 : index
    %c0_238 = arith.constant 0 : index
    %222 = vector.load %arg11[%c0_236, %c0_237, %c0_238] : memref<1x8x384xf32, #tpu.memory_space<vmem>>, vector<1x8x384xf32>
    tpu.vector_store %arg11[%c0_236, %c0_237, %c0_238], %221 {strides = array<i32>} : memref<1x8x384xf32, #tpu.memory_space<vmem>>, vector<1x8x384xf32>,
    return
  }
  func.func @transform_0(%arg0: i32) -> (i32, i32, i32) {
    %c0_i32 = arith.constant 0 : i32
    %c0_i32_0 = arith.constant 0 : i32
    %c0_i32_1 = arith.constant 0 : i32
    return %arg0, %c0_i32, %c0_i32_0 : i32, i32, i32
  }
  func.func @transform_1(%arg0: i32) -> (i32, i32, i32) {
    %c0_i32 = arith.constant 0 : i32
    %c0_i32_0 = arith.constant 0 : i32
    %c0_i32_1 = arith.constant 0 : i32
    %c0_i32_2 = arith.constant 0 : i32
    return %c0_i32, %c0_i32_0, %c0_i32_1 : i32, i32, i32
  }
  func.func @transform_2(%arg0: i32) -> (i32, i32, i32) {
    %c0_i32 = arith.constant 0 : i32
    %c0_i32_0 = arith.constant 0 : i32
    %c0_i32_1 = arith.constant 0 : i32
    %c0_i32_2 = arith.constant 0 : i32
    return %c0_i32, %c0_i32_0, %c0_i32_1 : i32, i32, i32
  }
  func.func @transform_3(%arg0: i32) -> (i32, i32, i32) {
    %c0_i32 = arith.constant 0 : i32
    %c0_i32_0 = arith.constant 0 : i32
    %c0_i32_1 = arith.constant 0 : i32
    %c0_i32_2 = arith.constant 0 : i32
    return %c0_i32, %c0_i32_0, %c0_i32_1 : i32, i32, i32
  }
  func.func @transform_4(%arg0: i32) -> (i32, i32, i32) {
    %c0_i32 = arith.constant 0 : i32
    %c0_i32_0 = arith.constant 0 : i32
    %c0_i32_1 = arith.constant 0 : i32
    %c0_i32_2 = arith.constant 0 : i32
    return %c0_i32, %c0_i32_0, %c0_i32_1 : i32, i32, i32
  }
  func.func @transform_5(%arg0: i32) -> (i32, i32) {
    %c0_i32 = arith.constant 0 : i32
    %c0_i32_0 = arith.constant 0 : i32
    %c0_i32_1 = arith.constant 0 : i32
    return %c0_i32, %c0_i32_0 : i32, i32
  }
  func.func @transform_6(%arg0: i32) -> (i32, i32) {
    %c0_i32 = arith.constant 0 : i32
    %c0_i32_0 = arith.constant 0 : i32
    %c0_i32_1 = arith.constant 0 : i32
    return %c0_i32, %c0_i32_0 : i32, i32
  }
  func.func @transform_7(%arg0: i32) -> (i32, i32) {
    %c0_i32 = arith.constant 0 : i32
    %c0_i32_0 = arith.constant 0 : i32
    %c0_i32_1 = arith.constant 0 : i32
    return %c0_i32, %c0_i32_0 : i32, i32
  }
  func.func @transform_8(%arg0: i32) -> (i32, i32) {
    %c0_i32 = arith.constant 0 : i32
    %c0_i32_0 = arith.constant 0 : i32
    %c0_i32_1 = arith.constant 0 : i32
    return %c0_i32, %c0_i32_0 : i32, i32
  }
  func.func @transform_9(%arg0: i32) -> (i32, i32) {
    %c0_i32 = arith.constant 0 : i32
    %c0_i32_0 = arith.constant 0 : i32
    %c0_i32_1 = arith.constant 0 : i32
    return %c0_i32, %c0_i32_0 : i32, i32
  }
  func.func @transform_10(%arg0: i32) -> (i32, i32, i32) {
    %c0_i32 = arith.constant 0 : i32
    %c0_i32_0 = arith.constant 0 : i32
    %c0_i32_1 = arith.constant 0 : i32
    return %arg0, %c0_i32, %c0_i32_0 : i32, i32, i32
  }
}

</mosaic_0001>

<bundles_post_ra>
// kernel: squeeze.1
= control target key start
LH: loop header
LB: loop body
LE: loop exit
PB: predicated region body
PF: predicated region fallthrough
CT: control target
= control target key end

     0   :  { %vm108_vm0 = vcmask 1014784   ;;  %s167_s12 = smov 114   ;;  %vm121_vm1 = vcmask 1031168   ;;  %s168_s13 = smov 4   ;;  %vm17_vm2 = vcmask 146432   ;;  %vm112_vm3 = vcmask 31744   ;;  %s268_s0 = inlined_call_operand.vmem [shape: f32[2,288], index: 0, kind: input, shape index: {}]   ;;  %s269_s1 = inlined_call_operand.vmem [shape: f32[2,16,18], index: 1, kind: output, shape index: {}]  }
   0x1   :  { %v14_v0 = vld [vmem:[%s268_s0] sm:$0x3]  ;;  %v132_v1 = vld [vmem:[%s268_s0 + $0x4] sm:$0x3]  ;;  %v133_v2 = vld [vmem:[%s268_s0 + $0x2] sm:$0x3] }
   0x2   :  { %15 = vst [vmem:[#allocation0 + $0x8] sm:$0x3] %v14_v0  ;;  %9 = vst [vmem:[#allocation0] sm:$0x3] %v132_v1  ;;  %s166_s0 = smov 110   ;;  %s169_s14 = smov 112  }
   0x3   :  { %13 = vst [vmem:[#allocation0 + $0x10] sm:$0x3] %v133_v2  ;;  %s170_s17 = smov 2   ;;  %s171_s18 = smov 94   ;;  %vm115_vm4 = vcmask 146464   ;;  %vm125_vm5 = vcmask 15360  }
   0x4   :  { %s172_s19 = smov 92   ;;  %s173_s20 = smov 76   ;;  %vm128_vm6 = vcmask 146448  }
   0x5   :  { %s174_s21 = smov 74   ;;  %s175_s22 = smov 58  }
   0x6   :  { %s176_s23 = smov 56   ;;  %s177_s24 = smov 40  }
   0x7   :  { %s178_s25 = smov 38   ;;  %s179_s26 = smov 22  }
   0x8   :  { %s180_s27 = smov 20  }
   0x9   :  { %v33_v3 = vld [vmem:[#allocation0 + $0x8] sm:$0x3]   ;;  %v107_v4 = vld [vmem:[#allocation0] sm:$0x3]  }
   0xa   :  { %v20_v5 = vld [vmem:[#allocation0] sm:$0x3]   ;;  %34 = vrot.lane.b32.xlu0 %v33_v3, %s166_s0  ;;  %v105_v6 = vld [vmem:[#allocation0 + $0x10] sm:$0x3]   ;;  %v118_v9 = vld [vmem:[#allocation0 + $0x8] sm:$0x3]  }
   0xb   :  { %21 = vrot.lane.b32.xlu1 %v20_v5, %s167_s12  ;;  %v109_v7 = vsel %vm108_vm0, %v107_v4, %v105_v6  ;;  %v27_v8 = vld [vmem:[#allocation0 + $0x10] sm:$0x3]   ;;  %v16_v11 = vld [vmem:[#allocation0 + $0x8] sm:$0x3]  }
   0xc   :  { %v120_v10 = vld [vmem:[#allocation0 + $0x10] sm:$0x3]   ;;  %18 = vst.msk [vmem:[%s269_s1] ss:$16 sm:$0x3] %vm17_vm2, %v16_v11  }
   0xd   :  { %v122_v12 = vsel %vm121_vm1, %v120_v10, %v118_v9  ;;  %v40_v13 = vld [vmem:[#allocation0 + $0x10] sm:$0x3]   ;;  %v46_v14 = vld [vmem:[#allocation0 + $0x8] sm:$0x3]  }
   0xe   :  { %110 = vrot.lane.b32.xlu0 %v109_v7, %s168_s13  ;;  %v53_v15 = vld [vmem:[#allocation0 + $0x10] sm:$0x3]   ;;  %v59_v16 = vld [vmem:[#allocation0 + $0x8] sm:$0x3]  }
   0xf   :  { %28 = vrot.lane.b32.xlu1 %v27_v8, %s169_s14  ;;  %v66_v17 = vld [vmem:[#allocation0 + $0x10] sm:$0x3]   ;;  %v72_v18 = vld [vmem:[#allocation0 + $0x8] sm:$0x3]  }
  0x10   :  { %v79_v19 = vld [vmem:[#allocation0 + $0x10] sm:$0x3]   ;;  %v85_v20 = vld [vmem:[#allocation0 + $0x8] sm:$0x3]  }
  0x11   :  { %v92_v21 = vld [vmem:[#allocation0 + $0x10] sm:$0x3]   ;;  %v98_v22 = vld [vmem:[#allocation0 + $0x8] sm:$0x3]  }
  0x12   :  { %123 = vrot.lane.b32.xlu0 %v122_v12, %s170_s17 }
  0x13   :  { %41 = vrot.lane.b32.xlu1 %v40_v13, %s171_s18 }
  0x16   :  { %47 = vrot.lane.b32.xlu0 %v46_v14, %s172_s19 }
  0x17   :  { %54 = vrot.lane.b32.xlu1 %v53_v15, %s173_s20 }
  0x1a   :  { %60 = vrot.lane.b32.xlu0 %v59_v16, %s174_s21 }
  0x1b   :  { %67 = vrot.lane.b32.xlu1 %v66_v17, %s175_s22 }
  0x1e   :  { %73 = vrot.lane.b32.xlu0 %v72_v18, %s176_s23 }
  0x1f   :  { %80 = vrot.lane.b32.xlu1 %v79_v19, %s177_s24 }
  0x22   :  { %86 = vrot.lane.b32.xlu0 %v85_v20, %s178_s25 }
  0x23   :  { %93 = vrot.lane.b32.xlu1 %v92_v21, %s179_s26 }
  0x26   :  { %99 = vrot.lane.b32.xlu0 %v98_v22, %s180_s27 }
  0x7c   :  { %v35_v23 = vpop.permute.xlu0 %34  }
  0x7d   :  { %v22_v24 = vpop.permute.xlu1 %21   ;;  %136 = vst.msk [vmem:[%s269_s1 + $0x1] ss:$16 sm:$0x3] %vm17_vm2, %v35_v23  }
  0x7e   :  { %134 = vst.msk [vmem:[%s269_s1 + $0xf] ss:$16 sm:$0x3] %vm17_vm2, %v22_v24  }
  0x80   :  { %v111_v25 = vpop.permute.xlu0 %110  }
  0x81   :  { %v29_v26 = vpop.permute.xlu1 %28   ;;  %147 = vst.msk [vmem:[%s269_s1 + $0xe] ss:$16 sm:$0x3] %vm112_vm3, %v111_v25  }
  0x82   :  { %135 = vst.msk [vmem:[%s269_s1 + $0x8] ss:$16 sm:$0x3] %vm17_vm2, %v29_v26  }
  0x83   :  { %148 = vst.msk [vmem:[%s269_s1 + $0xe] ss:$16 sm:$0x3] %vm115_vm4, %v111_v25  }
  0x84   :  { %v124_v27 = vpop.permute.xlu0 %123  }
  0x85   :  { %v42_v28 = vpop.permute.xlu1 %41   ;;  %149 = vst.msk [vmem:[%s269_s1 + $0x7] ss:$16 sm:$0x3] %vm125_vm5, %v124_v27  }
  0x86   :  { %137 = vst.msk [vmem:[%s269_s1 + $0x9] ss:$16 sm:$0x3] %vm17_vm2, %v42_v28  }
  0x87   :  { %150 = vst.msk [vmem:[%s269_s1 + $0x7] ss:$16 sm:$0x3] %vm128_vm6, %v124_v27  }
  0x88   :  { %v48_v29 = vpop.permute.xlu0 %47  }
  0x89   :  { %v55_v30 = vpop.permute.xlu1 %54   ;;  %138 = vst.msk [vmem:[%s269_s1 + $0x2] ss:$16 sm:$0x3] %vm17_vm2, %v48_v29  }
  0x8a   :  { %139 = vst.msk [vmem:[%s269_s1 + $0xa] ss:$16 sm:$0x3] %vm17_vm2, %v55_v30  }
  0x8c   :  { %v61_v31 = vpop.permute.xlu0 %60  }
  0x8d   :  { %v68_v32 = vpop.permute.xlu1 %67   ;;  %140 = vst.msk [vmem:[%s269_s1 + $0x3] ss:$16 sm:$0x3] %vm17_vm2, %v61_v31  }
  0x8e   :  { %141 = vst.msk [vmem:[%s269_s1 + $0xb] ss:$16 sm:$0x3] %vm17_vm2, %v68_v32  }
  0x90   :  { %v74_v33 = vpop.permute.xlu0 %73  }
  0x91   :  { %v81_v34 = vpop.permute.xlu1 %80   ;;  %142 = vst.msk [vmem:[%s269_s1 + $0x4] ss:$16 sm:$0x3] %vm17_vm2, %v74_v33  }
  0x92   :  { %143 = vst.msk [vmem:[%s269_s1 + $0xc] ss:$16 sm:$0x3] %vm17_vm2, %v81_v34  }
  0x94   :  { %v87_v35 = vpop.permute.xlu0 %86  }
  0x95   :  { %v94_v36 = vpop.permute.xlu1 %93   ;;  %144 = vst.msk [vmem:[%s269_s1 + $0x5] ss:$16 sm:$0x3] %vm17_vm2, %v87_v35  }
  0x96   :  { %145 = vst.msk [vmem:[%s269_s1 + $0xd] ss:$16 sm:$0x3] %vm17_vm2, %v94_v36  }
  0x98   :  { %v100_v37 = vpop.permute.xlu0 %99  }
  0x99   :  { %146 = vst.msk [vmem:[%s269_s1 + $0x6] ss:$16 sm:$0x3] %vm17_vm2, %v100_v37  }

// kernel: prelim_nn_forward.1
= control target key start
LH: loop header
LB: loop body
LE: loop exit
PB: predicated region body
PF: predicated region fallthrough
CT: control target
= control target key end

     0   :  { %s13698_s13 = smov 0   ;;  %s20025_s0 = inlined_call_operand.vmem [shape: f32[2,4,640], index: 0, kind: input, shape index: {}]   ;;  %s20026_s1 = inlined_call_operand.vmem [shape: f32[9,64,4], index: 1, kind: input, shape index: {}]   ;;  %s20027_s2 = inlined_call_operand.vmem [shape: f32[9,64,64], index: 2, kind: input, shape index: {}]   ;;  %s20028_s3 = inlined_call_operand.vmem [shape: f32[9,32,64], index: 3, kind: input, shape index: {}]   ;;  %s20029_s4 = inlined_call_operand.vmem [shape: f32[9,8,32], index: 4, kind: input, shape index: {}]   ;;  %s20030_s5 = inlined_call_operand.vmem [shape: f32[64,1], index: 5, kind: input, shape index: {}]   ;;  %s20031_s6 = inlined_call_operand.vmem [shape: f32[64,1], index: 6, kind: input, shape index: {}]   ;;  %s20032_s7 = inlined_call_operand.vmem [shape: f32[32,1], index: 7, kind: input, shape index: {}]   ;;  %s20033_s8 = inlined_call_operand.vmem [shape: f32[8,1], index: 8, kind: input, shape index: {}]   ;;  %s20034_s9 = inlined_call_operand.vmem [shape: f32[1,384], index: 9, kind: input, shape index: {}]   ;;  %s20035_s10 = inlined_call_operand.vmem [shape: f32[2,8,384], index: 10, kind: output, shape index: {}]  }
   0x1 LB: > { %s11585_s14 = sadd.s32 4294967295, %s13630_s13   ;;  %p11589_p0 = scmp.ge.s32.totalorder %s13630_s13, 1  ;;  %s13630_s13 = sphi %s13698_s13, %s20_s13  }
   0x2   : > { %p312_p1 = scmp.lt.s32.totalorder %s13630_s13, 3 }
   0x4   : > { %p313_p2 = pnand %p11589_p0, %p312_p1 }
   0x6   : > { %316 = sbr.rel (%p313_p2) target bundleno = 2685 (0xa7d), region = 60 }
   0xb   : > { %p350_p3 = scmp.lt.s32.totalorder %s11585_s14, 1  ;;  %v20036_v0 = vmov 0.0   ;;  %s13633_s19 = smov 18   ;;  %vm424_vm0 = vcmask 146432   ;;  %vm453_vm1 = vcmask 1043456   ;;  %v11592_v14 = vld [vmem:[%s20026_s1 + $0x40] sm:$0xff] }
   0xc   : > { %524 = vmatprep.mubr.f32.mxu0 %v20036_v0  ;;  %566 = vmatprep.mubr.f32.mxu1 %v20036_v0  ;;  %s13634_s20 = smov 19   ;;  %s13635_s21 = smov 17   ;;  %vm428_vm2 = vcmask 31744   ;;  %v11599_v15 = vld [vmem:[%s20026_s1 + $0x78] sm:$0xff]  ;;  %vm686_vm3 = vcmask 154624   ;;  %v11593_v21 = vld [vmem:[%s20026_s1 + $0x48] sm:$0xff] }
   0xd   : > { %s21037_s14 = smov (!%p350_p3, %s11585_s14), 1  ;;  %s13636_s22 = smov 1   ;;  %v11594_v22 = vld [vmem:[%s20026_s1 + $0x50] sm:$0xff]  ;;  %v11595_v26 = vld [vmem:[%s20026_s1 + $0x58] sm:$0xff]  ;;  %v11596_v28 = vld [vmem:[%s20026_s1 + $0x60] sm:$0xff]  ;;  %vm961_vm4 = vcmask 138240  }
   0xe   : > { %s13222_s15 = smul.u32 20, %s21037_s14  ;;  %s13637_s23 = smov 127   ;;  %v11597_v31 = vld [vmem:[%s20026_s1 + $0x68] sm:$0xff]  ;;  %v11598_v33 = vld [vmem:[%s20026_s1 + $0x70] sm:$0xff]  ;;  %v395_v38 = vld [vmem:[%s20026_s1] sm:$0xff]  ;;  %vm1260_vm5 = vcmask 7168  }
   0xf   : > { %s13638_s24 = smov 111   ;;  %s13639_s25 = smov 110   ;;  %v396_v40 = vld [vmem:[%s20026_s1 + $0x8] sm:$0xff]  ;;  %v397_v42 = vld [vmem:[%s20026_s1 + $0x10] sm:$0xff]  ;;  %v398_v46 = vld [vmem:[%s20026_s1 + $0x18] sm:$0xff]  ;;  %vm1845_vm6 = vcmask 1039360  }
  0x10   : > { %s13714_s18 = scalar_lea.vmem %s20025_s0, %s13222_s15  ;;  %s13640_s26 = smov 109   ;;  %v399_v47 = vld [vmem:[%s20026_s1 + $0x20] sm:$0xff]  ;;  %v400_v48 = vld [vmem:[%s20026_s1 + $0x28] sm:$0xff]  ;;  %v401_v49 = vld [vmem:[%s20026_s1 + $0x30] sm:$0xff]  ;;  %vm2144_vm7 = vcmask 908288   ;;  %vm2443_vm8 = vcmask 900096  }
  0x11   : > { %v393_v1 = vld [vmem:[%s13714_s18] sm:$0xff]  ;;  %v394_v2 = vld [vmem:[%s13714_s18 + $0x8] sm:$0xff]  ;;  %v402_v50 = vld [vmem:[%s20026_s1 + $0x38] sm:$0xff]  ;;  %vm2742_vm9 = vcmask 891904   ;;  %vm3371_vm10 = vcmask 523264   ;;  %vm13642_vm11 = vmmov 0  }
  0x12   : > { %416 = vrot.lane.b32.xlu1 %v393_v1, %s13633_s19  ;;  %v414_v3 = vcombine.high %v393_v1, %v393_v1  ;;  %v415_v4 = vcombine.high %v394_v2, %v394_v2  ;;  %v1823_v5 = vld [vmem:[%s13714_s18 + $0xc] sm:$0xff]  ;;  %v13736_v7 = vld [vmem:[%s13714_s18 + $0x4] sm:$0xff]  ;;  %v11641_v57 = vld [vmem:[%s20026_s1 + $0x98] sm:$0xff]  ;;  %vm9762_vm12 = vcmask 261120  }
  0x13   : > { %v1836_v6 = vcombine.high %v1823_v5, %v1823_v5  ;;  %v13742_v8 = vcombine.high %v13736_v7, %v13736_v7  ;;  %v11638_v51 = vld [vmem:[%s20026_s1 + $0x80] sm:$0xff]  ;;  %v11639_v52 = vld [vmem:[%s20026_s1 + $0x88] sm:$0xff]  ;;  %v11640_v54 = vld [vmem:[%s20026_s1 + $0x90] sm:$0xff] }
  0x14   : > { %418 = vrot.lane.b32.xlu0 %v414_v3, %s13633_s19  ;;  %v1537_v56 = vld [vmem:[%s13714_s18 + $0xc] sm:$0xf]  ;;  %v11642_v58 = vld [vmem:[%s20026_s1 + $0xa0] sm:$0xff]  ;;  %v11644_v60 = vld [vmem:[%s20026_s1 + $0xb0] sm:$0xff] }
  0x15   : > { %v11643_v59 = vld [vmem:[%s20026_s1 + $0xa8] sm:$0xff]  ;;  %v11645_v62 = vld [vmem:[%s20026_s1 + $0xb8] sm:$0xff]  ;;  %v11665_v63 = vld [vmem:[%s20026_s1 + $0xc0] sm:$0xff] }
  0x16   : > { %422 = vrot.lane.b32.xlu1 %v415_v4, %s13633_s19 }
  0x18   : > { %420 = vrot.lane.b32.xlu0 %v394_v2, %s13633_s19 }
  0x1a   : > { %684 = vrot.lane.b32.xlu1 %v415_v4, %s13634_s20 }
  0x1c   : > { %682 = vrot.lane.b32.xlu0 %v394_v2, %s13634_s20 }
  0x1e   : > { %678 = vrot.lane.b32.xlu1 %v393_v1, %s13634_s20 }
  0x20   : > { %680 = vrot.lane.b32.xlu0 %v414_v3, %s13634_s20 }
  0x22   : > { %957 = vrot.lane.b32.xlu1 %v394_v2, %s13635_s21 }
  0x24   : > { %955 = vrot.lane.b32.xlu0 %v414_v3, %s13635_s21 }
  0x26   : > { %959 = vrot.lane.b32.xlu1 %v415_v4, %s13635_s21 }
  0x28   : > { %953 = vrot.lane.b32.xlu0 %v393_v1, %s13635_s21 }
  0x2a   : > { %1258 = vrot.lane.b32.xlu1 %v415_v4, %s13636_s22  ;;  %v11667_v4 = vld [vmem:[%s20026_s1 + $0xd0] sm:$0xff] }
  0x2c   : > { %1256 = vrot.lane.b32.xlu0 %v394_v2, %s13636_s22 }
  0x2e   : > { %1252 = vrot.lane.b32.xlu1 %v393_v1, %s13636_s22 }
  0x30   : > { %1254 = vrot.lane.b32.xlu0 %v414_v3, %s13636_s22  ;;  %v11666_v3 = vld [vmem:[%s20026_s1 + $0xc8] sm:$0xff] }
  0x32   : > { %1843 = vrot.lane.b32.xlu1 %v1836_v6, %s13637_s23 }
  0x34   : > { %1841 = vrot.lane.b32.xlu0 %v1823_v5, %s13637_s23 }
  0x36   : > { %1837 = vrot.lane.b32.xlu1 %v13736_v7, %s13637_s23 }
  0x38   : > { %1839 = vrot.lane.b32.xlu0 %v13742_v8, %s13637_s23 }
  0x3a   : > { %2140 = vrot.lane.b32.xlu1 %v1823_v5, %s13638_s24 }
  0x3c   : > { %2138 = vrot.lane.b32.xlu0 %v13742_v8, %s13638_s24 }
  0x3e   : > { %2142 = vrot.lane.b32.xlu1 %v1836_v6, %s13638_s24 }
  0x40   : > { %2136 = vrot.lane.b32.xlu0 %v13736_v7, %s13638_s24 }
  0x42   : > { %2441 = vrot.lane.b32.xlu1 %v1836_v6, %s13639_s25 }
  0x44   : > { %2439 = vrot.lane.b32.xlu0 %v1823_v5, %s13639_s25 }
  0x46   : > { %2435 = vrot.lane.b32.xlu1 %v13736_v7, %s13639_s25 }
  0x48   : > { %2437 = vrot.lane.b32.xlu0 %v13742_v8, %s13639_s25 }
  0x4a   : > { %2738 = vrot.lane.b32.xlu1 %v1823_v5, %s13640_s26 }
  0x4c   : > { %2736 = vrot.lane.b32.xlu0 %v13742_v8, %s13640_s26 }
  0x4e   : > { %2740 = vrot.lane.b32.xlu1 %v1836_v6, %s13640_s26 }
  0x50   : > { %2734 = vrot.lane.b32.xlu0 %v13736_v7, %s13640_s26 }
  0x84   : > { %v417_v9 = vpop.permute.xlu1 %416 }
  0x86   : > { %v419_v10 = vpop.permute.xlu0 %418 }
  0x87   : > { %v425_v16 = vsel %vm424_vm0, %v417_v9, %v419_v10  ;;  %v11669_v9 = vld [vmem:[%s20026_s1 + $0xe0] sm:$0xff] }
  0x88   : > { %v423_v11 = vpop.permute.xlu1 %422 }
  0x8a   : > { %v421_v12 = vpop.permute.xlu0 %420 }
  0x8b   : > { %v426_v13 = vsel %vm424_vm0, %v419_v10, %v421_v12  ;;  %v427_v18 = vsel %vm424_vm0, %v421_v12, %v423_v11  ;;  %v11670_v10 = vld [vmem:[%s20026_s1 + $0xe8] sm:$0xff]  ;;  %v11672_v11 = vld [vmem:[%s20026_s1 + $0xf8] sm:$0xff] }
  0x8c   : > { %11600 = vmatprep.subr.msk.mxu0 %vm453_vm1, %v426_v13  ;;  %13220 = vmatprep.subr.msk.mxu1 %vm453_vm1, %v426_v13  ;;  %v685_v17 = vpop.permute.xlu1 %684  ;;  %v11692_v13 = vld [vmem:[%s20026_s1 + $0x100] sm:$0xff] }
  0x8d   : > { %11601 = vmatpush1.msk.msra.mxu0 %vm453_vm1, %v425_v16  ;;  %13221 = vmatpush1.msk.msra.mxu1 %vm453_vm1, %v425_v16 }
  0x8e   : > { %11602 = vmatmul.mubr.msk.f32.vlgmr.msra.gmra.mxu0 %vm428_vm2, %v11592_v14  ;;  %11609 = vmatmul.mubr.msk.f32.vlgmr.msra.gmra.mxu1 %vm428_vm2, %v11599_v15  ;;  %v683_v19 = vpop.permute.xlu0 %682 }
  0x8f   : > { %12545 = vmatprep.subr.msk.mxu1 %vm453_vm1, %v427_v18  ;;  %v689_v20 = vsel %vm686_vm3, %v683_v19, %v685_v17  ;;  %530 = vmatprep.mubr.f32.mxu0 %v20036_v0  ;;  %v11693_v17 = vld [vmem:[%s20026_s1 + $0x108] sm:$0xff] }
  0x90   : > { %12546 = vmatpush3.msk.msra.mxu1 %vm453_vm1, %v427_v18  ;;  %12559 = vmatprep.subr.msk.mxu0 %vm453_vm1, %v689_v20  ;;  %v679_v23 = vpop.permute.xlu1 %678  ;;  %v11694_v18 = vld [vmem:[%s20026_s1 + $0x110] sm:$0xff] }
  0x91   : > { %12547 = vmatprep.mubr.msk.f32.mxu1 %vm428_vm2, %v11592_v14  ;;  %12560 = vmatpush3.msk.msra.mxu0 %vm453_vm1, %v689_v20 }
  0x92   : > { %11603 = vmatmul.mubr.msk.f32.gmra.mxu0 %vm428_vm2, %v11593_v21  ;;  %12548 = vmatmul.mubr.msk.f32.vlgmr.msra.gmra.mxu1 %vm428_vm2, %v11593_v21  ;;  %v681_v24 = vpop.permute.xlu0 %680 }
  0x93   : > { %v688_v25 = vsel %vm686_vm3, %v681_v24, %v683_v19  ;;  %536 = vmatprep.mubr.f32.mxu0 %v20036_v0  ;;  %12550 = vmatprep.mubr.msk.f32.mxu1 %vm428_vm2, %v11594_v22  ;;  %v687_v27 = vsel %vm686_vm3, %v679_v23, %v681_v24  ;;  %v11696_v23 = vld [vmem:[%s20026_s1 + $0x120] sm:$0xff] }
  0x94   : > { %11619 = vmatprep.subr.msk.mxu1 %vm453_vm1, %v688_v25  ;;  %v958_v29 = vpop.permute.xlu1 %957  ;;  %v11697_v25 = vld [vmem:[%s20026_s1 + $0x128] sm:$0xff] }
  0x95   : > { %11620 = vmatpush1.msk.msra.mxu1 %vm453_vm1, %v687_v27 }
  0x96   : > { %11604 = vmatmul.mubr.msk.f32.gmra.mxu0 %vm428_vm2, %v11594_v22  ;;  %12551 = vmatmul.mubr.msk.f32.gmra.mxu1 %vm428_vm2, %v11595_v26  ;;  %v956_v30 = vpop.permute.xlu0 %955  ;;  %v11695_v22 = vld [vmem:[%s20026_s1 + $0x118] sm:$0xff] }
  0x97   : > { %542 = vmatprep.mubr.f32.mxu0 %v20036_v0  ;;  %12553 = vmatprep.mubr.msk.f32.mxu1 %vm428_vm2, %v11596_v28  ;;  %v963_v32 = vsel %vm961_vm4, %v956_v30, %v958_v29 }
  0x98   : > { %11646 = vmatprep.subr.msk.mxu0 %vm453_vm1, %v963_v32  ;;  %v960_v34 = vpop.permute.xlu1 %959  ;;  %v11720_v32 = vld [vmem:[%s20026_s1 + $0x148] sm:$0xff] }
  0x99   : > { %v964_v35 = vsel %vm961_vm4, %v958_v29, %v960_v34  ;;  %v11719_v29 = vld [vmem:[%s20026_s1 + $0x140] sm:$0xff] }
  0x9a   : > { %11605 = vmatmul.mubr.msk.f32.gmra.mxu0 %vm428_vm2, %v11595_v26  ;;  %12554 = vmatmul.mubr.msk.f32.gmra.mxu1 %vm428_vm2, %v11597_v31  ;;  %v954_v36 = vpop.permute.xlu0 %953  ;;  %v11698_v26 = vld [vmem:[%s20026_s1 + $0x130] sm:$0xff]  ;;  %v3018_v34 = vld [vmem:[%s20030_s5] sm:$0xff] }
  0x9b   : > { %548 = vmatprep.mubr.f32.mxu0 %v20036_v0  ;;  %12556 = vmatprep.mubr.msk.f32.mxu1 %vm428_vm2, %v11598_v33  ;;  %v962_v43 = vsel %vm961_vm4, %v954_v36, %v956_v30 }
  0x9c   : > { %12573 = vmatprep.subr.msk.mxu1 %vm453_vm1, %v964_v35  ;;  %v1259_v44 = vpop.permute.xlu1 %1258 }
  0x9e   : > { %11606 = vmatmul.mubr.msk.f32.gmra.mxu0 %vm428_vm2, %v11596_v28  ;;  %12557 = vmatmul.mubr.msk.f32.gmra.mxu1 %vm428_vm2, %v11599_v15  ;;  %v1257_v37 = vpop.permute.xlu0 %1256  ;;  %v11699_v28 = vld [vmem:[%s20026_s1 + $0x138] sm:$0xff] }
  0x9f   : > { %554 = vmatprep.mubr.f32.mxu0 %v20036_v0  ;;  %784 = vmatprep.mubr.f32.mxu1 %v20036_v0  ;;  %v1263_v45 = vsel %vm1260_vm5, %v1257_v37, %v1259_v44  ;;  %v11725_v44 = vld [vmem:[%s20026_s1 + $0x170] sm:$0xff] }
  0xa0   : > { %v1253_v53 = vpop.permute.xlu1 %1252 }
  0xa2   : > { %11607 = vmatmul.mubr.msk.f32.gmra.mxu0 %vm428_vm2, %v11597_v31  ;;  %11621 = vmatmul.mubr.msk.f32.vlgmr.msra.gmra.mxu1 %vm428_vm2, %v395_v38  ;;  %v1255_v39 = vpop.permute.xlu0 %1254 }
  0xa3   : > { %560 = vmatprep.mubr.f32.mxu0 %v20036_v0  ;;  %790 = vmatprep.mubr.f32.mxu1 %v20036_v0  ;;  %v1262_v41 = vsel %vm1260_vm5, %v1255_v39, %v1257_v37  ;;  %v1261_v55 = vsel %vm1260_vm5, %v1253_v53, %v1255_v39  ;;  %v13641_v37 = vmov 0   ;;  %v11722_v39 = vld [vmem:[%s20026_s1 + $0x158] sm:$0xff] }
  0xa4   : > { %12574 = vmatpush3.msk.msra.mxu1 %vm453_vm1, %v964_v35  ;;  %v1844_v5 = vpop.permute.xlu1 %1843  ;;  %13243 = vset.pattern.permute.xlu0 %v13641_v37 }
  0xa5   : > { %11673 = vmatprep.subr.msk.mxu1 %vm453_vm1, %v1262_v41  ;;  %13244 = vset.pattern.permute.xlu1 %v13641_v37  ;;  %v11723_v41 = vld [vmem:[%s20026_s1 + $0x160] sm:$0xff] }
  0xa6   : > { %11608 = vmatmul.mubr.msk.f32.gmra.mxu0 %vm428_vm2, %v11598_v33  ;;  %11622 = vmatmul.mubr.msk.f32.gmra.mxu1 %vm428_vm2, %v396_v40  ;;  %v1842_v61 = vpop.permute.xlu0 %1841  ;;  %v11721_v33 = vld [vmem:[%s20026_s1 + $0x150] sm:$0xff] }
  0xa7   : > { %796 = vmatprep.mubr.f32.mxu1 %v20036_v0  ;;  %12561 = vmatprep.mubr.msk.f32.mxu0 %vm428_vm2, %v395_v38  ;;  %v1848_v6 = vsel %vm1845_vm6, %v1842_v61, %v1844_v5 }
  0xa8   : > { %v1838_v12 = vpop.permute.xlu1 %1837  ;;  %3028 = vperm.xlu0 %13243, %v3018_v34   ;;  %v11807_v34 = vld [vmem:[%s20026_s1 + $0x238] sm:$0xff] }
  0xaa   : > { %11623 = vmatmul.mubr.msk.f32.gmra.mxu1 %vm428_vm2, %v397_v42  ;;  %12562 = vmatmul.mubr.msk.f32.vlgmr.msra.gmra.mxu0 %vm428_vm2, %v396_v40  ;;  %v1840_v1 = vpop.permute.xlu0 %1839  ;;  %v3021_v40 = vld [vmem:[%s20030_s5 + $0x18] sm:$0xff] }
  0xab   : > { %11647 = vmatpush1.msk.msra.mxu0 %vm453_vm1, %v962_v43  ;;  %802 = vmatprep.mubr.f32.mxu1 %v20036_v0  ;;  %v1847_v2 = vsel %vm1845_vm6, %v1840_v1, %v1842_v61  ;;  %v1846_v20 = vsel %vm1845_vm6, %v1838_v12, %v1840_v1  ;;  %v3023_v43 = vld [vmem:[%s20030_s5 + $0x28] sm:$0xff]  ;;  %v3024_v61 = vld [vmem:[%s20030_s5 + $0x30] sm:$0xff]  ;;  %v11780_v12 = vld [vmem:[%s20026_s1 + $0x1f8] sm:$0xff] }
  0xac   : > { %12564 = vmatprep.mubr.msk.f32.mxu0 %vm428_vm2, %v397_v42  ;;  %12587 = vmatprep.subr.msk.mxu0 %vm453_vm1, %v1263_v45  ;;  %v2141_v14 = vpop.permute.xlu1 %2140  ;;  %v11724_v42 = vld [vmem:[%s20026_s1 + $0x168] sm:$0xff]  ;;  %v11752_v1 = vld [vmem:[%s20026_s1 + $0x1b0] sm:$0xff] }
  0xad   : > { %3043 = vperm.xlu0 %13243, %v3021_v40  }
  0xae   : > { %11624 = vmatmul.mubr.msk.f32.gmra.mxu1 %vm428_vm2, %v398_v46  ;;  %12565 = vmatmul.mubr.msk.f32.gmra.mxu0 %vm428_vm2, %v398_v46  ;;  %v2139_v15 = vpop.permute.xlu0 %2138 }
  0xaf   : > { %808 = vmatprep.mubr.f32.mxu1 %v20036_v0  ;;  %12567 = vmatprep.mubr.msk.f32.mxu0 %vm428_vm2, %v399_v47  ;;  %v2146_v16 = vsel %vm2144_vm7, %v2139_v15, %v2141_v14 }
  0xb0   : > { %v2143_v19 = vpop.permute.xlu1 %2142 }
  0xb1   : > { %v2147_v21 = vsel %vm2144_vm7, %v2141_v14, %v2143_v19  ;;  %3053 = vperm.xlu0 %13243, %v3023_v43   ;;  %v11801_v14 = vld [vmem:[%s20026_s1 + $0x208] sm:$0xff] }
  0xb2   : > { %11625 = vmatmul.mubr.msk.f32.gmra.mxu1 %vm428_vm2, %v399_v47  ;;  %12568 = vmatmul.mubr.msk.f32.gmra.mxu0 %vm428_vm2, %v400_v48  ;;  %v2137_v24 = vpop.permute.xlu0 %2136  ;;  %v3025_v47 = vld [vmem:[%s20030_s5 + $0x38] sm:$0xff] }
  0xb3   : > { %814 = vmatprep.mubr.f32.mxu1 %v20036_v0  ;;  %12570 = vmatprep.mubr.msk.f32.mxu0 %vm428_vm2, %v401_v49  ;;  %v2145_v35 = vsel %vm2144_vm7, %v2137_v24, %v2139_v15 }
  0xb4   : > { %v2442_v36 = vpop.permute.xlu1 %2441 }
  0xb5   : > { %3063 = vperm.xlu0 %13243, %v3025_v47  }
  0xb6   : > { %11626 = vmatmul.mubr.msk.f32.gmra.mxu1 %vm428_vm2, %v400_v48  ;;  %12571 = vmatmul.mubr.msk.f32.gmra.mxu0 %vm428_vm2, %v402_v50  ;;  %v2440_v27 = vpop.permute.xlu0 %2439  ;;  %v3019_v48 = vld [vmem:[%s20030_s5 + $0x8] sm:$0xff] }
  0xb7   : > { %820 = vmatprep.mubr.f32.mxu1 %v20036_v0  ;;  %1059 = vmatprep.mubr.f32.mxu0 %v20036_v0  ;;  %v2446_v38 = vsel %vm2443_vm8, %v2440_v27, %v2442_v36 }
  0xb8   : > { %v2436_v46 = vpop.permute.xlu1 %2435  ;;  %3033 = vperm.xlu1 %13244, %v3019_v48  }
  0xb9   : > { %13251 = vrot.lane.b32.xlu0 %v20036_v0, %s13633_s19 }
  0xba   : > { %11627 = vmatmul.mubr.msk.f32.gmra.mxu1 %vm428_vm2, %v401_v49  ;;  %11648 = vmatmul.mubr.msk.f32.vlgmr.msra.gmra.mxu0 %vm428_vm2, %v11638_v51  ;;  %v14053_v30 = vpop.permute.xlu0 %2437  ;;  %v11746_v49 = vld [vmem:[%s20026_s1 + $0x180] sm:$0xff] }
  0xbb   : > { %826 = vmatprep.mubr.f32.mxu1 %v20036_v0  ;;  %1065 = vmatprep.mubr.f32.mxu0 %v20036_v0  ;;  %v2445_v31 = vsel %vm2443_vm8, %v14053_v30, %v2440_v27 }
  0xbc   : > { %12588 = vmatpush3.msk.msra.mxu0 %vm453_vm1, %v1263_v45  ;;  %v11726_v45 = vld [vmem:[%s20026_s1 + $0x178] sm:$0xff] }
  0xbd   : > { %11700 = vmatprep.subr.msk.mxu0 %vm453_vm1, %v13742_v8  ;;  %v11668_v8 = vld [vmem:[%s20026_s1 + $0xd8] sm:$0xff]  ;;  %13261 = vrot.lane.b32.xlu0 %v20036_v0, %s13633_s19 }
  0xbe   : > { %11628 = vmatmul.mubr.msk.f32.gmra.mxu1 %vm428_vm2, %v402_v50  ;;  %11649 = vmatmul.mubr.msk.f32.gmra.mxu0 %vm428_vm2, %v11639_v52  ;;  %v2739_v50 = vpop.permute.xlu1 %2738 }
  0xbf   : > { %1071 = vmatprep.mubr.f32.mxu0 %v20036_v0  ;;  %12575 = vmatprep.mubr.msk.f32.mxu1 %vm428_vm2, %v11638_v51  ;;  %v2737_v51 = vpop.permute.xlu0 %2736 }
  0xc0   : > { %v2744_v53 = vsel %vm2742_vm9, %v2737_v51, %v2739_v50 }
  0xc1   : > { %13271 = vrot.lane.b32.xlu0 %v20036_v0, %s13634_s20 }
  0xc2   : > { %11650 = vmatmul.mubr.msk.f32.gmra.mxu0 %vm428_vm2, %v11640_v54  ;;  %12576 = vmatmul.mubr.msk.f32.vlgmr.msra.gmra.mxu1 %vm428_vm2, %v11639_v52  ;;  %v3020_v52 = vld [vmem:[%s20030_s5 + $0x10] sm:$0xff] }
  0xc3   : > { %1077 = vmatprep.mubr.f32.mxu0 %v20036_v0  ;;  %12578 = vmatprep.mubr.msk.f32.mxu1 %vm428_vm2, %v11640_v54  ;;  %v11747_v54 = vld [vmem:[%s20026_s1 + $0x188] sm:$0xff]  ;;  %v2735_v5 = vpop.permute.xlu0 %2734 }
  0xc4   : > { %11674 = vmatpush1.msk.msra.mxu1 %vm453_vm1, %v1261_v55  ;;  %3038 = vperm.xlu1 %13244, %v3020_v52   ;;  %v11748_v55 = vld [vmem:[%s20026_s1 + $0x190] sm:$0xff] }
  0xc5   : > { %12601 = vmatprep.subr.msk.mxu1 %vm453_vm1, %v1537_v56  ;;  %13281 = vrot.lane.b32.xlu0 %v20036_v0, %s13634_s20 }
  0xc6   : > { %11651 = vmatmul.mubr.msk.f32.gmra.mxu0 %vm428_vm2, %v11641_v57  ;;  %12579 = vmatmul.mubr.msk.f32.gmra.mxu1 %vm428_vm2, %v11641_v57  ;;  %v3022_v57 = vld [vmem:[%s20030_s5 + $0x20] sm:$0xff] }
  0xc7   : > { %1083 = vmatprep.mubr.f32.mxu0 %v20036_v0  ;;  %12581 = vmatprep.mubr.msk.f32.mxu1 %vm428_vm2, %v11642_v58 }
  0xc8   : > { %3048 = vperm.xlu1 %13244, %v3022_v57  }
  0xc9   : > { %13291 = vrot.lane.b32.xlu0 %v20036_v0, %s13635_s21 }
  0xca   : > { %11652 = vmatmul.mubr.msk.f32.gmra.mxu0 %vm428_vm2, %v11642_v58  ;;  %12582 = vmatmul.mubr.msk.f32.gmra.mxu1 %vm428_vm2, %v11643_v59  ;;  %v2444_v58 = vsel %vm2443_vm8, %v2436_v46, %v14053_v30 }
  0xcb   : > { %1089 = vmatprep.mubr.f32.mxu0 %v20036_v0  ;;  %12584 = vmatprep.mubr.msk.f32.mxu1 %vm428_vm2, %v11644_v60 }
  0xcc   : > { %3058 = vperm.xlu1 %13244, %v3024_v61  }
  0xcd   : > { %13301 = vrot.lane.b32.xlu0 %v20036_v0, %s13635_s21 }
  0xce   : > { %11653 = vmatmul.mubr.msk.f32.gmra.mxu0 %vm428_vm2, %v11643_v59  ;;  %12585 = vmatmul.mubr.msk.f32.gmra.mxu1 %vm428_vm2, %v11645_v62 }
  0xcf   : > { %1095 = vmatprep.mubr.f32.mxu0 %v20036_v0  ;;  %1358 = vmatprep.mubr.f32.mxu1 %v20036_v0 }
  0xd0   : > { %13246 = vrot.lane.b32.xlu1 %v20036_v0, %s13633_s19 }
  0xd1   : > { %13306 = vrot.lane.b32.xlu0 %v20036_v0, %s13636_s22 }
  0xd2   : > { %11654 = vmatmul.mubr.msk.f32.gmra.mxu0 %vm428_vm2, %v11644_v60  ;;  %11675 = vmatmul.mubr.msk.f32.vlgmr.msra.gmra.mxu1 %vm428_vm2, %v11665_v63  ;;  %v11749_v60 = vld [vmem:[%s20026_s1 + $0x198] sm:$0xff] }
  0xd3   : > { %1101 = vmatprep.mubr.f32.mxu0 %v20036_v0  ;;  %1364 = vmatprep.mubr.f32.mxu1 %v20036_v0 }
  0xd4   : > { %12602 = vmatpush3.msk.msra.mxu1 %vm453_vm1, %v1537_v56  ;;  %v2741_v56 = vpop.permute.xlu1 %2740  ;;  %13256 = vrot.lane.b32.xlu1 %v20036_v0, %s13633_s19 }
  0xd5   : > { %11727 = vmatprep.subr.msk.mxu1 %vm453_vm1, %v1847_v2  ;;  %v2745_v59 = vsel %vm2742_vm9, %v2739_v50, %v2741_v56  ;;  %v11753_v2 = vld [vmem:[%s20026_s1 + $0x1b8] sm:$0xff]  ;;  %13316 = vrot.lane.b32.xlu0 %v20036_v0, %s13636_s22 }
  0xd6   : > { %11655 = vmatmul.mubr.msk.f32.gmra.mxu0 %vm428_vm2, %v11645_v62  ;;  %11676 = vmatmul.mubr.msk.f32.gmra.mxu1 %vm428_vm2, %v11666_v3  ;;  %v11750_v62 = vld [vmem:[%s20026_s1 + $0x1a0] sm:$0xff] }
  0xd7   : > { %1370 = vmatprep.mubr.f32.mxu1 %v20036_v0  ;;  %12589 = vmatprep.mubr.msk.f32.mxu0 %vm428_vm2, %v11665_v63  ;;  %v11751_v63 = vld [vmem:[%s20026_s1 + $0x1a8] sm:$0xff] }
  0xd8   : > { %13266 = vrot.lane.b32.xlu1 %v20036_v0, %s13634_s20 }
  0xd9   : > { %13326 = vrot.lane.b32.xlu0 %v20036_v0, %s13637_s23 }
  0xda   : > { %11677 = vmatmul.mubr.msk.f32.gmra.mxu1 %vm428_vm2, %v11667_v4  ;;  %12590 = vmatmul.mubr.msk.f32.vlgmr.msra.gmra.mxu0 %vm428_vm2, %v11666_v3  ;;  %v11773_v3 = vld [vmem:[%s20026_s1 + $0x1c0] sm:$0xff] }
  0xdb   : > { %1376 = vmatprep.mubr.f32.mxu1 %v20036_v0  ;;  %12592 = vmatprep.mubr.msk.f32.mxu0 %vm428_vm2, %v11667_v4  ;;  %v11774_v4 = vld [vmem:[%s20026_s1 + $0x1c8] sm:$0xff] }
  0xdc   : > { %11701 = vmatpush1.msk.msra.mxu0 %vm453_vm1, %v13736_v7  ;;  %v11671_v7 = vld [vmem:[%s20026_s1 + $0xf0] sm:$0xff]  ;;  %13276 = vrot.lane.b32.xlu1 %v20036_v0, %s13634_s20 }
  0xdd   : > { %12615 = vmatprep.subr.msk.mxu0 %vm453_vm1, %v1848_v6  ;;  %13336 = vrot.lane.b32.xlu0 %v20036_v0, %s13637_s23 }
  0xde   : > { %11678 = vmatmul.mubr.msk.f32.gmra.mxu1 %vm428_vm2, %v11668_v8  ;;  %12593 = vmatmul.mubr.msk.f32.gmra.mxu0 %vm428_vm2, %v11668_v8  ;;  %v2743_v8 = vsel %vm2742_vm9, %v2735_v5, %v2737_v51 }
  0xdf   : > { %1382 = vmatprep.mubr.f32.mxu1 %v20036_v0  ;;  %12595 = vmatprep.mubr.msk.f32.mxu0 %vm428_vm2, %v11669_v9 }
  0xe0   : > { %13286 = vrot.lane.b32.xlu1 %v20036_v0, %s13635_s21 }
  0xe2   : > { %11679 = vmatmul.mubr.msk.f32.gmra.mxu1 %vm428_vm2, %v11669_v9  ;;  %12596 = vmatmul.mubr.msk.f32.gmra.mxu0 %vm428_vm2, %v11670_v10  ;;  %v11776_v9 = vld [vmem:[%s20026_s1 + $0x1d8] sm:$0xff] }
  0xe3   : > { %1388 = vmatprep.mubr.f32.mxu1 %v20036_v0  ;;  %12598 = vmatprep.mubr.msk.f32.mxu0 %vm428_vm2, %v11671_v7 }
  0xe4   : > { %13296 = vrot.lane.b32.xlu1 %v20036_v0, %s13635_s21 }
  0xe6   : > { %11680 = vmatmul.mubr.msk.f32.gmra.mxu1 %vm428_vm2, %v11670_v10  ;;  %12599 = vmatmul.mubr.msk.f32.gmra.mxu0 %vm428_vm2, %v11672_v11  ;;  %v11777_v10 = vld [vmem:[%s20026_s1 + $0x1e0] sm:$0xff] }
  0xe7   : > { %1394 = vmatprep.mubr.f32.mxu1 %v20036_v0  ;;  %1644 = vmatprep.mubr.f32.mxu0 %v20036_v0 }
  0xe8   : > { %13311 = vrot.lane.b32.xlu1 %v20036_v0, %s13636_s22 }
  0xea   : > { %11681 = vmatmul.mubr.msk.f32.gmra.mxu1 %vm428_vm2, %v11671_v7  ;;  %11702 = vmatmul.mubr.msk.f32.vlgmr.msra.gmra.mxu0 %vm428_vm2, %v11692_v13  ;;  %v11778_v7 = vld [vmem:[%s20026_s1 + $0x1e8] sm:$0xff] }
  0xeb   : > { %1400 = vmatprep.mubr.f32.mxu1 %v20036_v0  ;;  %1650 = vmatprep.mubr.f32.mxu0 %v20036_v0 }
  0xec   : > { %12616 = vmatpush3.msk.msra.mxu0 %vm453_vm1, %v1848_v6  ;;  %v11775_v6 = vld [vmem:[%s20026_s1 + $0x1d0] sm:$0xff]  ;;  %13321 = vrot.lane.b32.xlu1 %v20036_v0, %s13636_s22 }
  0xed   : > { %11754 = vmatprep.subr.msk.mxu0 %vm453_vm1, %v2146_v16 }
  0xee   : > { %11682 = vmatmul.mubr.msk.f32.gmra.mxu1 %vm428_vm2, %v11672_v11  ;;  %11703 = vmatmul.mubr.msk.f32.gmra.mxu0 %vm428_vm2, %v11693_v17  ;;  %v11779_v11 = vld [vmem:[%s20026_s1 + $0x1f0] sm:$0xff] }
  0xef   : > { %1656 = vmatprep.mubr.f32.mxu0 %v20036_v0  ;;  %12603 = vmatprep.mubr.msk.f32.mxu1 %vm428_vm2, %v11692_v13  ;;  %v11800_v13 = vld [vmem:[%s20026_s1 + $0x200] sm:$0xff] }
  0xf0   : > { %13331 = vrot.lane.b32.xlu1 %v20036_v0, %s13637_s23 }
  0xf2   : > { %11704 = vmatmul.mubr.msk.f32.gmra.mxu0 %vm428_vm2, %v11694_v18  ;;  %12604 = vmatmul.mubr.msk.f32.vlgmr.msra.gmra.mxu1 %vm428_vm2, %v11693_v17  ;;  %v11802_v17 = vld [vmem:[%s20026_s1 + $0x210] sm:$0xff] }
  0xf3   : > { %1662 = vmatprep.mubr.f32.mxu0 %v20036_v0  ;;  %12606 = vmatprep.mubr.msk.f32.mxu1 %vm428_vm2, %v11694_v18 }
  0xf4   : > { %11728 = vmatpush1.msk.msra.mxu1 %vm453_vm1, %v1846_v20  ;;  %13341 = vrot.lane.b32.xlu1 %v20036_v0, %s13637_s23 }
  0xf5   : > { %12629 = vmatprep.subr.msk.mxu1 %vm453_vm1, %v2147_v21 }
  0xf6   : > { %11705 = vmatmul.mubr.msk.f32.gmra.mxu0 %vm428_vm2, %v11695_v22  ;;  %12607 = vmatmul.mubr.msk.f32.gmra.mxu1 %vm428_vm2, %v11695_v22  ;;  %v11803_v22 = vld [vmem:[%s20026_s1 + $0x218] sm:$0xff] }
  0xf7   : > { %1668 = vmatprep.mubr.f32.mxu0 %v20036_v0  ;;  %12609 = vmatprep.mubr.msk.f32.mxu1 %vm428_vm2, %v11696_v23 }
  0xfa   : > { %11706 = vmatmul.mubr.msk.f32.gmra.mxu0 %vm428_vm2, %v11696_v23  ;;  %12610 = vmatmul.mubr.msk.f32.gmra.mxu1 %vm428_vm2, %v11697_v25 }
  0xfb   : > { %1674 = vmatprep.mubr.f32.mxu0 %v20036_v0  ;;  %12612 = vmatprep.mubr.msk.f32.mxu1 %vm428_vm2, %v11698_v26 }
  0xfe   : > { %11707 = vmatmul.mubr.msk.f32.gmra.mxu0 %vm428_vm2, %v11697_v25  ;;  %12613 = vmatmul.mubr.msk.f32.gmra.mxu1 %vm428_vm2, %v11699_v28  ;;  %v11804_v25 = vld [vmem:[%s20026_s1 + $0x220] sm:$0xff] }
  0xff   : > { %1680 = vmatprep.mubr.f32.mxu0 %v20036_v0  ;;  %1943 = vmatprep.mubr.f32.mxu1 %v20036_v0 }
 0x102   : > { %11708 = vmatmul.mubr.msk.f32.gmra.mxu0 %vm428_vm2, %v11698_v26  ;;  %11729 = vmatmul.mubr.msk.f32.vlgmr.msra.gmra.mxu1 %vm428_vm2, %v11719_v29 }
 0x103   : > { %1686 = vmatprep.mubr.f32.mxu0 %v20036_v0  ;;  %1949 = vmatprep.mubr.f32.mxu1 %v20036_v0 }
 0x104   : > { %12630 = vmatpush3.msk.msra.mxu1 %vm453_vm1, %v2147_v21 }
 0x105   : > { %11781 = vmatprep.subr.msk.mxu1 %vm453_vm1, %v2445_v31  ;;  %v11806_v31 = vld [vmem:[%s20026_s1 + $0x230] sm:$0xff] }
 0x106   : > { %11709 = vmatmul.mubr.msk.f32.gmra.mxu0 %vm428_vm2, %v11699_v28  ;;  %11730 = vmatmul.mubr.msk.f32.gmra.mxu1 %vm428_vm2, %v11720_v32  ;;  %v11805_v28 = vld [vmem:[%s20026_s1 + $0x228] sm:$0xff] }
 0x107   : > { %1955 = vmatprep.mubr.f32.mxu1 %v20036_v0  ;;  %12617 = vmatprep.mubr.msk.f32.mxu0 %vm428_vm2, %v11719_v29 }
 0x10a   : > { %11731 = vmatmul.mubr.msk.f32.gmra.mxu1 %vm428_vm2, %v11721_v33  ;;  %12618 = vmatmul.mubr.msk.f32.vlgmr.msra.gmra.mxu0 %vm428_vm2, %v11720_v32 }
 0x10b   : > { %11755 = vmatpush1.msk.msra.mxu0 %vm453_vm1, %v2145_v35  ;;  %1961 = vmatprep.mubr.f32.mxu1 %v20036_v0 }
 0x10c   : > { %12620 = vmatprep.mubr.msk.f32.mxu0 %vm428_vm2, %v11721_v33  ;;  %12643 = vmatprep.subr.msk.mxu0 %vm453_vm1, %v2446_v38 }
 0x10e   : > { %11732 = vmatmul.mubr.msk.f32.gmra.mxu1 %vm428_vm2, %v11722_v39  ;;  %12621 = vmatmul.mubr.msk.f32.gmra.mxu0 %vm428_vm2, %v11722_v39 }
 0x10f   : > { %1967 = vmatprep.mubr.f32.mxu1 %v20036_v0  ;;  %12623 = vmatprep.mubr.msk.f32.mxu0 %vm428_vm2, %v11723_v41 }
 0x112   : > { %11733 = vmatmul.mubr.msk.f32.gmra.mxu1 %vm428_vm2, %v11723_v41  ;;  %12624 = vmatmul.mubr.msk.f32.gmra.mxu0 %vm428_vm2, %v11724_v42 }
 0x113   : > { %1973 = vmatprep.mubr.f32.mxu1 %v20036_v0  ;;  %12626 = vmatprep.mubr.msk.f32.mxu0 %vm428_vm2, %v11725_v44 }
 0x116   : > { %11734 = vmatmul.mubr.msk.f32.gmra.mxu1 %vm428_vm2, %v11724_v42  ;;  %12627 = vmatmul.mubr.msk.f32.gmra.mxu0 %vm428_vm2, %v11726_v45 }
 0x117   : > { %1979 = vmatprep.mubr.f32.mxu1 %v20036_v0  ;;  %2242 = vmatprep.mubr.f32.mxu0 %v20036_v0 }
 0x11a   : > { %11735 = vmatmul.mubr.msk.f32.gmra.mxu1 %vm428_vm2, %v11725_v44  ;;  %11756 = vmatmul.mubr.msk.f32.vlgmr.msra.gmra.mxu0 %vm428_vm2, %v11746_v49 }
 0x11b   : > { %1985 = vmatprep.mubr.f32.mxu1 %v20036_v0  ;;  %2248 = vmatprep.mubr.f32.mxu0 %v20036_v0 }
 0x11c   : > { %12644 = vmatpush3.msk.msra.mxu0 %vm453_vm1, %v2446_v38 }
 0x11d   : > { %11808 = vmatprep.subr.msk.mxu0 %vm453_vm1, %v2744_v53 }
 0x11e   : > { %11736 = vmatmul.mubr.msk.f32.gmra.mxu1 %vm428_vm2, %v11726_v45  ;;  %11757 = vmatmul.mubr.msk.f32.gmra.mxu0 %vm428_vm2, %v11747_v54 }
 0x11f   : > { %2254 = vmatprep.mubr.f32.mxu0 %v20036_v0  ;;  %12631 = vmatprep.mubr.msk.f32.mxu1 %vm428_vm2, %v11746_v49 }
 0x122   : > { %11758 = vmatmul.mubr.msk.f32.gmra.mxu0 %vm428_vm2, %v11748_v55  ;;  %12632 = vmatmul.mubr.msk.f32.vlgmr.msra.gmra.mxu1 %vm428_vm2, %v11747_v54 }
 0x123   : > { %2260 = vmatprep.mubr.f32.mxu0 %v20036_v0  ;;  %12634 = vmatprep.mubr.msk.f32.mxu1 %vm428_vm2, %v11748_v55 }
 0x124   : > { %11782 = vmatpush1.msk.msra.mxu1 %vm453_vm1, %v2444_v58 }
 0x125   : > { %12657 = vmatprep.subr.msk.mxu1 %vm453_vm1, %v2745_v59 }
 0x126   : > { %11759 = vmatmul.mubr.msk.f32.gmra.mxu0 %vm428_vm2, %v11749_v60  ;;  %12635 = vmatmul.mubr.msk.f32.gmra.mxu1 %vm428_vm2, %v11749_v60 }
 0x127   : > { %2266 = vmatprep.mubr.f32.mxu0 %v20036_v0  ;;  %12637 = vmatprep.mubr.msk.f32.mxu1 %vm428_vm2, %v11750_v62 }
 0x12a   : > { %11760 = vmatmul.mubr.msk.f32.gmra.mxu0 %vm428_vm2, %v11750_v62  ;;  %12638 = vmatmul.mubr.msk.f32.gmra.mxu1 %vm428_vm2, %v11751_v63 }
 0x12b   : > { %2272 = vmatprep.mubr.f32.mxu0 %v20036_v0  ;;  %12640 = vmatprep.mubr.msk.f32.mxu1 %vm428_vm2, %v11752_v1 }
 0x12e   : > { %11761 = vmatmul.mubr.msk.f32.gmra.mxu0 %vm428_vm2, %v11751_v63  ;;  %12641 = vmatmul.mubr.msk.f32.gmra.mxu1 %vm428_vm2, %v11753_v2 }
 0x12f   : > { %2278 = vmatprep.mubr.f32.mxu0 %v20036_v0  ;;  %2541 = vmatprep.mubr.f32.mxu1 %v20036_v0 }
 0x132   : > { %11762 = vmatmul.mubr.msk.f32.gmra.mxu0 %vm428_vm2, %v11752_v1  ;;  %11783 = vmatmul.mubr.msk.f32.vlgmr.msra.gmra.mxu1 %vm428_vm2, %v11773_v3 }
 0x133   : > { %2284 = vmatprep.mubr.f32.mxu0 %v20036_v0  ;;  %2547 = vmatprep.mubr.f32.mxu1 %v20036_v0 }
 0x134   : > { %12658 = vmatpush3.msk.msra.mxu1 %vm453_vm1, %v2745_v59 }
 0x136   : > { %11763 = vmatmul.mubr.msk.f32.gmra.mxu0 %vm428_vm2, %v11753_v2  ;;  %11784 = vmatmul.mubr.msk.f32.gmra.mxu1 %vm428_vm2, %v11774_v4 }
 0x137   : > { %2553 = vmatprep.mubr.f32.mxu1 %v20036_v0  ;;  %12645 = vmatprep.mubr.msk.f32.mxu0 %vm428_vm2, %v11773_v3 }
 0x13a   : > { %11785 = vmatmul.mubr.msk.f32.gmra.mxu1 %vm428_vm2, %v11775_v6  ;;  %12646 = vmatmul.mubr.msk.f32.vlgmr.msra.gmra.mxu0 %vm428_vm2, %v11774_v4 }
 0x13b   : > { %11809 = vmatpush1.msk.msra.mxu0 %vm453_vm1, %v2743_v8  ;;  %2559 = vmatprep.mubr.f32.mxu1 %v20036_v0 }
 0x13c   : > { %12648 = vmatprep.mubr.msk.f32.mxu0 %vm428_vm2, %v11775_v6 }
 0x13e   : > { %11786 = vmatmul.mubr.msk.f32.gmra.mxu1 %vm428_vm2, %v11776_v9  ;;  %12649 = vmatmul.mubr.msk.f32.gmra.mxu0 %vm428_vm2, %v11776_v9 }
 0x13f   : > { %2565 = vmatprep.mubr.f32.mxu1 %v20036_v0  ;;  %12651 = vmatprep.mubr.msk.f32.mxu0 %vm428_vm2, %v11777_v10 }
 0x142   : > { %11787 = vmatmul.mubr.msk.f32.gmra.mxu1 %vm428_vm2, %v11777_v10  ;;  %12652 = vmatmul.mubr.msk.f32.gmra.mxu0 %vm428_vm2, %v11778_v7 }
 0x143   : > { %2571 = vmatprep.mubr.f32.mxu1 %v20036_v0  ;;  %12654 = vmatprep.mubr.msk.f32.mxu0 %vm428_vm2, %v11779_v11 }
 0x146   : > { %11788 = vmatmul.mubr.msk.f32.gmra.mxu1 %vm428_vm2, %v11778_v7  ;;  %12655 = vmatmul.mubr.msk.f32.gmra.mxu0 %vm428_vm2, %v11780_v12 }
 0x147   : > { %2577 = vmatprep.mubr.f32.mxu1 %v20036_v0  ;;  %2840 = vmatprep.mubr.f32.mxu0 %v20036_v0 }
 0x14a   : > { %11789 = vmatmul.mubr.msk.f32.gmra.mxu1 %vm428_vm2, %v11779_v11  ;;  %11810 = vmatmul.mubr.msk.f32.vlgmr.msra.gmra.mxu0 %vm428_vm2, %v11800_v13 }
 0x14b   : > { %2583 = vmatprep.mubr.f32.mxu1 %v20036_v0  ;;  %2846 = vmatprep.mubr.f32.mxu0 %v20036_v0 }
 0x14e   : > { %v526_v15 = vpop.f32.mrf.mxu0  ;;  %v14249_v16 = vpop.f32.mrf.mxu1  ;;  %11790 = vmatmul.mubr.msk.f32.gmra.mxu1 %vm428_vm2, %v11780_v12  ;;  %11811 = vmatmul.mubr.msk.f32.gmra.mxu0 %vm428_vm2, %v11801_v14 }
 0x14f   : > { %2852 = vmatprep.mubr.f32.mxu0 %v20036_v0  ;;  %12659 = vmatprep.mubr.msk.f32.mxu1 %vm428_vm2, %v11800_v13 }
 0x150   : > { %v14258_v18 = vpop.f32.mrf.mxu0  ;;  %v14260_v19 = vpop.f32.mrf.mxu1 }
 0x151   : > { %20269 = vst [vmem:[#allocation4_spill] sm:$0xff] %v14260_v19 }
 0x152   : > { %v532_v20 = vpop.f32.mrf.mxu0  ;;  %v12549_v21 = vpop.f32.mrf.mxu1  ;;  %11812 = vmatmul.mubr.msk.f32.gmra.mxu0 %vm428_vm2, %v11802_v17  ;;  %12660 = vmatmul.mubr.msk.f32.vlgmr.msra.gmra.mxu1 %vm428_vm2, %v11801_v14 }
 0x153   : > { %2858 = vmatprep.mubr.f32.mxu0 %v20036_v0  ;;  %12662 = vmatprep.mubr.msk.f32.mxu1 %vm428_vm2, %v11802_v17 }
 0x154   : > { %v14269_v23 = vpop.f32.mrf.mxu0  ;;  %v14271_v24 = vpop.f32.mrf.mxu1 }
 0x156   : > { %v538_v26 = vpop.f32.mrf.mxu0  ;;  %v12552_v27 = vpop.f32.mrf.mxu1  ;;  %11813 = vmatmul.mubr.msk.f32.gmra.mxu0 %vm428_vm2, %v11803_v22  ;;  %12663 = vmatmul.mubr.msk.f32.gmra.mxu1 %vm428_vm2, %v11803_v22 }
 0x157   : > { %2864 = vmatprep.mubr.f32.mxu0 %v20036_v0  ;;  %12665 = vmatprep.mubr.msk.f32.mxu1 %vm428_vm2, %v11804_v25 }
 0x158   : > { %v14283_v29 = vpop.f32.mrf.mxu0  ;;  %v14285_v30 = vpop.f32.mrf.mxu1 }
 0x159   : > { %20270 = vst [vmem:[#allocation5_spill] sm:$0xff] %v14285_v30 }
 0x15a   : > { %v544_v32 = vpop.f32.mrf.mxu0  ;;  %v12555_v33 = vpop.f32.mrf.mxu1  ;;  %11814 = vmatmul.mubr.msk.f32.gmra.mxu0 %vm428_vm2, %v11804_v25  ;;  %12666 = vmatmul.mubr.msk.f32.gmra.mxu1 %vm428_vm2, %v11805_v28 }
 0x15b   : > { %2870 = vmatprep.mubr.f32.mxu0 %v20036_v0  ;;  %12668 = vmatprep.mubr.msk.f32.mxu1 %vm428_vm2, %v11806_v31 }
 0x15c   : > { %v14297_v35 = vpop.f32.mrf.mxu0  ;;  %v14299_v36 = vpop.f32.mrf.mxu1 }
 0x15d   : > { %20271 = vst [vmem:[#allocation6_spill] sm:$0xff] %v14297_v35  ;;  %20272 = vst [vmem:[#allocation7_spill] sm:$0xff] %v14299_v36 }
 0x15e   : > { %v550_v37 = vpop.f32.mrf.mxu0  ;;  %v12558_v38 = vpop.f32.mrf.mxu1  ;;  %11815 = vmatmul.mubr.msk.f32.gmra.mxu0 %vm428_vm2, %v11805_v28  ;;  %12669 = vmatmul.mubr.msk.f32.gmra.mxu1 %vm428_vm2, %v11807_v34 }
 0x15f   : > { %2876 = vmatprep.mubr.f32.mxu0 %v20036_v0  ;;  %3460 = vmatprep.mubr.f32.mxu1 %v20036_v0 }
 0x160   : > { %v14305_v39 = vpop.f32.mrf.mxu0  ;;  %v14307_v40 = vpop.f32.mrf.mxu1 }
 0x161   : > { %20273 = vst [vmem:[#allocation8_spill] sm:$0xff] %v14305_v39  ;;  %20274 = vst [vmem:[#allocation9_spill] sm:$0xff] %v14307_v40 }
 0x162   : > { %v556_v41 = vpop.f32.mrf.mxu0  ;;  %v786_v42 = vpop.f32.mrf.mxu1  ;;  %11816 = vmatmul.mubr.msk.f32.gmra.mxu0 %vm428_vm2, %v11806_v31 }
 0x163   : > { %v787_v43 = vadd.f32 %v786_v42, %v526_v15  ;;  %2882 = vmatprep.mubr.f32.mxu0 %v20036_v0 }
 0x164   : > { %v14311_v44 = vpop.f32.mrf.mxu0  ;;  %v14313_v45 = vpop.f32.mrf.mxu1 }
 0x165   : > { %20275 = vst [vmem:[#allocation10_spill] sm:$0xff] %v14311_v44 }
 0x166   : > { %v562_v46 = vpop.f32.mrf.mxu0  ;;  %v792_v47 = vpop.f32.mrf.mxu1  ;;  %11817 = vmatmul.mubr.msk.f32.gmra.mxu0 %vm428_vm2, %v11807_v34 }
 0x167   : > { %v793_v48 = vadd.f32 %v792_v47, %v532_v20 }
 0x168   : > { %v14316_v49 = vpop.f32.mrf.mxu0  ;;  %v14318_v50 = vpop.f32.mrf.mxu1 }
 0x169   : > { %20276 = vst [vmem:[#allocation11_spill] sm:$0xff] %v14316_v49 }
 0x16a   : > { %v798_v51 = vpop.f32.mrf.mxu1  ;;  %v12563_v52 = vpop.f32.mrf.mxu0 }
 0x16b   : > { %v799_v53 = vadd.f32 %v798_v51, %v538_v26  ;;  %v905_v54 = vadd.f32 %v12563_v52, %v12549_v21 }
 0x16c   : > { %v14320_v55 = vpop.f32.mrf.mxu1  ;;  %v14322_v56 = vpop.f32.mrf.mxu0 }
 0x16e   : > { %v804_v57 = vpop.f32.mrf.mxu1  ;;  %v12566_v58 = vpop.f32.mrf.mxu0 }
 0x16f   : > { %v805_v59 = vadd.f32 %v804_v57, %v544_v32  ;;  %v915_v60 = vadd.f32 %v12566_v58, %v12552_v27 }
 0x170   : > { %v14328_v61 = vpop.f32.mrf.mxu1  ;;  %v14330_v62 = vpop.f32.mrf.mxu0 }
 0x171   : > { %20277 = vst [vmem:[#allocation12_spill] sm:$0xff] %v14328_v61  ;;  %20278 = vst [vmem:[#allocation13_spill] sm:$0xff] %v14330_v62 }
 0x172   : > { %v810_v63 = vpop.f32.mrf.mxu1  ;;  %v12569_v1 = vpop.f32.mrf.mxu0 }
 0x173   : > { %v811_v2 = vadd.f32 %v810_v63, %v550_v37  ;;  %v925_v3 = vadd.f32 %v12569_v1, %v12555_v33 }
 0x174   : > { %v14336_v4 = vpop.f32.mrf.mxu1  ;;  %v14338_v5 = vpop.f32.mrf.mxu0 }
 0x175   : > { %20279 = vst [vmem:[#allocation14_spill] sm:$0xff] %v14336_v4  ;;  %20280 = vst [vmem:[#allocation15_spill] sm:$0xff] %v14338_v5 }
 0x176   : > { %v816_v6 = vpop.f32.mrf.mxu1  ;;  %v12572_v8 = vpop.f32.mrf.mxu0 }
 0x177   : > { %v817_v9 = vadd.f32 %v816_v6, %v556_v41  ;;  %v935_v10 = vadd.f32 %v12572_v8, %v12558_v38 }
 0x178   : > { %v14344_v7 = vpop.f32.mrf.mxu1  ;;  %v14346_v11 = vpop.f32.mrf.mxu0 }
 0x179   : > { %20281 = vst [vmem:[#allocation16_spill] sm:$0xff] %v14344_v7  ;;  %20282 = vst [vmem:[#allocation17_spill] sm:$0xff] %v14346_v11 }
 0x17a   : > { %v822_v12 = vpop.f32.mrf.mxu1  ;;  %v1061_v13 = vpop.f32.mrf.mxu0 }
 0x17b   : > { %v823_v14 = vadd.f32 %v822_v12, %v562_v46  ;;  %v1213_v15 = vadd.f32 %v1061_v13, %v787_v43 }
 0x17c   : > { %v14352_v17 = vpop.f32.mrf.mxu1  ;;  %v14354_v20 = vpop.f32.mrf.mxu0 }
 0x17d   : > { %20283 = vst [vmem:[#allocation18_spill] sm:$0xff] %v14352_v17 }
 0x17e   : > { %v828_v21 = vpop.f32.mrf.mxu1  ;;  %v1067_v22 = vpop.f32.mrf.mxu0 }
 0x17f   : > { %v829_v25 = vadd.f32 %v828_v21, %v14249_v16  ;;  %v1216_v26 = vadd.f32 %v1067_v22, %v793_v48 }
 0x180   : > { %v14361_v27 = vpop.f32.mrf.mxu1  ;;  %v14363_v28 = vpop.f32.mrf.mxu0 }
 0x181   : > { %20284 = vst [vmem:[#allocation19_spill] sm:$0xff] %v14361_v27 }
 0x182   : > { %v1073_v31 = vpop.f32.mrf.mxu0  ;;  %v12577_v32 = vpop.f32.mrf.mxu1 }
 0x183   : > { %v1219_v33 = vadd.f32 %v1073_v31, %v799_v53  ;;  %v1218_v34 = vadd.f32 %v12577_v32, %v905_v54 }
 0x184   : > { %v14369_v37 = vpop.f32.mrf.mxu0  ;;  %v14371_v38 = vpop.f32.mrf.mxu1 }
 0x186   : > { %v1079_v16 = vpop.f32.mrf.mxu0  ;;  %v12580_v41 = vpop.f32.mrf.mxu1 }
 0x187   : > { %v1222_v42 = vadd.f32 %v1079_v16, %v805_v59  ;;  %v1224_v43 = vadd.f32 %v12580_v41, %v915_v60 }
 0x188   : > { %v14377_v46 = vpop.f32.mrf.mxu0  ;;  %v14379_v47 = vpop.f32.mrf.mxu1 }
 0x189   : > { %20285 = vst [vmem:[#allocation20_spill] sm:$0xff] %v14377_v46  ;;  %20286 = vst [vmem:[#allocation21_spill] sm:$0xff] %v14379_v47 }
 0x18a   : > { %v1085_v48 = vpop.f32.mrf.mxu0  ;;  %v12583_v51 = vpop.f32.mrf.mxu1 }
 0x18b   : > { %v1225_v52 = vadd.f32 %v1085_v48, %v811_v2  ;;  %v1230_v53 = vadd.f32 %v12583_v51, %v925_v3 }
 0x18c   : > { %v14385_v54 = vpop.f32.mrf.mxu0  ;;  %v14387_v57 = vpop.f32.mrf.mxu1 }
 0x18d   : > { %20287 = vst [vmem:[#allocation22_spill] sm:$0xff] %v14385_v54  ;;  %20288 = vst [vmem:[#allocation23_spill] sm:$0xff] %v14387_v57 }
 0x18e   : > { %v1091_v58 = vpop.f32.mrf.mxu0  ;;  %v12586_v59 = vpop.f32.mrf.mxu1 }
 0x18f   : > { %v1228_v60 = vadd.f32 %v1091_v58, %v817_v9  ;;  %v1236_v63 = vadd.f32 %v12586_v59, %v935_v10 }
 0x190   : > { %v14393_v1 = vpop.f32.mrf.mxu0  ;;  %v14395_v6 = vpop.f32.mrf.mxu1 }
 0x191   : > { %20289 = vst [vmem:[#allocation24_spill] sm:$0xff] %v14393_v1  ;;  %20290 = vst [vmem:[#allocation25_spill] sm:$0xff] %v14395_v6 }
 0x192   : > { %v1097_v2 = vpop.f32.mrf.mxu0  ;;  %v1360_v3 = vpop.f32.mrf.mxu1 }
 0x193   : > { %v1231_v8 = vadd.f32 %v1097_v2, %v823_v14  ;;  %v1512_v12 = vadd.f32 %v1360_v3, %v1213_v15 }
 0x194   : > { %v14401_v13 = vpop.f32.mrf.mxu0  ;;  %v14403_v21 = vpop.f32.mrf.mxu1 }
 0x195   : > { %20291 = vst [vmem:[#allocation26_spill] sm:$0xff] %v14401_v13 }
 0x196   : > { %v1103_v9 = vpop.f32.mrf.mxu0  ;;  %v1366_v10 = vpop.f32.mrf.mxu1 }
 0x197   : > { %v1234_v22 = vadd.f32 %v1103_v9, %v829_v25  ;;  %v1515_v31 = vadd.f32 %v1366_v10, %v1216_v26 }
 0x198   : > { %v14405_v32 = vpop.f32.mrf.mxu0  ;;  %v14407_v16 = vpop.f32.mrf.mxu1 }
 0x199   : > { %20292 = vst [vmem:[#allocation27_spill] sm:$0xff] %v14405_v32 }
 0x19a   : > { %v1372_v41 = vpop.f32.mrf.mxu1  ;;  %v12591_v48 = vpop.f32.mrf.mxu0 }
 0x19b   : > { %v1518_v51 = vadd.f32 %v1372_v41, %v1219_v33  ;;  %v1517_v58 = vadd.f32 %v12591_v48, %v1218_v34 }
 0x19c   : > { %v14409_v59 = vpop.f32.mrf.mxu1  ;;  %v14411_v14 = vpop.f32.mrf.mxu0 }
 0x19e   : > { %v1378_v15 = vpop.f32.mrf.mxu1  ;;  %v12594_v2 = vpop.f32.mrf.mxu0 }
 0x19f   : > { %v1521_v3 = vadd.f32 %v1378_v15, %v1222_v42  ;;  %v1523_v0 = vadd.f32 %v12594_v2, %v1224_v43 }
 0x1a0   : > { %v14413_v27 = vpop.f32.mrf.mxu1  ;;  %v14415_v25 = vpop.f32.mrf.mxu0 }
 0x1a1   : > { %20293 = vst [vmem:[#allocation28_spill] sm:$0xff] %v14413_v27  ;;  %20294 = vst [vmem:[#allocation29_spill] sm:$0xff] %v14415_v25 }
 0x1a2   : > { %v1384_v26 = vpop.f32.mrf.mxu1  ;;  %v12597_v9 = vpop.f32.mrf.mxu0 }
 0x1a3   : > { %v1524_v10 = vadd.f32 %v1384_v26, %v1225_v52  ;;  %v1529_v32 = vadd.f32 %v12597_v9, %v1230_v53 }
 0x1a4   : > { %v14417_v19 = vpop.f32.mrf.mxu1  ;;  %v14419_v33 = vpop.f32.mrf.mxu0 }
 0x1a5   : > { %20295 = vst [vmem:[#allocation30_spill] sm:$0xff] %v14417_v19  ;;  %20296 = vst [vmem:[#allocation31_spill] sm:$0xff] %v14419_v33 }
 0x1a6   : > { %v1390_v34 = vpop.f32.mrf.mxu1  ;;  %v12600_v41 = vpop.f32.mrf.mxu0 }
 0x1a7   : > { %v1527_v48 = vadd.f32 %v1390_v34, %v1228_v60  ;;  %v1535_v13 = vadd.f32 %v12600_v41, %v1236_v63 }
 0x1a8   : > { %v14421_v17 = vpop.f32.mrf.mxu1  ;;  %v14423_v42 = vpop.f32.mrf.mxu0 }
 0x1a9   : > { %20297 = vst [vmem:[#allocation32_spill] sm:$0xff] %v14421_v17  ;;  %20298 = vst [vmem:[#allocation33_spill] sm:$0xff] %v14423_v42 }
 0x1aa   : > { %v1396_v43 = vpop.f32.mrf.mxu1  ;;  %v1646_v15 = vpop.f32.mrf.mxu0 }
 0x1ab   : > { %v1530_v2 = vadd.f32 %v1396_v43, %v1231_v8  ;;  %v14425_v49 = vadd.f32 %v1646_v15, %v1512_v12 }
 0x1ac   : > { %v14427_v6 = vpop.f32.mrf.mxu1  ;;  %v14429_v52 = vpop.f32.mrf.mxu0 }
 0x1ad   : > { %20299 = vst [vmem:[#allocation34_spill] sm:$0xff] %v14427_v6 }
 0x1ae   : > { %v1402_v53 = vpop.f32.mrf.mxu1  ;;  %v1652_v26 = vpop.f32.mrf.mxu0 }
 0x1af   : > { %v1533_v9 = vadd.f32 %v1402_v53, %v1234_v22  ;;  %v14431_v11 = vadd.f32 %v1652_v26, %v1515_v31 }
 0x1b0   : > { %v14433_v60 = vpop.f32.mrf.mxu1  ;;  %v14435_v63 = vpop.f32.mrf.mxu0 }
 0x1b1   : > { %20300 = vst [vmem:[#allocation35_spill] sm:$0xff] %v14433_v60 }
 0x1b2   : > { %v1658_v34 = vpop.f32.mrf.mxu0  ;;  %v12605_v41 = vpop.f32.mrf.mxu1 }
 0x1b3   : > { %v1804_v42 = vadd.f32 %v1658_v34, %v1518_v51  ;;  %v1803_v40 = vadd.f32 %v12605_v41, %v1517_v58 }
 0x1b4   : > { %v14437_v8 = vpop.f32.mrf.mxu0  ;;  %v14439_v12 = vpop.f32.mrf.mxu1 }
 0x1b6   : > { %v1664_v43 = vpop.f32.mrf.mxu0  ;;  %v12608_v15 = vpop.f32.mrf.mxu1 }
 0x1b7   : > { %v1807_v6 = vadd.f32 %v1664_v43, %v1521_v3  ;;  %v1809_v17 = vadd.f32 %v12608_v15, %v1523_v0 }
 0x1b8   : > { %v14441_v1 = vpop.f32.mrf.mxu0  ;;  %v14443_v22 = vpop.f32.mrf.mxu1 }
 0x1b9   : > { %20301 = vst [vmem:[#allocation36_spill] sm:$0xff] %v14441_v1  ;;  %20302 = vst [vmem:[#allocation37_spill] sm:$0xff] %v14443_v22 }
 0x1ba   : > { %v1670_v31 = vpop.f32.mrf.mxu0  ;;  %v12611_v53 = vpop.f32.mrf.mxu1 }
 0x1bb   : > { %v1810_v26 = vadd.f32 %v1670_v31, %v1524_v10  ;;  %v1815_v60 = vadd.f32 %v12611_v53, %v1529_v32 }
 0x1bc   : > { %v14445_v7 = vpop.f32.mrf.mxu0  ;;  %v14447_v51 = vpop.f32.mrf.mxu1 }
 0x1bd   : > { %20303 = vst [vmem:[#allocation38_spill] sm:$0xff] %v14445_v7  ;;  %20304 = vst [vmem:[#allocation39_spill] sm:$0xff] %v14447_v51 }
 0x1be   : > { %v1676_v58 = vpop.f32.mrf.mxu0  ;;  %v12614_v34 = vpop.f32.mrf.mxu1 }
 0x1bf   : > { %v1813_v41 = vadd.f32 %v1676_v58, %v1527_v48  ;;  %v1821_v44 = vadd.f32 %v12614_v34, %v1535_v13 }
 0x1c0   : > { %v14449_v33 = vpop.f32.mrf.mxu0  ;;  %v14451_v3 = vpop.f32.mrf.mxu1 }
 0x1c1   : > { %20305 = vst [vmem:[#allocation40_spill] sm:$0xff] %v14449_v33  ;;  %20306 = vst [vmem:[#allocation41_spill] sm:$0xff] %v14451_v3 }
 0x1c2   : > { %v1682_v0 = vpop.f32.mrf.mxu0  ;;  %v14453_v43 = vpop.f32.mrf.mxu1 }
 0x1c3   : > { %v1816_v15 = vadd.f32 %v1682_v0, %v1530_v2 }
 0x1c4   : > { %v14455_v19 = vpop.f32.mrf.mxu0  ;;  %v14457_v10 = vpop.f32.mrf.mxu1 }
 0x1c5   : > { %20307 = vst [vmem:[#allocation42_spill] sm:$0xff] %v14455_v19 }
 0x1c6   : > { %v1688_v32 = vpop.f32.mrf.mxu0  ;;  %v14459_v31 = vpop.f32.mrf.mxu1 }
 0x1c7   : > { %v1819_v53 = vadd.f32 %v1688_v32, %v1533_v9 }
 0x1c8   : > { %v14461_v51 = vpop.f32.mrf.mxu0  ;;  %v14463_v48 = vpop.f32.mrf.mxu1 }
 0x1c9   : > { %20308 = vst [vmem:[#allocation43_spill] sm:$0xff] %v14461_v51 }
 0x1ca   : > { %v1957_v13 = vpop.f32.mrf.mxu1  ;;  %v12619_v58 = vpop.f32.mrf.mxu0 }
 0x1cb   : > { %v2103_v34 = vadd.f32 %v1957_v13, %v1804_v42  ;;  %v14465_v3 = vadd.f32 %v12619_v58, %v1803_v40 }
 0x1cc   : > { %v14467_v33 = vpop.f32.mrf.mxu1  ;;  %v14469_v2 = vpop.f32.mrf.mxu0 }
 0x1ce   : > { %v1963_v0 = vpop.f32.mrf.mxu1  ;;  %v12622_v19 = vpop.f32.mrf.mxu0 }
 0x1cf   : > { %v2106_v7 = vadd.f32 %v1963_v0, %v1807_v6  ;;  %v2108_v57 = vadd.f32 %v12622_v19, %v1809_v17 }
 0x1d0   : > { %v14471_v54 = vpop.f32.mrf.mxu1  ;;  %v14473_v9 = vpop.f32.mrf.mxu0 }
 0x1d1   : > { %20309 = vst [vmem:[#allocation44_spill] sm:$0xff] %v14471_v54  ;;  %20310 = vst [vmem:[#allocation45_spill] sm:$0xff] %v14473_v9 }
 0x1d2   : > { %v1969_v32 = vpop.f32.mrf.mxu1  ;;  %v12625_v51 = vpop.f32.mrf.mxu0 }
 0x1d3   : > { %v2109_v5 = vadd.f32 %v1969_v32, %v1810_v26  ;;  %v2114_v36 = vadd.f32 %v12625_v51, %v1815_v60 }
 0x1d4   : > { %v14475_v4 = vpop.f32.mrf.mxu1  ;;  %v14477_v40 = vpop.f32.mrf.mxu0 }
 0x1d5   : > { %20311 = vst [vmem:[#allocation46_spill] sm:$0xff] %v14475_v4  ;;  %20312 = vst [vmem:[#allocation47_spill] sm:$0xff] %v14477_v40 }
 0x1d6   : > { %v1975_v42 = vpop.f32.mrf.mxu1  ;;  %v12628_v13 = vpop.f32.mrf.mxu0 }
 0x1d7   : > { %v2112_v58 = vadd.f32 %v1975_v42, %v1813_v41  ;;  %v2120_v39 = vadd.f32 %v12628_v13, %v1821_v44 }
 0x1d8   : > { %v14479_v1 = vpop.f32.mrf.mxu1  ;;  %v14481_v6 = vpop.f32.mrf.mxu0 }
 0x1d9   : > { %20313 = vst [vmem:[#allocation48_spill] sm:$0xff] %v14479_v1  ;;  %20314 = vst [vmem:[#allocation49_spill] sm:$0xff] %v14481_v6 }
 0x1da   : > { %v1981_v19 = vpop.f32.mrf.mxu1  ;;  %v14483_v17 = vpop.f32.mrf.mxu0 }
 0x1db   : > { %v2115_v0 = vadd.f32 %v1981_v19, %v1816_v15 }
 0x1dc   : > { %v14485_v54 = vpop.f32.mrf.mxu1  ;;  %v14487_v26 = vpop.f32.mrf.mxu0 }
 0x1dd   : > { %20315 = vst [vmem:[#allocation50_spill] sm:$0xff] %v14485_v54 }
 0x1de   : > { %v1987_v60 = vpop.f32.mrf.mxu1  ;;  %v14489_v51 = vpop.f32.mrf.mxu0 }
 0x1df   : > { %v2118_v32 = vadd.f32 %v1987_v60, %v1819_v53 }
 0x1e0   : > { %v14491_v40 = vpop.f32.mrf.mxu1  ;;  %v14493_v41 = vpop.f32.mrf.mxu0 }
 0x1e1   : > { %20316 = vst [vmem:[#allocation51_spill] sm:$0xff] %v14491_v40 }
 0x1e2   : > { %v2256_v44 = vpop.f32.mrf.mxu0  ;;  %v14495_v42 = vpop.f32.mrf.mxu1 }
 0x1e3   : > { %v14497_v13 = vadd.f32 %v2256_v44, %v2103_v34 }
 0x1e4   : > { %v14499_v6 = vpop.f32.mrf.mxu0  ;;  %v14501_v15 = vpop.f32.mrf.mxu1 }
 0x1e6   : > { %v2262_v19 = vpop.f32.mrf.mxu0  ;;  %v12636_v54 = vpop.f32.mrf.mxu1 }
 0x1e7   : > { %v14503_v1 = vadd.f32 %v2262_v19, %v2106_v7  ;;  %v2407_v4 = vadd.f32 %v12636_v54, %v2108_v57 }
 0x1e8   : > { %v14505_v9 = vpop.f32.mrf.mxu0  ;;  %v14507_v53 = vpop.f32.mrf.mxu1 }
 0x1e9   : > { %20317 = vst [vmem:[#allocation52_spill] sm:$0xff] %v14503_v1  ;;  %20318 = vst [vmem:[#allocation53_spill] sm:$0xff] %v14505_v9 }
 0x1ea   : > { %20319 = vst [vmem:[#allocation54_spill] sm:$0xff] %v14507_v53  ;;  %v2268_v60 = vpop.f32.mrf.mxu0  ;;  %v12639_v40 = vpop.f32.mrf.mxu1 }
 0x1eb   : > { %v2408_v27 = vadd.f32 %v2268_v60, %v2109_v5  ;;  %v2413_v22 = vadd.f32 %v12639_v40, %v2114_v36 }
 0x1ec   : > { %v14509_v46 = vpop.f32.mrf.mxu0  ;;  %v14511_v34 = vpop.f32.mrf.mxu1 }
 0x1ed   : > { %20320 = vst [vmem:[#allocation55_spill] sm:$0xff] %v14509_v46  ;;  %20321 = vst [vmem:[#allocation56_spill] sm:$0xff] %v14511_v34 }
 0x1ee   : > { %v2274_v44 = vpop.f32.mrf.mxu0  ;;  %v12642_v25 = vpop.f32.mrf.mxu1 }
 0x1ef   : > { %v2411_v61 = vadd.f32 %v2274_v44, %v2112_v58  ;;  %v2419_v35 = vadd.f32 %v12642_v25, %v2120_v39 }
 0x1f0   : > { %v14513_v47 = vpop.f32.mrf.mxu0  ;;  %v14515_v7 = vpop.f32.mrf.mxu1 }
 0x1f1   : > { %20322 = vst [vmem:[#allocation57_spill] sm:$0xff] %v14513_v47  ;;  %20323 = vst [vmem:[#allocation58_spill] sm:$0xff] %v14515_v7  ;;  %v3115_v47 = vlaneseq }
 0x1f2   : > { %v2280_v54 = vpop.f32.mrf.mxu0  ;;  %v2543_v57 = vpop.f32.mrf.mxu1 }
 0x1f3   : > { %v2414_v19 = vadd.f32 %v2280_v54, %v2115_v0 }
 0x1f4   : > { %v14517_v9 = vpop.f32.mrf.mxu0  ;;  %v2545_v53 = vpop.f32.mrf.mxu1 }
 0x1f5   : > { %20324 = vst [vmem:[#allocation59_spill] sm:$0xff] %v14517_v9  ;;  %v789_v9 = vadd.f32 %v14313_v45, %v14258_v18 }
 0x1f6   : > { %v2286_v5 = vpop.f32.mrf.mxu0  ;;  %v14519_v36 = vpop.f32.mrf.mxu1 }
 0x1f7   : > { %v2417_v40 = vadd.f32 %v2286_v5, %v2118_v32 }
 0x1f8   : > { %v14521_v60 = vpop.f32.mrf.mxu0  ;;  %v14523_v34 = vpop.f32.mrf.mxu1 }
 0x1f9   : > { %20325 = vst [vmem:[#allocation60_spill] sm:$0xff] %v14521_v60  ;;  %v1214_v60 = vadd.f32 %v14354_v20, %v789_v9 }
 0x1fa   : > { %v14525_v58 = vpop.f32.mrf.mxu1  ;;  %v14527_v39 = vpop.f32.mrf.mxu0 }
 0x1fb   : > { %v1513_v62 = vadd.f32 %v14403_v21, %v1214_v60  ;;  %v14578_v60 = vpop.permute.xlu0 %3028 }
 0x1fc   : > { %v14529_v25 = vpop.f32.mrf.mxu1  ;;  %v14531_v44 = vpop.f32.mrf.mxu0 }
 0x1fd   : > { %20326 = vst [vmem:[#allocation61_spill] sm:$0xff] %v14529_v25  ;;  %v1799_v45 = vadd.f32 %v14429_v52, %v1513_v62 }
 0x1fe   : > { %v14533_v0 = vpop.f32.mrf.mxu1  ;;  %v12650_v54 = vpop.f32.mrf.mxu0 }
 0x1ff   : > { %20327 = vst [vmem:[#allocation62_spill] sm:$0xff] %v14533_v0  ;;  %v14537_v7 = vadd.f32 %v12650_v54, %v2407_v4  ;;  %v2097_v4 = vadd.f32 %v14453_v43, %v14425_v49  ;;  %v14556_v54 = vshrl.u32 %v3115_v47, 7  ;;  %v795_v47 = vadd.f32 %v14318_v50, %v14269_v23 }
 0x200   : > { %v14539_v32 = vpop.f32.mrf.mxu1  ;;  %v14541_v5 = vpop.f32.mrf.mxu0 }
 0x201   : > { %20328 = vst [vmem:[#allocation63_spill] sm:$0xff] %v14539_v32  ;;  %v2098_v32 = vadd.f32 %v14457_v10, %v1799_v45  ;;  %v3117_v49 = vsub.s32 0, %v14556_v54  ;;  %v3121_v10 = vsub.s32 1, %v14556_v54 }
 0x202   : > { %v2567_v46 = vpop.f32.mrf.mxu1  ;;  %v12653_v1 = vpop.f32.mrf.mxu0 }
 0x203   : > { %v14545_v30 = vadd.f32 %v2567_v46, %v2408_v27  ;;  %v14547_v0 = vadd.f32 %v12653_v1, %v2413_v22  ;;  %v2396_v27 = vadd.f32 %v14483_v17, %v2097_v4  ;;  %v2397_v62 = vadd.f32 %v14487_v26, %v2098_v32 }
 0x204   : > { %v14549_v25 = vpop.f32.mrf.mxu1  ;;  %v14551_v18 = vpop.f32.mrf.mxu0 }
 0x205   : > { %v2695_v52 = vadd.f32 %v2543_v57, %v2396_v27  ;;  %v2696_v17 = vadd.f32 %v2545_v53, %v2397_v62  ;;  %v1217_v57 = vadd.f32 %v14363_v28, %v795_v47 }
 0x206   : > { %v2573_v20 = vpop.f32.mrf.mxu1  ;;  %v12656_v9 = vpop.f32.mrf.mxu0 }
 0x207   : > { %v14560_v46 = vadd.f32 %v2573_v20, %v2411_v61  ;;  %v14562_v1 = vadd.f32 %v12656_v9, %v2419_v35  ;;  %v14575_v61 = vld [vmem:[%s20034_s9] sm:$0x7]  ;;  %v1516_v9 = vadd.f32 %v14407_v16, %v1217_v57 }
 0x208   : > { %v14564_v21 = vpop.f32.mrf.mxu1  ;;  %v14566_v22 = vpop.f32.mrf.mxu0  ;;  %v14587_v4 = vrot.slane %v14575_v61, %v3117_v49  ;;  %v14591_v53 = vrot.slane %v14575_v61, %v3121_v10 }
 0x209   : > { %v1802_v47 = vadd.f32 %v14435_v63, %v1516_v9  ;;  %v900_v9 = vadd.f32 %v14322_v56, %v14271_v24  ;;  %v801_v56 = vadd.f32 %v14320_v55, %v14283_v29  ;;  %v3125_v55 = vsub.s32 2, %v14556_v54 }
 0x20a   : > { %v2579_v43 = vpop.f32.mrf.mxu1  ;;  %v2842_v35 = vpop.f32.mrf.mxu0  ;;  %20329 = vst [vmem:[#allocation64_spill] sm:$0xff] %v14587_v4  ;;  %20330 = vst [vmem:[#allocation65_spill] sm:$0xff] %v14591_v53 }
 0x20b   : > { %v14580_v45 = vadd.f32 %v2579_v43, %v2414_v19  ;;  %v2994_v26 = vadd.f32 %v2842_v35, %v2695_v52  ;;  %v2100_v19 = vadd.f32 %v14459_v31, %v14431_v11  ;;  %v2101_v10 = vadd.f32 %v14463_v48, %v1802_v47 }
 0x20c   : > { %v14583_v32 = vpop.f32.mrf.mxu1  ;;  %v2844_v23 = vpop.f32.mrf.mxu0 }
 0x20d   : > { %v3066_v50 = vadd.f32 %v14578_v60, %v2994_v26  ;;  %v2995_v20 = vadd.f32 %v2844_v23, %v2696_v17  ;;  %v2399_v49 = vadd.f32 %v14489_v51, %v2100_v19  ;;  %v2400_v31 = vadd.f32 %v14493_v41, %v2101_v10  ;;  %v3034_v51 = vpop.permute.xlu1 %3033 }
 0x20e   : > { %v2585_v27 = vpop.f32.mrf.mxu1  ;;  %v2848_v35 = vpop.f32.mrf.mxu0  ;;  %v2701_v19 = vadd.f32 %v14525_v58, %v14497_v13 }
 0x20f   : > { %v3090_v62 = vmax.f32 %v3066_v50, 0.0  ;;  %v3067_v28 = vadd.f32 %v14578_v60, %v2995_v20  ;;  %v14596_v52 = vadd.f32 %v2585_v27, %v2417_v40  ;;  %v2698_v17 = vadd.f32 %v14519_v36, %v2399_v49 }
 0x210   : > { %v2850_v40 = vpop.f32.mrf.mxu0  ;;  %v2699_v26 = vadd.f32 %v14523_v34, %v2400_v31  ;;  %v14624_v34 = vpop.f32.mrf.mxu1  ;;  %v2401_v27 = vadd.f32 %v14495_v42, %v14465_v3  ;;  %v14670_v31 = vrot.slane %v14575_v61, %v3125_v55  ;;  %v20345_v55 = vld [vmem:[#allocation20_spill] sm:$0xff] }
 0x211   : > { %v14601_v43 = vmul.f32 %v14587_v4, %v3090_v62  ;;  %v3091_v16 = vmax.f32 %v3067_v28, 0.0  ;;  %v2997_v63 = vadd.f32 %v2848_v35, %v2698_v17  ;;  %v1215_v28 = vadd.f32 %v14371_v38, %v900_v9  ;;  %v14646_v24 = vpop.permute.xlu1 %3038 }
 0x212   : > { %v2998_v36 = vadd.f32 %v2850_v40, %v2699_v26  ;;  %v2854_v20 = vpop.f32.mrf.mxu0  ;;  %v12661_v62 = vpop.f32.mrf.mxu1  ;;  %v2700_v47 = vadd.f32 %v14527_v39, %v2401_v27  ;;  %v1220_v38 = vadd.f32 %v14369_v37, %v801_v56  ;;  %20333 = vst [vmem:[#allocation68_spill] sm:$0xff] %v14670_v31  ;;  %v20340_v56 = vld [vmem:[#allocation6_spill] sm:$0xff] }
 0x213   : > { %20331 = vst [vmem:[#allocation66_spill] sm:$0xff] %v14601_v43  ;;  %v14606_v11 = vmul.f32 %v14591_v53, %v3091_v16  ;;  %3261 = vrot.lane.b32.xlu0 %v14601_v43, %s13633_s19  ;;  %v3069_v48 = vadd.f32 %v3034_v51, %v2997_v63  ;;  %v3000_v16 = vadd.f32 %v2854_v20, %v2701_v19  ;;  %v20338_v20 = vld [vmem:[#allocation13_spill] sm:$0xff] }
 0x214   : > { %v3070_v57 = vadd.f32 %v3034_v51, %v2998_v36  ;;  %v1514_v3 = vadd.f32 %v14411_v14, %v1215_v28  ;;  %v2999_v42 = vadd.f32 %v12661_v62, %v2700_v47  ;;  %v1519_v39 = vadd.f32 %v14409_v59, %v1220_v38  ;;  %v2955_v10 = vpop.f32.mrf.mxu1  ;;  %v2856_v63 = vpop.f32.mrf.mxu0  ;;  %v20339_v62 = vld [vmem:[#allocation21_spill] sm:$0xff] }
 0x215   : > { %20332 = vst [vmem:[#allocation67_spill] sm:$0xff] %v14606_v11  ;;  %3263 = vrot.lane.b32.xlu1 %v14606_v11, %s13633_s19  ;;  %v3093_v41 = vmax.f32 %v3069_v48, 0.0  ;;  %v3072_v58 = vadd.f32 %v14646_v24, %v3000_v16  ;;  %v14710_v19 = vpop.permute.xlu1 %3048  ;;  %v20342_v38 = vld [vmem:[#allocation29_spill] sm:$0xff] }
 0x216   : > { %v3094_v50 = vmax.f32 %v3070_v57, 0.0  ;;  %v1800_v13 = vadd.f32 %v14439_v12, %v1514_v3  ;;  %v3071_v29 = vadd.f32 %v3034_v51, %v2999_v42  ;;  %v1805_v14 = vadd.f32 %v14437_v8, %v1519_v39  ;;  %v12664_v57 = vpop.f32.mrf.mxu1  ;;  %v2860_v16 = vpop.f32.mrf.mxu0  ;;  %v20341_v3 = vld [vmem:[#allocation12_spill] sm:$0xff]  ;;  %v20344_v39 = vld [vmem:[#allocation62_spill] sm:$0xff] }
 0x217   : > { %3616 = vrot.lane.b32.xlu0 %v14601_v43, %s13634_s20  ;;  %v14627_v23 = vmul.f32 %v14587_v4, %v3093_v41  ;;  %v3096_v12 = vmax.f32 %v3072_v58, 0.0  ;;  %v3005_v47 = vadd.f32 %v12664_v57, %v14537_v7  ;;  %v807_v42 = vadd.f32 %v20341_v3, %v20340_v56  ;;  %v20343_v58 = vld [vmem:[#allocation52_spill] sm:$0xff]  ;;  %v20346_v7 = vld [vmem:[#allocation37_spill] sm:$0xff] }
 0x218   : > { %v14642_v49 = vmul.f32 %v14591_v53, %v3094_v50  ;;  %v2099_v35 = vadd.f32 %v14469_v2, %v1800_v13  ;;  %v2104_v17 = vadd.f32 %v14467_v33, %v1805_v14  ;;  %v3095_v2 = vmax.f32 %v3071_v29, 0.0  ;;  %v20334_v33 = vld [vmem:[#allocation61_spill] sm:$0xff]  ;;  %v2965_v57 = vpop.f32.mrf.mxu1 }
 0x219   : > { %3618 = vrot.lane.b32.xlu1 %v14606_v11, %s13634_s20  ;;  %v20337_v50 = vld [vmem:[#allocation5_spill] sm:$0xff]  ;;  %v1223_v14 = vadd.f32 %v20345_v55, %v807_v42  ;;  %v2862_v42 = vpop.f32.mrf.mxu0 }
 0x21a   : > { %v2398_v37 = vadd.f32 %v14501_v15, %v2099_v35  ;;  %v2403_v8 = vadd.f32 %v14499_v6, %v2104_v17  ;;  %v14676_v15 = vmul.f32 %v14587_v4, %v3096_v12  ;;  %v3044_v6 = vpop.permute.xlu0 %3043  ;;  %v910_v9 = vadd.f32 %v20338_v20, %v20337_v50  ;;  %v14729_v17 = vpop.permute.xlu1 %3058  ;;  %v20351_v50 = vld [vmem:[#allocation44_spill] sm:$0xff] }
 0x21b   : > { %3979 = vrot.lane.b32.xlu0 %v14601_v43, %s13635_s21  ;;  %v2704_v35 = vadd.f32 %v20344_v39, %v20343_v58 }
 0x21c   : > { %v2697_v59 = vadd.f32 %v14531_v44, %v2398_v37  ;;  %v2702_v51 = vadd.f32 %v20334_v33, %v2403_v8  ;;  %v14682_v44 = vmul.f32 %v14670_v31, %v3095_v2  ;;  %v1221_v28 = vadd.f32 %v20339_v62, %v910_v9  ;;  %v20348_v8 = vld [vmem:[#allocation45_spill] sm:$0xff]  ;;  %v20349_v33 = vld [vmem:[#allocation36_spill] sm:$0xff] }
 0x21d   : > { %3981 = vrot.lane.b32.xlu1 %v14606_v11, %s13635_s21  ;;  %v3003_v12 = vadd.f32 %v2860_v16, %v2704_v35  ;;  %v20352_v62 = vld [vmem:[#allocation53_spill] sm:$0xff] }
 0x21e   : > { %v2996_v54 = vadd.f32 %v2955_v10, %v2697_v59  ;;  %20335 = vst [vmem:[#allocation61_spill] sm:$0xff] %v14682_v44  ;;  %v3001_v61 = vadd.f32 %v2856_v63, %v2702_v51  ;;  %v1520_v13 = vadd.f32 %v20342_v38, %v1221_v28  ;;  %v3077_v10 = vadd.f32 %v3044_v6, %v3005_v47  ;;  %v20347_v59 = vld [vmem:[#allocation28_spill] sm:$0xff]  ;;  %v20353_v38 = vld [vmem:[#allocation63_spill] sm:$0xff] }
 0x21f   : > { %4366 = vrot.lane.b32.xlu0 %v14601_v43, %s13636_s22  ;;  %v1522_v2 = vadd.f32 %v20347_v59, %v1223_v14 }
 0x220   : > { %v3068_v40 = vadd.f32 %v14578_v60, %v2996_v54  ;;  %v3073_v26 = vadd.f32 %v14646_v24, %v3001_v61  ;;  %v14701_v60 = vpop.permute.xlu0 %3053  ;;  %v1806_v37 = vadd.f32 %v20346_v7, %v1520_v13  ;;  %v20350_v61 = vld [vmem:[#allocation54_spill] sm:$0xff] }
 0x221   : > { %4368 = vrot.lane.b32.xlu1 %v14606_v11, %s13636_s22  ;;  %v1808_v51 = vadd.f32 %v20349_v33, %v1522_v2 }
 0x222   : > { %v3092_v48 = vmax.f32 %v3068_v40, 0.0  ;;  %v3097_v36 = vmax.f32 %v3073_v26, 0.0  ;;  %v2105_v54 = vadd.f32 %v20348_v8, %v1806_v37  ;;  %v3075_v26 = vadd.f32 %v3044_v6, %v3003_v12 }
 0x223   : > { %4374 = vrot.lane.b32.xlu0 %v14627_v23, %s13636_s22  ;;  %v2107_v20 = vadd.f32 %v20351_v50, %v1808_v51  ;;  %v2866_v51 = vpop.f32.mrf.mxu0 }
 0x224   : > { %v14697_v41 = vmul.f32 %v14670_v31, %v3092_v48  ;;  %v14708_v27 = vmul.f32 %v14591_v53, %v3097_v36  ;;  %v14723_v29 = vpop.permute.xlu0 %3063  ;;  %v2404_v40 = vadd.f32 %v20350_v61, %v2105_v54  ;;  %v3101_v48 = vmax.f32 %v3077_v10, 0.0  ;;  %v14743_v36 = vpop.permute.xlu1 %13246 }
 0x225   : > { %3269 = vrot.lane.b32.xlu1 %v14627_v23, %s13633_s19  ;;  %v2406_v28 = vadd.f32 %v20352_v62, %v2107_v20  ;;  %v3099_v47 = vmax.f32 %v3075_v26, 0.0  ;;  %v12667_v61 = vpop.f32.mrf.mxu1  ;;  %v20363_v62 = vld [vmem:[#allocation14_spill] sm:$0xff] }
 0x226   : > { %20336 = vst [vmem:[#allocation69_spill] sm:$0xff] %v14697_v41  ;;  %v2703_v9 = vadd.f32 %v14541_v5, %v2404_v40  ;;  %v14751_v16 = vmul.f32 %v14670_v31, %v3101_v48  ;;  %v3006_v40 = vadd.f32 %v2866_v51, %v14545_v30  ;;  %v3011_v48 = vadd.f32 %v12667_v61, %v14547_v0 }
 0x227   : > { %3271 = vrot.lane.b32.xlu0 %v14642_v49, %s13633_s19  ;;  %v2705_v13 = vadd.f32 %v20353_v38, %v2406_v28  ;;  %v14763_v58 = vmul.f32 %v14587_v4, %v3099_v47 }
 0x228   : > { %v14737_v63 = vpop.permute.xlu0 %13251  ;;  %v3002_v56 = vadd.f32 %v2965_v57, %v2703_v9  ;;  %v14760_v5 = vpop.permute.xlu1 %13256  ;;  %v3078_v50 = vadd.f32 %v14710_v19, %v3006_v40  ;;  %v3083_v20 = vadd.f32 %v14701_v60, %v3011_v48  ;;  %v20362_v9 = vld [vmem:[#allocation8_spill] sm:$0xff]  ;;  %v20371_v48 = vld [vmem:[#allocation31_spill] sm:$0xff] }
 0x229   : > { %3624 = vrot.lane.b32.xlu1 %v14627_v23, %s13634_s20  ;;  %v3004_v39 = vadd.f32 %v2862_v42, %v2705_v13  ;;  %v813_v0 = vadd.f32 %v20363_v62, %v20362_v9  ;;  %v20366_v42 = vld [vmem:[#allocation15_spill] sm:$0xff]  ;;  %v20367_v13 = vld [vmem:[#allocation22_spill] sm:$0xff] }
 0x22a   : > { %v3074_v35 = vadd.f32 %v14646_v24, %v3002_v56  ;;  %v3102_v28 = vmax.f32 %v3078_v50, 0.0  ;;  %v20365_v56 = vld [vmem:[#allocation7_spill] sm:$0xff]  ;;  %v20372_v9 = vld [vmem:[#allocation38_spill] sm:$0xff] }
 0x22b   : > { %3626 = vrot.lane.b32.xlu0 %v14642_v49, %s13634_s20  ;;  %v3076_v14 = vadd.f32 %v3044_v6, %v3004_v39  ;;  %v920_v38 = vadd.f32 %v20366_v42, %v20365_v56  ;;  %v1226_v39 = vadd.f32 %v20367_v13, %v813_v0  ;;  %v20374_v56 = vld [vmem:[#allocation39_spill] sm:$0xff]  ;;  %v20375_v42 = vld [vmem:[#allocation46_spill] sm:$0xff] }
 0x22c   : > { %v14755_v3 = vpop.permute.xlu0 %13261  ;;  %v3098_v7 = vmax.f32 %v3074_v35, 0.0  ;;  %v14774_v37 = vpop.permute.xlu1 %13266  ;;  %v3107_v35 = vmax.f32 %v3083_v20, 0.0  ;;  %v14846_v61 = vmul.f32 %v14587_v4, %v3102_v28  ;;  %v20376_v13 = vld [vmem:[#allocation47_spill] sm:$0xff] }
 0x22d   : > { %3987 = vrot.lane.b32.xlu1 %v14627_v23, %s13635_s21  ;;  %20354 = vst [vmem:[#allocation5_spill] sm:$0xff] %v14774_v37  ;;  %v3100_v12 = vmax.f32 %v3076_v14, 0.0  ;;  %v20368_v14 = vld [vmem:[#allocation23_spill] sm:$0xff] }
 0x22e   : > { %v14779_v24 = vmul.f32 %v14670_v31, %v3098_v7  ;;  %v1227_v7 = vadd.f32 %v20368_v14, %v920_v38  ;;  %v14855_v20 = vmul.f32 %v14670_v31, %v3107_v35  ;;  %v20377_v14 = vld [vmem:[#allocation55_spill] sm:$0xff] }
 0x22f   : > { %3989 = vrot.lane.b32.xlu0 %v14642_v49, %s13635_s21  ;;  %v14790_v59 = vmul.f32 %v14591_v53, %v3100_v12  ;;  %v20369_v12 = vld [vmem:[#allocation30_spill] sm:$0xff] }
 0x230   : > { %v14770_v55 = vpop.permute.xlu0 %13271  ;;  %v14787_v6 = vpop.permute.xlu1 %13276  ;;  %v1525_v51 = vadd.f32 %v20369_v12, %v1226_v39  ;;  %v1526_v50 = vadd.f32 %v20371_v48, %v1227_v7 }
 0x231   : > { %4376 = vrot.lane.b32.xlu1 %v14642_v49, %s13636_s22  ;;  %v2868_v12 = vpop.f32.mrf.mxu0 }
 0x232   : > { %v1811_v62 = vadd.f32 %v20372_v9, %v1525_v51  ;;  %v1812_v28 = vadd.f32 %v20374_v56, %v1526_v50  ;;  %v20379_v51 = vld [vmem:[#allocation56_spill] sm:$0xff] }
 0x233   : > { %3995 = vrot.lane.b32.xlu0 %v14676_v15, %s13635_s21 }
 0x234   : > { %v14783_v10 = vpop.permute.xlu0 %13281  ;;  %v14800_v8 = vpop.permute.xlu1 %13286  ;;  %v2110_v38 = vadd.f32 %v20375_v42, %v1811_v62  ;;  %v2111_v39 = vadd.f32 %v20376_v13, %v1812_v28 }
 0x235   : > { %3273 = vrot.lane.b32.xlu1 %v14682_v44, %s13633_s19  ;;  %20356 = vst [vmem:[#allocation21_spill] sm:$0xff] %v14800_v8  ;;  %v2975_v62 = vpop.f32.mrf.mxu1 }
 0x236   : > { %v2409_v7 = vadd.f32 %v20377_v14, %v2110_v38  ;;  %v2410_v48 = vadd.f32 %v20379_v51, %v2111_v39 }
 0x237   : > { %4378 = vrot.lane.b32.xlu0 %v14682_v44, %s13636_s22 }
 0x238   : > { %v14796_v2 = vpop.permute.xlu0 %13291  ;;  %v14810_v33 = vpop.permute.xlu1 %13296  ;;  %v2708_v9 = vadd.f32 %v14549_v25, %v2409_v7  ;;  %v2709_v56 = vadd.f32 %v14551_v18, %v2410_v48 }
 0x239   : > { %3277 = vrot.lane.b32.xlu1 %v14676_v15, %s13633_s19  ;;  %20355 = vst [vmem:[#allocation13_spill] sm:$0xff] %v14796_v2  ;;  %20358 = vst [vmem:[#allocation12_spill] sm:$0xff] %v14810_v33 }
 0x23a   : > { %v3007_v28 = vadd.f32 %v2868_v12, %v2708_v9  ;;  %v3008_v42 = vadd.f32 %v2975_v62, %v2709_v56  ;;  %v2872_v9 = vpop.f32.mrf.mxu0 }
 0x23b   : > { %5102 = vrot.lane.b32.xlu0 %v14682_v44, %s13637_s23 }
 0x23c   : > { %v14806_v54 = vpop.permute.xlu0 %13301  ;;  %v14822_v57 = vpop.permute.xlu1 %13311  ;;  %v3079_v25 = vadd.f32 %v14710_v19, %v3007_v28  ;;  %v3080_v39 = vadd.f32 %v14710_v19, %v3008_v42  ;;  %v3009_v28 = vadd.f32 %v2872_v9, %v14560_v46 }
 0x23d   : > { %3628 = vrot.lane.b32.xlu1 %v14682_v44, %s13634_s20  ;;  %20357 = vst [vmem:[#allocation6_spill] sm:$0xff] %v14806_v54  ;;  %20360 = vst [vmem:[#allocation52_spill] sm:$0xff] %v14822_v57 }
 0x23e   : > { %v3103_v14 = vmax.f32 %v3079_v25, 0.0  ;;  %v3104_v12 = vmax.f32 %v3080_v39, 0.0  ;;  %v3081_v39 = vadd.f32 %v14701_v60, %v3009_v28 }
 0x23f   : > { %3265 = vrot.lane.b32.xlu0 %v14697_v41, %s13633_s19 }
 0x240   : > { %v14817_v26 = vpop.permute.xlu0 %13306  ;;  %v14836_v47 = vpop.permute.xlu1 %13321  ;;  %v14903_v48 = vmul.f32 %v14591_v53, %v3103_v14  ;;  %v14910_v62 = vmul.f32 %v14670_v31, %v3104_v12  ;;  %v3105_v9 = vmax.f32 %v3081_v39, 0.0  ;;  %v20393_v39 = vld [vmem:[#allocation24_spill] sm:$0xff] }
 0x241   : > { %3632 = vrot.lane.b32.xlu1 %v14676_v15, %s13634_s20  ;;  %20359 = vst [vmem:[#allocation29_spill] sm:$0xff] %v14817_v26  ;;  %20364 = vst [vmem:[#allocation20_spill] sm:$0xff] %v14836_v47  ;;  %v12670_v12 = vpop.f32.mrf.mxu1 }
 0x243   : > { %3279 = vrot.lane.b32.xlu0 %v14708_v27, %s13633_s19 }
 0x244   : > { %v14830_v30 = vpop.permute.xlu0 %13316  ;;  %v14859_v0 = vpop.permute.xlu1 %13331 }
 0x245   : > { %3991 = vrot.lane.b32.xlu1 %v14682_v44, %s13635_s21  ;;  %20361 = vst [vmem:[#allocation62_spill] sm:$0xff] %v14830_v30  ;;  %20373 = vst [vmem:[#allocation28_spill] sm:$0xff] %v14859_v0  ;;  %v20390_v0 = vld [vmem:[#allocation10_spill] sm:$0xff]  ;;  %v20395_v30 = vld [vmem:[#allocation32_spill] sm:$0xff] }
 0x247   : > { %3620 = vrot.lane.b32.xlu0 %v14697_v41, %s13634_s20 }
 0x248   : > { %v14850_v40 = vpop.permute.xlu0 %13326  ;;  %v14875_v50 = vpop.permute.xlu1 %13341 }
 0x249   : > { %4382 = vrot.lane.b32.xlu1 %v14676_v15, %s13636_s22  ;;  %20370 = vst [vmem:[#allocation37_spill] sm:$0xff] %v14850_v40  ;;  %20380 = vst [vmem:[#allocation36_spill] sm:$0xff] %v14875_v50  ;;  %v20391_v40 = vld [vmem:[#allocation16_spill] sm:$0xff] }
 0x24b   : > { %3634 = vrot.lane.b32.xlu0 %v14708_v27, %s13634_s20 }
 0x24c   : > { %v14869_v35 = vpop.permute.xlu0 %13336 }
 0x24d   : > { %3997 = vrot.lane.b32.xlu1 %v14708_v27, %s13635_s21  ;;  %20378 = vst [vmem:[#allocation45_spill] sm:$0xff] %v14869_v35  ;;  %v3017_v35 = vadd.f32 %v12670_v12, %v14562_v1 }
 0x24f   : > { %4384 = vrot.lane.b32.xlu0 %v14708_v27, %s13636_s22  ;;  %v3089_v1 = vadd.f32 %v14723_v29, %v3017_v35 }
 0x251   : > { %4007 = vrot.lane.b32.xlu1 %v14751_v16, %s13635_s21 }
 0x253   : > { %3983 = vrot.lane.b32.xlu0 %v14697_v41, %s13635_s21 }
 0x255   : > { %4390 = vrot.lane.b32.xlu1 %v14763_v58, %s13636_s22 }
 0x257   : > { %4370 = vrot.lane.b32.xlu0 %v14697_v41, %s13636_s22 }
 0x259   : > { %5118 = vrot.lane.b32.xlu1 %v14751_v16, %s13637_s23 }
 0x25b   : > { %5094 = vrot.lane.b32.xlu0 %v14697_v41, %s13637_s23 }
 0x25d   : > { %3281 = vrot.lane.b32.xlu1 %v14779_v24, %s13633_s19 }
 0x25f   : > { %3285 = vrot.lane.b32.xlu0 %v14763_v58, %s13633_s19 }
 0x261   : > { %3287 = vrot.lane.b32.xlu1 %v14790_v59, %s13633_s19 }
 0x263   : > { %3289 = vrot.lane.b32.xlu0 %v14751_v16, %s13633_s19 }
 0x265   : > { %3636 = vrot.lane.b32.xlu1 %v14779_v24, %s13634_s20 }
 0x267   : > { %3640 = vrot.lane.b32.xlu0 %v14763_v58, %s13634_s20 }
 0x269   : > { %3642 = vrot.lane.b32.xlu1 %v14790_v59, %s13634_s20 }
 0x26b   : > { %3644 = vrot.lane.b32.xlu0 %v14751_v16, %s13634_s20 }
 0x26d   : > { %4005 = vrot.lane.b32.xlu1 %v14790_v59, %s13635_s21 }
 0x26f   : > { %4003 = vrot.lane.b32.xlu0 %v14763_v58, %s13635_s21 }
 0x271   : > { %4392 = vrot.lane.b32.xlu1 %v14790_v59, %s13636_s22 }
 0x273   : > { %4394 = vrot.lane.b32.xlu0 %v14751_v16, %s13636_s22 }
 0x275   : > { %4386 = vrot.lane.b32.xlu1 %v14779_v24, %s13636_s22 }
 0x277   : > { %3999 = vrot.lane.b32.xlu0 %v14779_v24, %s13635_s21 }
 0x279   : > { %5110 = vrot.lane.b32.xlu1 %v14779_v24, %s13637_s23 }
 0x27b   : > { %3293 = vrot.lane.b32.xlu0 %v14846_v61, %s13633_s19 }
 0x27d   : > { %3305 = vrot.lane.b32.xlu1 %v14855_v20, %s13633_s19 }
 0x27f   : > { %3648 = vrot.lane.b32.xlu0 %v14846_v61, %s13634_s20 }
 0x281   : > { %3660 = vrot.lane.b32.xlu1 %v14855_v20, %s13634_s20 }
 0x283   : > { %4410 = vrot.lane.b32.xlu0 %v14855_v20, %s13636_s22 }
 0x285   : > { %4011 = vrot.lane.b32.xlu1 %v14846_v61, %s13635_s21  ;;  %v14882_v38 = vpop.permute.xlu0 %3261 }
 0x287   : > { %v14885_v13 = vpop.permute.xlu1 %3263  ;;  %4398 = vrot.lane.b32.xlu0 %v14846_v61, %s13636_s22 }
 0x289   : > { %4023 = vrot.lane.b32.xlu1 %v14855_v20, %s13635_s21  ;;  %v14892_v18 = vpop.permute.xlu0 %3616 }
 0x28a   : > { %20381 = vst [vmem:[#allocation54_spill] sm:$0xff] %v14892_v18 }
 0x28b   : > { %v14894_v7 = vpop.permute.xlu1 %3618  ;;  %5134 = vrot.lane.b32.xlu0 %v14855_v20, %s13637_s23 }
 0x28c   : > { %20382 = vst [vmem:[#allocation44_spill] sm:$0xff] %v14894_v7 }
 0x28d   : > { %5521 = vrot.lane.b32.xlu1 %v14855_v20, %s13638_s24  ;;  %v14900_v51 = vpop.permute.xlu0 %3979 }
 0x28e   : > { %20383 = vst [vmem:[#allocation53_spill] sm:$0xff] %v14900_v51  ;;  %v20399_v51 = vld [vmem:[#allocation40_spill] sm:$0xff] }
 0x28f   : > { %v14905_v19 = vpop.permute.xlu1 %3981  ;;  %5122 = vrot.lane.b32.xlu0 %v14846_v61, %s13637_s23 }
 0x290   : > { %20384 = vst [vmem:[#allocation63_spill] sm:$0xff] %v14905_v19 }
 0x291   : > { %3295 = vrot.lane.b32.xlu1 %v14903_v48, %s13633_s19  ;;  %v14914_v56 = vpop.permute.xlu0 %4366 }
 0x292   : > { %20385 = vst [vmem:[#allocation8_spill] sm:$0xff] %v14914_v56  ;;  %v819_v56 = vadd.f32 %v20391_v40, %v20390_v0  ;;  %v20397_v0 = vld [vmem:[#allocation9_spill] sm:$0xff] }
 0x293   : > { %v14917_v42 = vpop.permute.xlu1 %4368  ;;  %3297 = vrot.lane.b32.xlu0 %v14910_v62, %s13633_s19 }
 0x294   : > { %20386 = vst [vmem:[#allocation14_spill] sm:$0xff] %v14917_v42  ;;  %v14946_v42 = vmul.f32 %v14587_v4, %v3105_v9  ;;  %v1229_v47 = vadd.f32 %v20393_v39, %v819_v56  ;;  %v20398_v9 = vld [vmem:[#allocation17_spill] sm:$0xff]  ;;  %v3113_v56 = vmax.f32 %v3089_v1, 0.0 }
 0x295   : > { %3650 = vrot.lane.b32.xlu1 %v14903_v48, %s13634_s20  ;;  %v14923_v25 = vpop.permute.xlu0 %4374  ;;  %v930_v26 = vadd.f32 %v20398_v9, %v20397_v0  ;;  %v20401_v39 = vld [vmem:[#allocation25_spill] sm:$0xff] }
 0x296   : > { %20387 = vst [vmem:[#allocation7_spill] sm:$0xff] %v14923_v25  ;;  %v1528_v57 = vadd.f32 %v20395_v30, %v1229_v47  ;;  %v20404_v0 = vld [vmem:[#allocation57_spill] sm:$0xff] }
 0x297   : > { %v14926_v14 = vpop.permute.xlu1 %3269  ;;  %3652 = vrot.lane.b32.xlu0 %v14910_v62, %s13634_s20  ;;  %v20407_v1 = vld [vmem:[#allocation41_spill] sm:$0xff] }
 0x298   : > { %v1814_v19 = vadd.f32 %v20399_v51, %v1528_v57  ;;  %v14979_v57 = vmul.f32 %v14670_v31, %v3113_v56 }
 0x299   : > { %4402 = vrot.lane.b32.xlu1 %v14910_v62, %s13636_s22  ;;  %v14932_v46 = vpop.permute.xlu0 %3271 }
 0x29a   : > { %20405 = vst [vmem:[#allocation39_spill] sm:$0xff] %v14979_v57 }
 0x29b   : > { %v14934_v50 = vpop.permute.xlu1 %3624  ;;  %4013 = vrot.lane.b32.xlu0 %v14903_v48, %s13635_s21 }
 0x29c   : > { %20388 = vst [vmem:[#allocation15_spill] sm:$0xff] %v14934_v50 }
 0x29d   : > { %5124 = vrot.lane.b32.xlu1 %v14903_v48, %s13637_s23  ;;  %v14941_v28 = vpop.permute.xlu0 %3626 }
 0x29e   : > { %20389 = vst [vmem:[#allocation22_spill] sm:$0xff] %v14941_v28 }
 0x29f   : > { %v14948_v25 = vpop.permute.xlu1 %3987  ;;  %4015 = vrot.lane.b32.xlu0 %v14910_v62, %s13635_s21 }
 0x2a0   : > { %20392 = vst [vmem:[#allocation23_spill] sm:$0xff] %v14948_v25  ;;  %v1233_v25 = vadd.f32 %v20401_v39, %v930_v26  ;;  %v2874_v26 = vpop.f32.mrf.mxu0 }
 0x2a1   : > { %3301 = vrot.lane.b32.xlu1 %v14946_v42, %s13633_s19  ;;  %v14956_v12 = vpop.permute.xlu0 %3989 }
 0x2a2   : > { %20394 = vst [vmem:[#allocation30_spill] sm:$0xff] %v14956_v12  ;;  %v20402_v12 = vld [vmem:[#allocation48_spill] sm:$0xff] }
 0x2a3   : > { %v14959_v40 = vpop.permute.xlu1 %4376  ;;  %4400 = vrot.lane.b32.xlu0 %v14903_v48, %s13636_s22  ;;  %v2113_v30 = vadd.f32 %v20402_v12, %v1814_v19 }
 0x2a4   : > { %20396 = vst [vmem:[#allocation31_spill] sm:$0xff] %v14959_v40  ;;  %v20403_v40 = vld [vmem:[#allocation33_spill] sm:$0xff] }
 0x2a5   : > { %3656 = vrot.lane.b32.xlu1 %v14946_v42, %s13634_s20  ;;  %v14968_v35 = vpop.permute.xlu0 %3995  ;;  %v1532_v54 = vadd.f32 %v20403_v40, %v1233_v25  ;;  %v2412_v9 = vadd.f32 %v20404_v0, %v2113_v30  ;;  %v20408_v25 = vld [vmem:[#allocation49_spill] sm:$0xff]  ;;  %v20410_v0 = vld [vmem:[#allocation58_spill] sm:$0xff] }
 0x2a6   : > { %20400 = vst [vmem:[#allocation38_spill] sm:$0xff] %v14968_v35 }
 0x2a7   : > { %v14972_v47 = vpop.permute.xlu1 %3273  ;;  %5126 = vrot.lane.b32.xlu0 %v14910_v62, %s13637_s23  ;;  %v1818_v19 = vadd.f32 %v20407_v1, %v1532_v54  ;;  %v2711_v12 = vadd.f32 %v14564_v21, %v2412_v9  ;;  %v2985_v21 = vpop.f32.mrf.mxu1 }
 0x2a9   : > { %4019 = vrot.lane.b32.xlu1 %v14946_v42, %s13635_s21  ;;  %v14983_v51 = vpop.permute.xlu0 %4378  ;;  %v2117_v40 = vadd.f32 %v20408_v25, %v1818_v19  ;;  %v3010_v30 = vadd.f32 %v2874_v26, %v2711_v12 }
 0x2aa   : > { %20406 = vst [vmem:[#allocation46_spill] sm:$0xff] %v14983_v51 }
 0x2ab   : > { %v14987_v39 = vpop.permute.xlu1 %3277  ;;  %3321 = vrot.lane.b32.xlu0 %v14979_v57, %s13633_s19  ;;  %v2416_v51 = vadd.f32 %v20410_v0, %v2117_v40  ;;  %v3082_v9 = vadd.f32 %v14701_v60, %v3010_v30 }
 0x2ad   : > { %4039 = vrot.lane.b32.xlu1 %v14979_v57, %s13635_s21  ;;  %v14994_v56 = vpop.permute.xlu0 %5102  ;;  %v2715_v54 = vadd.f32 %v14566_v22, %v2416_v51  ;;  %v3106_v12 = vmax.f32 %v3082_v9, 0.0 }
 0x2ae   : > { %20409 = vst [vmem:[#allocation47_spill] sm:$0xff] %v14994_v56  ;;  %v20422_v56 = vld [vmem:[#allocation11_spill] sm:$0xff] }
 0x2af   : > { %v14997_v35 = vpop.permute.xlu1 %3628  ;;  %3676 = vrot.lane.b32.xlu0 %v14979_v57, %s13634_s20  ;;  %v3014_v1 = vadd.f32 %v2985_v21, %v2715_v54  ;;  %v15021_v51 = vmul.f32 %v14591_v53, %v3106_v12 }
 0x2b0   : > { %20411 = vst [vmem:[#allocation55_spill] sm:$0xff] %v14997_v35 }
 0x2b1   : > { %5150 = vrot.lane.b32.xlu1 %v14979_v57, %s13637_s23  ;;  %v15005_v26 = vpop.permute.xlu0 %3265  ;;  %v3086_v22 = vadd.f32 %v14729_v17, %v3014_v1  ;;  %20414 = vst [vmem:[#allocation16_spill] sm:$0xff] %v15021_v51 }
 0x2b3   : > { %v15007_v19 = vpop.permute.xlu1 %3632  ;;  %4426 = vrot.lane.b32.xlu0 %v14979_v57, %s13636_s22  ;;  %v3110_v30 = vmax.f32 %v3086_v22, 0.0  ;;  %v2878_v22 = vpop.f32.mrf.mxu0 }
 0x2b4   : > { %20412 = vst [vmem:[#allocation56_spill] sm:$0xff] %v15007_v19  ;;  %v3012_v33 = vadd.f32 %v2878_v22, %v14580_v45  ;;  %v20431_v45 = vld [vmem:[#allocation50_spill] sm:$0xff] }
 0x2b5   : > { %5537 = vrot.lane.b32.xlu1 %v14979_v57, %s13638_s24  ;;  %v15013_v25 = vpop.permute.xlu0 %3279  ;;  %v15036_v54 = vmul.f32 %v14670_v31, %v3110_v30 }
 0x2b7   : > { %v15016_v60 = vpop.permute.xlu1 %3991  ;;  %4406 = vrot.lane.b32.xlu0 %v14946_v42, %s13636_s22  ;;  %20418 = vst [vmem:[#allocation17_spill] sm:$0xff] %v15036_v54 }
 0x2b8   : > { %20413 = vst [vmem:[#allocation10_spill] sm:$0xff] %v15016_v60  ;;  %v20425_v60 = vld [vmem:[#allocation26_spill] sm:$0xff] }
 0x2b9   : > { %5130 = vrot.lane.b32.xlu1 %v14946_v42, %s13637_s23  ;;  %v15025_v40 = vpop.permute.xlu0 %3620 }
 0x2ba   : > { %20415 = vst [vmem:[#allocation24_spill] sm:$0xff] %v15025_v40 }
 0x2bb   : > { %v15027_v0 = vpop.permute.xlu1 %4382  ;;  %3303 = vrot.lane.b32.xlu0 %v15021_v51, %s13633_s19 }
 0x2bc   : > { %20416 = vst [vmem:[#allocation32_spill] sm:$0xff] %v15027_v0  ;;  %v20423_v0 = vld [vmem:[#allocation18_spill] sm:$0xff] }
 0x2bd   : > { %5517 = vrot.lane.b32.xlu1 %v14946_v42, %s13638_s24  ;;  %v15033_v21 = vpop.permute.xlu0 %3634  ;;  %v825_v30 = vadd.f32 %v20423_v0, %v20422_v56  ;;  %v20429_v0 = vld [vmem:[#allocation42_spill] sm:$0xff] }
 0x2be   : > { %20417 = vst [vmem:[#allocation9_spill] sm:$0xff] %v15033_v21 }
 0x2bf   : > { %v15038_v9 = vpop.permute.xlu1 %3997  ;;  %3658 = vrot.lane.b32.xlu0 %v15021_v51, %s13634_s20 }
 0x2c0   : > { %20419 = vst [vmem:[#allocation40_spill] sm:$0xff] %v15038_v9  ;;  %v1232_v9 = vadd.f32 %v20425_v60, %v825_v30 }
 0x2c1   : > { %3313 = vrot.lane.b32.xlu1 %v15036_v54, %s13633_s19  ;;  %v15044_v1 = vpop.permute.xlu0 %4384 }
 0x2c2   : > { %20420 = vst [vmem:[#allocation25_spill] sm:$0xff] %v15044_v1  ;;  %v20427_v1 = vld [vmem:[#allocation34_spill] sm:$0xff] }
 0x2c3   : > { %v15046_v12 = vpop.permute.xlu1 %4007  ;;  %4021 = vrot.lane.b32.xlu0 %v15021_v51, %s13635_s21 }
 0x2c4   : > { %20421 = vst [vmem:[#allocation48_spill] sm:$0xff] %v15046_v12  ;;  %v1531_v12 = vadd.f32 %v20427_v1, %v1232_v9  ;;  %v20433_v1 = vld [vmem:[#allocation59_spill] sm:$0xff] }
 0x2c5   : > { %3668 = vrot.lane.b32.xlu1 %v15036_v54, %s13634_s20  ;;  %v15054_v31 = vpop.permute.xlu0 %3983 }
 0x2c6   : > { %20424 = vst [vmem:[#allocation33_spill] sm:$0xff] %v15054_v31  ;;  %v1817_v8 = vadd.f32 %v20429_v0, %v1531_v12  ;;  %v3084_v31 = vadd.f32 %v14729_v17, %v3012_v33  ;;  %v2880_v33 = vpop.f32.mrf.mxu0 }
 0x2c7   : > { %v15058_v2 = vpop.permute.xlu1 %4390  ;;  %4031 = vrot.lane.b32.xlu0 %v15036_v54, %s13635_s21 }
 0x2c8   : > { %20426 = vst [vmem:[#allocation57_spill] sm:$0xff] %v15058_v2  ;;  %v2116_v60 = vadd.f32 %v20431_v45, %v1817_v8  ;;  %v3108_v30 = vmax.f32 %v3084_v31, 0.0 }
 0x2c9   : > { %4418 = vrot.lane.b32.xlu1 %v15036_v54, %s13636_s22  ;;  %v15065_v56 = vpop.permute.xlu0 %4370 }
 0x2ca   : > { %20428 = vst [vmem:[#allocation41_spill] sm:$0xff] %v15065_v56  ;;  %v2415_v22 = vadd.f32 %v20433_v1, %v2116_v60  ;;  %v15089_v0 = vmul.f32 %v14587_v4, %v3108_v30  ;;  %v20436_v1 = vld [vmem:[#allocation4_spill] sm:$0xff] }
 0x2cb   : > { %v15069_v40 = vpop.permute.xlu1 %5118  ;;  %5132 = vrot.lane.b32.xlu0 %v15021_v51, %s13637_s23 }
 0x2cc   : > { %20430 = vst [vmem:[#allocation49_spill] sm:$0xff] %v15069_v40  ;;  %v2714_v12 = vadd.f32 %v14583_v32, %v2415_v22  ;;  %20434 = vst [vmem:[#allocation11_spill] sm:$0xff] %v15089_v0  ;;  %v20437_v22 = vld [vmem:[#allocation19_spill] sm:$0xff] }
 0x2cd   : > { %4408 = vrot.lane.b32.xlu1 %v15021_v51, %s13636_s22  ;;  %v15076_v9 = vpop.permute.xlu0 %5094  ;;  %v831_v30 = vadd.f32 %v20437_v22, %v20436_v1  ;;  %v20443_v22 = vld [vmem:[#allocation43_spill] sm:$0xff] }
 0x2ce   : > { %20432 = vst [vmem:[#allocation58_spill] sm:$0xff] %v15076_v9  ;;  %v3013_v45 = vadd.f32 %v2880_v33, %v2714_v12  ;;  %v20439_v12 = vld [vmem:[#allocation27_spill] sm:$0xff] }
 0x2cf   : > { %v15079_v56 = vpop.permute.xlu1 %3281  ;;  %5529 = vrot.lane.b32.xlu0 %v15036_v54, %s13638_s24  ;;  %v1235_v40 = vadd.f32 %v20439_v12, %v831_v30  ;;  %v20446_v12 = vld [vmem:[#allocation51_spill] sm:$0xff] }
 0x2d0   : > { %v3085_v32 = vadd.f32 %v14729_v17, %v3013_v45  ;;  %v2884_v17 = vpop.f32.mrf.mxu0  ;;  %v20441_v45 = vld [vmem:[#allocation35_spill] sm:$0xff] }
 0x2d1   : > { %5142 = vrot.lane.b32.xlu1 %v15036_v54, %s13637_s23  ;;  %v15086_v8 = vpop.permute.xlu0 %3285  ;;  %v1534_v7 = vadd.f32 %v20441_v45, %v1235_v40  ;;  %v20448_v45 = vld [vmem:[#allocation60_spill] sm:$0xff] }
 0x2d2   : > { %v3109_v2 = vmax.f32 %v3085_v32, 0.0  ;;  %v3015_v32 = vadd.f32 %v2884_v17, %v14596_v52  ;;  %v2886_v52 = vpop.f32.mrf.mxu0 }
 0x2d3   : > { %v15091_v9 = vpop.permute.xlu1 %3287  ;;  %5519 = vrot.lane.b32.xlu0 %v15021_v51, %s13638_s24  ;;  %v1820_v35 = vadd.f32 %v20443_v22, %v1534_v7 }
 0x2d4   : > { %v15122_v50 = vmul.f32 %v14591_v53, %v3109_v2  ;;  %v3087_v7 = vadd.f32 %v14723_v29, %v3015_v32 }
 0x2d5   : > { %3309 = vrot.lane.b32.xlu1 %v15089_v0, %s13633_s19  ;;  %v15097_v31 = vpop.permute.xlu0 %3289  ;;  %v2119_v28 = vadd.f32 %v20446_v12, %v1820_v35 }
 0x2d6   : > { %20444 = vst [vmem:[#allocation50_spill] sm:$0xff] %v15122_v50  ;;  %v3111_v22 = vmax.f32 %v3087_v7, 0.0 }
 0x2d7   : > { %v15100_v60 = vpop.permute.xlu1 %3636  ;;  %4027 = vrot.lane.b32.xlu0 %v15089_v0, %s13635_s21  ;;  %v2418_v37 = vadd.f32 %v20448_v45, %v2119_v28 }
 0x2d8   : > { %20435 = vst [vmem:[#allocation18_spill] sm:$0xff] %v15100_v60  ;;  %v15154_v32 = vmul.f32 %v14587_v4, %v3111_v22  ;;  %v15199_v4 = vld [vmem:[%s20027_s2 + $0x40] sm:$0xff] }
 0x2d9   : > { %3664 = vrot.lane.b32.xlu1 %v15089_v0, %s13634_s20  ;;  %v15108_v33 = vpop.permute.xlu0 %3640  ;;  %v2717_v17 = vadd.f32 %v14624_v34, %v2418_v37  ;;  %12687 = vmatprep.mubr.msk.f32.mxu0 %vm3371_vm10, %v15199_v4 }
 0x2da   : > { %20438 = vst [vmem:[#allocation26_spill] sm:$0xff] %v15108_v33  ;;  %20453 = vst [vmem:[#allocation51_spill] sm:$0xff] %v15154_v32 }
 0x2db   : > { %v15111_v18 = vpop.permute.xlu1 %3642  ;;  %5138 = vrot.lane.b32.xlu0 %v15089_v0, %s13637_s23  ;;  %v3016_v12 = vadd.f32 %v2886_v52, %v2717_v17 }
 0x2dc   : > { %20440 = vst [vmem:[#allocation34_spill] sm:$0xff] %v15111_v18 }
 0x2dd   : > { %4414 = vrot.lane.b32.xlu1 %v15089_v0, %s13636_s22  ;;  %v15118_v1 = vpop.permute.xlu0 %3644  ;;  %v3088_v34 = vadd.f32 %v14723_v29, %v3016_v12 }
 0x2de   : > { %20442 = vst [vmem:[#allocation42_spill] sm:$0xff] %v15118_v1 }
 0x2df   : > { %v15125_v30 = vpop.permute.xlu1 %4005  ;;  %5525 = vrot.lane.b32.xlu0 %v15089_v0, %s13638_s24  ;;  %v3112_v7 = vmax.f32 %v3088_v34, 0.0 }
 0x2e0   : > { %20445 = vst [vmem:[#allocation59_spill] sm:$0xff] %v15125_v30 }
 0x2e1   : > { %4029 = vrot.lane.b32.xlu1 %v15122_v50, %s13635_s21  ;;  %v15132_v40 = vpop.permute.xlu0 %4003  ;;  %v15174_v17 = vmul.f32 %v14591_v53, %v3112_v7 }
 0x2e2   : > { %20447 = vst [vmem:[#allocation4_spill] sm:$0xff] %v15132_v40 }
 0x2e3   : > { %v15136_v2 = vpop.permute.xlu1 %4392  ;;  %3311 = vrot.lane.b32.xlu0 %v15122_v50, %s13633_s19 }
 0x2e4   : > { %20449 = vst [vmem:[#allocation19_spill] sm:$0xff] %v15136_v2 }
 0x2e5   : > { %5140 = vrot.lane.b32.xlu1 %v15122_v50, %s13637_s23  ;;  %v15143_v35 = vpop.permute.xlu0 %4394 }
 0x2e6   : > { %20450 = vst [vmem:[#allocation27_spill] sm:$0xff] %v15143_v35 }
 0x2e7   : > { %v15145_v40 = vpop.permute.xlu1 %4386  ;;  %3666 = vrot.lane.b32.xlu0 %v15122_v50, %s13634_s20 }
 0x2e8   : > { %20451 = vst [vmem:[#allocation35_spill] sm:$0xff] %v15145_v40 }
 0x2e9   : > { %5527 = vrot.lane.b32.xlu1 %v15122_v50, %s13638_s24  ;;  %v15151_v28 = vpop.permute.xlu0 %3999 }
 0x2ea   : > { %20452 = vst [vmem:[#allocation43_spill] sm:$0xff] %v15151_v28 }
 0x2eb   : > { %v15157_v37 = vpop.permute.xlu1 %5110  ;;  %4416 = vrot.lane.b32.xlu0 %v15122_v50, %s13636_s22 }
 0x2ec   : > { %20454 = vst [vmem:[#allocation60_spill] sm:$0xff] %v15157_v37 }
 0x2ed   : > { %4422 = vrot.lane.b32.xlu1 %v15154_v32, %s13636_s22  ;;  %v15163_v45 = vpop.permute.xlu0 %3293 }
 0x2ef   : > { %v15165_v52 = vpop.permute.xlu1 %3305  ;;  %3317 = vrot.lane.b32.xlu0 %v15154_v32, %s13633_s19 }
 0x2f1   : > { %5533 = vrot.lane.b32.xlu1 %v15154_v32, %s13638_s24  ;;  %v15171_v29 = vpop.permute.xlu0 %3648 }
 0x2f3   : > { %v15176_v22 = vpop.permute.xlu1 %3660  ;;  %5116 = vrot.lane.b32.xlu0 %v14790_v59, %s13637_s23 }
 0x2f5   : > { %3319 = vrot.lane.b32.xlu1 %v15174_v17, %s13633_s19  ;;  %v15182_v12 = vpop.permute.xlu0 %4410 }
 0x2f6   : > { %20455 = vst [vmem:[#allocation70_spill] sm:$0xff] %v15182_v12 }
 0x2f7   : > { %v15184_v34 = vpop.permute.xlu1 %4011  ;;  %3672 = vrot.lane.b32.xlu0 %v15154_v32, %s13634_s20 }
 0x2f8   : > { %20456 = vst [vmem:[#allocation71_spill] sm:$0xff] %v15184_v34 }
 0x2f9   : > { %5511 = vrot.lane.b32.xlu1 %v14903_v48, %s13638_s24  ;;  %v15190_v7 = vpop.permute.xlu0 %4398 }
 0x2fa   : > { %20457 = vst [vmem:[#allocation72_spill] sm:$0xff] %v15190_v7 }
 0x2fb   : > { %v15192_v53 = vpop.permute.xlu1 %4023  ;;  %4035 = vrot.lane.b32.xlu0 %v15154_v32, %s13635_s21 }
 0x2fc   : > { %20458 = vst [vmem:[#allocation73_spill] sm:$0xff] %v15192_v53 }
 0x2fd   : > { %5114 = vrot.lane.b32.xlu1 %v14763_v58, %s13637_s23  ;;  %v15203_v37 = vpop.permute.xlu0 %5134 }
 0x2fe   : > { %20459 = vst [vmem:[#allocation74_spill] sm:$0xff] %v15203_v37 }
 0x2ff   : > { %v15207_v40 = vpop.permute.xlu1 %5521  ;;  %5146 = vrot.lane.b32.xlu0 %v15154_v32, %s13637_s23 }
 0x300   : > { %20460 = vst [vmem:[#allocation75_spill] sm:$0xff] %v15207_v40 }
 0x301   : > { %5108 = vrot.lane.b32.xlu1 %v14708_v27, %s13637_s23  ;;  %v15213_v35 = vpop.permute.xlu0 %5122 }
 0x302   : > { %20461 = vst [vmem:[#allocation76_spill] sm:$0xff] %v15213_v35 }
 0x303   : > { %v15215_v2 = vpop.permute.xlu1 %3295  ;;  %5513 = vrot.lane.b32.xlu0 %v14910_v62, %s13638_s24 }
 0x305   : > { %5505 = vrot.lane.b32.xlu1 %v14751_v16, %s13638_s24  ;;  %v15221_v37 = vpop.permute.xlu0 %3297 }
 0x307   : > { %v15223_v7 = vpop.permute.xlu1 %3650  ;;  %5509 = vrot.lane.b32.xlu0 %v14846_v61, %s13638_s24 }
 0x309   : > { %5501 = vrot.lane.b32.xlu1 %v14763_v58, %s13638_s24  ;;  %v15229_v40 = vpop.permute.xlu0 %3652 }
 0x30b   : > { %v15231_v35 = vpop.permute.xlu1 %4402  ;;  %5503 = vrot.lane.b32.xlu0 %v14790_v59, %s13638_s24 }
 0x30c   : > { %20462 = vst [vmem:[#allocation77_spill] sm:$0xff] %v15231_v35 }
 0x30d   : > { %5495 = vrot.lane.b32.xlu1 %v14708_v27, %s13638_s24  ;;  %v15237_v12 = vpop.permute.xlu0 %4013 }
 0x30e   : > { %20463 = vst [vmem:[#allocation78_spill] sm:$0xff] %v15237_v12 }
 0x30f   : > { %v15239_v28 = vpop.permute.xlu1 %5124  ;;  %5106 = vrot.lane.b32.xlu0 %v14676_v15, %s13637_s23 }
 0x310   : > { %20464 = vst [vmem:[#allocation79_spill] sm:$0xff] %v15239_v28 }
 0x311   : > { %5098 = vrot.lane.b32.xlu1 %v14627_v23, %s13637_s23  ;;  %v15245_v30 = vpop.permute.xlu0 %4015 }
 0x312   : > { %20465 = vst [vmem:[#allocation80_spill] sm:$0xff] %v15245_v30 }
 0x313   : > { %v15247_v34 = vpop.permute.xlu1 %3301  ;;  %5100 = vrot.lane.b32.xlu0 %v14642_v49, %s13637_s23 }
 0x315   : > { %3674 = vrot.lane.b32.xlu1 %v15174_v17, %s13634_s20  ;;  %v15253_v35 = vpop.permute.xlu0 %4400 }
 0x316   : > { %20466 = vst [vmem:[#allocation81_spill] sm:$0xff] %v15253_v35 }
 0x317   : > { %v15255_v12 = vpop.permute.xlu1 %3656  ;;  %5497 = vrot.lane.b32.xlu0 %v14779_v24, %s13638_s24 }
 0x319   : > { %5092 = vrot.lane.b32.xlu1 %v14606_v11, %s13637_s23  ;;  %v15261_v28 = vpop.permute.xlu0 %5126 }
 0x31a   : > { %20467 = vst [vmem:[#allocation82_spill] sm:$0xff] %v15261_v28 }
 0x31b   : > { %v15263_v30 = vpop.permute.xlu1 %4019  ;;  %5493 = vrot.lane.b32.xlu0 %v14676_v15, %s13638_s24 }
 0x31c   : > { %20468 = vst [vmem:[#allocation83_spill] sm:$0xff] %v15263_v30 }
 0x31d   : > { %5489 = vrot.lane.b32.xlu1 %v14682_v44, %s13638_s24  ;;  %v15269_v53 = vpop.permute.xlu0 %3321 }
 0x31f   : > { %v15271_v35 = vpop.permute.xlu1 %4039  ;;  %5487 = vrot.lane.b32.xlu0 %v14642_v49, %s13638_s24 }
 0x320   : > { %20469 = vst [vmem:[#allocation84_spill] sm:$0xff] %v15271_v35 }
 0x321   : > { %5485 = vrot.lane.b32.xlu1 %v14627_v23, %s13638_s24  ;;  %v15277_v60 = vpop.permute.xlu0 %3676 }
 0x323   : > { %v15279_v28 = vpop.permute.xlu1 %5150  ;;  %5090 = vrot.lane.b32.xlu0 %v14601_v43, %s13637_s23 }
 0x324   : > { %20470 = vst [vmem:[#allocation85_spill] sm:$0xff] %v15279_v28  ;;  %v20475_v28 = vmov 0.0  }
 0x325   : > { %4037 = vrot.lane.b32.xlu1 %v15174_v17, %s13635_s21  ;;  %v15285_v30 = vpop.permute.xlu0 %4426 }
 0x326   : > { %20471 = vst [vmem:[#allocation86_spill] sm:$0xff] %v15285_v30 }
 0x327   : > { %v15287_v19 = vpop.permute.xlu1 %5537  ;;  %5479 = vrot.lane.b32.xlu0 %v14606_v11, %s13638_s24 }
 0x328   : > { %20472 = vst [vmem:[#allocation87_spill] sm:$0xff] %v15287_v19 }
 0x329   : > { %5481 = vrot.lane.b32.xlu1 %v14697_v41, %s13638_s24  ;;  %v15293_v35 = vpop.permute.xlu0 %4406 }
 0x32a   : > { %20473 = vst [vmem:[#allocation88_spill] sm:$0xff] %v15293_v35 }
 0x32b   : > { %v15295_v21 = vpop.permute.xlu1 %5130  ;;  %5477 = vrot.lane.b32.xlu0 %v14601_v43, %s13638_s24 }
 0x32c   : > { %20474 = vst [vmem:[#allocation89_spill] sm:$0xff] %v15295_v21 }
 0x32d   : > { %13346 = vrot.lane.b32.xlu1 %v20475_v28, %s13638_s24  ;;  %v15301_v1 = vpop.permute.xlu0 %3303 }
 0x32f   : > { %v15303_v30 = vpop.permute.xlu1 %5517  ;;  %5924 = vrot.lane.b32.xlu0 %v14979_v57, %s13639_s25 }
 0x330   : > { %20476 = vst [vmem:[#allocation90_spill] sm:$0xff] %v15303_v30 }
 0x331   : > { %13351 = vrot.lane.b32.xlu1 %v20475_v28, %s13639_s25  ;;  %v15309_v19 = vpop.permute.xlu0 %3658 }
 0x333   : > { %v15311_v35 = vpop.permute.xlu1 %3313  ;;  %13356 = vrot.lane.b32.xlu0 %v20475_v28, %s13638_s24 }
 0x335   : > { %5916 = vrot.lane.b32.xlu1 %v15036_v54, %s13639_s25  ;;  %v15317_v21 = vpop.permute.xlu0 %4021 }
 0x336   : > { %20477 = vst [vmem:[#allocation91_spill] sm:$0xff] %v15317_v21 }
 0x337   : > { %v15319_v43 = vpop.permute.xlu1 %3668  ;;  %5908 = vrot.lane.b32.xlu0 %v14855_v20, %s13639_s25 }
 0x339   : > { %13361 = vrot.lane.b32.xlu1 %v20475_v28, %s13639_s25  ;;  %v15325_v30 = vpop.permute.xlu0 %4031 }
 0x33a   : > { %20478 = vst [vmem:[#allocation92_spill] sm:$0xff] %v15325_v30 }
 0x33b   : > { %v15327_v33 = vpop.permute.xlu1 %4418  ;;  %13366 = vrot.lane.b32.xlu0 %v20475_v28, %s13638_s24 }
 0x33c   : > { %20479 = vst [vmem:[#allocation93_spill] sm:$0xff] %v15327_v33 }
 0x33d   : > { %5900 = vrot.lane.b32.xlu1 %v14910_v62, %s13639_s25  ;;  %v15333_v18 = vpop.permute.xlu0 %5132 }
 0x33e   : > { %20480 = vst [vmem:[#allocation94_spill] sm:$0xff] %v15333_v18 }
 0x33f   : > { %v15335_v21 = vpop.permute.xlu1 %4408  ;;  %5892 = vrot.lane.b32.xlu0 %v14751_v16, %s13639_s25 }
 0x340   : > { %20481 = vst [vmem:[#allocation95_spill] sm:$0xff] %v15335_v21 }
 0x341   : > { %13371 = vrot.lane.b32.xlu1 %v20475_v28, %s13639_s25  ;;  %v15341_v11 = vpop.permute.xlu0 %5529 }
 0x342   : > { %20482 = vst [vmem:[#allocation96_spill] sm:$0xff] %v15341_v11 }
 0x343   : > { %v15343_v30 = vpop.permute.xlu1 %5142  ;;  %13376 = vrot.lane.b32.xlu0 %v20475_v28, %s13638_s24 }
 0x344   : > { %20483 = vst [vmem:[#allocation97_spill] sm:$0xff] %v15343_v30 }
 0x345   : > { %4424 = vrot.lane.b32.xlu1 %v15174_v17, %s13636_s22  ;;  %v15349_v33 = vpop.permute.xlu0 %5519 }
 0x346   : > { %20484 = vst [vmem:[#allocation98_spill] sm:$0xff] %v15349_v33 }
 0x347   : > { %v3310_v18 = vpop.permute.xlu1 %3309  ;;  %5876 = vrot.lane.b32.xlu0 %v14682_v44, %s13639_s25 }
 0x349   : > { %5884 = vrot.lane.b32.xlu1 %v14779_v24, %s13639_s25  ;;  %v15355_v21 = vpop.permute.xlu0 %4027 }
 0x34a   : > { %20485 = vst [vmem:[#allocation99_spill] sm:$0xff] %v15355_v21 }
 0x34b   : > { %v15357_v11 = vpop.permute.xlu1 %3664  ;;  %5868 = vrot.lane.b32.xlu0 %v14697_v41, %s13639_s25 }
 0x34d   : > { %13381 = vrot.lane.b32.xlu1 %v20475_v28, %s13639_s25  ;;  %v15363_v30 = vpop.permute.xlu0 %5138 }
 0x34e   : > { %20486 = vst [vmem:[#allocation100_spill] sm:$0xff] %v15363_v30 }
 0x34f   : > { %v15365_v33 = vpop.permute.xlu1 %4414  ;;  %5920 = vrot.lane.b32.xlu0 %v15154_v32, %s13639_s25 }
 0x350   : > { %20487 = vst [vmem:[#allocation101_spill] sm:$0xff] %v15365_v33 }
 0x351   : > { %5914 = vrot.lane.b32.xlu1 %v15122_v50, %s13639_s25  ;;  %v15371_v44 = vpop.permute.xlu0 %5525 }
 0x352   : > { %20488 = vst [vmem:[#allocation102_spill] sm:$0xff] %v15371_v44 }
 0x353   : > { %v15373_v21 = vpop.permute.xlu1 %4029  ;;  %5912 = vrot.lane.b32.xlu0 %v15089_v0, %s13639_s25 }
 0x354   : > { %20489 = vst [vmem:[#allocation103_spill] sm:$0xff] %v15373_v21 }
 0x355   : > { %6311 = vrot.lane.b32.xlu1 %v14979_v57, %s13640_s26  ;;  %v3312_v41 = vpop.permute.xlu0 %3311 }
 0x357   : > { %v15379_v30 = vpop.permute.xlu1 %5140  ;;  %5906 = vrot.lane.b32.xlu0 %v15021_v51, %s13639_s25 }
 0x358   : > { %20490 = vst [vmem:[#allocation104_spill] sm:$0xff] %v15379_v30 }
 0x359   : > { %6307 = vrot.lane.b32.xlu1 %v15154_v32, %s13640_s26  ;;  %v15385_v33 = vpop.permute.xlu0 %3666 }
 0x35b   : > { %v15387_v44 = vpop.permute.xlu1 %5527  ;;  %6303 = vrot.lane.b32.xlu0 %v15036_v54, %s13640_s26  ;;  %v13264_v54 = vunpack.i.h.bf16 %v14755_v3 }
 0x35c   : > { %20491 = vst [vmem:[#allocation105_spill] sm:$0xff] %v15387_v44 }
 0x35d   : > { %6301 = vrot.lane.b32.xlu1 %v15122_v50, %s13640_s26  ;;  %v15393_v57 = vpop.permute.xlu0 %4416 }
 0x35e   : > { %20492 = vst [vmem:[#allocation106_spill] sm:$0xff] %v15393_v57 }
 0x35f   : > { %v15395_v21 = vpop.permute.xlu1 %4422  ;;  %6299 = vrot.lane.b32.xlu0 %v15089_v0, %s13640_s26 }
 0x360   : > { %20493 = vst [vmem:[#allocation107_spill] sm:$0xff] %v15395_v21 }
 0x361   : > { %5904 = vrot.lane.b32.xlu1 %v14946_v42, %s13639_s25  ;;  %v3318_v30 = vpop.permute.xlu0 %3317 }
 0x363   : > { %v15401_v32 = vpop.permute.xlu1 %5533  ;;  %6293 = vrot.lane.b32.xlu0 %v15021_v51, %s13640_s26  ;;  %v3344_v51 = vsel %vm424_vm0, %v13264_v54, %v3318_v30  ;;  %v13259_v54 = vunpack.i.h.bf16 %v14760_v5 }
 0x364   : > { %20494 = vst [vmem:[#allocation108_spill] sm:$0xff] %v15401_v32 }
 0x365   : > { %5898 = vrot.lane.b32.xlu1 %v14903_v48, %s13639_s25  ;;  %v15407_v44 = vpop.permute.xlu0 %5116 }
 0x366   : > { %20495 = vst [vmem:[#allocation109_spill] sm:$0xff] %v15407_v44  ;;  %v13263_v44 = vunpack.i.l.bf16 %v14755_v3  ;;  %v3340_v3 = vsel %vm424_vm0, %v15301_v1, %v15165_v52  ;;  %v13254_v52 = vunpack.i.h.bf16 %v14737_v63 }
 0x367   : > { %v3320_v50 = vpop.permute.xlu1 %3319  ;;  %5896 = vrot.lane.b32.xlu0 %v14846_v61, %s13639_s25 }
 0x368   : > { %v3345_v0 = vsel %vm424_vm0, %v3318_v30, %v3320_v50  ;;  %v3346_v57 = vsel %vm424_vm0, %v3320_v50, %v15269_v53  ;;  %v3342_v53 = vsel %vm424_vm0, %v3310_v18, %v3312_v41  ;;  %v3343_v50 = vsel %vm424_vm0, %v3312_v41, %v15311_v35 }
 0x369   : > { %6295 = vrot.lane.b32.xlu1 %v14855_v20, %s13640_s26  ;;  %3412 = vmatprep.subr.mxu1 %v3345_v0  ;;  %v15417_v32 = vpop.permute.xlu0 %3672  ;;  %v3341_v0 = vsel %vm424_vm0, %v13263_v44, %v3310_v18  ;;  %v3339_v41 = vsel %vm424_vm0, %v15247_v34, %v15301_v1  ;;  %v13258_v44 = vunpack.i.l.bf16 %v14760_v5  ;;  %v3338_v18 = vsel %vm424_vm0, %v13259_v54, %v15247_v34 }
 0x36a   : > { %12671 = vmatprep.subr.mxu0 %v3346_v57  ;;  %3413 = vmatpush1.msra.mxu1 %v3344_v51  ;;  %v3336_v30 = vsel %vm424_vm0, %v15163_v45, %v15215_v2  ;;  %v3337_v1 = vsel %vm424_vm0, %v15215_v2, %v15221_v37  ;;  %v3334_v34 = vsel %vm424_vm0, %v15091_v9, %v15097_v31 }
 0x36b   : > { %12672 = vmatpush3.msra.mxu0 %v3346_v57  ;;  %v15421_v21 = vpop.permute.xlu1 %5511  ;;  %5890 = vrot.lane.b32.xlu0 %v14790_v59, %s13639_s25  ;;  %v3335_v5 = vsel %vm424_vm0, %v13258_v44, %v15163_v45  ;;  %v3333_v2 = vsel %vm424_vm0, %v15086_v8, %v15091_v9  ;;  %v13253_v45 = vunpack.i.l.bf16 %v14737_v63  ;;  %v3330_v31 = vsel %vm424_vm0, %v14987_v39, %v15013_v25  ;;  %v11830_v44 = vld [vmem:[%s20027_s2 + $0x58] sm:$0xff] }
 0x36c   : > { %3414 = vmatprep.subr.mxu1 %v3342_v53  ;;  %12673 = vmatprep.subr.mxu0 %v3343_v50  ;;  %v3332_v53 = vsel %vm424_vm0, %v13254_v52, %v15086_v8  ;;  %v3331_v9 = vsel %vm424_vm0, %v15013_v25, %v15079_v56  ;;  %v13249_v8 = vunpack.i.h.bf16 %v14743_v36  ;;  %v3327_v25 = vsel %vm424_vm0, %v14926_v14, %v14932_v46 }
 0x36d   : > { %3415 = vmatpush1.msra.mxu1 %v3341_v0  ;;  %12674 = vmatpush3.msra.mxu0 %v3343_v50  ;;  %v15433_v57 = vpop.permute.xlu0 %4035  ;;  %v3329_v63 = vsel %vm424_vm0, %v13253_v45, %v14987_v39  ;;  %v3328_v0 = vsel %vm424_vm0, %v14932_v46, %v14972_v47  ;;  %v13248_v39 = vunpack.i.l.bf16 %v14743_v36  ;;  %v3324_v47 = vsel %vm424_vm0, %v14882_v38, %v14885_v13 }
 0x36e   : > { %6291 = vrot.lane.b32.xlu1 %v14946_v42, %s13640_s26  ;;  %12675 = vmatprep.subr.mxu0 %v3340_v3  ;;  %v3326_v56 = vsel %vm424_vm0, %v13249_v8, %v14926_v14  ;;  %v3325_v46 = vsel %vm424_vm0, %v14885_v13, %v15005_v26  ;;  %v11829_v26 = vld [vmem:[%s20027_s2 + $0x50] sm:$0xff]  ;;  %v3697_v8 = vsel %vm686_vm3, %v15357_v11, %v15385_v33 }
 0x36f   : > { %3416 = vmatprep.subr.mxu1 %v3339_v41  ;;  %12676 = vmatpush3.msra.mxu0 %v3340_v3  ;;  %v15443_v51 = vpop.permute.xlu1 %5114  ;;  %v3323_v36 = vsel %vm424_vm0, %v13248_v39, %v14882_v38  ;;  %v11828_v38 = vld [vmem:[%s20027_s2 + $0x48] sm:$0xff]  ;;  %v13279_v39 = vunpack.i.h.bf16 %v14787_v6 }
 0x370   : > { %3417 = vmatpush1.msra.mxu1 %v3338_v18  ;;  %6287 = vrot.lane.b32.xlu0 %v14910_v62, %s13640_s26 }
 0x371   : > { %3418 = vmatprep.subr.mxu1 %v3336_v30  ;;  %12677 = vmatprep.subr.mxu0 %v3337_v1  ;;  %v15455_v35 = vpop.permute.xlu0 %5146  ;;  %v11831_v30 = vld [vmem:[%s20027_s2 + $0x60] sm:$0xff] }
 0x372   : > { %3419 = vmatpush1.msra.mxu1 %v3335_v5  ;;  %12678 = vmatpush3.msra.mxu0 %v3337_v1  ;;  %v11832_v5 = vld [vmem:[%s20027_s2 + $0x68] sm:$0xff] }
 0x373   : > { %6285 = vrot.lane.b32.xlu1 %v14903_v48, %s13640_s26  ;;  %12679 = vmatprep.subr.mxu0 %v3334_v34  ;;  %v15466_v37 = vpop.permute.xlu1 %5108 }
 0x374   : > { %3420 = vmatprep.subr.mxu1 %v3333_v2  ;;  %12680 = vmatpush3.msra.mxu0 %v3334_v34  ;;  %v11833_v34 = vld [vmem:[%s20027_s2 + $0x70] sm:$0xff] }
 0x375   : > { %3421 = vmatpush1.msra.mxu1 %v3332_v53  ;;  %6283 = vrot.lane.b32.xlu0 %v14846_v61, %s13640_s26  ;;  %v15479_v50 = vpop.permute.xlu0 %5513  ;;  %v13284_v53 = vunpack.i.h.bf16 %v14783_v10 }
 0x376   : > { %3422 = vmatprep.subr.mxu1 %v3330_v31  ;;  %12681 = vmatprep.subr.mxu0 %v3331_v9 }
 0x377   : > { %3423 = vmatpush1.msra.mxu1 %v3329_v63  ;;  %12682 = vmatpush3.msra.mxu0 %v3331_v9  ;;  %v15487_v54 = vpop.permute.xlu1 %5505  ;;  %v13283_v63 = vunpack.i.l.bf16 %v14783_v10 }
 0x378   : > { %5888 = vrot.lane.b32.xlu1 %v14763_v58, %s13639_s25  ;;  %12683 = vmatprep.subr.mxu0 %v3328_v0 }
 0x379   : > { %3424 = vmatprep.subr.mxu1 %v3327_v25  ;;  %12684 = vmatpush3.msra.mxu0 %v3328_v0  ;;  %v15497_v3 = vpop.permute.xlu0 %5509  ;;  %v3696_v10 = vsel %vm686_vm3, %v13283_v63, %v15357_v11  ;;  %v20503_v63 = vld [vmem:[#allocation18_spill] sm:$0xff] }
 0x37a   : > { %3425 = vmatpush1.msra.mxu1 %v3326_v56  ;;  %6277 = vrot.lane.b32.xlu0 %v14790_v59, %s13640_s26  ;;  %v3693_v56 = vsel %vm686_vm3, %v13279_v39, %v15255_v12  ;;  %v20504_v39 = vld [vmem:[#allocation5_spill] sm:$0xff] }
 0x37b   : > { %3426 = vmatprep.subr.mxu1 %v3324_v47  ;;  %12685 = vmatprep.subr.mxu0 %v3325_v46  ;;  %v15509_v14 = vpop.permute.xlu1 %5501  ;;  %v13278_v47 = vunpack.i.l.bf16 %v14787_v6 }
 0x37c   : > { %3427 = vmatpush1.msra.mxu1 %v3323_v36  ;;  %12686 = vmatpush3.msra.mxu0 %v3325_v46  ;;  %v3691_v46 = vsel %vm686_vm3, %v15171_v29, %v15223_v7 }
 0x37d   : > { %5882 = vrot.lane.b32.xlu1 %v14708_v27, %s13639_s25  ;;  %11835 = vmatmul.mubr.msk.f32.vlgmr.msra.gmra.mxu1 %vm3371_vm10, %v15199_v4  ;;  %v15515_v41 = vpop.permute.xlu0 %5503  ;;  %v3690_v6 = vsel %vm686_vm3, %v13278_v47, %v15171_v29  ;;  %v20507_v47 = vld [vmem:[#allocation15_spill] sm:$0xff] }
 0x37e   : > { %5880 = vrot.lane.b32.xlu0 %v14676_v15, %s13639_s25  ;;  %3466 = vmatprep.mubr.f32.mxu1 %v20475_v28 }
 0x37f   : > { %v15523_v13 = vpop.permute.xlu1 %5495  ;;  %12688 = vmatmul.mubr.msk.f32.vlgmr.msra.gmra.mxu0 %vm3371_vm10, %v11828_v38 }
 0x380   : > { %12690 = vmatprep.mubr.msk.f32.mxu0 %vm3371_vm10, %v11829_v26 }
 0x381   : > { %6279 = vrot.lane.b32.xlu1 %v14751_v16, %s13640_s26  ;;  %11836 = vmatmul.mubr.msk.f32.gmra.mxu1 %vm3371_vm10, %v11828_v38  ;;  %v15533_v4 = vpop.permute.xlu0 %5106  ;;  %v20496_v38 = vld [vmem:[#allocation67_spill] sm:$0xff] }
 0x382   : > { %5535 = vrot.lane.b32.xlu0 %v15174_v17, %s13638_s24  ;;  %3472 = vmatprep.mubr.f32.mxu1 %v20475_v28 }
 0x383   : > { %v15541_v18 = vpop.permute.xlu1 %5098  ;;  %12691 = vmatmul.mubr.msk.f32.gmra.mxu0 %vm3371_vm10, %v11830_v44 }
 0x384   : > { %12693 = vmatprep.mubr.msk.f32.mxu0 %vm3371_vm10, %v11831_v30 }
 0x385   : > { %5148 = vrot.lane.b32.xlu1 %v15174_v17, %s13637_s23  ;;  %11837 = vmatmul.mubr.msk.f32.gmra.mxu1 %vm3371_vm10, %v11829_v26  ;;  %v15551_v1 = vpop.permute.xlu0 %5100  ;;  %v20497_v26 = vld [vmem:[#allocation34_spill] sm:$0xff] }
 0x386   : > { %5874 = vrot.lane.b32.xlu0 %v14642_v49, %s13639_s25  ;;  %3478 = vmatprep.mubr.f32.mxu1 %v20475_v28 }
 0x387   : > { %v3675_v52 = vpop.permute.xlu1 %3674  ;;  %12694 = vmatmul.mubr.msk.f32.gmra.mxu0 %vm3371_vm10, %v11832_v5 }
 0x388   : > { %v3700_v2 = vsel %vm686_vm3, %v15417_v32, %v3675_v52  ;;  %v3701_v45 = vsel %vm686_vm3, %v3675_v52, %v15277_v60  ;;  %12696 = vmatprep.mubr.msk.f32.mxu0 %vm3371_vm10, %v11833_v34  ;;  %v3699_v60 = vsel %vm686_vm3, %v13284_v53, %v15417_v32  ;;  %v3698_v32 = vsel %vm686_vm3, %v15385_v33, %v15319_v43 }
 0x389   : > { %6275 = vrot.lane.b32.xlu1 %v14763_v58, %s13640_s26  ;;  %11838 = vmatmul.mubr.msk.f32.gmra.mxu1 %vm3371_vm10, %v11830_v44  ;;  %v15572_v31 = vpop.permute.xlu0 %5497  ;;  %v3694_v43 = vsel %vm686_vm3, %v15255_v12, %v15309_v19  ;;  %v3695_v33 = vsel %vm686_vm3, %v15309_v19, %v15176_v22  ;;  %v3692_v19 = vsel %vm686_vm3, %v15223_v7, %v15229_v40  ;;  %v13274_v12 = vunpack.i.h.bf16 %v14770_v55  ;;  %v20498_v44 = vld [vmem:[#allocation26_spill] sm:$0xff] }
 0x38a   : > { %6271 = vrot.lane.b32.xlu0 %v14779_v24, %s13640_s26  ;;  %3484 = vmatprep.mubr.f32.mxu1 %v20475_v28  ;;  %v3688_v40 = vsel %vm686_vm3, %v20498_v44, %v20497_v26  ;;  %v20499_v7 = vld [vmem:[#allocation42_spill] sm:$0xff]  ;;  %v13273_v52 = vunpack.i.l.bf16 %v14770_v55  ;;  %v11834_v55 = vld [vmem:[%s20027_s2 + $0x78] sm:$0xff] }
 0x38b   : > { %3766 = vmatprep.subr.mxu0 %v3700_v2  ;;  %12699 = vmatprep.subr.mxu1 %v3701_v45  ;;  %v15579_v9 = vpop.permute.xlu1 %5092  ;;  %v20500_v2 = vld [vmem:[#allocation9_spill] sm:$0xff] }
 0x38c   : > { %3767 = vmatpush1.msra.mxu0 %v3699_v60  ;;  %12700 = vmatpush3.msra.mxu1 %v3701_v45  ;;  %v20502_v60 = vld [vmem:[#allocation66_spill] sm:$0xff] }
 0x38d   : > { %6269 = vrot.lane.b32.xlu1 %v14708_v27, %s13640_s26  ;;  %11839 = vmatmul.mubr.msk.f32.gmra.mxu1 %vm3371_vm10, %v11831_v30  ;;  %v15588_v0 = vpop.permute.xlu0 %5493  ;;  %v3689_v30 = vsel %vm686_vm3, %v20497_v26, %v20499_v7  ;;  %v20510_v7 = vld [vmem:[#allocation44_spill] sm:$0xff] }
 0x38e   : > { %6267 = vrot.lane.b32.xlu0 %v14676_v15, %s13640_s26  ;;  %3768 = vmatprep.subr.mxu0 %v3697_v8  ;;  %v3686_v8 = vsel %vm686_vm3, %v20500_v2, %v20503_v63 }
 0x38f   : > { %12701 = vmatprep.subr.mxu1 %v3698_v32  ;;  %3490 = vmatprep.mubr.f32.mxu1 %v20475_v28  ;;  %v15598_v25 = vpop.permute.xlu1 %5489 }
 0x390   : > { %3769 = vmatpush1.msra.mxu0 %v3696_v10  ;;  %12702 = vmatpush3.msra.mxu1 %v3698_v32 }
 0x391   : > { %5872 = vrot.lane.b32.xlu1 %v14627_v23, %s13639_s25  ;;  %11840 = vmatmul.mubr.msk.f32.gmra.mxu1 %vm3371_vm10, %v11832_v5  ;;  %v15610_v11 = vpop.permute.xlu0 %5487  ;;  %v3687_v5 = vsel %vm686_vm3, %v13274_v12, %v20498_v44  ;;  %v13268_v44 = vunpack.i.l.bf16 %v20504_v39 }
 0x392   : > { %3770 = vmatprep.subr.mxu0 %v3694_v43  ;;  %12703 = vmatprep.subr.mxu1 %v3695_v33  ;;  %v13269_v43 = vunpack.i.h.bf16 %v20504_v39 }
 0x393   : > { %3771 = vmatpush1.msra.mxu0 %v3693_v56  ;;  %12704 = vmatpush3.msra.mxu1 %v3695_v33  ;;  %v15618_v36 = vpop.permute.xlu1 %5485  ;;  %v20505_v33 = vld [vmem:[#allocation61_spill] sm:$0xff]  ;;  %v20506_v56 = vld [vmem:[#allocation22_spill] sm:$0xff] }
 0x394   : > { %6261 = vrot.lane.b32.xlu0 %v14642_v49, %s13640_s26  ;;  %3772 = vmatprep.subr.mxu0 %v3691_v46  ;;  %v3682_v46 = vsel %vm686_vm3, %v20507_v47, %v20506_v56  ;;  %v3681_v26 = vsel %vm686_vm3, %v13269_v43, %v20507_v47  ;;  %v20515_v43 = vld [vmem:[#allocation84_spill] sm:$0xff] }
 0x395   : > { %12705 = vmatprep.subr.mxu1 %v3692_v19  ;;  %3496 = vmatprep.mubr.f32.mxu1 %v20475_v28  ;;  %v15628_v22 = vpop.permute.xlu0 %5090 }
 0x396   : > { %3773 = vmatpush1.msra.mxu0 %v3690_v6  ;;  %12706 = vmatpush3.msra.mxu1 %v3692_v19  ;;  %v20509_v6 = vld [vmem:[#allocation55_spill] sm:$0xff] }
 0x397   : > { %5866 = vrot.lane.b32.xlu1 %v20496_v38, %s13639_s25  ;;  %11841 = vmatmul.mubr.msk.f32.gmra.mxu1 %vm3371_vm10, %v11833_v34  ;;  %v4038_v29 = vpop.permute.xlu1 %4037  ;;  %v20501_v34 = vld [vmem:[#allocation56_spill] sm:$0xff]  ;;  %v3683_v12 = vsel %vm686_vm3, %v20506_v56, %v20509_v6 }
 0x398   : > { %3774 = vmatprep.subr.mxu0 %v3688_v40  ;;  %12707 = vmatprep.subr.mxu1 %v3689_v30  ;;  %v3685_v45 = vsel %vm686_vm3, %v20501_v34, %v20500_v2  ;;  %v3684_v32 = vsel %vm686_vm3, %v13273_v52, %v20501_v34  ;;  %v20512_v52 = vld [vmem:[#allocation24_spill] sm:$0xff]  ;;  %v4064_v56 = vsel %vm961_vm4, %v4038_v29, %v20515_v43  ;;  %v20523_v43 = vld [vmem:[#allocation91_spill] sm:$0xff] }
 0x399   : > { %3775 = vmatpush1.msra.mxu0 %v3687_v5  ;;  %12708 = vmatpush3.msra.mxu1 %v3689_v30  ;;  %v15646_v53 = vpop.permute.xlu0 %5479  ;;  %v20511_v30 = vld [vmem:[#allocation54_spill] sm:$0xff]  ;;  %v3680_v2 = vsel %vm686_vm3, %v20510_v7, %v20512_v52  ;;  %v3210_v34 = vld [vmem:[%s20027_s2] sm:$0xff] }
 0x39a   : > { %5864 = vrot.lane.b32.xlu0 %v20502_v60, %s13639_s25  ;;  %3776 = vmatprep.subr.mxu0 %v3685_v45  ;;  %v3679_v5 = vsel %vm686_vm3, %v20511_v30, %v20510_v7  ;;  %v3678_v45 = vsel %vm686_vm3, %v13268_v44, %v20511_v30  ;;  %v20517_v44 = vld [vmem:[#allocation103_spill] sm:$0xff] }
 0x39b   : > { %12709 = vmatprep.subr.mxu1 %v3686_v8  ;;  %3502 = vmatprep.mubr.f32.mxu1 %v20475_v28  ;;  %v15659_v10 = vpop.permute.xlu1 %5481  ;;  %v20518_v7 = vld [vmem:[#allocation99_spill] sm:$0xff] }
 0x39c   : > { %3777 = vmatpush1.msra.mxu0 %v3684_v32  ;;  %12710 = vmatpush3.msra.mxu1 %v3686_v8  ;;  %v3211_v8 = vld [vmem:[%s20027_s2 + $0x8] sm:$0xff]  ;;  %v4060_v30 = vsel %vm961_vm4, %v20518_v7, %v20517_v44 }
 0x39d   : > { %6263 = vrot.lane.b32.xlu1 %v20505_v33, %s13640_s26  ;;  %12697 = vmatmul.mubr.msk.f32.gmra.mxu0 %vm3371_vm10, %v11834_v55  ;;  %v15668_v19 = vpop.permute.xlu0 %5477  ;;  %v20514_v32 = vld [vmem:[#allocation21_spill] sm:$0xff] }
 0x39e   : > { %20508 = vst [vmem:[#allocation67_spill] sm:$0xff] %v15668_v19  ;;  %11842 = vmatmul.mubr.msk.f32.gmra.mxu1 %vm3371_vm10, %v11834_v55  ;;  %3778 = vmatprep.subr.mxu0 %v3682_v46  ;;  %v4063_v55 = vsel %vm961_vm4, %v15433_v57, %v4038_v29  ;;  %v13289_v39 = vunpack.i.h.bf16 %v20514_v32  ;;  %v3212_v29 = vld [vmem:[%s20027_s2 + $0x10] sm:$0xff] }
 0x39f   : > { %12711 = vmatprep.subr.mxu1 %v3683_v12  ;;  %3779 = vmatpush1.msra.mxu0 %v3681_v26  ;;  %v15677_v40 = vpop.permute.xlu1 %13346 }
 0x3a0   : > { %12712 = vmatpush3.msra.mxu1 %v3683_v12  ;;  %6253 = vrot.lane.b32.xlu0 %v20496_v38, %s13640_s26  ;;  %v4062_v46 = vsel %vm961_vm4, %v13289_v39, %v15433_v57  ;;  %v20516_v12 = vld [vmem:[#allocation13_spill] sm:$0xff] }
 0x3a1   : > { %3780 = vmatprep.subr.mxu0 %v3679_v5  ;;  %12713 = vmatprep.subr.mxu1 %v3680_v2  ;;  %v15692_v63 = vpop.permute.xlu0 %5924  ;;  %v13293_v26 = vunpack.i.l.bf16 %v20516_v12  ;;  %v20519_v5 = vld [vmem:[#allocation92_spill] sm:$0xff]  ;;  %v20522_v39 = vld [vmem:[#allocation69_spill] sm:$0xff] }
 0x3a2   : > { %20513 = vst [vmem:[#allocation34_spill] sm:$0xff] %v15692_v63  ;;  %3781 = vmatpush1.msra.mxu0 %v3678_v45  ;;  %3814 = vmatprep.mubr.f32.mxu0 %v20475_v28  ;;  %v4061_v57 = vsel %vm961_vm4, %v20517_v44, %v20519_v5  ;;  %v20526_v44 = vld [vmem:[#allocation73_spill] sm:$0xff]  ;;  %v20528_v5 = vld [vmem:[#allocation12_spill] sm:$0xff] }
 0x3a3   : > { %12714 = vmatpush3.msra.mxu1 %v3680_v2  ;;  %12715 = vmatprep.mubr.msk.f32.mxu1 %vm3371_vm10, %v3210_v34  ;;  %v15704_v47 = vpop.permute.xlu1 %13351  ;;  %v4059_v2 = vsel %vm961_vm4, %v13293_v26, %v20518_v7 }
 0x3a4   : > { %6259 = vrot.lane.b32.xlu1 %v14627_v23, %s13640_s26  ;;  %11851 = vmatmul.mubr.msk.f32.vlgmr.msra.gmra.mxu0 %vm3371_vm10, %v3210_v34  ;;  %v3213_v34 = vld [vmem:[%s20027_s2 + $0x18] sm:$0xff] }
 0x3a5   : > { %12716 = vmatmul.mubr.msk.f32.vlgmr.msra.gmra.mxu1 %vm3371_vm10, %v3211_v8  ;;  %4129 = vmatprep.subr.mxu1 %v4063_v55  ;;  %v15712_v6 = vpop.permute.xlu0 %13356  ;;  %v13294_v55 = vunpack.i.h.bf16 %v20516_v12  ;;  %v4058_v12 = vsel %vm961_vm4, %v20523_v43, %v20526_v44 }
 0x3a6   : > { %12727 = vmatprep.subr.mxu0 %v4064_v56  ;;  %4130 = vmatpush1.msra.mxu1 %v4062_v46 }
 0x3a7   : > { %12728 = vmatpush3.msra.mxu0 %v4064_v56  ;;  %6251 = vrot.lane.b32.xlu0 %v20502_v60, %s13640_s26  ;;  %v15726_v52 = vpop.permute.xlu1 %5916  ;;  %v20524_v56 = vld [vmem:[#allocation83_spill] sm:$0xff] }
 0x3a8   : > { %20520 = vst [vmem:[#allocation26_spill] sm:$0xff] %v15726_v52  ;;  %4131 = vmatprep.subr.mxu1 %v4060_v30  ;;  %12729 = vmatprep.subr.mxu0 %v4061_v57  ;;  %v4057_v46 = vsel %vm961_vm4, %v20524_v56, %v20523_v43  ;;  %v4056_v7 = vsel %vm961_vm4, %v13294_v55, %v20524_v56  ;;  %v20530_v43 = vld [vmem:[#allocation71_spill] sm:$0xff]  ;;  %v20531_v55 = vld [vmem:[#allocation80_spill] sm:$0xff]  ;;  %v20540_v52 = vld [vmem:[#allocation38_spill] sm:$0xff] }
 0x3a9   : > { %3820 = vmatprep.mubr.f32.mxu0 %v20475_v28  ;;  %12718 = vmatprep.mubr.msk.f32.mxu1 %vm3371_vm10, %v3212_v29  ;;  %v15735_v45 = vpop.permute.xlu0 %5908 }
 0x3aa   : > { %20521 = vst [vmem:[#allocation42_spill] sm:$0xff] %v15735_v45  ;;  %4132 = vmatpush1.msra.mxu1 %v4059_v2  ;;  %12730 = vmatpush3.msra.mxu0 %v4061_v57  ;;  %v13298_v57 = vunpack.i.l.bf16 %v20528_v5  ;;  %v20529_v2 = vld [vmem:[#allocation78_spill] sm:$0xff]  ;;  %v13299_v45 = vunpack.i.h.bf16 %v20528_v5  ;;  %v20537_v5 = vld [vmem:[#allocation48_spill] sm:$0xff] }
 0x3ab   : > { %6255 = vrot.lane.b32.xlu1 %v20522_v39, %s13640_s26  ;;  %11852 = vmatmul.mubr.msk.f32.gmra.mxu0 %vm3371_vm10, %v3211_v8  ;;  %v15744_v26 = vpop.permute.xlu1 %13361  ;;  %v15755_v8 = vld [vmem:[%s20027_s2 + $0x20] sm:$0xff]  ;;  %v4055_v56 = vsel %vm961_vm4, %v20529_v2, %v20531_v55 }
 0x3ac   : > { %20525 = vst [vmem:[#allocation9_spill] sm:$0xff] %v15744_v26  ;;  %12719 = vmatmul.mubr.msk.f32.gmra.mxu1 %vm3371_vm10, %v3213_v34  ;;  %4133 = vmatprep.subr.mxu1 %v4057_v46  ;;  %v4054_v46 = vsel %vm961_vm4, %v20530_v43, %v20529_v2  ;;  %v20535_v55 = vld [vmem:[#allocation4_spill] sm:$0xff]  ;;  %v20548_v26 = vld [vmem:[#allocation53_spill] sm:$0xff] }
 0x3ad   : > { %12731 = vmatprep.subr.mxu0 %v4058_v12  ;;  %4134 = vmatpush1.msra.mxu1 %v4056_v7  ;;  %v15757_v30 = vpop.permute.xlu0 %13366  ;;  %v15778_v7 = vld [vmem:[%s20027_s2 + $0x28] sm:$0xff] }
 0x3ae   : > { %20527 = vst [vmem:[#allocation56_spill] sm:$0xff] %v15757_v30  ;;  %12732 = vmatpush3.msra.mxu0 %v4058_v12  ;;  %13391 = vrot.lane.b32.xlu0 %v20475_v28, %s13640_s26  ;;  %v4053_v12 = vsel %vm961_vm4, %v13298_v57, %v20530_v43  ;;  %v20536_v43 = vld [vmem:[#allocation6_spill] sm:$0xff] }
 0x3af   : > { %4135 = vmatprep.subr.mxu1 %v4054_v46  ;;  %12733 = vmatprep.subr.mxu0 %v4055_v56  ;;  %v15768_v44 = vpop.permute.xlu1 %5900  ;;  %v20534_v46 = vld [vmem:[#allocation59_spill] sm:$0xff] }
 0x3b0   : > { %20532 = vst [vmem:[#allocation66_spill] sm:$0xff] %v15768_v44  ;;  %3826 = vmatprep.mubr.f32.mxu0 %v20475_v28  ;;  %12721 = vmatprep.mubr.msk.f32.mxu1 %vm3371_vm10, %v15755_v8  ;;  %v4051_v57 = vsel %vm961_vm4, %v20535_v55, %v20534_v46  ;;  %v13303_v44 = vunpack.i.l.bf16 %v20536_v43 }
 0x3b1   : > { %4136 = vmatpush1.msra.mxu1 %v4053_v12  ;;  %12734 = vmatpush3.msra.mxu0 %v4055_v56  ;;  %v15781_v2 = vpop.permute.xlu0 %5892  ;;  %v4052_v56 = vsel %vm961_vm4, %v20534_v46, %v20537_v5  ;;  %v4050_v12 = vsel %vm961_vm4, %v13299_v45, %v20535_v55  ;;  %v20541_v5 = vld [vmem:[#allocation43_spill] sm:$0xff] }
 0x3b2   : > { %20533 = vst [vmem:[#allocation18_spill] sm:$0xff] %v15781_v2  ;;  %13386 = vrot.lane.b32.xlu1 %v20475_v28, %s13640_s26  ;;  %11853 = vmatmul.mubr.msk.f32.gmra.mxu0 %vm3371_vm10, %v3212_v29  ;;  %v15802_v29 = vld [vmem:[%s20027_s2 + $0x30] sm:$0xff] }
 0x3b3   : > { %12722 = vmatmul.mubr.msk.f32.gmra.mxu1 %vm3371_vm10, %v15778_v7  ;;  %4137 = vmatprep.subr.mxu1 %v4051_v57  ;;  %v15797_v2 = vpop.permute.xlu1 %13371  ;;  %v20539_v57 = vld [vmem:[#allocation40_spill] sm:$0xff] }
 0x3b4   : > { %20538 = vst [vmem:[#allocation5_spill] sm:$0xff] %v15797_v2  ;;  %12735 = vmatprep.subr.mxu0 %v4052_v56  ;;  %4138 = vmatpush1.msra.mxu1 %v4050_v12  ;;  %v4048_v46 = vsel %vm961_vm4, %v20540_v52, %v20539_v57  ;;  %v4049_v45 = vsel %vm961_vm4, %v20539_v57, %v20541_v5  ;;  %v13304_v12 = vunpack.i.h.bf16 %v20536_v43  ;;  %v15823_v2 = vld [vmem:[%s20027_s2 + $0x38] sm:$0xff]  ;;  %v20543_v43 = vld [vmem:[#allocation30_spill] sm:$0xff] }
 0x3b5   : > { %12736 = vmatpush3.msra.mxu0 %v4052_v56  ;;  %13401 = vrot.lane.b32.xlu0 %v20475_v28, %s13640_s26  ;;  %v15812_v55 = vpop.permute.xlu0 %13376  ;;  %v4047_v56 = vsel %vm961_vm4, %v13303_v44, %v20540_v52  ;;  %v6636_v52 = vld [vmem:[%s20031_s6 + $0x38] sm:$0xff] }
 0x3b6   : > { %20542 = vst [vmem:[#allocation61_spill] sm:$0xff] %v15812_v55  ;;  %4139 = vmatprep.subr.mxu1 %v4048_v46  ;;  %12737 = vmatprep.subr.mxu0 %v4049_v45  ;;  %v20544_v46 = vld [vmem:[#allocation23_spill] sm:$0xff]  ;;  %v13288_v55 = vunpack.i.l.bf16 %v20514_v32  ;;  %v6629_v32 = vld [vmem:[%s20031_s6] sm:$0xff] }
 0x3b7   : > { %3832 = vmatprep.mubr.f32.mxu0 %v20475_v28  ;;  %12724 = vmatprep.mubr.msk.f32.mxu1 %vm3371_vm10, %v15802_v29  ;;  %v4425_v57 = vpop.permute.xlu1 %4424  ;;  %v4045_v5 = vsel %vm961_vm4, %v20544_v46, %v20543_v43 }
 0x3b8   : > { %4140 = vmatpush1.msra.mxu1 %v4047_v56  ;;  %12738 = vmatpush3.msra.mxu0 %v4049_v45  ;;  %v20546_v45 = vld [vmem:[#allocation10_spill] sm:$0xff] }
 0x3b9   : > { %13396 = vrot.lane.b32.xlu1 %v20475_v28, %s13640_s26  ;;  %11854 = vmatmul.mubr.msk.f32.gmra.mxu0 %vm3371_vm10, %v3213_v34  ;;  %v15834_v44 = vpop.permute.xlu0 %5876  ;;  %v4046_v56 = vsel %vm961_vm4, %v20543_v43, %v20546_v45  ;;  %v4044_v34 = vsel %vm961_vm4, %v13304_v12, %v20544_v46  ;;  %v4041_v12 = vsel %vm961_vm4, %v13288_v55, %v20548_v26  ;;  %v11867_v46 = vld [vmem:[%s20027_s2 + $0x80] sm:$0xff]  ;;  %v20550_v55 = vld [vmem:[#allocation107_spill] sm:$0xff] }
 0x3ba   : > { %20545 = vst [vmem:[#allocation22_spill] sm:$0xff] %v15834_v44  ;;  %12725 = vmatmul.mubr.msk.f32.gmra.mxu1 %vm3371_vm10, %v15823_v2  ;;  %4141 = vmatprep.subr.mxu1 %v4045_v5  ;;  %v20547_v44 = vld [vmem:[#allocation63_spill] sm:$0xff]  ;;  %v20549_v5 = vld [vmem:[#allocation33_spill] sm:$0xff] }
 0x3bb   : > { %12739 = vmatprep.subr.mxu0 %v4046_v56  ;;  %4142 = vmatpush1.msra.mxu1 %v4044_v34  ;;  %v15844_v30 = vpop.permute.xlu1 %5884  ;;  %v4042_v63 = vsel %vm961_vm4, %v20548_v26, %v20547_v44  ;;  %v4043_v19 = vsel %vm961_vm4, %v20547_v44, %v20549_v5  ;;  %v20551_v44 = vld [vmem:[#allocation86_spill] sm:$0xff] }
 0x3bc   : > { %12740 = vmatpush3.msra.mxu0 %v4046_v56  ;;  %6674 = vperm.xlu0 %13243, %v6636_v52   ;;  %v4450_v52 = vsel %vm1260_vm5, %v20550_v55, %v4425_v57  ;;  %v4451_v45 = vsel %vm1260_vm5, %v4425_v57, %v20551_v44  ;;  %v6635_v56 = vld [vmem:[%s20031_s6 + $0x30] sm:$0xff]  ;;  %v20556_v44 = vld [vmem:[#allocation93_spill] sm:$0xff] }
 0x3bd   : > { %4143 = vmatprep.subr.mxu1 %v4042_v63  ;;  %12741 = vmatprep.subr.mxu0 %v4043_v19  ;;  %v15857_v43 = vpop.permute.xlu0 %5868  ;;  %v6634_v63 = vld [vmem:[%s20031_s6 + $0x28] sm:$0xff]  ;;  %v11869_v5 = vld [vmem:[%s20027_s2 + $0x90] sm:$0xff] }
 0x3be   : > { %3838 = vmatprep.mubr.f32.mxu0 %v20475_v28  ;;  %4144 = vmatpush1.msra.mxu1 %v4041_v12  ;;  %v6632_v12 = vld [vmem:[%s20031_s6 + $0x18] sm:$0xff] }
 0x3bf   : > { %4177 = vmatprep.mubr.f32.mxu1 %v20475_v28  ;;  %12742 = vmatpush3.msra.mxu0 %v4043_v19  ;;  %v15867_v26 = vpop.permute.xlu1 %13381 }
 0x3c0   : > { %6639 = vperm.xlu1 %13244, %v6629_v32   ;;  %11855 = vmatmul.mubr.msk.f32.gmra.mxu0 %vm3371_vm10, %v15755_v8  ;;  %v11868_v8 = vld [vmem:[%s20027_s2 + $0x88] sm:$0xff]  ;;  %v6633_v32 = vld [vmem:[%s20031_s6 + $0x20] sm:$0xff] }
 0x3c1   : > { %11875 = vmatmul.mubr.msk.f32.vlgmr.msra.gmra.mxu1 %vm3371_vm10, %v11867_v46  ;;  %6664 = vperm.xlu0 %13243, %v6634_v63   ;;  %v15879_v19 = vpop.permute.xlu0 %5920 }
 0x3c2   : > { %20552 = vst [vmem:[#allocation15_spill] sm:$0xff] %v15879_v19  ;;  %3844 = vmatprep.mubr.f32.mxu0 %v20475_v28  ;;  %4183 = vmatprep.mubr.f32.mxu1 %v20475_v28 }
 0x3c3   : > { %4516 = vmatprep.subr.mxu0 %v4450_v52  ;;  %12755 = vmatprep.subr.mxu1 %v4451_v45  ;;  %v15886_v57 = vpop.permute.xlu1 %5914  ;;  %v11870_v52 = vld [vmem:[%s20027_s2 + $0x98] sm:$0xff] }
 0x3c4   : > { %20553 = vst [vmem:[#allocation55_spill] sm:$0xff] %v15886_v57  ;;  %6669 = vperm.xlu1 %13244, %v6635_v56   ;;  %11856 = vmatmul.mubr.msk.f32.gmra.mxu0 %vm3371_vm10, %v15778_v7  ;;  %v20560_v57 = vld [vmem:[#allocation29_spill] sm:$0xff] }
 0x3c5   : > { %11876 = vmatmul.mubr.msk.f32.gmra.mxu1 %vm3371_vm10, %v11868_v8  ;;  %6309 = vrot.lane.b32.xlu0 %v15174_v17, %s13640_s26  ;;  %v15893_v34 = vpop.permute.xlu0 %5912  ;;  %v13308_v19 = vunpack.i.l.bf16 %v20560_v57 }
 0x3c6   : > { %20554 = vst [vmem:[#allocation44_spill] sm:$0xff] %v15893_v34  ;;  %3850 = vmatprep.mubr.f32.mxu0 %v20475_v28  ;;  %4189 = vmatprep.mubr.f32.mxu1 %v20475_v28 }
 0x3c7   : > { %12756 = vmatpush3.msra.mxu1 %v4451_v45  ;;  %v15903_v7 = vpop.permute.xlu1 %6311  ;;  %v20557_v45 = vld [vmem:[#allocation106_spill] sm:$0xff] }
 0x3c8   : > { %5922 = vrot.lane.b32.xlu1 %v15174_v17, %s13639_s25  ;;  %11857 = vmatmul.mubr.msk.f32.gmra.mxu0 %vm3371_vm10, %v15802_v29  ;;  %v6630_v29 = vld [vmem:[%s20031_s6 + $0x8] sm:$0xff]  ;;  %v4448_v56 = vsel %vm1260_vm5, %v20557_v45, %v20556_v44  ;;  %v4449_v44 = vsel %vm1260_vm5, %v13308_v19, %v20550_v55  ;;  %v20564_v55 = vld [vmem:[#allocation52_spill] sm:$0xff] }
 0x3c9   : > { %11877 = vmatmul.mubr.msk.f32.gmra.mxu1 %vm3371_vm10, %v11869_v5  ;;  %6654 = vperm.xlu0 %13243, %v6632_v12   ;;  %v15913_v63 = vpop.permute.xlu0 %5906  ;;  %v13313_v19 = vunpack.i.l.bf16 %v20564_v55 }
 0x3ca   : > { %20555 = vst [vmem:[#allocation54_spill] sm:$0xff] %v15913_v63  ;;  %3856 = vmatprep.mubr.f32.mxu0 %v20475_v28  ;;  %4195 = vmatprep.mubr.f32.mxu1 %v20475_v28  ;;  %v6631_v63 = vld [vmem:[%s20031_s6 + $0x10] sm:$0xff] }
 0x3cb   : > { %12757 = vmatprep.subr.mxu1 %v4448_v56  ;;  %v15926_v12 = vpop.permute.xlu1 %6307 }
 0x3cc   : > { %20558 = vst [vmem:[#allocation24_spill] sm:$0xff] %v15926_v12  ;;  %6659 = vperm.xlu1 %13244, %v6633_v32   ;;  %11858 = vmatmul.mubr.msk.f32.gmra.mxu0 %vm3371_vm10, %v15823_v2  ;;  %v11871_v32 = vld [vmem:[%s20027_s2 + $0xa0] sm:$0xff] }
 0x3cd   : > { %11878 = vmatmul.mubr.msk.f32.gmra.mxu1 %vm3371_vm10, %v11870_v52  ;;  %6644 = vperm.xlu0 %13243, %v6630_v29   ;;  %v15934_v34 = vpop.permute.xlu0 %6303  ;;  %v13309_v29 = vunpack.i.h.bf16 %v20560_v57 }
 0x3ce   : > { %20559 = vst [vmem:[#allocation21_spill] sm:$0xff] %v15934_v34  ;;  %4201 = vmatprep.mubr.f32.mxu1 %v20475_v28  ;;  %12743 = vmatprep.mubr.msk.f32.mxu0 %vm3371_vm10, %v11867_v46  ;;  %v20562_v46 = vld [vmem:[#allocation101_spill] sm:$0xff] }
 0x3cf   : > { %12758 = vmatpush3.msra.mxu1 %v4448_v56  ;;  %v15942_v2 = vpop.permute.xlu1 %6301  ;;  %v4447_v34 = vsel %vm1260_vm5, %v20562_v46, %v20557_v45  ;;  %v4446_v57 = vsel %vm1260_vm5, %v13309_v29, %v20562_v46  ;;  %v20566_v56 = vld [vmem:[#allocation88_spill] sm:$0xff] }
 0x3d0   : > { %20561 = vst [vmem:[#allocation84_spill] sm:$0xff] %v15942_v2  ;;  %6649 = vperm.xlu1 %13244, %v6631_v63   ;;  %12744 = vmatmul.mubr.msk.f32.vlgmr.msra.gmra.mxu0 %vm3371_vm10, %v11868_v8  ;;  %v11872_v8 = vld [vmem:[%s20027_s2 + $0xa8] sm:$0xff]  ;;  %v20565_v63 = vld [vmem:[#allocation95_spill] sm:$0xff] }
 0x3d1   : > { %11879 = vmatmul.mubr.msk.f32.gmra.mxu1 %vm3371_vm10, %v11871_v32  ;;  %4517 = vmatpush1.msra.mxu0 %v4449_v44  ;;  %v15952_v12 = vpop.permute.xlu0 %6299  ;;  %v4444_v45 = vsel %vm1260_vm5, %v20566_v56, %v20565_v63 }
 0x3d2   : > { %20563 = vst [vmem:[#allocation13_spill] sm:$0xff] %v15952_v12  ;;  %4518 = vmatprep.subr.mxu0 %v4447_v34  ;;  %4207 = vmatprep.mubr.f32.mxu1 %v20475_v28  ;;  %v20568_v34 = vld [vmem:[#allocation70_spill] sm:$0xff]  ;;  %v20571_v12 = vld [vmem:[#allocation72_spill] sm:$0xff] }
 0x3d3   : > { %12746 = vmatprep.mubr.msk.f32.mxu0 %vm3371_vm10, %v11869_v5  ;;  %4519 = vmatpush1.msra.mxu0 %v4446_v57  ;;  %v15965_v44 = vpop.permute.xlu1 %5904  ;;  %v4445_v29 = vsel %vm1260_vm5, %v20565_v63, %v20568_v34  ;;  %v4443_v5 = vsel %vm1260_vm5, %v13313_v19, %v20566_v56  ;;  %v13314_v57 = vunpack.i.h.bf16 %v20564_v55  ;;  %v11873_v19 = vld [vmem:[%s20027_s2 + $0xb0] sm:$0xff] }
 0x3d4   : > { %20567 = vst [vmem:[#allocation103_spill] sm:$0xff] %v15965_v44  ;;  %12747 = vmatmul.mubr.msk.f32.gmra.mxu0 %vm3371_vm10, %v11870_v52  ;;  %4520 = vmatprep.subr.mxu0 %v4444_v45  ;;  %v20570_v44 = vld [vmem:[#allocation81_spill] sm:$0xff]  ;;  %v20574_v34 = vld [vmem:[#allocation62_spill] sm:$0xff] }
 0x3d5   : > { %11880 = vmatmul.mubr.msk.f32.gmra.mxu1 %vm3371_vm10, %v11872_v8  ;;  %12759 = vmatprep.subr.mxu1 %v4445_v29  ;;  %v15974_v46 = vpop.permute.xlu0 %6293  ;;  %v4441_v52 = vsel %vm1260_vm5, %v20571_v12, %v20570_v44  ;;  %v20572_v45 = vld [vmem:[#allocation77_spill] sm:$0xff]  ;;  %v4440_v55 = vsel %vm1260_vm5, %v13314_v57, %v20571_v12 }
 0x3d6   : > { %20569 = vst [vmem:[#allocation99_spill] sm:$0xff] %v15974_v46  ;;  %4521 = vmatpush1.msra.mxu0 %v4443_v5  ;;  %12760 = vmatpush3.msra.mxu1 %v4445_v29  ;;  %v4442_v63 = vsel %vm1260_vm5, %v20570_v44, %v20572_v45  ;;  %v13318_v29 = vunpack.i.l.bf16 %v20574_v34  ;;  %v20576_v5 = vld [vmem:[#allocation19_spill] sm:$0xff] }
 0x3d7   : > { %4522 = vmatprep.subr.mxu0 %v4441_v52  ;;  %12761 = vmatprep.subr.mxu1 %v4442_v63  ;;  %v15986_v56 = vpop.permute.xlu1 %5898  ;;  %v20577_v52 = vld [vmem:[#allocation57_spill] sm:$0xff]  ;;  %v20581_v46 = vld [vmem:[#allocation35_spill] sm:$0xff] }
 0x3d8   : > { %20573 = vst [vmem:[#allocation92_spill] sm:$0xff] %v15986_v56  ;;  %4213 = vmatprep.mubr.f32.mxu1 %v20475_v28  ;;  %12749 = vmatprep.mubr.msk.f32.mxu0 %vm3371_vm10, %v11871_v32  ;;  %v4438_v45 = vsel %vm1260_vm5, %v20577_v52, %v20576_v5  ;;  %v20578_v56 = vld [vmem:[#allocation27_spill] sm:$0xff]  ;;  %v4437_v12 = vsel %vm1260_vm5, %v13318_v29, %v20577_v52  ;;  %v20582_v29 = vld [vmem:[#allocation20_spill] sm:$0xff] }
 0x3d9   : > { %4523 = vmatpush1.msra.mxu0 %v4440_v55  ;;  %12762 = vmatpush3.msra.mxu1 %v4442_v63  ;;  %v15993_v44 = vpop.permute.xlu0 %5896  ;;  %v4439_v32 = vsel %vm1260_vm5, %v20576_v5, %v20578_v56  ;;  %v13319_v63 = vunpack.i.h.bf16 %v20574_v34  ;;  %v20580_v55 = vld [vmem:[#allocation32_spill] sm:$0xff]  ;;  %v11874_v56 = vld [vmem:[%s20027_s2 + $0xb8] sm:$0xff]  ;;  %v13323_v5 = vunpack.i.l.bf16 %v20582_v29 }
 0x3da   : > { %20575 = vst [vmem:[#allocation69_spill] sm:$0xff] %v15993_v44  ;;  %11881 = vmatmul.mubr.msk.f32.gmra.mxu1 %vm3371_vm10, %v11873_v19  ;;  %12750 = vmatmul.mubr.msk.f32.gmra.mxu0 %vm3371_vm10, %v11872_v8  ;;  %v20579_v8 = vld [vmem:[#allocation25_spill] sm:$0xff] }
 0x3db   : > { %4524 = vmatprep.subr.mxu0 %v4438_v45  ;;  %12763 = vmatprep.subr.mxu1 %v4439_v32  ;;  %v16005_v57 = vpop.permute.xlu1 %6295  ;;  %v4435_v44 = vsel %vm1260_vm5, %v20580_v55, %v20579_v8  ;;  %v4436_v2 = vsel %vm1260_vm5, %v20579_v8, %v20581_v46  ;;  %v4434_v34 = vsel %vm1260_vm5, %v13319_v63, %v20580_v55  ;;  %v20584_v46 = vld [vmem:[#allocation31_spill] sm:$0xff]  ;;  %v13324_v63 = vunpack.i.h.bf16 %v20582_v29  ;;  %v20587_v8 = vld [vmem:[#allocation14_spill] sm:$0xff]  ;;  %v20588_v55 = vld [vmem:[#allocation8_spill] sm:$0xff] }
 0x3dc   : > { %4525 = vmatpush1.msra.mxu0 %v4437_v12  ;;  %12764 = vmatpush3.msra.mxu1 %v4439_v32  ;;  %v20586_v32 = vld [vmem:[#allocation46_spill] sm:$0xff] }
 0x3dd   : > { %4526 = vmatprep.subr.mxu0 %v4435_v44  ;;  %12765 = vmatprep.subr.mxu1 %v4436_v2  ;;  %v16022_v52 = vpop.permute.xlu0 %5890  ;;  %v20585_v44 = vld [vmem:[#allocation7_spill] sm:$0xff]  ;;  %v4428_v29 = vsel %vm1260_vm5, %v13324_v63, %v20588_v55 }
 0x3de   : > { %4219 = vmatprep.mubr.f32.mxu1 %v20475_v28  ;;  %12752 = vmatprep.mubr.msk.f32.mxu0 %vm3371_vm10, %v11873_v19  ;;  %20583 = vst [vmem:[#allocation91_spill] sm:$0xff] %v16022_v52  ;;  %v4432_v45 = vsel %vm1260_vm5, %v20585_v44, %v20584_v46  ;;  %v4433_v19 = vsel %vm1260_vm5, %v20584_v46, %v20586_v32  ;;  %v11891_v46 = vld [vmem:[%s20027_s2 + $0xc0] sm:$0xff]  ;;  %v20590_v32 = vld [vmem:[#allocation39_spill] sm:$0xff] }
 0x3df   : > { %4527 = vmatpush1.msra.mxu0 %v4434_v34  ;;  %12766 = vmatpush3.msra.mxu1 %v4436_v2  ;;  %v4431_v2 = vsel %vm1260_vm5, %v13323_v5, %v20585_v44  ;;  %v20589_v34 = vld [vmem:[#allocation41_spill] sm:$0xff]  ;;  %v20591_v63 = vld [vmem:[#allocation51_spill] sm:$0xff] }
 0x3e0   : > { %11882 = vmatmul.mubr.msk.f32.gmra.mxu1 %vm3371_vm10, %v11874_v56  ;;  %12753 = vmatmul.mubr.msk.f32.gmra.mxu0 %vm3371_vm10, %v11874_v56  ;;  %v16032_v12 = vpop.permute.xlu1 %6291  ;;  %v4429_v56 = vsel %vm1260_vm5, %v20588_v55, %v20587_v8  ;;  %v4430_v52 = vsel %vm1260_vm5, %v20587_v8, %v20589_v34  ;;  %v11892_v5 = vld [vmem:[%s20027_s2 + $0xc8] sm:$0xff]  ;;  %v11894_v8 = vld [vmem:[%s20027_s2 + $0xd8] sm:$0xff]  ;;  %v20595_v34 = vld [vmem:[#allocation16_spill] sm:$0xff] }
 0x3e1   : > { %4528 = vmatprep.subr.mxu0 %v4432_v45  ;;  %12767 = vmatprep.subr.mxu1 %v4433_v19  ;;  %v20594_v55 = vld [vmem:[#allocation11_spill] sm:$0xff] }
 0x3e2   : > { %4529 = vmatpush1.msra.mxu0 %v4431_v2  ;;  %12768 = vmatpush3.msra.mxu1 %v4433_v19  ;;  %v16053_v44 = vpop.permute.xlu0 %6287  ;;  %v11893_v19 = vld [vmem:[%s20027_s2 + $0xd0] sm:$0xff]  ;;  %v20593_v2 = vld [vmem:[#allocation17_spill] sm:$0xff] }
 0x3e3   : > { %4530 = vmatprep.subr.mxu0 %v4429_v56  ;;  %12769 = vmatprep.subr.mxu1 %v4430_v52 }
 0x3e4   : > { %4531 = vmatpush1.msra.mxu0 %v4428_v29  ;;  %4564 = vmatprep.mubr.f32.mxu0 %v20475_v28  ;;  %v11896_v29 = vld [vmem:[%s20027_s2 + $0xe8] sm:$0xff] }
 0x3e5   : > { %12770 = vmatpush3.msra.mxu1 %v4430_v52  ;;  %12771 = vmatprep.mubr.msk.f32.mxu1 %vm3371_vm10, %v11891_v46  ;;  %v16055_v45 = vpop.permute.xlu1 %6285  ;;  %v20592_v52 = vld [vmem:[#allocation50_spill] sm:$0xff] }
 0x3e6   : > { %11899 = vmatmul.mubr.msk.f32.vlgmr.msra.gmra.mxu0 %vm3371_vm10, %v11891_v46  ;;  %12772 = vmatmul.mubr.msk.f32.vlgmr.msra.gmra.mxu1 %vm3371_vm10, %v11892_v5  ;;  %v11895_v46 = vld [vmem:[%s20027_s2 + $0xe0] sm:$0xff] }
 0x3e7   : > { %4791 = vmatprep.subr.mxu1 %v15174_v17  ;;  %12783 = vmatprep.subr.mxu0 %v20590_v32  ;;  %v16077_v56 = vpop.permute.xlu0 %6283 }
 0x3e8   : > { %4792 = vmatpush1.msra.mxu1 %v20591_v63  ;;  %12784 = vmatpush3.msra.mxu0 %v20590_v32 }
 0x3e9   : > { %4793 = vmatprep.subr.mxu1 %v20592_v52  ;;  %12785 = vmatprep.subr.mxu0 %v20593_v2  ;;  %v20600_v52 = vld [vmem:[#allocation74_spill] sm:$0xff] }
 0x3ea   : > { %4570 = vmatprep.mubr.f32.mxu0 %v20475_v28  ;;  %12774 = vmatprep.mubr.msk.f32.mxu1 %vm3371_vm10, %v11893_v19  ;;  %v16073_v17 = vpop.permute.xlu1 %5888 }
 0x3eb   : > { %4794 = vmatpush1.msra.mxu1 %v20594_v55  ;;  %12786 = vmatpush3.msra.mxu0 %v20593_v2  ;;  %v20601_v55 = vld [vmem:[#allocation45_spill] sm:$0xff] }
 0x3ec   : > { %11900 = vmatmul.mubr.msk.f32.gmra.mxu0 %vm3371_vm10, %v11892_v5  ;;  %12775 = vmatmul.mubr.msk.f32.gmra.mxu1 %vm3371_vm10, %v11894_v8 }
 0x3ed   : > { %4795 = vmatprep.subr.mxu1 %v20595_v34  ;;  %12787 = vmatprep.subr.mxu0 %v14855_v20  ;;  %v13338_v34 = vunpack.i.l.bf16 %v20601_v55 }
 0x3ee   : > { %4796 = vmatpush1.msra.mxu1 %v14946_v42  ;;  %12788 = vmatpush3.msra.mxu0 %v14855_v20  ;;  %v16099_v42 = vpop.permute.xlu0 %6277  ;;  %v11897_v20 = vld [vmem:[%s20027_s2 + $0xf0] sm:$0xff] }
 0x3ef   : > { %4797 = vmatprep.subr.mxu1 %v14903_v48  ;;  %12789 = vmatprep.subr.mxu0 %v14910_v62  ;;  %v16093_v5 = vpop.permute.xlu1 %5882  ;;  %v20597_v48 = vld [vmem:[#allocation85_spill] sm:$0xff] }
 0x3f0   : > { %4576 = vmatprep.mubr.f32.mxu0 %v20475_v28  ;;  %12777 = vmatprep.mubr.msk.f32.mxu1 %vm3371_vm10, %v11895_v46 }
 0x3f1   : > { %4798 = vmatpush1.msra.mxu1 %v14846_v61  ;;  %12790 = vmatpush3.msra.mxu0 %v14910_v62  ;;  %v16115_v61 = vld [vmem:[%s20027_s2 + $0xf8] sm:$0xff] }
 0x3f2   : > { %11901 = vmatmul.mubr.msk.f32.gmra.mxu0 %vm3371_vm10, %v11893_v19  ;;  %12778 = vmatmul.mubr.msk.f32.gmra.mxu1 %vm3371_vm10, %v11896_v29  ;;  %v11916_v19 = vld [vmem:[%s20027_s2 + $0x108] sm:$0xff] }
 0x3f3   : > { %4799 = vmatprep.subr.mxu1 %v14790_v59  ;;  %12791 = vmatprep.subr.mxu0 %v14751_v16  ;;  %v16117_v59 = vpop.permute.xlu1 %6279 }
 0x3f4   : > { %4800 = vmatpush1.msra.mxu1 %v14763_v58  ;;  %12792 = vmatpush3.msra.mxu0 %v14751_v16  ;;  %v16123_v16 = vpop.permute.xlu0 %5880  ;;  %v20596_v58 = vld [vmem:[#allocation37_spill] sm:$0xff] }
 0x3f5   : > { %4801 = vmatprep.subr.mxu1 %v14708_v27  ;;  %12793 = vmatprep.subr.mxu0 %v14779_v24 }
 0x3f6   : > { %4582 = vmatprep.mubr.f32.mxu0 %v20475_v28  ;;  %12780 = vmatprep.mubr.msk.f32.mxu1 %vm3371_vm10, %v11897_v20 }
 0x3f7   : > { %4802 = vmatpush1.msra.mxu1 %v14676_v15  ;;  %12794 = vmatpush3.msra.mxu0 %v14779_v24  ;;  %v11915_v15 = vld [vmem:[%s20027_s2 + $0x100] sm:$0xff]  ;;  %v16137_v27 = vpop.permute.xlu1 %5148  ;;  %v13328_v24 = vunpack.i.l.bf16 %v20596_v58 }
 0x3f8   : > { %11902 = vmatmul.mubr.msk.f32.gmra.mxu0 %vm3371_vm10, %v11894_v8  ;;  %12781 = vmatmul.mubr.msk.f32.gmra.mxu1 %vm3371_vm10, %v16115_v61 }
 0x3f9   : > { %4803 = vmatprep.subr.mxu1 %v14642_v49  ;;  %12795 = vmatprep.subr.mxu0 %v20505_v33  ;;  %v13329_v49 = vunpack.i.h.bf16 %v20596_v58  ;;  %v5177_v62 = vsel %vm1845_vm6, %v20597_v48, %v13328_v24  ;;  %v13339_v24 = vunpack.i.h.bf16 %v20601_v55  ;;  %v20606_v55 = vld [vmem:[#allocation47_spill] sm:$0xff] }
 0x3fa   : > { %4804 = vmatpush1.msra.mxu1 %v14627_v23  ;;  %12796 = vmatpush3.msra.mxu0 %v20505_v33  ;;  %v16144_v23 = vpop.permute.xlu0 %5535 }
 0x3fb   : > { %4805 = vmatprep.subr.mxu1 %v20496_v38  ;;  %12797 = vmatprep.subr.mxu0 %v20522_v39  ;;  %v5176_v38 = vsel %vm1845_vm6, %v16137_v27, %v20597_v48 }
 0x3fc   : > { %4588 = vmatprep.mubr.f32.mxu0 %v20475_v28  ;;  %4806 = vmatpush1.msra.mxu1 %v20502_v60  ;;  %v20598_v60 = vld [vmem:[#allocation28_spill] sm:$0xff] }
 0x3fd   : > { %4839 = vmatprep.mubr.f32.mxu1 %v20475_v28  ;;  %12798 = vmatpush3.msra.mxu0 %v20522_v39  ;;  %v13333_v33 = vunpack.i.l.bf16 %v20598_v60  ;;  %v20599_v39 = vld [vmem:[#allocation97_spill] sm:$0xff]  ;;  %v13334_v63 = vunpack.i.h.bf16 %v20598_v60 }
 0x3fe   : > { %11903 = vmatmul.mubr.msk.f32.gmra.mxu0 %vm3371_vm10, %v11895_v46  ;;  %11923 = vmatmul.mubr.msk.f32.vlgmr.msra.gmra.mxu1 %vm3371_vm10, %v11915_v15  ;;  %v5174_v32 = vsel %vm1845_vm6, %v20599_v39, %v13329_v49  ;;  %v16167_v8 = vpop.permute.xlu0 %5874  ;;  %v20602_v46 = vld [vmem:[#allocation82_spill] sm:$0xff]  ;;  %v20603_v49 = vld [vmem:[#allocation49_spill] sm:$0xff] }
 0x3ff   : > { %12811 = vmatprep.subr.mxu1 %v5177_v62  ;;  %4594 = vmatprep.mubr.f32.mxu0 %v20475_v28  ;;  %v5171_v2 = vsel %vm1845_vm6, %v20600_v52, %v13333_v33  ;;  %v5168_v58 = vsel %vm1845_vm6, %v20602_v46, %v13334_v63  ;;  %v5165_v48 = vsel %vm1845_vm6, %v20603_v49, %v13338_v34  ;;  %v20605_v33 = vld [vmem:[#allocation60_spill] sm:$0xff] }
 0x400   : > { %12812 = vmatpush3.msra.mxu1 %v5177_v62  ;;  %4845 = vmatprep.mubr.f32.mxu1 %v20475_v28  ;;  %v16182_v62 = vpop.permute.xlu1 %6275 }
 0x401   : > { %12813 = vmatprep.subr.mxu1 %v5174_v32  ;;  %5242 = vmatprep.subr.mxu0 %v5176_v38  ;;  %v20604_v38 = vld [vmem:[#allocation36_spill] sm:$0xff] }
 0x402   : > { %12814 = vmatpush3.msra.mxu1 %v5174_v32  ;;  %11904 = vmatmul.mubr.msk.f32.gmra.mxu0 %vm3371_vm10, %v11896_v29  ;;  %v11917_v29 = vld [vmem:[%s20027_s2 + $0x110] sm:$0xff]  ;;  %v13343_v60 = vunpack.i.l.bf16 %v20604_v38  ;;  %v5162_v32 = vsel %vm1845_vm6, %v20605_v33, %v13339_v24  ;;  %v16192_v63 = vpop.permute.xlu0 %6271 }
 0x403   : > { %11924 = vmatmul.mubr.msk.f32.gmra.mxu1 %vm3371_vm10, %v11916_v19  ;;  %12815 = vmatprep.subr.mxu1 %v5171_v2 }
 0x404   : > { %12816 = vmatpush3.msra.mxu1 %v5171_v2  ;;  %4600 = vmatprep.mubr.f32.mxu0 %v20475_v28  ;;  %v13344_v2 = vunpack.i.h.bf16 %v20604_v38  ;;  %v5159_v34 = vsel %vm1845_vm6, %v20606_v55, %v13343_v60  ;;  %v16210_v60 = vpop.permute.xlu1 %6269 }
 0x405   : > { %12817 = vmatprep.subr.mxu1 %v5168_v58  ;;  %4851 = vmatprep.mubr.f32.mxu1 %v20475_v28 }
 0x406   : > { %12818 = vmatpush3.msra.mxu1 %v5168_v58  ;;  %11905 = vmatmul.mubr.msk.f32.gmra.mxu0 %vm3371_vm10, %v11897_v20  ;;  %v11918_v20 = vld [vmem:[%s20027_s2 + $0x118] sm:$0xff]  ;;  %v20607_v58 = vld [vmem:[#allocation58_spill] sm:$0xff] }
 0x407   : > { %11925 = vmatmul.mubr.msk.f32.gmra.mxu1 %vm3371_vm10, %v11917_v29  ;;  %12819 = vmatprep.subr.mxu1 %v5165_v48  ;;  %v5156_v24 = vsel %vm1845_vm6, %v20607_v58, %v13344_v2  ;;  %v16218_v2 = vpop.permute.xlu0 %6267 }
 0x408   : > { %12820 = vmatpush3.msra.mxu1 %v5165_v48  ;;  %4606 = vmatprep.mubr.f32.mxu0 %v20475_v28  ;;  %v11919_v48 = vld [vmem:[%s20027_s2 + $0x120] sm:$0xff] }
 0x409   : > { %12821 = vmatprep.subr.mxu1 %v5162_v32  ;;  %4857 = vmatprep.mubr.f32.mxu1 %v20475_v28 }
 0x40a   : > { %12822 = vmatpush3.msra.mxu1 %v5162_v32  ;;  %11906 = vmatmul.mubr.msk.f32.gmra.mxu0 %vm3371_vm10, %v16115_v61  ;;  %v20608_v61 = vld [vmem:[#allocation87_spill] sm:$0xff]  ;;  %v5175_v32 = vsel %vm1845_vm6, %v15455_v35, %v16137_v27  ;;  %v20610_v35 = vld [vmem:[#allocation100_spill] sm:$0xff] }
 0x40b   : > { %11926 = vmatmul.mubr.msk.f32.gmra.mxu1 %vm3371_vm10, %v11918_v20  ;;  %12823 = vmatprep.subr.mxu1 %v5159_v34  ;;  %v5563_v38 = vsel %vm2144_vm7, %v16144_v23, %v20608_v61 }
 0x40c   : > { %12824 = vmatpush3.msra.mxu1 %v5159_v34  ;;  %4863 = vmatprep.mubr.f32.mxu1 %v20475_v28 }
 0x40d   : > { %12825 = vmatprep.subr.mxu1 %v5156_v24  ;;  %12799 = vmatprep.mubr.msk.f32.mxu0 %vm3371_vm10, %v11915_v15  ;;  %v11920_v15 = vld [vmem:[%s20027_s2 + $0x128] sm:$0xff] }
 0x40e   : > { %12826 = vmatpush3.msra.mxu1 %v5156_v24  ;;  %12800 = vmatmul.mubr.msk.f32.vlgmr.msra.gmra.mxu0 %vm3371_vm10, %v11916_v19  ;;  %v20609_v19 = vld [vmem:[#allocation104_spill] sm:$0xff]  ;;  %v11921_v24 = vld [vmem:[%s20027_s2 + $0x130] sm:$0xff] }
 0x40f   : > { %11927 = vmatmul.mubr.msk.f32.gmra.mxu1 %vm3371_vm10, %v11919_v48  ;;  %12802 = vmatprep.mubr.msk.f32.mxu0 %vm3371_vm10, %v11917_v29  ;;  %v5173_v34 = vsel %vm1845_vm6, %v20609_v19, %v20599_v39  ;;  %v5172_v27 = vsel %vm1845_vm6, %v20610_v35, %v20609_v19  ;;  %v16233_v29 = vpop.permute.xlu1 %5872  ;;  %v20611_v39 = vld [vmem:[#allocation94_spill] sm:$0xff] }
 0x410   : > { %4869 = vmatprep.mubr.f32.mxu1 %v20475_v28  ;;  %5629 = vmatprep.subr.mxu1 %v5563_v38  ;;  %v16242_v38 = vpop.permute.xlu0 %6261 }
 0x411   : > { %5243 = vmatpush1.msra.mxu0 %v5175_v32  ;;  %v20612_v32 = vld [vmem:[#allocation89_spill] sm:$0xff]  ;;  %13411 = vrot.lane.b32.xlu0 %v20475_v28, %s13633_s19 }
 0x412   : > { %12803 = vmatmul.mubr.msk.f32.gmra.mxu0 %vm3371_vm10, %v11918_v20  ;;  %5244 = vmatprep.subr.mxu0 %v5173_v34  ;;  %v5170_v20 = vsel %vm1845_vm6, %v20611_v39, %v20600_v52  ;;  %v5169_v19 = vsel %vm1845_vm6, %v20612_v32, %v20611_v39  ;;  %v20613_v52 = vld [vmem:[#allocation79_spill] sm:$0xff]  ;;  %v20615_v39 = vld [vmem:[#allocation109_spill] sm:$0xff] }
 0x413   : > { %11928 = vmatmul.mubr.msk.f32.gmra.mxu1 %vm3371_vm10, %v11920_v15  ;;  %12805 = vmatprep.mubr.msk.f32.mxu0 %vm3371_vm10, %v11919_v48  ;;  %v11922_v48 = vld [vmem:[%s20027_s2 + $0x138] sm:$0xff]  ;;  %v5167_v34 = vsel %vm1845_vm6, %v20613_v52, %v20602_v46  ;;  %v16262_v35 = vpop.permute.xlu1 %5866  ;;  %v5164_v46 = vsel %vm1845_vm6, %v20615_v39, %v20603_v49  ;;  %v5163_v32 = vsel %vm1845_vm6, %v15443_v51, %v20615_v39 }
 0x414   : > { %4875 = vmatprep.mubr.f32.mxu1 %v20475_v28  ;;  %5245 = vmatpush1.msra.mxu0 %v5172_v27  ;;  %v20614_v27 = vld [vmem:[#allocation76_spill] sm:$0xff]  ;;  %v5161_v49 = vsel %vm1845_vm6, %v15466_v37, %v20605_v33  ;;  %v5160_v51 = vsel %vm1845_vm6, %v15533_v4, %v15466_v37  ;;  %v20618_v33 = vld [vmem:[#allocation105_spill] sm:$0xff]  ;;  %v16311_v37 = vld [vmem:[%s20027_s2 + $0x158] sm:$0xff]  ;;  %v5158_v4 = vsel %vm1845_vm6, %v15551_v1, %v20606_v55 }
 0x415   : > { %5246 = vmatprep.subr.mxu0 %v5170_v20  ;;  %v16272_v20 = vpop.permute.xlu0 %5864  ;;  %v20621_v55 = vld [vmem:[#allocation98_spill] sm:$0xff]  ;;  %13431 = vrot.lane.b32.xlu0 %v20475_v28, %s13634_s20 }
 0x416   : > { %12806 = vmatmul.mubr.msk.f32.gmra.mxu0 %vm3371_vm10, %v11920_v15  ;;  %v16260_v15 = vld [vmem:[%s20027_s2 + $0x140] sm:$0xff]  ;;  %13406 = vrot.lane.b32.xlu1 %v20475_v28, %s13633_s19 }
 0x417   : > { %11929 = vmatmul.mubr.msk.f32.gmra.mxu1 %vm3371_vm10, %v11921_v24  ;;  %12808 = vmatprep.mubr.msk.f32.mxu0 %vm3371_vm10, %v11921_v24  ;;  %v5166_v24 = vsel %vm1845_vm6, %v20614_v27, %v20613_v52  ;;  %v20616_v52 = vld [vmem:[#allocation108_spill] sm:$0xff]  ;;  %v16301_v27 = vpop.permute.xlu1 %6263 }
 0x418   : > { %4881 = vmatprep.mubr.f32.mxu1 %v20475_v28  ;;  %5247 = vmatpush1.msra.mxu0 %v5169_v19  ;;  %v16282_v19 = vld [vmem:[%s20027_s2 + $0x148] sm:$0xff] }
 0x419   : > { %5248 = vmatprep.subr.mxu0 %v5167_v34  ;;  %v5562_v34 = vsel %vm2144_vm7, %v20616_v52, %v16144_v23  ;;  %v20619_v23 = vld [vmem:[#allocation102_spill] sm:$0xff]  ;;  %v20620_v52 = vld [vmem:[#allocation75_spill] sm:$0xff]  ;;  %13441 = vrot.lane.b32.xlu0 %v20475_v28, %s13634_s20 }
 0x41a   : > { %12809 = vmatmul.mubr.msk.f32.gmra.mxu0 %vm3371_vm10, %v11922_v48  ;;  %13416 = vrot.lane.b32.xlu1 %v20475_v28, %s13633_s19 }
 0x41b   : > { %11930 = vmatmul.mubr.msk.f32.gmra.mxu1 %vm3371_vm10, %v11922_v48  ;;  %5249 = vmatpush1.msra.mxu0 %v5166_v24  ;;  %v16287_v48 = vld [vmem:[%s20027_s2 + $0x150] sm:$0xff]  ;;  %v20617_v24 = vld [vmem:[#allocation96_spill] sm:$0xff] }
 0x41c   : > { %12827 = vmatprep.mubr.msk.f32.mxu1 %vm3371_vm10, %v16260_v15  ;;  %5250 = vmatprep.subr.mxu0 %v5164_v46  ;;  %v5560_v39 = vsel %vm2144_vm7, %v20618_v33, %v20617_v24  ;;  %v5559_v46 = vsel %vm2144_vm7, %v20619_v23, %v20618_v33  ;;  %v20622_v33 = vld [vmem:[#allocation90_spill] sm:$0xff]  ;;  %v5553_v23 = vsel %vm2144_vm7, %v15497_v3, %v15421_v21 }
 0x41d   : > { %5251 = vmatpush1.msra.mxu0 %v5163_v32  ;;  %5290 = vmatprep.mubr.f32.mxu0 %v20475_v28  ;;  %v16322_v32 = vld [vmem:[%s20027_s2 + $0x160] sm:$0xff]  ;;  %v5550_v3 = vsel %vm2144_vm7, %v15509_v14, %v15515_v41  ;;  %v5547_v14 = vsel %vm2144_vm7, %v15588_v0, %v15523_v13  ;;  %v13358_v0 = vunpack.i.l.bf16 %v15712_v6 }
 0x41e   : > { %5252 = vmatprep.subr.mxu0 %v5161_v49  ;;  %v5157_v49 = vsel %vm1845_vm6, %v15541_v18, %v15551_v1  ;;  %v5554_v18 = vsel %vm2144_vm7, %v15421_v21, %v15479_v50  ;;  %v16345_v1 = vld [vmem:[%s20027_s2 + $0x168] sm:$0xff]  ;;  %v5551_v21 = vsel %vm2144_vm7, %v15515_v41, %v15487_v54  ;;  %13446 = vrot.lane.b32.xlu0 %v20475_v28, %s13635_s21 }
 0x41f   : > { %12828 = vmatmul.mubr.msk.f32.vlgmr.msra.gmra.mxu1 %vm3371_vm10, %v16282_v19  ;;  %5253 = vmatpush1.msra.mxu0 %v5160_v51  ;;  %v16327_v51 = vpop.permute.xlu0 %6253 }
 0x420   : > { %5630 = vmatpush1.msra.mxu1 %v5562_v34  ;;  %12830 = vmatprep.mubr.msk.f32.mxu1 %vm3371_vm10, %v16287_v48  ;;  %v5557_v34 = vsel %vm2144_vm7, %v20621_v55, %v20620_v52 }
 0x421   : > { %5631 = vmatprep.subr.mxu1 %v5560_v39  ;;  %5254 = vmatprep.subr.mxu0 %v5158_v4  ;;  %v5556_v39 = vsel %vm2144_vm7, %v20622_v33, %v20621_v55  ;;  %v5155_v4 = vsel %vm1845_vm6, %v15579_v9, %v20607_v58  ;;  %v16360_v55 = vld [vmem:[%s20027_s2 + $0x170] sm:$0xff]  ;;  %v5548_v58 = vsel %vm2144_vm7, %v15523_v13, %v15572_v31  ;;  %v16383_v33 = vld [vmem:[%s20027_s2 + $0x178] sm:$0xff] }
 0x422   : > { %5632 = vmatpush1.msra.mxu1 %v5559_v46  ;;  %5255 = vmatpush1.msra.mxu0 %v5157_v49  ;;  %v5154_v46 = vsel %vm1845_vm6, %v15628_v22, %v15579_v9  ;;  %v13348_v49 = vunpack.i.l.bf16 %v15677_v40  ;;  %v13349_v22 = vunpack.i.h.bf16 %v15677_v40  ;;  %v5545_v40 = vsel %vm2144_vm7, %v15610_v11, %v15598_v25 }
 0x423   : > { %5633 = vmatprep.subr.mxu1 %v5557_v34  ;;  %12831 = vmatmul.mubr.msk.f32.gmra.mxu1 %vm3371_vm10, %v16311_v37  ;;  %v16362_v34 = vpop.permute.xlu1 %6259  ;;  %v16372_v9 = vpop.permute.xlu0 %6251 }
 0x424   : > { %5634 = vmatpush1.msra.mxu1 %v5556_v39  ;;  %12833 = vmatprep.mubr.msk.f32.mxu1 %vm3371_vm10, %v16322_v32  ;;  %v5564_v41 = vsel %vm2144_vm7, %v20608_v61, %v13348_v49  ;;  %v5544_v39 = vsel %vm2144_vm7, %v15618_v36, %v15610_v11  ;;  %v5542_v61 = vsel %vm2144_vm7, %v15646_v53, %v15659_v10  ;;  %v20623_v11 = vld [vmem:[#allocation67_spill] sm:$0xff]  ;;  %v13354_v49 = vunpack.i.h.bf16 %v15704_v47 }
 0x425   : > { %5635 = vmatprep.subr.mxu1 %v5554_v18  ;;  %5256 = vmatprep.subr.mxu0 %v5155_v4  ;;  %v13353_v18 = vunpack.i.l.bf16 %v15704_v47  ;;  %v5541_v36 = vsel %vm2144_vm7, %v20623_v11, %v15646_v53  ;;  %v20627_v47 = vld [vmem:[#allocation26_spill] sm:$0xff] }
 0x426   : > { %5636 = vmatpush1.msra.mxu1 %v5553_v23  ;;  %5257 = vmatpush1.msra.mxu0 %v5154_v46  ;;  %v13359_v23 = vunpack.i.h.bf16 %v15712_v6  ;;  %v16419_v46 = vld [vmem:[%s20027_s2 + $0x180] sm:$0xff]  ;;  %v5558_v6 = vsel %vm2144_vm7, %v20620_v52, %v13358_v0 }
 0x427   : > { %5637 = vmatprep.subr.mxu1 %v5551_v21  ;;  %12834 = vmatmul.mubr.msk.f32.gmra.mxu1 %vm3371_vm10, %v16345_v1  ;;  %v16401_v13 = vpop.permute.xlu1 %6255  ;;  %v16412_v4 = vpop.permute.xlu0 %13391  ;;  %v20625_v21 = vld [vmem:[#allocation9_spill] sm:$0xff] }
 0x428   : > { %5638 = vmatpush1.msra.mxu1 %v5550_v3  ;;  %12836 = vmatprep.mubr.msk.f32.mxu1 %vm3371_vm10, %v16360_v55  ;;  %v13363_v3 = vunpack.i.l.bf16 %v20625_v21  ;;  %v13364_v0 = vunpack.i.h.bf16 %v20625_v21 }
 0x429   : > { %5639 = vmatprep.subr.mxu1 %v5548_v58  ;;  %11947 = vmatmul.mubr.msk.f32.vlgmr.msra.gmra.mxu0 %vm3371_vm10, %v16260_v15  ;;  %v5561_v15 = vsel %vm2144_vm7, %v20617_v24, %v13349_v22  ;;  %v20624_v24 = vld [vmem:[#allocation34_spill] sm:$0xff]  ;;  %v20626_v58 = vld [vmem:[#allocation56_spill] sm:$0xff] }
 0x42a   : > { %5640 = vmatpush1.msra.mxu1 %v5547_v14  ;;  %12839 = vmatprep.subr.mxu0 %v5564_v41  ;;  %v5951_v53 = vsel %vm2443_vm8, %v20624_v24, %v13353_v18  ;;  %v13368_v14 = vunpack.i.l.bf16 %v20626_v58  ;;  %v20628_v18 = vld [vmem:[#allocation42_spill] sm:$0xff] }
 0x42b   : > { %5641 = vmatprep.subr.mxu1 %v5545_v40  ;;  %12837 = vmatmul.mubr.msk.f32.gmra.mxu1 %vm3371_vm10, %v16383_v33  ;;  %v16432_v22 = vpop.permute.xlu1 %13386  ;;  %v16439_v52 = vpop.permute.xlu0 %13401  ;;  %v13369_v40 = vunpack.i.h.bf16 %v20626_v58  ;;  %v20633_v58 = vld [vmem:[#allocation18_spill] sm:$0xff] }
 0x42c   : > { %5642 = vmatpush1.msra.mxu1 %v5544_v39  ;;  %12840 = vmatpush3.msra.mxu0 %v5564_v41  ;;  %v5948_v41 = vsel %vm2443_vm8, %v20627_v47, %v13354_v49  ;;  %v16446_v39 = vld [vmem:[%s20027_s2 + $0x188] sm:$0xff] }
 0x42d   : > { %5643 = vmatprep.subr.mxu1 %v5542_v61  ;;  %12841 = vmatprep.subr.mxu0 %v5561_v15  ;;  %v5552_v61 = vsel %vm2144_vm7, %v15487_v54, %v13368_v14  ;;  %v5549_v54 = vsel %vm2144_vm7, %v15572_v31, %v13369_v40 }
 0x42e   : > { %5644 = vmatpush1.msra.mxu1 %v5541_v36  ;;  %5296 = vmatprep.mubr.f32.mxu0 %v20475_v28 }
 0x42f   : > { %5677 = vmatprep.mubr.f32.mxu1 %v20475_v28  ;;  %12842 = vmatpush3.msra.mxu0 %v5561_v15  ;;  %v20629_v15 = vld [vmem:[#allocation5_spill] sm:$0xff]  ;;  %v16459_v36 = vpop.permute.xlu1 %13396 }
 0x430   : > { %12867 = vmatprep.subr.mxu1 %v5951_v53  ;;  %11948 = vmatmul.mubr.msk.f32.gmra.mxu0 %vm3371_vm10, %v16282_v19  ;;  %v5555_v19 = vsel %vm2144_vm7, %v15479_v50, %v13359_v23  ;;  %v5945_v50 = vsel %vm2443_vm8, %v20628_v18, %v13363_v3  ;;  %v13373_v11 = vunpack.i.l.bf16 %v20629_v15  ;;  %v16473_v3 = vld [vmem:[%s20027_s2 + $0x190] sm:$0xff]  ;;  %v13374_v31 = vunpack.i.h.bf16 %v20629_v15 }
 0x431   : > { %11971 = vmatmul.mubr.msk.f32.vlgmr.msra.gmra.mxu1 %vm3371_vm10, %v16419_v46  ;;  %12843 = vmatprep.subr.mxu0 %v5558_v6 }
 0x432   : > { %12868 = vmatpush3.msra.mxu1 %v5951_v53  ;;  %12844 = vmatpush3.msra.mxu0 %v5558_v6  ;;  %v20631_v53 = vld [vmem:[#allocation61_spill] sm:$0xff]  ;;  %v20632_v6 = vld [vmem:[#allocation66_spill] sm:$0xff]  ;;  %v5939_v14 = vsel %vm2443_vm8, %v20633_v58, %v13373_v11  ;;  %v13384_v11 = vunpack.i.h.bf16 %v15867_v26 }
 0x433   : > { %12869 = vmatprep.subr.mxu1 %v5948_v41  ;;  %12845 = vmatprep.subr.mxu0 %v5555_v19  ;;  %v13378_v49 = vunpack.i.l.bf16 %v20631_v53  ;;  %v13379_v21 = vunpack.i.h.bf16 %v20631_v53  ;;  %v11966_v53 = vld [vmem:[%s20027_s2 + $0x198] sm:$0xff] }
 0x434   : > { %12870 = vmatpush3.msra.mxu1 %v5948_v41  ;;  %5302 = vmatprep.mubr.f32.mxu0 %v20475_v28 }
 0x435   : > { %5683 = vmatprep.mubr.f32.mxu1 %v20475_v28  ;;  %12846 = vmatpush3.msra.mxu0 %v5555_v19  ;;  %v5546_v19 = vsel %vm2144_vm7, %v15598_v25, %v13378_v49  ;;  %v20638_v49 = vld [vmem:[#allocation22_spill] sm:$0xff] }
 0x436   : > { %12871 = vmatprep.subr.mxu1 %v5945_v50  ;;  %11949 = vmatmul.mubr.msk.f32.gmra.mxu0 %vm3371_vm10, %v16287_v48  ;;  %v5942_v48 = vsel %vm2443_vm8, %v20632_v6, %v13364_v0 }
 0x437   : > { %11972 = vmatmul.mubr.msk.f32.gmra.mxu1 %vm3371_vm10, %v16446_v39  ;;  %12847 = vmatprep.subr.mxu0 %v5552_v61  ;;  %v16461_v23 = vpop.permute.xlu0 %6674 }
 0x438   : > { %20630 = vst [vmem:[#allocation83_spill] sm:$0xff] %v16461_v23  ;;  %12872 = vmatpush3.msra.mxu1 %v5945_v50  ;;  %12848 = vmatpush3.msra.mxu0 %v5552_v61  ;;  %v13383_v50 = vunpack.i.l.bf16 %v15867_v26  ;;  %v5936_v61 = vsel %vm2443_vm8, %v15844_v30, %v13374_v31  ;;  %v11967_v31 = vld [vmem:[%s20027_s2 + $0x1a0] sm:$0xff] }
 0x439   : > { %12873 = vmatprep.subr.mxu1 %v5942_v48  ;;  %12849 = vmatprep.subr.mxu0 %v5549_v54  ;;  %v16572_v23 = vld [vmem:[%s20027_s2 + $0x1c0] sm:$0xff] }
 0x43a   : > { %12874 = vmatpush3.msra.mxu1 %v5942_v48  ;;  %5308 = vmatprep.mubr.f32.mxu0 %v20475_v28 }
 0x43b   : > { %5689 = vmatprep.mubr.f32.mxu1 %v20475_v28  ;;  %12850 = vmatpush3.msra.mxu0 %v5549_v54  ;;  %v16478_v41 = vpop.permute.xlu1 %6639 }
 0x43c   : > { %20634 = vst [vmem:[#allocation73_spill] sm:$0xff] %v16478_v41  ;;  %12875 = vmatprep.subr.mxu1 %v5939_v14  ;;  %11950 = vmatmul.mubr.msk.f32.gmra.mxu0 %vm3371_vm10, %v16311_v37  ;;  %v16485_v40 = vpop.permute.xlu0 %6664  ;;  %v5543_v37 = vsel %vm2144_vm7, %v15659_v10, %v13379_v21  ;;  %v5933_v10 = vsel %vm2443_vm8, %v20638_v49, %v13383_v50  ;;  %v16600_v41 = vld [vmem:[%s20027_s2 + $0x1d0] sm:$0xff] }
 0x43d   : > { %20635 = vst [vmem:[#allocation12_spill] sm:$0xff] %v16485_v40  ;;  %11973 = vmatmul.mubr.msk.f32.gmra.mxu1 %vm3371_vm10, %v16473_v3  ;;  %12851 = vmatprep.subr.mxu0 %v5546_v19  ;;  %v16490_v0 = vpop.f32.mrf.mxu1  ;;  %v20642_v40 = vld [vmem:[#allocation15_spill] sm:$0xff] }
 0x43e   : > { %12876 = vmatpush3.msra.mxu1 %v5939_v14  ;;  %12852 = vmatpush3.msra.mxu0 %v5546_v19  ;;  %v5930_v14 = vsel %vm2443_vm8, %v15857_v43, %v13384_v11 }
 0x43f   : > { %12877 = vmatprep.subr.mxu1 %v5936_v61  ;;  %12853 = vmatprep.subr.mxu0 %v5543_v37  ;;  %v16496_v25 = vpop.permute.xlu1 %6669  ;;  %v16498_v15 = vpop.f32.mrf.mxu1 }
 0x440   : > { %20636 = vst [vmem:[#allocation78_spill] sm:$0xff] %v16496_v25  ;;  %20637 = vst [vmem:[#allocation71_spill] sm:$0xff] %v16498_v15  ;;  %12878 = vmatpush3.msra.mxu1 %v5936_v61  ;;  %5314 = vmatprep.mubr.f32.mxu0 %v20475_v28  ;;  %v6310_v26 = vpop.permute.xlu0 %6309  ;;  %v16528_v61 = vpop.f32.mrf.mxu0  ;;  %v11970_v25 = vld [vmem:[%s20027_s2 + $0x1b8] sm:$0xff] }
 0x441   : > { %5695 = vmatprep.mubr.f32.mxu1 %v20475_v28  ;;  %12854 = vmatpush3.msra.mxu0 %v5543_v37  ;;  %v16508_v48 = vpop.f32.mrf.mxu1  ;;  %v6337_v19 = vsel %vm2742_vm9, %v6310_v26, %v15903_v7 }
 0x442   : > { %12879 = vmatprep.subr.mxu1 %v5933_v10  ;;  %11951 = vmatmul.mubr.msk.f32.gmra.mxu0 %vm3371_vm10, %v16322_v32 }
 0x443   : > { %11974 = vmatmul.mubr.msk.f32.gmra.mxu1 %vm3371_vm10, %v11966_v53  ;;  %5320 = vmatprep.mubr.f32.mxu0 %v20475_v28  ;;  %v5923_v54 = vpop.permute.xlu1 %5922  ;;  %v16514_v21 = vpop.f32.mrf.mxu1 }
 0x444   : > { %20639 = vst [vmem:[#allocation80_spill] sm:$0xff] %v16514_v21  ;;  %12880 = vmatpush3.msra.mxu1 %v5933_v10  ;;  %5701 = vmatprep.mubr.f32.mxu1 %v20475_v28  ;;  %v5950_v32 = vsel %vm2443_vm8, %v5923_v54, %v20624_v24  ;;  %v11968_v24 = vld [vmem:[%s20027_s2 + $0x1a8] sm:$0xff]  ;;  %v16542_v10 = vpop.f32.mrf.mxu0 }
 0x445   : > { %12881 = vmatprep.subr.mxu1 %v5930_v14  ;;  %6016 = vmatprep.subr.mxu0 %v5950_v32  ;;  %v16526_v50 = vpop.f32.mrf.mxu1  ;;  %20641 = vst [vmem:[#allocation4_spill] sm:$0xff] %v16542_v10 }
 0x446   : > { %12882 = vmatpush3.msra.mxu1 %v5930_v14  ;;  %11952 = vmatmul.mubr.msk.f32.gmra.mxu0 %vm3371_vm10, %v16345_v1  ;;  %v11969_v14 = vld [vmem:[%s20027_s2 + $0x1b0] sm:$0xff] }
 0x447   : > { %11975 = vmatmul.mubr.msk.f32.gmra.mxu1 %vm3371_vm10, %v11967_v31  ;;  %5326 = vmatprep.mubr.f32.mxu0 %v20475_v28  ;;  %v16534_v37 = vpop.f32.mrf.mxu1 }
 0x448   : > { %20640 = vst [vmem:[#allocation59_spill] sm:$0xff] %v16534_v37  ;;  %5707 = vmatprep.mubr.f32.mxu1 %v20475_v28  ;;  %6403 = vmatprep.subr.mxu1 %v6337_v19  ;;  %v16556_v19 = vpop.f32.mrf.mxu0 }
 0x449   : > { %v16540_v11 = vpop.f32.mrf.mxu1  ;;  %13456 = vrot.lane.b32.xlu0 %v20475_v28, %s13635_s21  ;;  %13421 = vrot.lane.b32.xlu1 %v20475_v28, %s13633_s19 }
 0x44a   : > { %11953 = vmatmul.mubr.msk.f32.gmra.mxu0 %vm3371_vm10, %v16360_v55  ;;  %v16578_v10 = vpop.f32.mrf.mxu0 }
 0x44b   : > { %11976 = vmatmul.mubr.msk.f32.gmra.mxu1 %vm3371_vm10, %v11968_v24  ;;  %5332 = vmatprep.mubr.f32.mxu0 %v20475_v28  ;;  %v16548_v1 = vpop.f32.mrf.mxu1  ;;  %20643 = vst [vmem:[#allocation6_spill] sm:$0xff] %v16578_v10 }
 0x44c   : > { %5713 = vmatprep.mubr.f32.mxu1 %v20475_v28  ;;  %v16604_v21 = vpop.f32.mrf.mxu0 }
 0x44d   : > { %v16554_v32 = vpop.f32.mrf.mxu1  ;;  %13461 = vrot.lane.b32.xlu0 %v20475_v28, %s13635_s21  ;;  %13426 = vrot.lane.b32.xlu1 %v20475_v28, %s13634_s20 }
 0x44e   : > { %11954 = vmatmul.mubr.msk.f32.gmra.mxu0 %vm3371_vm10, %v16383_v33  ;;  %v5949_v33 = vsel %vm2443_vm8, %v20642_v40, %v5923_v54  ;;  %v16592_v40 = vld [vmem:[%s20027_s2 + $0x1c8] sm:$0xff]  ;;  %v20645_v54 = vld [vmem:[#allocation55_spill] sm:$0xff] }
 0x44f   : > { %11977 = vmatmul.mubr.msk.f32.gmra.mxu1 %vm3371_vm10, %v11969_v14  ;;  %12855 = vmatprep.mubr.msk.f32.mxu0 %vm3371_vm10, %v16419_v46  ;;  %v16563_v55 = vpop.f32.mrf.mxu1 }
 0x450   : > { %5719 = vmatprep.mubr.f32.mxu1 %v20475_v28 }
 0x451   : > { %v16576_v15 = vpop.f32.mrf.mxu1  ;;  %13466 = vrot.lane.b32.xlu0 %v20475_v28, %s13636_s22  ;;  %13436 = vrot.lane.b32.xlu1 %v20475_v28, %s13634_s20 }
 0x452   : > { %12856 = vmatmul.mubr.msk.f32.vlgmr.msra.gmra.mxu0 %vm3371_vm10, %v16446_v39  ;;  %v5947_v39 = vsel %vm2443_vm8, %v20645_v54, %v20627_v47  ;;  %v20647_v47 = vld [vmem:[#allocation44_spill] sm:$0xff] }
 0x453   : > { %11978 = vmatmul.mubr.msk.f32.gmra.mxu1 %vm3371_vm10, %v11970_v25  ;;  %12858 = vmatprep.mubr.msk.f32.mxu0 %vm3371_vm10, %v16473_v3  ;;  %v16585_v46 = vpop.f32.mrf.mxu1  ;;  %v20646_v3 = vld [vmem:[#allocation24_spill] sm:$0xff]  ;;  %v5946_v10 = vsel %vm2443_vm8, %v20647_v47, %v20645_v54  ;;  %v16633_v47 = vpop.f32.mrf.mxu0 }
 0x454   : > { %20644 = vst [vmem:[#allocation48_spill] sm:$0xff] %v16585_v46  ;;  %12883 = vmatprep.mubr.msk.f32.mxu1 %vm3371_vm10, %v16572_v23  ;;  %6017 = vmatpush1.msra.mxu0 %v5949_v33  ;;  %v6336_v37 = vsel %vm2742_vm9, %v20646_v3, %v6310_v26  ;;  %v16620_v26 = vld [vmem:[%s20027_s2 + $0x1d8] sm:$0xff]  ;;  %v16631_v54 = vld [vmem:[%s20027_s2 + $0x1e0] sm:$0xff]  ;;  %20651 = vst [vmem:[#allocation40_spill] sm:$0xff] %v16633_v47 }
 0x455   : > { %6018 = vmatprep.subr.mxu0 %v5947_v39  ;;  %v20649_v39 = vld [vmem:[#allocation84_spill] sm:$0xff]  ;;  %v16669_v47 = vld [vmem:[%s20027_s2 + $0x1f0] sm:$0xff]  ;;  %13476 = vrot.lane.b32.xlu0 %v20475_v28, %s13636_s22 }
 0x456   : > { %12859 = vmatmul.mubr.msk.f32.gmra.mxu0 %vm3371_vm10, %v11966_v53  ;;  %v20648_v53 = vld [vmem:[#allocation21_spill] sm:$0xff]  ;;  %13451 = vrot.lane.b32.xlu1 %v20475_v28, %s13635_s21 }
 0x457   : > { %12884 = vmatmul.mubr.msk.f32.vlgmr.msra.gmra.mxu1 %vm3371_vm10, %v16592_v40  ;;  %12861 = vmatprep.mubr.msk.f32.mxu0 %vm3371_vm10, %v11967_v31  ;;  %v16610_v33 = vpop.f32.mrf.mxu1  ;;  %v6334_v3 = vsel %vm2742_vm9, %v20649_v39, %v20648_v53  ;;  %v20650_v31 = vld [vmem:[#allocation13_spill] sm:$0xff] }
 0x458   : > { %12886 = vmatprep.mubr.msk.f32.mxu1 %vm3371_vm10, %v16600_v41  ;;  %6404 = vmatpush1.msra.mxu1 %v6336_v37  ;;  %v6333_v46 = vsel %vm2742_vm9, %v20650_v31, %v20649_v39  ;;  %v20652_v39 = vld [vmem:[#allocation99_spill] sm:$0xff]  ;;  %v6328_v31 = vsel %vm2742_vm9, %v16055_v45, %v16053_v44 }
 0x459   : > { %6405 = vmatprep.subr.mxu1 %v6334_v3  ;;  %6019 = vmatpush1.msra.mxu0 %v5946_v10  ;;  %v16636_v37 = vpop.f32.mrf.mxu1  ;;  %v6331_v3 = vsel %vm2742_vm9, %v20652_v39, %v16005_v57  ;;  %v6330_v10 = vsel %vm2742_vm9, %v16032_v12, %v20652_v39  ;;  %v20654_v39 = vld [vmem:[#allocation103_spill] sm:$0xff] }
 0x45a   : > { %12862 = vmatmul.mubr.msk.f32.gmra.mxu0 %vm3371_vm10, %v11968_v24  ;;  %6406 = vmatpush1.msra.mxu1 %v6333_v46  ;;  %v16652_v24 = vld [vmem:[%s20027_s2 + $0x1e8] sm:$0xff]  ;;  %v20653_v46 = vld [vmem:[#allocation54_spill] sm:$0xff] }
 0x45b   : > { %12887 = vmatmul.mubr.msk.f32.gmra.mxu1 %vm3371_vm10, %v16620_v26  ;;  %12864 = vmatprep.mubr.msk.f32.mxu0 %vm3371_vm10, %v11969_v14  ;;  %v5944_v14 = vsel %vm2443_vm8, %v20653_v46, %v20628_v18 }
 0x45c   : > { %12889 = vmatprep.mubr.msk.f32.mxu1 %vm3371_vm10, %v16631_v54  ;;  %6407 = vmatprep.subr.mxu1 %v6331_v3  ;;  %v5943_v3 = vsel %vm2443_vm8, %v20654_v39, %v20653_v46  ;;  %v20655_v46 = vld [vmem:[#allocation92_spill] sm:$0xff] }
 0x45d   : > { %6408 = vmatpush1.msra.mxu1 %v6330_v10  ;;  %6020 = vmatprep.subr.mxu0 %v5944_v14  ;;  %v16660_v12 = vpop.f32.mrf.mxu0  ;;  %v6327_v10 = vsel %vm2742_vm9, %v16077_v56, %v16055_v45  ;;  %v6325_v14 = vsel %vm2742_vm9, %v16099_v42, %v16117_v59  ;;  %v20656_v56 = vld [vmem:[#allocation69_spill] sm:$0xff] }
 0x45e   : > { %12865 = vmatmul.mubr.msk.f32.gmra.mxu0 %vm3371_vm10, %v11970_v25  ;;  %6409 = vmatprep.subr.mxu1 %v6328_v31  ;;  %v16671_v18 = vpop.f32.mrf.mxu1  ;;  %v5941_v25 = vsel %vm2443_vm8, %v20655_v46, %v20632_v6  ;;  %v16687_v31 = vld [vmem:[%s20027_s2 + $0x1f8] sm:$0xff]  ;;  %v5940_v39 = vsel %vm2443_vm8, %v20656_v56, %v20655_v46  ;;  %v6324_v6 = vsel %vm2742_vm9, %v16182_v62, %v16099_v42 }
 0x45f   : > { %12890 = vmatmul.mubr.msk.f32.gmra.mxu1 %vm3371_vm10, %v16652_v24  ;;  %6021 = vmatpush1.msra.mxu0 %v5943_v3  ;;  %v16689_v45 = vpop.f32.mrf.mxu0  ;;  %v6322_v42 = vsel %vm2742_vm9, %v16210_v60, %v16192_v63  ;;  %v6321_v62 = vsel %vm2742_vm9, %v16218_v2, %v16210_v60  ;;  %v6319_v56 = vsel %vm2742_vm9, %v16242_v38, %v16301_v27 }
 0x460   : > { %6410 = vmatpush1.msra.mxu1 %v6327_v10  ;;  %6022 = vmatprep.subr.mxu0 %v5941_v25  ;;  %v16699_v3 = vpop.f32.mrf.mxu1  ;;  %v20657_v10 = vld [vmem:[#allocation91_spill] sm:$0xff]  ;;  %v6318_v2 = vsel %vm2742_vm9, %v16362_v34, %v16242_v38  ;;  %v6316_v38 = vsel %vm2742_vm9, %v16327_v51, %v16401_v13 }
 0x461   : > { %12892 = vmatprep.mubr.msk.f32.mxu1 %vm3371_vm10, %v16669_v47  ;;  %6411 = vmatprep.subr.mxu1 %v6325_v14  ;;  %v5938_v25 = vsel %vm2443_vm8, %v20657_v10, %v20633_v58  ;;  %v5937_v46 = vsel %vm2443_vm8, %v16073_v17, %v20657_v10  ;;  %v5935_v58 = vsel %vm2443_vm8, %v16093_v5, %v15844_v30  ;;  %v13388_v30 = vunpack.i.l.bf16 %v16432_v22 }
 0x462   : > { %6023 = vmatpush1.msra.mxu0 %v5940_v39  ;;  %6412 = vmatpush1.msra.mxu1 %v6324_v6  ;;  %v5934_v17 = vsel %vm2443_vm8, %v16123_v16, %v16093_v5  ;;  %v5932_v5 = vsel %vm2443_vm8, %v16167_v8, %v20638_v49  ;;  %v6315_v6 = vsel %vm2742_vm9, %v16372_v9, %v16327_v51  ;;  %v13389_v49 = vunpack.i.h.bf16 %v16432_v22 }
 0x463   : > { %12893 = vmatmul.mubr.msk.f32.gmra.mxu1 %vm3371_vm10, %v16687_v31  ;;  %6024 = vmatprep.subr.mxu0 %v5938_v25  ;;  %v13393_v10 = vunpack.i.l.bf16 %v16412_v4  ;;  %v6338_v51 = vsel %vm2742_vm9, %v15903_v7, %v13388_v30  ;;  %v13398_v25 = vunpack.i.l.bf16 %v16459_v36 }
 0x464   : > { %6413 = vmatprep.subr.mxu1 %v6322_v42  ;;  %6025 = vmatpush1.msra.mxu0 %v5937_v46  ;;  %v3816_v14 = vpop.f32.mrf.mxu0  ;;  %v6335_v9 = vsel %vm2742_vm9, %v20648_v53, %v13389_v49  ;;  %v13399_v46 = vunpack.i.h.bf16 %v16459_v36  ;;  %v13403_v42 = vunpack.i.l.bf16 %v16439_v52  ;;  %v16808_v36 = vld [vmem:[%s20027_s2 + $0x210] sm:$0xff] }
 0x465   : > { %6414 = vmatpush1.msra.mxu1 %v6321_v62  ;;  %6026 = vmatprep.subr.mxu0 %v5935_v58  ;;  %v16725_v39 = vadd.f32 %v3816_v14, %v16490_v0  ;;  %v12717_v60 = vpop.f32.mrf.mxu1  ;;  %v5931_v0 = vsel %vm2443_vm8, %v16233_v29, %v16167_v8  ;;  %v5929_v8 = vsel %vm2443_vm8, %v16262_v35, %v15857_v43  ;;  %v16764_v43 = vld [vmem:[%s20027_s2 + $0x200] sm:$0xff]  ;;  %v13404_v14 = vunpack.i.h.bf16 %v16439_v52 }
 0x466   : > { %6415 = vmatprep.subr.mxu1 %v6319_v56  ;;  %6027 = vmatpush1.msra.mxu0 %v5934_v17  ;;  %v16735_v16 = vadd.f32 %v12717_v60, %v16528_v61  ;;  %v16743_v34 = vpop.f32.mrf.mxu0  ;;  %v5928_v61 = vsel %vm2443_vm8, %v16272_v20, %v16262_v35  ;;  %v13394_v20 = vunpack.i.h.bf16 %v16412_v4  ;;  %v6332_v4 = vsel %vm2742_vm9, %v16005_v57, %v13393_v10  ;;  %v12015_v56 = vld [vmem:[%s20027_s2 + $0x220] sm:$0xff] }
 0x467   : > { %6416 = vmatpush1.msra.mxu1 %v6318_v2  ;;  %6028 = vmatprep.subr.mxu0 %v5932_v5  ;;  %20658 = vst [vmem:[#allocation38_spill] sm:$0xff] %v16743_v34  ;;  %v16752_v29 = vpop.f32.mrf.mxu1  ;;  %v6320_v52 = vsel %vm2742_vm9, %v16301_v27, %v13403_v42 }
 0x468   : > { %6417 = vmatprep.subr.mxu1 %v6316_v38  ;;  %6029 = vmatpush1.msra.mxu0 %v5931_v0  ;;  %20659 = vst [vmem:[#allocation43_spill] sm:$0xff] %v16752_v29  ;;  %v6329_v57 = vsel %vm2742_vm9, %v16053_v44, %v13394_v20  ;;  %v12017_v0 = vld [vmem:[%s20027_s2 + $0x230] sm:$0xff] }
 0x469   : > { %6418 = vmatpush1.msra.mxu1 %v6315_v6  ;;  %6030 = vmatprep.subr.mxu0 %v5929_v8 }
 0x46a   : > { %6031 = vmatpush1.msra.mxu0 %v5928_v61  ;;  %6064 = vmatprep.mubr.f32.mxu0 %v20475_v28 }
 0x46b   : > { %11995 = vmatmul.mubr.msk.f32.vlgmr.msra.gmra.mxu0 %vm3371_vm10, %v16572_v23  ;;  %12895 = vmatprep.subr.mxu0 %v6338_v51  ;;  %v3822_v35 = vpop.f32.mrf.mxu0 }
 0x46c   : > { %6451 = vmatprep.mubr.f32.mxu1 %v20475_v28  ;;  %12896 = vmatpush3.msra.mxu0 %v6338_v51  ;;  %v16773_v7 = vadd.f32 %v3822_v35, %v16508_v48  ;;  %v12720_v22 = vpop.f32.mrf.mxu1  ;;  %v16787_v48 = vld [vmem:[%s20027_s2 + $0x208] sm:$0xff] }
 0x46d   : > { %12019 = vmatmul.mubr.msk.f32.vlgmr.msra.gmra.mxu1 %vm3371_vm10, %v16764_v43  ;;  %12897 = vmatprep.subr.mxu0 %v6335_v9  ;;  %v16778_v23 = vadd.f32 %v12720_v22, %v16556_v19  ;;  %v16789_v53 = vpop.f32.mrf.mxu0 }
 0x46e   : > { %6070 = vmatprep.mubr.f32.mxu0 %v20475_v28  ;;  %12898 = vmatpush3.msra.mxu0 %v6335_v9  ;;  %v16793_v19 = vpop.f32.mrf.mxu1 }
 0x46f   : > { %11996 = vmatmul.mubr.msk.f32.gmra.mxu0 %vm3371_vm10, %v16592_v40  ;;  %12899 = vmatprep.subr.mxu0 %v6332_v4  ;;  %v6326_v40 = vsel %vm2742_vm9, %v16117_v59, %v13398_v25  ;;  %v6323_v59 = vsel %vm2742_vm9, %v16192_v63, %v13399_v46 }
 0x470   : > { %6457 = vmatprep.mubr.f32.mxu1 %v20475_v28  ;;  %12900 = vmatpush3.msra.mxu0 %v6332_v4 }
 0x471   : > { %12020 = vmatmul.mubr.msk.f32.gmra.mxu1 %vm3371_vm10, %v16787_v48  ;;  %12901 = vmatprep.subr.mxu0 %v6329_v57 }
 0x472   : > { %6076 = vmatprep.mubr.f32.mxu0 %v20475_v28  ;;  %12902 = vmatpush3.msra.mxu0 %v6329_v57  ;;  %v3828_v62 = vpop.f32.mrf.mxu0 }
 0x473   : > { %11997 = vmatmul.mubr.msk.f32.gmra.mxu0 %vm3371_vm10, %v16600_v41  ;;  %12903 = vmatprep.subr.mxu0 %v6326_v40  ;;  %v16813_v44 = vadd.f32 %v3828_v62, %v16526_v50  ;;  %v12723_v58 = vpop.f32.mrf.mxu1  ;;  %v16832_v50 = vld [vmem:[%s20027_s2 + $0x218] sm:$0xff] }
 0x474   : > { %6463 = vmatprep.mubr.f32.mxu1 %v20475_v28  ;;  %12904 = vmatpush3.msra.mxu0 %v6326_v40  ;;  %v16820_v17 = vadd.f32 %v12723_v58, %v16604_v21  ;;  %v16824_v41 = vpop.f32.mrf.mxu0  ;;  %v6317_v21 = vsel %vm2742_vm9, %v16401_v13, %v13404_v14 }
 0x475   : > { %12021 = vmatmul.mubr.msk.f32.gmra.mxu1 %vm3371_vm10, %v16808_v36  ;;  %12905 = vmatprep.subr.mxu0 %v6323_v59  ;;  %v16834_v63 = vpop.f32.mrf.mxu1 }
 0x476   : > { %6082 = vmatprep.mubr.f32.mxu0 %v20475_v28  ;;  %12906 = vmatpush3.msra.mxu0 %v6323_v59 }
 0x477   : > { %11998 = vmatmul.mubr.msk.f32.gmra.mxu0 %vm3371_vm10, %v16620_v26  ;;  %12907 = vmatprep.subr.mxu0 %v6320_v52 }
 0x478   : > { %6469 = vmatprep.mubr.f32.mxu1 %v20475_v28  ;;  %12908 = vmatpush3.msra.mxu0 %v6320_v52 }
 0x479   : > { %12022 = vmatmul.mubr.msk.f32.gmra.mxu1 %vm3371_vm10, %v16832_v50  ;;  %12909 = vmatprep.subr.mxu0 %v6317_v21  ;;  %v3834_v27 = vpop.f32.mrf.mxu0 }
 0x47a   : > { %6088 = vmatprep.mubr.f32.mxu0 %v20475_v28  ;;  %12910 = vmatpush3.msra.mxu0 %v6317_v21  ;;  %v3835_v26 = vadd.f32 %v3834_v27, %v16540_v11  ;;  %v12726_v60 = vpop.f32.mrf.mxu1  ;;  %v12016_v11 = vld [vmem:[%s20027_s2 + $0x228] sm:$0xff] }
 0x47b   : > { %11999 = vmatmul.mubr.msk.f32.gmra.mxu0 %vm3371_vm10, %v16631_v54  ;;  %6475 = vmatprep.mubr.f32.mxu1 %v20475_v28  ;;  %v16852_v13 = vadd.f32 %v12726_v60, %v16660_v12  ;;  %v16855_v2 = vpop.f32.mrf.mxu0 }
 0x47c   : > { %6094 = vmatprep.mubr.f32.mxu0 %v20475_v28  ;;  %v16858_v30 = vpop.f32.mrf.mxu1  ;;  %13481 = vrot.lane.b32.xlu0 %v20475_v28, %s13636_s22 }
 0x47d   : > { %12023 = vmatmul.mubr.msk.f32.gmra.mxu1 %vm3371_vm10, %v12015_v56  ;;  %13471 = vrot.lane.b32.xlu1 %v20475_v28, %s13636_s22 }
 0x47e   : > { %6481 = vmatprep.mubr.f32.mxu1 %v20475_v28 }
 0x47f   : > { %12000 = vmatmul.mubr.msk.f32.gmra.mxu0 %vm3371_vm10, %v16652_v24 }
 0x480   : > { %6100 = vmatprep.mubr.f32.mxu0 %v20475_v28  ;;  %v3840_v54 = vpop.f32.mrf.mxu0  ;;  %13486 = vrot.lane.b32.xlu0 %v20475_v28, %s13637_s23 }
 0x481   : > { %12024 = vmatmul.mubr.msk.f32.gmra.mxu1 %vm3371_vm10, %v12016_v11  ;;  %v3841_v12 = vadd.f32 %v3840_v54, %v16554_v32  ;;  %v4179_v5 = vpop.f32.mrf.mxu1  ;;  %13496 = vrot.lane.b32.xlu1 %v20475_v28, %s13637_s23 }
 0x482   : > { %6487 = vmatprep.mubr.f32.mxu1 %v20475_v28  ;;  %v16874_v38 = vadd.f32 %v4179_v5, %v16725_v39  ;;  %v16876_v6 = vpop.f32.mrf.mxu0  ;;  %v12018_v39 = vld [vmem:[%s20027_s2 + $0x238] sm:$0xff] }
 0x483   : > { %12001 = vmatmul.mubr.msk.f32.gmra.mxu0 %vm3371_vm10, %v16669_v47  ;;  %v16880_v24 = vpop.f32.mrf.mxu1 }
 0x484   : > { %20660 = vst [vmem:[#allocation30_spill] sm:$0xff] %v16880_v24  ;;  %6106 = vmatprep.mubr.f32.mxu0 %v20475_v28  ;;  %v3846_v32 = vpop.f32.mrf.mxu0  ;;  %13491 = vrot.lane.b32.xlu0 %v20475_v28, %s13637_s23 }
 0x485   : > { %12025 = vmatmul.mubr.msk.f32.gmra.mxu1 %vm3371_vm10, %v12017_v0  ;;  %v3847_v49 = vadd.f32 %v3846_v32, %v16576_v15  ;;  %v4185_v8 = vpop.f32.mrf.mxu1 }
 0x486   : > { %6493 = vmatprep.mubr.f32.mxu1 %v20475_v28  ;;  %v16890_v61 = vadd.f32 %v4185_v8, %v16773_v7  ;;  %v16892_v47 = vpop.f32.mrf.mxu0 }
 0x487   : > { %12002 = vmatmul.mubr.msk.f32.gmra.mxu0 %vm3371_vm10, %v16687_v31  ;;  %v16896_v10 = vpop.f32.mrf.mxu1 }
 0x488   : > { %20661 = vst [vmem:[#allocation23_spill] sm:$0xff] %v16896_v10  ;;  %12911 = vmatprep.mubr.msk.f32.mxu0 %vm3371_vm10, %v16764_v43  ;;  %v3852_v15 = vpop.f32.mrf.mxu0  ;;  %13501 = vrot.lane.b32.xlu0 %v20475_v28, %s13637_s23 }
 0x489   : > { %12026 = vmatmul.mubr.msk.f32.gmra.mxu1 %vm3371_vm10, %v12018_v39  ;;  %v3853_v51 = vadd.f32 %v3852_v15, %v16610_v33  ;;  %v4191_v35 = vpop.f32.mrf.mxu1 }
 0x48a   : > { %v16905_v20 = vadd.f32 %v4191_v35, %v16813_v44  ;;  %v16907_v9 = vpop.f32.mrf.mxu0 }
 0x48b   : > { %12912 = vmatmul.mubr.msk.f32.vlgmr.msra.gmra.mxu0 %vm3371_vm10, %v16787_v48  ;;  %v16911_v31 = vpop.f32.mrf.mxu1 }
 0x48c   : > { %20662 = vst [vmem:[#allocation10_spill] sm:$0xff] %v16911_v31  ;;  %12914 = vmatprep.mubr.msk.f32.mxu0 %vm3371_vm10, %v16808_v36  ;;  %v3858_v43 = vpop.f32.mrf.mxu0 }
 0x48d   : > { %v3859_v33 = vadd.f32 %v3858_v43, %v16671_v18  ;;  %v4197_v7 = vpop.f32.mrf.mxu1 }
 0x48e   : > { %v16918_v22 = vadd.f32 %v4197_v7, %v3835_v26  ;;  %v16920_v25 = vpop.f32.mrf.mxu0 }
 0x48f   : > { %12915 = vmatmul.mubr.msk.f32.gmra.mxu0 %vm3371_vm10, %v16832_v50  ;;  %v16924_v4 = vpop.f32.mrf.mxu1 }
 0x490   : > { %12917 = vmatprep.mubr.msk.f32.mxu0 %vm3371_vm10, %v12015_v56  ;;  %v12745_v48 = vpop.f32.mrf.mxu0 }
 0x491   : > { %v4203_v46 = vpop.f32.mrf.mxu1  ;;  %v4336_v57 = vadd.f32 %v12745_v48, %v16735_v16 }
 0x492   : > { %v16930_v18 = vadd.f32 %v4203_v46, %v3841_v12  ;;  %v16932_v42 = vpop.f32.mrf.mxu0 }
 0x493   : > { %20663 = vst [vmem:[#allocation63_spill] sm:$0xff] %v16932_v42  ;;  %12918 = vmatmul.mubr.msk.f32.gmra.mxu0 %vm3371_vm10, %v12016_v11  ;;  %v16935_v40 = vpop.f32.mrf.mxu1 }
 0x494   : > { %12920 = vmatprep.mubr.msk.f32.mxu0 %vm3371_vm10, %v12017_v0  ;;  %v12748_v36 = vpop.f32.mrf.mxu0 }
 0x495   : > { %v4209_v62 = vpop.f32.mrf.mxu1  ;;  %v4342_v44 = vadd.f32 %v12748_v36, %v16778_v23 }
 0x496   : > { %v4346_v58 = vadd.f32 %v4209_v62, %v3847_v49  ;;  %v16941_v14 = vpop.f32.mrf.mxu0 }
 0x497   : > { %12921 = vmatmul.mubr.msk.f32.gmra.mxu0 %vm3371_vm10, %v12018_v39  ;;  %v16944_v16 = vpop.f32.mrf.mxu1 }
 0x498   : > { %7034 = vmatprep.mubr.f32.mxu0 %v20475_v28 }
 0x49a   : > { %v4215_v59 = vpop.f32.mrf.mxu1  ;;  %v12751_v52 = vpop.f32.mrf.mxu0 }
 0x49b   : > { %v4349_v50 = vadd.f32 %v4215_v59, %v3853_v51  ;;  %v4348_v21 = vadd.f32 %v12751_v52, %v16820_v17 }
 0x49c   : > { %v16950_v27 = vpop.f32.mrf.mxu1  ;;  %v16952_v23 = vpop.f32.mrf.mxu0 }
 0x4a0   : > { %v4221_v56 = vpop.f32.mrf.mxu1  ;;  %v12754_v26 = vpop.f32.mrf.mxu0 }
 0x4a1   : > { %v4352_v60 = vadd.f32 %v4221_v56, %v3859_v33  ;;  %v4354_v11 = vadd.f32 %v12754_v26, %v16852_v13 }
 0x4a2   : > { %v16959_v54 = vpop.f32.mrf.mxu1  ;;  %v16961_v12 = vpop.f32.mrf.mxu0 }
 0x4a6   : > { %v4566_v17 = vpop.f32.mrf.mxu0  ;;  %v12773_v5 = vpop.f32.mrf.mxu1 }
 0x4a7   : > { %v4718_v0 = vadd.f32 %v4566_v17, %v16874_v38  ;;  %v4723_v32 = vadd.f32 %v12773_v5, %v4336_v57 }
 0x4a8   : > { %v16966_v49 = vpop.f32.mrf.mxu0  ;;  %v16968_v8 = vpop.f32.mrf.mxu1 }
 0x4a9   : > { %20664 = vst [vmem:[#allocation53_spill] sm:$0xff] %v16966_v49  ;;  %20665 = vst [vmem:[#allocation33_spill] sm:$0xff] %v16968_v8 }
 0x4ac   : > { %v4572_v13 = vpop.f32.mrf.mxu0  ;;  %v12776_v39 = vpop.f32.mrf.mxu1 }
 0x4ad   : > { %v4721_v15 = vadd.f32 %v4572_v13, %v16890_v61  ;;  %v4729_v51 = vadd.f32 %v12776_v39, %v4342_v44 }
 0x4ae   : > { %v16975_v35 = vpop.f32.mrf.mxu0  ;;  %v16977_v43 = vpop.f32.mrf.mxu1 }
 0x4af   : > { %20666 = vst [vmem:[#allocation107_spill] sm:$0xff] %v16975_v35 }
 0x4b2   : > { %v4578_v38 = vpop.f32.mrf.mxu0  ;;  %v12779_v33 = vpop.f32.mrf.mxu1 }
 0x4b3   : > { %v4724_v7 = vadd.f32 %v4578_v38, %v16905_v20  ;;  %v4735_v48 = vadd.f32 %v12779_v33, %v4348_v21 }
 0x4b4   : > { %v16982_v46 = vpop.f32.mrf.mxu0  ;;  %v16984_v57 = vpop.f32.mrf.mxu1 }
 0x4b5   : > { %20667 = vst [vmem:[#allocation86_spill] sm:$0xff] %v16982_v46 }
 0x4b8   : > { %v4584_v61 = vpop.f32.mrf.mxu0  ;;  %v12782_v36 = vpop.f32.mrf.mxu1 }
 0x4b9   : > { %v4727_v62 = vadd.f32 %v4584_v61, %v16918_v22  ;;  %v4741_v44 = vadd.f32 %v12782_v36, %v4354_v11 }
 0x4ba   : > { %v16991_v59 = vpop.f32.mrf.mxu0  ;;  %v16993_v52 = vpop.f32.mrf.mxu1 }
 0x4be   : > { %v4590_v20 = vpop.f32.mrf.mxu0  ;;  %v4841_v21 = vpop.f32.mrf.mxu1 }
 0x4bf   : > { %v4730_v56 = vadd.f32 %v4590_v20, %v16930_v18  ;;  %v17000_v26 = vadd.f32 %v4841_v21, %v4718_v0 }
 0x4c0   : > { %v17002_v17 = vpop.f32.mrf.mxu0  ;;  %v17004_v22 = vpop.f32.mrf.mxu1 }
 0x4c1   : > { %20668 = vst [vmem:[#allocation93_spill] sm:$0xff] %v17000_v26  ;;  %20669 = vst [vmem:[#allocation106_spill] sm:$0xff] %v17004_v22 }
 0x4c2   : > { %v4596_v11 = vpop.f32.mrf.mxu0 }
 0x4c3   : > { %v4733_v5 = vadd.f32 %v4596_v11, %v4346_v58  ;;  %v4847_v13 = vpop.f32.mrf.mxu1 }
 0x4c4   : > { %v4996_v39 = vadd.f32 %v4847_v13, %v4721_v15  ;;  %v17008_v38 = vpop.f32.mrf.mxu0 }
 0x4c5   : > { %v17010_v33 = vpop.f32.mrf.mxu1 }
 0x4c6   : > { %20670 = vst [vmem:[#allocation29_spill] sm:$0xff] %v17010_v33  ;;  %v4602_v61 = vpop.f32.mrf.mxu0 }
 0x4c7   : > { %v4736_v18 = vadd.f32 %v4602_v61, %v4349_v50  ;;  %v4853_v0 = vpop.f32.mrf.mxu1 }
 0x4c8   : > { %v4999_v36 = vadd.f32 %v4853_v0, %v4724_v7  ;;  %v17014_v20 = vpop.f32.mrf.mxu0 }
 0x4c9   : > { %v17016_v21 = vpop.f32.mrf.mxu1 }
 0x4ca   : > { %20671 = vst [vmem:[#allocation101_spill] sm:$0xff] %v17016_v21  ;;  %v4608_v22 = vpop.f32.mrf.mxu0 }
 0x4cb   : > { %v4739_v58 = vadd.f32 %v4608_v22, %v4352_v60  ;;  %v4859_v15 = vpop.f32.mrf.mxu1 }
 0x4cc   : > { %v5002_v11 = vadd.f32 %v4859_v15, %v4727_v62  ;;  %v17020_v13 = vpop.f32.mrf.mxu0 }
 0x4cd   : > { %v17022_v49 = vpop.f32.mrf.mxu1 }
 0x4ce   : > { %v12801_v24 = vpop.f32.mrf.mxu0 }
 0x4cf   : > { %v4865_v50 = vpop.f32.mrf.mxu1  ;;  %v4998_v7 = vadd.f32 %v12801_v24, %v4723_v32 }
 0x4d0   : > { %v5005_v61 = vadd.f32 %v4865_v50, %v4730_v56  ;;  %v17026_v0 = vpop.f32.mrf.mxu0 }
 0x4d1   : > { %20672 = vst [vmem:[#allocation52_spill] sm:$0xff] %v17026_v0  ;;  %v17028_v34 = vpop.f32.mrf.mxu1 }
 0x4d2   : > { %v12804_v8 = vpop.f32.mrf.mxu0 }
 0x4d3   : > { %v4871_v60 = vpop.f32.mrf.mxu1  ;;  %v5004_v62 = vadd.f32 %v12804_v8, %v4729_v51 }
 0x4d4   : > { %v17032_v22 = vadd.f32 %v4871_v60, %v4733_v5  ;;  %v17034_v15 = vpop.f32.mrf.mxu0 }
 0x4d5   : > { %v17036_v42 = vpop.f32.mrf.mxu1 }
 0x4d6   : > { %v12807_v29 = vpop.f32.mrf.mxu0 }
 0x4d7   : > { %v4877_v21 = vpop.f32.mrf.mxu1  ;;  %v5010_v24 = vadd.f32 %v12807_v29, %v4735_v48 }
 0x4d8   : > { %v17038_v32 = vadd.f32 %v4877_v21, %v4736_v18  ;;  %v17040_v56 = vpop.f32.mrf.mxu0 }
 0x4d9   : > { %v17042_v50 = vpop.f32.mrf.mxu1 }
 0x4da   : > { %v12810_v0 = vpop.f32.mrf.mxu0 }
 0x4db   : > { %v4883_v46 = vpop.f32.mrf.mxu1  ;;  %v5016_v28 = vadd.f32 %v12810_v0, %v4741_v44 }
 0x4dc   : > { %v17044_v33 = vadd.f32 %v4883_v46, %v4739_v58  ;;  %v17056_v18 = vpop.f32.mrf.mxu0 }
 0x4dd   : > { %v17046_v8 = vpop.f32.mrf.mxu1 }
 0x4df   : > { %v12829_v51 = vpop.f32.mrf.mxu1 }
 0x4e0   : > { %v17048_v5 = vadd.f32 %v12829_v51, %v4998_v7 }
 0x4e1   : > { %v17050_v60 = vpop.f32.mrf.mxu1 }
 0x4e2   : > { %20673 = vst [vmem:[#allocation95_spill] sm:$0xff] %v17048_v5  ;;  %20674 = vst [vmem:[#allocation88_spill] sm:$0xff] %v17050_v60 }
 0x4e3   : > { %v12832_v31 = vpop.f32.mrf.mxu1 }
 0x4e4   : > { %v17052_v29 = vadd.f32 %v12832_v31, %v5004_v62 }
 0x4e5   : > { %v17054_v48 = vpop.f32.mrf.mxu1 }
 0x4e6   : > { %20675 = vst [vmem:[#allocation70_spill] sm:$0xff] %v17052_v29 }
 0x4e7   : > { %v12835_v21 = vpop.f32.mrf.mxu1 }
 0x4e8   : > { %v17058_v35 = vadd.f32 %v12835_v21, %v5010_v24 }
 0x4e9   : > { %v17060_v44 = vpop.f32.mrf.mxu1  ;;  %v17062_v46 = vpop.f32.mrf.mxu0 }
 0x4ea   : > { %20676 = vst [vmem:[#allocation81_spill] sm:$0xff] %v17062_v46 }
 0x4eb   : > { %v12838_v58 = vpop.f32.mrf.mxu1  ;;  %v17066_v7 = vpop.f32.mrf.mxu0 }
 0x4ec   : > { %v17064_v0 = vadd.f32 %v12838_v58, %v5016_v28  ;;  %20677 = vst [vmem:[#allocation72_spill] sm:$0xff] %v17066_v7  ;;  %v3837_v58 = vadd.f32 %v16855_v2, %v16548_v1 }
 0x4ed   : > { %v17068_v51 = vpop.f32.mrf.mxu1 }
 0x4f0   : > { %v5298_v31 = vpop.f32.mrf.mxu0 }
 0x4f1   : > { %v5447_v62 = vadd.f32 %v5298_v31, %v4996_v39  ;;  %v17070_v29 = vpop.f32.mrf.mxu1 }
 0x4f2   : > { %20678 = vst [vmem:[#allocation77_spill] sm:$0xff] %v17070_v29  ;;  %v17072_v5 = vpop.f32.mrf.mxu0 }
 0x4f3   : > { %20679 = vst [vmem:[#allocation62_spill] sm:$0xff] %v17072_v5  ;;  %v17074_v60 = vpop.f32.mrf.mxu1  ;;  %v3843_v5 = vadd.f32 %v16876_v6, %v16563_v55 }
 0x4f4   : > { %20680 = vst [vmem:[#allocation19_spill] sm:$0xff] %v17074_v60  ;;  %v4341_v60 = vadd.f32 %v16924_v4, %v3837_v58 }
 0x4f5   : > { %v4344_v1 = vadd.f32 %v16935_v40, %v3843_v5 }
 0x4f6   : > { %v5304_v24 = vpop.f32.mrf.mxu0 }
 0x4f7   : > { %v5450_v21 = vadd.f32 %v5304_v24, %v4999_v36  ;;  %v5685_v26 = vpop.f32.mrf.mxu1  ;;  %v20683_v24 = vld [vmem:[#allocation48_spill] sm:$0xff]  ;;  %v4731_v55 = vadd.f32 %v17002_v17, %v4344_v1 }
 0x4f8   : > { %v17076_v10 = vadd.f32 %v5685_v26, %v5447_v62  ;;  %v17078_v46 = vpop.f32.mrf.mxu0  ;;  %v4728_v62 = vadd.f32 %v16991_v59, %v4341_v60  ;;  %v3855_v59 = vadd.f32 %v16907_v9, %v16636_v37  ;;  %v3861_v37 = vadd.f32 %v16920_v25, %v16699_v3 }
 0x4f9   : > { %20682 = vst [vmem:[#allocation27_spill] sm:$0xff] %v17078_v46  ;;  %v17080_v28 = vpop.f32.mrf.mxu1 }
 0x4fa   : > { %20681 = vst [vmem:[#allocation57_spill] sm:$0xff] %v17076_v10  ;;  %v3849_v10 = vadd.f32 %v16892_v47, %v20683_v24  ;;  %v5003_v2 = vadd.f32 %v17022_v49, %v4728_v62  ;;  %v5006_v47 = vadd.f32 %v17028_v34, %v4731_v55 }
 0x4fc   : > { %v5310_v7 = vpop.f32.mrf.mxu0  ;;  %v4347_v60 = vadd.f32 %v16944_v16, %v3849_v10  ;;  %v4350_v10 = vadd.f32 %v16950_v27, %v3855_v59  ;;  %v20684_v59 = vld [vmem:[#allocation6_spill] sm:$0xff] }
 0x4fd   : > { %v5453_v39 = vadd.f32 %v5310_v7, %v5002_v11  ;;  %v5691_v31 = vpop.f32.mrf.mxu1 }
 0x4fe   : > { %v17087_v29 = vadd.f32 %v5691_v31, %v5450_v21  ;;  %v5312_v36 = vpop.f32.mrf.mxu0  ;;  %v4734_v17 = vadd.f32 %v17008_v38, %v4347_v60  ;;  %v4737_v38 = vadd.f32 %v17014_v20, %v4350_v10  ;;  %v3940_v60 = vadd.f32 %v16793_v19, %v20684_v59 }
 0x4ff   : > { %v17089_v26 = vpop.f32.mrf.mxu1  ;;  %v5454_v6 = vadd.f32 %v5312_v36, %v5003_v2 }
 0x500   : > { %v5009_v34 = vadd.f32 %v17036_v42, %v4734_v17  ;;  %v5012_v3 = vadd.f32 %v17042_v50, %v4737_v38 }
 0x502   : > { %v5316_v11 = vpop.f32.mrf.mxu0 }
 0x503   : > { %v5456_v7 = vadd.f32 %v5316_v11, %v5005_v61  ;;  %v5697_v46 = vpop.f32.mrf.mxu1 }
 0x504   : > { %v17097_v4 = vadd.f32 %v5697_v46, %v5453_v39  ;;  %v5318_v21 = vpop.f32.mrf.mxu0 }
 0x505   : > { %v5699_v58 = vpop.f32.mrf.mxu1  ;;  %v5457_v31 = vadd.f32 %v5318_v21, %v5006_v47 }
 0x506   : > { %v17103_v40 = vadd.f32 %v5699_v58, %v5454_v6  ;;  %v5322_v49 = vpop.f32.mrf.mxu0 }
 0x507   : > { %v5459_v61 = vadd.f32 %v5322_v49, %v17032_v22  ;;  %v5703_v5 = vpop.f32.mrf.mxu1 }
 0x508   : > { %v17107_v46 = vadd.f32 %v5703_v5, %v5456_v7  ;;  %v5324_v39 = vpop.f32.mrf.mxu0  ;;  %v4353_v7 = vadd.f32 %v16959_v54, %v3861_v37 }
 0x509   : > { %v5705_v36 = vpop.f32.mrf.mxu1  ;;  %v5460_v24 = vadd.f32 %v5324_v39, %v5009_v34 }
 0x50a   : > { %v17113_v9 = vadd.f32 %v5705_v36, %v5457_v31  ;;  %v5328_v16 = vpop.f32.mrf.mxu0  ;;  %v20685_v31 = vld [vmem:[#allocation40_spill] sm:$0xff] }
 0x50b   : > { %v5462_v22 = vadd.f32 %v5328_v16, %v17038_v32  ;;  %v5709_v62 = vpop.f32.mrf.mxu1  ;;  %v4740_v32 = vadd.f32 %v17020_v13, %v4353_v7  ;;  %v3950_v39 = vadd.f32 %v16834_v63, %v20685_v31  ;;  %v20691_v31 = vld [vmem:[#allocation107_spill] sm:$0xff] }
 0x50c   : > { %v17117_v1 = vadd.f32 %v5709_v62, %v5459_v61  ;;  %v5330_v2 = vpop.f32.mrf.mxu0 }
 0x50d   : > { %v5711_v11 = vpop.f32.mrf.mxu1  ;;  %v5463_v6 = vadd.f32 %v5330_v2, %v5012_v3  ;;  %v5015_v54 = vadd.f32 %v17046_v8, %v4740_v32  ;;  %v4345_v10 = vadd.f32 %v16952_v23, %v3950_v39 }
 0x50e   : > { %v17121_v25 = vadd.f32 %v5711_v11, %v5460_v24  ;;  %v5334_v42 = vpop.f32.mrf.mxu0 }
 0x50f   : > { %v5465_v27 = vadd.f32 %v5334_v42, %v17044_v33  ;;  %v5715_v55 = vpop.f32.mrf.mxu1  ;;  %v4339_v33 = vadd.f32 %v16941_v14, %v3940_v60  ;;  %v4732_v63 = vadd.f32 %v16984_v57, %v4345_v10 }
 0x510   : > { %v17125_v21 = vadd.f32 %v5715_v55, %v5462_v22  ;;  %v5336_v20 = vpop.f32.mrf.mxu0  ;;  %v3960_v22 = vadd.f32 %v16858_v30, %v16689_v45 }
 0x511   : > { %v5717_v58 = vpop.f32.mrf.mxu1  ;;  %v5466_v61 = vadd.f32 %v5336_v20, %v5015_v54  ;;  %v4726_v19 = vadd.f32 %v16977_v43, %v4339_v33  ;;  %v5007_v23 = vadd.f32 %v17040_v56, %v4732_v63  ;;  %v20686_v20 = vld [vmem:[#allocation80_spill] sm:$0xff] }
 0x512   : > { %v17130_v47 = vadd.f32 %v5717_v58, %v5463_v6  ;;  %v17132_v50 = vpop.f32.mrf.mxu0  ;;  %v4351_v2 = vadd.f32 %v16961_v12, %v3960_v22  ;;  %v20694_v22 = vld [vmem:[#allocation29_spill] sm:$0xff] }
 0x513   : > { %v5721_v49 = vpop.f32.mrf.mxu1  ;;  %v5001_v14 = vadd.f32 %v17034_v15, %v4726_v19  ;;  %v5458_v45 = vadd.f32 %v17060_v44, %v5007_v23  ;;  %v3825_v44 = vadd.f32 %v16789_v53, %v20686_v20  ;;  %v20692_v19 = vld [vmem:[#allocation77_spill] sm:$0xff]  ;;  %v20693_v53 = vld [vmem:[#allocation10_spill] sm:$0xff] }
 0x514   : > { %v17135_v5 = vadd.f32 %v5721_v49, %v5465_v27  ;;  %v17137_v13 = vpop.f32.mrf.mxu0  ;;  %v4738_v3 = vadd.f32 %v16993_v52, %v4351_v2  ;;  %v20688_v49 = vld [vmem:[#allocation23_spill] sm:$0xff]  ;;  %v20695_v2 = vld [vmem:[#allocation86_spill] sm:$0xff] }
 0x515   : > { %v5723_v17 = vpop.f32.mrf.mxu1  ;;  %v5452_v43 = vadd.f32 %v17054_v48, %v5001_v14  ;;  %v4335_v33 = vadd.f32 %v20688_v49, %v3825_v44  ;;  %v20696_v23 = vld [vmem:[#allocation62_spill] sm:$0xff]  ;;  %v20700_v44 = vld [vmem:[#allocation64_spill] sm:$0xff] }
 0x516   : > { %v17142_v36 = vadd.f32 %v5723_v17, %v5466_v61  ;;  %v17144_v8 = vpop.f32.mrf.mxu0  ;;  %v20689_v61 = vld [vmem:[#allocation93_spill] sm:$0xff] }
 0x517   : > { %v17146_v37 = vpop.f32.mrf.mxu1  ;;  %v20690_v17 = vld [vmem:[#allocation81_spill] sm:$0xff]  ;;  %v4722_v39 = vadd.f32 %v20691_v31, %v4335_v33  ;;  %v20701_v31 = vld [vmem:[#allocation4_spill] sm:$0xff] }
 0x518   : > { %v5802_v34 = vpop.f32.mrf.mxu0 }
 0x519   : > { %v17150_v16 = vpop.f32.mrf.mxu1  ;;  %v5839_v15 = vadd.f32 %v5802_v34, %v5452_v43  ;;  %v4997_v63 = vadd.f32 %v20694_v22, %v4722_v39  ;;  %v20702_v39 = vld [vmem:[#allocation43_spill] sm:$0xff] }
 0x51a   : > { %v12863_v62 = vpop.f32.mrf.mxu0 }
 0x51b   : > { %v5848_v38 = vadd.f32 %v12863_v62, %v17058_v35  ;;  %v17157_v24 = vpop.f32.mrf.mxu1  ;;  %v5013_v35 = vadd.f32 %v17056_v18, %v4738_v3  ;;  %v20687_v18 = vld [vmem:[#allocation59_spill] sm:$0xff]  ;;  %v20697_v3 = vld [vmem:[#allocation101_spill] sm:$0xff] }
 0x51c   : > { %v5812_v11 = vpop.f32.mrf.mxu0  ;;  %v3831_v54 = vadd.f32 %v16824_v41, %v20687_v18 }
 0x51d   : > { %v6189_v7 = vpop.f32.mrf.mxu1  ;;  %v5845_v27 = vadd.f32 %v5812_v11, %v5458_v45  ;;  %v5464_v32 = vadd.f32 %v17068_v51, %v5013_v35  ;;  %v5444_v51 = vadd.f32 %v20690_v17, %v20689_v61 }
 0x51e   : > { %v17163_v30 = vadd.f32 %v6189_v7, %v5839_v15  ;;  %v12866_v57 = vpop.f32.mrf.mxu0  ;;  %v4338_v34 = vadd.f32 %v20693_v53, %v3831_v54  ;;  %v5448_v15 = vadd.f32 %v20696_v23, %v4997_v63  ;;  %v17245_v23 = vpop.permute.xlu0 %6654 }
 0x51f   : > { %v5854_v48 = vadd.f32 %v12866_v57, %v17064_v0  ;;  %v12891_v42 = vpop.f32.mrf.mxu1  ;;  %v5831_v10 = vadd.f32 %v20692_v19, %v5444_v51  ;;  %v3930_v19 = vadd.f32 %v20702_v39, %v20701_v31 }
 0x520   : > { %v17167_v55 = vadd.f32 %v12891_v42, %v5848_v38  ;;  %v5822_v12 = vpop.f32.mrf.mxu0  ;;  %v4725_v41 = vadd.f32 %v20695_v2, %v4338_v34  ;;  %v5835_v57 = vadd.f32 %v17080_v28, %v5448_v15  ;;  %v20704_v34 = vld [vmem:[#allocation33_spill] sm:$0xff] }
 0x521   : > { %v6199_v56 = vpop.f32.mrf.mxu1  ;;  %v5851_v58 = vadd.f32 %v5822_v12, %v5464_v32 }
 0x522   : > { %v17170_v6 = vadd.f32 %v6199_v56, %v5845_v27  ;;  %v5000_v45 = vadd.f32 %v20697_v3, %v4725_v41  ;;  %v20699_v27 = vld [vmem:[#allocation27_spill] sm:$0xff] }
 0x523   : > { %v12894_v52 = vpop.f32.mrf.mxu1  ;;  %v20707_v3 = vld [vmem:[#allocation71_spill] sm:$0xff] }
 0x524   : > { %v17174_v59 = vadd.f32 %v12894_v52, %v5854_v48  ;;  %v20698_v48 = vld [vmem:[#allocation73_spill] sm:$0xff]  ;;  %v5451_v12 = vadd.f32 %v20699_v27, %v5000_v45  ;;  %v20708_v45 = vld [vmem:[#allocation38_spill] sm:$0xff] }
 0x525   : > { %v6209_v0 = vpop.f32.mrf.mxu1 }
 0x526   : > { %v17176_v60 = vadd.f32 %v6209_v0, %v5851_v58  ;;  %v5838_v20 = vadd.f32 %v17089_v26, %v5451_v12 }
 0x52b   : > { %v6066_v14 = vpop.f32.mrf.mxu0 }
 0x52c   : > { %v6218_v43 = vadd.f32 %v6066_v14, %v5831_v10  ;;  %v20703_v14 = vld [vmem:[#allocation63_spill] sm:$0xff] }
 0x52d   : > { %v17187_v62 = vpop.f32.mrf.mxu0  ;;  %v6453_v38 = vpop.f32.mrf.mxu1  ;;  %v4333_v53 = vadd.f32 %v20703_v14, %v3930_v19  ;;  %v20713_v19 = vld [vmem:[#allocation72_spill] sm:$0xff] }
 0x52e   : > { %v6605_v11 = vadd.f32 %v6453_v38, %v6218_v43  ;;  %v20705_v38 = vld [vmem:[#allocation52_spill] sm:$0xff] }
 0x52f   : > { %v17191_v7 = vpop.f32.mrf.mxu0  ;;  %v4720_v22 = vadd.f32 %v20704_v34, %v4333_v53  ;;  %v6455_v34 = vpop.f32.mrf.mxu1 }
 0x530   : > { %v6677_v42 = vadd.f32 %v20698_v48, %v6605_v11 }
 0x531   : > { %v6074_v35 = vpop.f32.mrf.mxu0  ;;  %v4995_v2 = vadd.f32 %v20705_v38, %v4720_v22 }
 0x532   : > { %v6701_v56 = vmax.f32 %v6677_v42, 0.0  ;;  %v17197_v32 = vadd.f32 %v6074_v35, %v5835_v57  ;;  %v3819_v57 = vadd.f32 %v20708_v45, %v20707_v3  ;;  %v20709_v42 = vld [vmem:[#allocation95_spill] sm:$0xff]  ;;  %v6459_v45 = vpop.f32.mrf.mxu1 }
 0x533   : > { %v6078_v52 = vpop.f32.mrf.mxu0 }
 0x534   : > { %v17201_v58 = vmul.f32 %v6701_v56, %v20700_v44  ;;  %v17204_v0 = vadd.f32 %v6078_v52, %v17087_v29 }
 0x535   : > { %v6080_v18 = vpop.f32.mrf.mxu0 }
 0x536   : > { %v17206_v54 = vadd.f32 %v6080_v18, %v5838_v20  ;;  %6848 = vrot.lane.b32.xlu0 %v17201_v58, %s13633_s19  ;;  %v20710_v20 = vld [vmem:[#allocation30_spill] sm:$0xff] }
 0x537   : > { %v6084_v28 = vpop.f32.mrf.mxu0 }
 0x538   : > { %v17211_v49 = vadd.f32 %v6084_v28, %v17097_v4 }
 0x539   : > { %v6086_v33 = vpop.f32.mrf.mxu0 }
 0x53a   : > { %v17214_v61 = vadd.f32 %v6086_v33, %v17103_v40  ;;  %7146 = vrot.lane.b32.xlu0 %v17201_v58, %s13634_s20  ;;  %v6645_v33 = vpop.permute.xlu0 %6644 }
 0x53b   : > { %v6090_v26 = vpop.f32.mrf.mxu0 }
 0x53c   : > { %v17219_v29 = vadd.f32 %v6090_v26, %v17107_v46 }
 0x53d   : > { %v6092_v17 = vpop.f32.mrf.mxu0 }
 0x53e   : > { %v17222_v51 = vadd.f32 %v6092_v17, %v17113_v9  ;;  %7449 = vrot.lane.b32.xlu0 %v17201_v58, %s13635_s21  ;;  %v20711_v17 = vld [vmem:[#allocation53_spill] sm:$0xff] }
 0x53f   : > { %v6096_v4 = vpop.f32.mrf.mxu0 }
 0x540   : > { %v17229_v40 = vadd.f32 %v6096_v4, %v17117_v1 }
 0x541   : > { %v6098_v10 = vpop.f32.mrf.mxu0 }
 0x542   : > { %v17233_v46 = vadd.f32 %v6098_v10, %v17121_v25  ;;  %7764 = vrot.lane.b32.xlu0 %v17201_v58, %s13636_s22  ;;  %v20706_v25 = vld [vmem:[#allocation88_spill] sm:$0xff] }
 0x543   : > { %v6102_v9 = vpop.f32.mrf.mxu0  ;;  %v5446_v15 = vadd.f32 %v20706_v25, %v4995_v2  ;;  %v20718_v25 = vld [vmem:[#allocation57_spill] sm:$0xff] }
 0x544   : > { %v17239_v63 = vadd.f32 %v6102_v9, %v17125_v21  ;;  %v5836_v21 = vadd.f32 %v17132_v50, %v20709_v42 }
 0x545   : > { %v6104_v43 = vpop.f32.mrf.mxu0  ;;  %v5833_v27 = vadd.f32 %v17137_v13, %v5446_v15  ;;  %v20712_v13 = vld [vmem:[#allocation106_spill] sm:$0xff] }
 0x546   : > { %v17243_v1 = vadd.f32 %v6104_v43, %v17130_v47  ;;  %v6223_v12 = vadd.f32 %v17146_v37, %v5836_v21  ;;  %v20714_v37 = vld [vmem:[#allocation70_spill] sm:$0xff]  ;;  %v20717_v43 = vld [vmem:[#allocation19_spill] sm:$0xff] }
 0x547   : > { %v6108_v41 = vpop.f32.mrf.mxu0  ;;  %v6220_v52 = vadd.f32 %v17150_v16, %v5833_v27  ;;  %v5842_v14 = vadd.f32 %v17144_v8, %v20714_v37  ;;  %v20715_v16 = vld [vmem:[#allocation68_spill] sm:$0xff]  ;;  %v6221_v8 = vadd.f32 %v17191_v7, %v20718_v25 }
 0x548   : > { %v17249_v11 = vadd.f32 %v6108_v41, %v17135_v5  ;;  %v4332_v5 = vadd.f32 %v20710_v20, %v3819_v57  ;;  %v17314_v20 = vpop.permute.xlu0 %13411 }
 0x549   : > { %v6110_v35 = vpop.f32.mrf.mxu0  ;;  %v6229_v2 = vadd.f32 %v17157_v24, %v5842_v14  ;;  %v6608_v57 = vadd.f32 %v6459_v45, %v6221_v8 }
 0x54a   : > { %v17257_v47 = vadd.f32 %v6110_v35, %v17142_v36  ;;  %v4719_v4 = vadd.f32 %v20711_v17, %v4332_v5 }
 0x54b   : > { %v12913_v56 = vpop.f32.mrf.mxu0  ;;  %v6680_v7 = vadd.f32 %v6645_v33, %v6608_v57 }
 0x54c   : > { %v6610_v18 = vadd.f32 %v12913_v56, %v6223_v12  ;;  %v4994_v39 = vadd.f32 %v20712_v13, %v4719_v4  ;;  %v17320_v5 = vpop.permute.xlu0 %13431 }
 0x54d   : > { %v6566_v28 = vpop.f32.mrf.mxu0  ;;  %v6704_v27 = vmax.f32 %v6680_v7, 0.0 }
 0x54e   : > { %v6607_v26 = vadd.f32 %v6566_v28, %v6220_v52  ;;  %v6682_v50 = vadd.f32 %v6645_v33, %v6610_v18  ;;  %v5445_v10 = vadd.f32 %v20713_v19, %v4994_v39  ;;  %v6461_v18 = vpop.f32.mrf.mxu1 }
 0x54f   : > { %v12916_v22 = vpop.f32.mrf.mxu0  ;;  %v17308_v52 = vmul.f32 %v6704_v27, %v20700_v44  ;;  %v6609_v28 = vadd.f32 %v6461_v18, %v17197_v32 }
 0x550   : > { %v6679_v31 = vadd.f32 %v20698_v48, %v6607_v26  ;;  %v6706_v36 = vmax.f32 %v6682_v50, 0.0  ;;  %v5832_v38 = vadd.f32 %v20717_v43, %v5445_v10  ;;  %v6616_v3 = vadd.f32 %v12916_v22, %v6229_v2  ;;  %v17327_v26 = vpop.permute.xlu1 %6659  ;;  %v17333_v4 = vpop.permute.xlu0 %13441  ;;  %v20723_v22 = vld [vmem:[#allocation12_spill] sm:$0xff] }
 0x551   : > { %v6576_v17 = vpop.f32.mrf.mxu0  ;;  %20720 = vst [vmem:[#allocation32_spill] sm:$0xff] %v17333_v4  ;;  %v6681_v50 = vadd.f32 %v6645_v33, %v6609_v28 }
 0x552   : > { %v17269_v53 = vmul.f32 %v6706_v36, %v20715_v16  ;;  %v6703_v9 = vmax.f32 %v6679_v31, 0.0  ;;  %v6219_v41 = vadd.f32 %v17187_v62, %v5832_v38  ;;  %v6688_v42 = vadd.f32 %v17245_v23, %v6616_v3 }
 0x553   : > { %v6613_v31 = vadd.f32 %v6576_v17, %v17163_v30  ;;  %v6705_v13 = vmax.f32 %v6681_v50, 0.0  ;;  %v12919_v19 = vpop.f32.mrf.mxu0 }
 0x554   : > { %20716 = vst [vmem:[#allocation25_spill] sm:$0xff] %v17269_v53  ;;  %6860 = vrot.lane.b32.xlu1 %v17269_v53, %s13633_s19  ;;  %8356 = vrot.lane.b32.xlu0 %v17269_v53, %s13637_s23  ;;  %v17281_v15 = vmul.f32 %v6703_v9, %v20715_v16  ;;  %v6606_v24 = vadd.f32 %v6455_v34, %v6219_v41  ;;  %v6712_v21 = vmax.f32 %v6688_v42, 0.0  ;;  %v6650_v32 = vpop.permute.xlu1 %6649  ;;  %v17340_v36 = vpop.permute.xlu0 %13446 }
 0x555   : > { %v6685_v39 = vadd.f32 %v6650_v32, %v6613_v31  ;;  %20721 = vst [vmem:[#allocation35_spill] sm:$0xff] %v17340_v36  ;;  %v6622_v14 = vadd.f32 %v12919_v19, %v17167_v55  ;;  %v6465_v9 = vpop.f32.mrf.mxu1  ;;  %v6586_v42 = vpop.f32.mrf.mxu0 }
 0x556   : > { %v6678_v62 = vadd.f32 %v20698_v48, %v6606_v24  ;;  %v17298_v12 = vmul.f32 %v6712_v21, %v20715_v16  ;;  %v20719_v48 = vld [vmem:[#allocation65_spill] sm:$0xff]  ;;  %v6611_v34 = vadd.f32 %v6465_v9, %v17204_v0  ;;  %v6619_v21 = vadd.f32 %v6586_v42, %v17170_v6 }
 0x557   : > { %v17347_v33 = vmul.f32 %v6705_v13, %v20719_v48  ;;  %v6709_v30 = vmax.f32 %v6685_v39, 0.0  ;;  %v6694_v43 = vadd.f32 %v20723_v22, %v6622_v14  ;;  %v6467_v45 = vpop.f32.mrf.mxu1 }
 0x558   : > { %7158 = vrot.lane.b32.xlu1 %v17269_v53, %s13634_s20  ;;  %6852 = vrot.lane.b32.xlu0 %v17281_v15, %s13633_s19  ;;  %v6702_v35 = vmax.f32 %v6678_v62, 0.0  ;;  %v17353_v10 = vpop.permute.xlu0 %13456  ;;  %v6683_v55 = vadd.f32 %v6650_v32, %v6611_v34  ;;  %v6612_v24 = vadd.f32 %v6467_v45, %v17206_v54  ;;  %v17394_v57 = vpop.permute.xlu1 %13406  ;;  %v6691_v27 = vadd.f32 %v17327_v26, %v6619_v21 }
 0x559   : > { %20722 = vst [vmem:[#allocation20_spill] sm:$0xff] %v17353_v10  ;;  %v17356_v37 = vmul.f32 %v6709_v30, %v20715_v16  ;;  %v6718_v2 = vmax.f32 %v6694_v43, 0.0  ;;  %v6471_v19 = vpop.f32.mrf.mxu1  ;;  %v12922_v43 = vpop.f32.mrf.mxu0 }
 0x55a   : > { %v17305_v56 = vmul.f32 %v6702_v35, %v20719_v48  ;;  %v6707_v0 = vmax.f32 %v6683_v55, 0.0  ;;  %v6684_v7 = vadd.f32 %v6650_v32, %v6612_v24  ;;  %v6715_v28 = vmax.f32 %v6691_v27, 0.0  ;;  %v20740_v24 = vld [vmem:[#allocation83_spill] sm:$0xff] }
 0x55b   : > { %v17378_v25 = vmul.f32 %v6718_v2, %v20715_v16  ;;  %v6614_v9 = vadd.f32 %v6471_v19, %v17211_v49  ;;  %v6628_v2 = vadd.f32 %v12922_v43, %v17174_v59  ;;  %v6596_v19 = vpop.f32.mrf.mxu0 }
 0x55c   : > { %7461 = vrot.lane.b32.xlu1 %v17269_v53, %s13635_s21  ;;  %7768 = vrot.lane.b32.xlu0 %v17281_v15, %s13636_s22  ;;  %v17365_v38 = vpop.permute.xlu0 %13461  ;;  %v17385_v8 = vmul.f32 %v6707_v0, %v20700_v44  ;;  %v17407_v54 = vpop.permute.xlu1 %13416  ;;  %v6708_v35 = vmax.f32 %v6684_v7, 0.0  ;;  %v17428_v31 = vmul.f32 %v6715_v28, %v20715_v16 }
 0x55d   : > { %20724 = vst [vmem:[#allocation31_spill] sm:$0xff] %v17365_v38  ;;  %20726 = vst [vmem:[#allocation46_spill] sm:$0xff] %v17378_v25  ;;  %v6686_v55 = vadd.f32 %v17245_v23, %v6614_v9  ;;  %v6700_v42 = vadd.f32 %v20740_v24, %v6628_v2  ;;  %v6473_v7 = vpop.f32.mrf.mxu1 }
 0x55e   : > { %20727 = vst [vmem:[#allocation14_spill] sm:$0xff] %v17385_v8  ;;  %v17417_v6 = vmul.f32 %v6708_v35, %v20719_v48  ;;  %20733 = vst [vmem:[#allocation17_spill] sm:$0xff] %v17428_v31  ;;  %v6615_v35 = vadd.f32 %v6473_v7, %v17214_v61 }
 0x55f   : > { %v6710_v49 = vmax.f32 %v6686_v55, 0.0  ;;  %v6724_v27 = vmax.f32 %v6700_v42, 0.0  ;;  %v6625_v55 = vadd.f32 %v6596_v19, %v17176_v60  ;;  %v20744_v42 = vld [vmem:[#allocation78_spill] sm:$0xff] }
 0x560   : > { %7776 = vrot.lane.b32.xlu1 %v17269_v53, %s13636_s22  ;;  %8348 = vrot.lane.b32.xlu0 %v17281_v15, %s13637_s23  ;;  %v17375_v41 = vpop.permute.xlu0 %13466  ;;  %20731 = vst [vmem:[#allocation51_spill] sm:$0xff] %v17417_v6  ;;  %v17419_v17 = vpop.permute.xlu1 %13421  ;;  %v6687_v9 = vadd.f32 %v17245_v23, %v6615_v35 }
 0x561   : > { %20725 = vst [vmem:[#allocation7_spill] sm:$0xff] %v17375_v41  ;;  %v17481_v21 = vmul.f32 %v6710_v49, %v20700_v44  ;;  %v17492_v43 = vmul.f32 %v6724_v27, %v20715_v16  ;;  %v6697_v7 = vadd.f32 %v20744_v42, %v6625_v55 }
 0x562   : > { %v6711_v49 = vmax.f32 %v6687_v9, 0.0 }
 0x563   : > { %v6721_v35 = vmax.f32 %v6697_v7, 0.0 }
 0x564   : > { %8344 = vrot.lane.b32.xlu1 %v17201_v58, %s13637_s23  ;;  %6876 = vrot.lane.b32.xlu0 %v17298_v12, %s13633_s19  ;;  %v17387_v3 = vpop.permute.xlu0 %13476  ;;  %v17434_v32 = vpop.permute.xlu1 %13426  ;;  %v17513_v60 = vmul.f32 %v6711_v49, %v20719_v48 }
 0x565   : > { %20728 = vst [vmem:[#allocation8_spill] sm:$0xff] %v17387_v3  ;;  %v17524_v9 = vmul.f32 %v6721_v35, %v20715_v16 }
 0x566   : > { %20746 = vst [vmem:[#allocation36_spill] sm:$0xff] %v17513_v60 }
 0x568   : > { %6850 = vrot.lane.b32.xlu1 %v17305_v56, %s13633_s19  ;;  %7154 = vrot.lane.b32.xlu0 %v17308_v52, %s13634_s20  ;;  %v17396_v62 = vpop.permute.xlu0 %13481  ;;  %v17442_v39 = vpop.permute.xlu1 %13436 }
 0x569   : > { %20729 = vst [vmem:[#allocation41_spill] sm:$0xff] %v17396_v62  ;;  %20735 = vst [vmem:[#allocation16_spill] sm:$0xff] %v17442_v39 }
 0x56c   : > { %7148 = vrot.lane.b32.xlu1 %v17305_v56, %s13634_s20  ;;  %7174 = vrot.lane.b32.xlu0 %v17298_v12, %s13634_s20  ;;  %v17410_v18 = vpop.permute.xlu0 %13486  ;;  %v17454_v14 = vpop.permute.xlu1 %13451 }
 0x56d   : > { %20730 = vst [vmem:[#allocation39_spill] sm:$0xff] %v17410_v18  ;;  %20736 = vst [vmem:[#allocation37_spill] sm:$0xff] %v17454_v14 }
 0x570   : > { %7150 = vrot.lane.b32.xlu1 %v17281_v15, %s13634_s20  ;;  %7457 = vrot.lane.b32.xlu0 %v17308_v52, %s13635_s21  ;;  %v17421_v50 = vpop.permute.xlu0 %13491  ;;  %v17465_v0 = vpop.permute.xlu1 %13471 }
 0x571   : > { %20732 = vst [vmem:[#allocation50_spill] sm:$0xff] %v17421_v50  ;;  %20738 = vst [vmem:[#allocation28_spill] sm:$0xff] %v17465_v0 }
 0x574   : > { %7451 = vrot.lane.b32.xlu1 %v17305_v56, %s13635_s21  ;;  %7477 = vrot.lane.b32.xlu0 %v17298_v12, %s13635_s21  ;;  %v17436_v13 = vpop.permute.xlu0 %13501  ;;  %v17478_v59 = vpop.permute.xlu1 %13496 }
 0x575   : > { %20734 = vst [vmem:[#allocation11_spill] sm:$0xff] %v17436_v13  ;;  %20741 = vst [vmem:[#allocation74_spill] sm:$0xff] %v17478_v59 }
 0x578   : > { %7453 = vrot.lane.b32.xlu1 %v17281_v15, %s13635_s21  ;;  %7772 = vrot.lane.b32.xlu0 %v17308_v52, %s13636_s22 }
 0x57c   : > { %7766 = vrot.lane.b32.xlu1 %v17305_v56, %s13636_s22  ;;  %8372 = vrot.lane.b32.xlu0 %v17298_v12, %s13637_s23 }
 0x580   : > { %8346 = vrot.lane.b32.xlu1 %v17305_v56, %s13637_s23  ;;  %6858 = vrot.lane.b32.xlu0 %v17347_v33, %s13633_s19 }
 0x584   : > { %6856 = vrot.lane.b32.xlu1 %v17308_v52, %s13633_s19  ;;  %7166 = vrot.lane.b32.xlu0 %v17356_v37, %s13634_s20 }
 0x588   : > { %7792 = vrot.lane.b32.xlu1 %v17298_v12, %s13636_s22  ;;  %7469 = vrot.lane.b32.xlu0 %v17356_v37, %s13635_s21 }
 0x58c   : > { %8352 = vrot.lane.b32.xlu1 %v17308_v52, %s13637_s23  ;;  %7784 = vrot.lane.b32.xlu0 %v17356_v37, %s13636_s22 }
 0x590   : > { %8687 = vrot.lane.b32.xlu1 %v17298_v12, %s13638_s24  ;;  %6892 = vrot.lane.b32.xlu0 %v17378_v25, %s13633_s19 }
 0x594   : > { %6868 = vrot.lane.b32.xlu1 %v17356_v37, %s13633_s19  ;;  %7162 = vrot.lane.b32.xlu0 %v17385_v8, %s13634_s20 }
 0x598   : > { %7156 = vrot.lane.b32.xlu1 %v17347_v33, %s13634_s20  ;;  %8388 = vrot.lane.b32.xlu0 %v17378_v25, %s13637_s23 }
 0x59c   : > { %7459 = vrot.lane.b32.xlu1 %v17347_v33, %s13635_s21  ;;  %8360 = vrot.lane.b32.xlu0 %v17385_v8, %s13637_s23 }
 0x5a0   : > { %7774 = vrot.lane.b32.xlu1 %v17347_v33, %s13636_s22  ;;  %8703 = vrot.lane.b32.xlu0 %v17378_v25, %s13638_s24 }
 0x5a4   : > { %8364 = vrot.lane.b32.xlu1 %v17356_v37, %s13637_s23  ;;  %6866 = vrot.lane.b32.xlu0 %v17417_v6, %s13633_s19 }
 0x5a8   : > { %8354 = vrot.lane.b32.xlu1 %v17347_v33, %s13637_s23  ;;  %6884 = vrot.lane.b32.xlu0 %v17428_v31, %s13633_s19  ;;  %v17444_v30 = vpop.permute.xlu0 %6848 }
 0x5ac   : > { %8679 = vrot.lane.b32.xlu1 %v17356_v37, %s13638_s24  ;;  %7467 = vrot.lane.b32.xlu0 %v17417_v6, %s13635_s21  ;;  %v17457_v34 = vpop.permute.xlu0 %7146 }
 0x5ad   : > { %20737 = vst [vmem:[#allocation85_spill] sm:$0xff] %v17457_v34 }
 0x5b0   : > { %6864 = vrot.lane.b32.xlu1 %v17385_v8, %s13633_s19  ;;  %7782 = vrot.lane.b32.xlu0 %v17417_v6, %s13636_s22  ;;  %v17467_v45 = vpop.permute.xlu0 %7449 }
 0x5b1   : > { %20739 = vst [vmem:[#allocation97_spill] sm:$0xff] %v17467_v45 }
 0x5b4   : > { %7190 = vrot.lane.b32.xlu1 %v17378_v25, %s13634_s20  ;;  %7800 = vrot.lane.b32.xlu0 %v17428_v31, %s13636_s22  ;;  %v17484_v28 = vpop.permute.xlu0 %7764 }
 0x5b5   : > { %20742 = vst [vmem:[#allocation45_spill] sm:$0xff] %v17484_v28 }
 0x5b8   : > { %7465 = vrot.lane.b32.xlu1 %v17385_v8, %s13635_s21  ;;  %8362 = vrot.lane.b32.xlu0 %v17417_v6, %s13637_s23 }
 0x5bc   : > { %7493 = vrot.lane.b32.xlu1 %v17378_v25, %s13635_s21  ;;  %8695 = vrot.lane.b32.xlu0 %v17428_v31, %s13638_s24 }
 0x5c0   : > { %7780 = vrot.lane.b32.xlu1 %v17385_v8, %s13636_s22  ;;  %8677 = vrot.lane.b32.xlu0 %v17417_v6, %s13638_s24 }
 0x5c4   : > { %7808 = vrot.lane.b32.xlu1 %v17378_v25, %s13636_s22  ;;  %6872 = vrot.lane.b32.xlu0 %v17481_v21, %s13633_s19 }
 0x5c6   : > { %v17495_v2 = vpop.permute.xlu1 %6860  ;;  %v17497_v61 = vpop.permute.xlu0 %8356 }
 0x5c7   : > { %20743 = vst [vmem:[#allocation82_spill] sm:$0xff] %v17497_v61 }
 0x5c8   : > { %7164 = vrot.lane.b32.xlu1 %v17417_v6, %s13634_s20  ;;  %6908 = vrot.lane.b32.xlu0 %v17492_v43, %s13633_s19 }
 0x5ca   : > { %v17504_v13 = vpop.permute.xlu1 %7158  ;;  %v17506_v23 = vpop.permute.xlu0 %6852 }
 0x5cb   : > { %20745 = vst [vmem:[#allocation49_spill] sm:$0xff] %v17504_v13 }
 0x5cc   : > { %7182 = vrot.lane.b32.xlu1 %v17428_v31, %s13634_s20  ;;  %8404 = vrot.lane.b32.xlu0 %v17492_v43, %s13637_s23 }
 0x5ce   : > { %v17515_v27 = vpop.permute.xlu1 %7461  ;;  %v17517_v19 = vpop.permute.xlu0 %7768 }
 0x5cf   : > { %20747 = vst [vmem:[#allocation60_spill] sm:$0xff] %v17515_v27  ;;  %20748 = vst [vmem:[#allocation47_spill] sm:$0xff] %v17517_v19 }
 0x5d0   : > { %7485 = vrot.lane.b32.xlu1 %v17428_v31, %s13635_s21  ;;  %7172 = vrot.lane.b32.xlu0 %v17513_v60, %s13634_s20 }
 0x5d2   : > { %v17526_v55 = vpop.permute.xlu1 %7776  ;;  %v17528_v61 = vpop.permute.xlu0 %8348 }
 0x5d3   : > { %20749 = vst [vmem:[#allocation58_spill] sm:$0xff] %v17526_v55  ;;  %20750 = vst [vmem:[#allocation87_spill] sm:$0xff] %v17528_v61  ;;  %v6477_v61 = vpop.f32.mrf.mxu1 }
 0x5d4   : > { %8380 = vrot.lane.b32.xlu1 %v17428_v31, %s13637_s23  ;;  %7198 = vrot.lane.b32.xlu0 %v17524_v9, %s13634_s20 }
 0x5d5   : > { %v6479_v0 = vpop.f32.mrf.mxu1 }
 0x5d6   : > { %v17534_v49 = vpop.permute.xlu1 %8344  ;;  %v17536_v7 = vpop.permute.xlu0 %6876 }
 0x5d7   : > { %20751 = vst [vmem:[#allocation104_spill] sm:$0xff] %v17534_v49  ;;  %v6617_v49 = vadd.f32 %v6477_v61, %v17219_v29 }
 0x5d8   : > { %7170 = vrot.lane.b32.xlu1 %v17481_v21, %s13634_s20  ;;  %7475 = vrot.lane.b32.xlu0 %v17513_v60, %s13635_s21 }
 0x5d9   : > { %v6689_v18 = vadd.f32 %v17327_v26, %v6617_v49 }
 0x5da   : > { %v17542_v35 = vpop.permute.xlu1 %6850  ;;  %v17544_v16 = vpop.permute.xlu0 %7154 }
 0x5db   : > { %20752 = vst [vmem:[#allocation100_spill] sm:$0xff] %v17544_v16  ;;  %v6713_v29 = vmax.f32 %v6689_v18, 0.0  ;;  %v6618_v18 = vadd.f32 %v6479_v0, %v17222_v51 }
 0x5dc   : > { %7206 = vrot.lane.b32.xlu1 %v17492_v43, %s13634_s20  ;;  %7501 = vrot.lane.b32.xlu0 %v17524_v9, %s13635_s21 }
 0x5dd   : > { %v17577_v49 = vmul.f32 %v6713_v29, %v20700_v44  ;;  %v6690_v29 = vadd.f32 %v17327_v26, %v6618_v18 }
 0x5de   : > { %v17551_v59 = vpop.permute.xlu1 %7148  ;;  %v17553_v50 = vpop.permute.xlu0 %7174 }
 0x5df   : > { %20753 = vst [vmem:[#allocation94_spill] sm:$0xff] %v17551_v59  ;;  %20754 = vst [vmem:[#allocation89_spill] sm:$0xff] %v17553_v50  ;;  %v6714_v51 = vmax.f32 %v6690_v29, 0.0 }
 0x5e0   : > { %7473 = vrot.lane.b32.xlu1 %v17481_v21, %s13635_s21  ;;  %7790 = vrot.lane.b32.xlu0 %v17513_v60, %s13636_s22 }
 0x5e1   : > { %v17615_v26 = vmul.f32 %v6714_v51, %v20719_v48 }
 0x5e2   : > { %v17560_v19 = vpop.permute.xlu1 %7150  ;;  %v17562_v28 = vpop.permute.xlu0 %7457 }
 0x5e3   : > { %20755 = vst [vmem:[#allocation79_spill] sm:$0xff] %v17560_v19  ;;  %20756 = vst [vmem:[#allocation76_spill] sm:$0xff] %v17562_v28 }
 0x5e4   : > { %7509 = vrot.lane.b32.xlu1 %v17492_v43, %s13635_s21  ;;  %7816 = vrot.lane.b32.xlu0 %v17524_v9, %s13636_s22 }
 0x5e6   : > { %v17568_v61 = vpop.permute.xlu1 %7451  ;;  %v17570_v55 = vpop.permute.xlu0 %7477 }
 0x5e7   : > { %20757 = vst [vmem:[#allocation109_spill] sm:$0xff] %v17568_v61  ;;  %20758 = vst [vmem:[#allocation108_spill] sm:$0xff] %v17570_v55  ;;  %v6483_v61 = vpop.f32.mrf.mxu1 }
 0x5e8   : > { %7788 = vrot.lane.b32.xlu1 %v17481_v21, %s13636_s22  ;;  %8685 = vrot.lane.b32.xlu0 %v17513_v60, %s13638_s24  ;;  %v6620_v0 = vadd.f32 %v6483_v61, %v17229_v40 }
 0x5e9   : > { %v6485_v28 = vpop.f32.mrf.mxu1 }
 0x5ea   : > { %v17579_v62 = vpop.permute.xlu1 %7453  ;;  %v17581_v3 = vpop.permute.xlu0 %7772  ;;  %v6692_v18 = vadd.f32 %v20723_v22, %v6620_v0 }
 0x5eb   : > { %20759 = vst [vmem:[#allocation96_spill] sm:$0xff] %v17579_v62  ;;  %20760 = vst [vmem:[#allocation105_spill] sm:$0xff] %v17581_v3 }
 0x5ec   : > { %7824 = vrot.lane.b32.xlu1 %v17492_v43, %s13636_s22  ;;  %6880 = vrot.lane.b32.xlu0 %v17577_v49, %s13633_s19  ;;  %v6716_v40 = vmax.f32 %v6692_v18, 0.0 }
 0x5ee   : > { %v17588_v41 = vpop.permute.xlu1 %7766  ;;  %v17590_v45 = vpop.permute.xlu0 %8372  ;;  %v17635_v51 = vmul.f32 %v6716_v40, %v20700_v44 }
 0x5ef   : > { %20761 = vst [vmem:[#allocation102_spill] sm:$0xff] %v17588_v41  ;;  %20762 = vst [vmem:[#allocation75_spill] sm:$0xff] %v17590_v45 }
 0x5f0   : > { %8368 = vrot.lane.b32.xlu1 %v17481_v21, %s13637_s23  ;;  %7481 = vrot.lane.b32.xlu0 %v17577_v49, %s13635_s21  ;;  %20769 = vst [vmem:[#allocation26_spill] sm:$0xff] %v17635_v51 }
 0x5f2   : > { %v17597_v3 = vpop.permute.xlu1 %8346  ;;  %v17599_v62 = vpop.permute.xlu0 %6858 }
 0x5f3   : > { %20763 = vst [vmem:[#allocation98_spill] sm:$0xff] %v17597_v3 }
 0x5f4   : > { %8719 = vrot.lane.b32.xlu1 %v17492_v43, %s13638_s24  ;;  %7796 = vrot.lane.b32.xlu0 %v17577_v49, %s13636_s22 }
 0x5f6   : > { %v17606_v45 = vpop.permute.xlu1 %6856  ;;  %v17608_v41 = vpop.permute.xlu0 %7166 }
 0x5f7   : > { %20764 = vst [vmem:[#allocation90_spill] sm:$0xff] %v17608_v41 }
 0x5f8   : > { %8683 = vrot.lane.b32.xlu1 %v17481_v21, %s13638_s24  ;;  %8376 = vrot.lane.b32.xlu0 %v17577_v49, %s13637_s23 }
 0x5fa   : > { %v17618_v3 = vpop.permute.xlu1 %7792  ;;  %v17620_v29 = vpop.permute.xlu0 %7469 }
 0x5fb   : > { %20765 = vst [vmem:[#allocation67_spill] sm:$0xff] %v17618_v3  ;;  %20766 = vst [vmem:[#allocation34_spill] sm:$0xff] %v17620_v29 }
 0x5fc   : > { %6874 = vrot.lane.b32.xlu1 %v17513_v60, %s13633_s19  ;;  %7180 = vrot.lane.b32.xlu0 %v17615_v26, %s13634_s20 }
 0x5fe   : > { %v17626_v61 = vpop.permute.xlu1 %8352  ;;  %v17628_v27 = vpop.permute.xlu0 %7784 }
 0x5ff   : > { %20767 = vst [vmem:[#allocation9_spill] sm:$0xff] %v17626_v61  ;;  %20768 = vst [vmem:[#allocation56_spill] sm:$0xff] %v17628_v27  ;;  %v6489_v27 = vpop.f32.mrf.mxu1 }
 0x600   : > { %6900 = vrot.lane.b32.xlu1 %v17524_v9, %s13633_s19  ;;  %8378 = vrot.lane.b32.xlu0 %v17615_v26, %s13637_s23  ;;  %v6623_v40 = vadd.f32 %v6489_v27, %v17239_v63 }
 0x601   : > { %v6491_v14 = vpop.f32.mrf.mxu1 }
 0x602   : > { %v17637_v0 = vpop.permute.xlu1 %8687  ;;  %v17639_v3 = vpop.permute.xlu0 %6892  ;;  %v6695_v29 = vadd.f32 %v20744_v42, %v6623_v40 }
 0x603   : > { %20770 = vst [vmem:[#allocation42_spill] sm:$0xff] %v17637_v0 }
 0x604   : > { %8396 = vrot.lane.b32.xlu1 %v17524_v9, %s13637_s23  ;;  %6888 = vrot.lane.b32.xlu0 %v17635_v51, %s13633_s19  ;;  %v6719_v63 = vmax.f32 %v6695_v29, 0.0 }
 0x606   : > { %v17645_v18 = vpop.permute.xlu1 %6868  ;;  %v17647_v61 = vpop.permute.xlu0 %7162  ;;  %v17680_v40 = vmul.f32 %v6719_v63, %v20700_v44 }
 0x607   : > { %20771 = vst [vmem:[#allocation5_spill] sm:$0xff] %v17647_v61 }
 0x608   : > { %8370 = vrot.lane.b32.xlu1 %v17513_v60, %s13637_s23  ;;  %7186 = vrot.lane.b32.xlu0 %v17635_v51, %s13634_s20  ;;  %20778 = vst [vmem:[#allocation24_spill] sm:$0xff] %v17680_v40 }
 0x60a   : > { %v17654_v0 = vpop.permute.xlu1 %7156  ;;  %v17656_v38 = vpop.permute.xlu0 %8388 }
 0x60b   : > { %20772 = vst [vmem:[#allocation61_spill] sm:$0xff] %v17654_v0  ;;  %20773 = vst [vmem:[#allocation66_spill] sm:$0xff] %v17656_v38 }
 0x60c   : > { %8711 = vrot.lane.b32.xlu1 %v17524_v9, %s13638_s24  ;;  %7489 = vrot.lane.b32.xlu0 %v17635_v51, %s13635_s21 }
 0x60e   : > { %v17663_v55 = vpop.permute.xlu1 %7459  ;;  %v17665_v10 = vpop.permute.xlu0 %8360 }
 0x60f   : > { %20774 = vst [vmem:[#allocation18_spill] sm:$0xff] %v17663_v55  ;;  %20775 = vst [vmem:[#allocation22_spill] sm:$0xff] %v17665_v10  ;;  %v6624_v10 = vadd.f32 %v6491_v14, %v17243_v1  ;;  %v6621_v1 = vadd.f32 %v6485_v28, %v17233_v46 }
 0x610   : > { %7178 = vrot.lane.b32.xlu1 %v17577_v49, %s13634_s20  ;;  %7804 = vrot.lane.b32.xlu0 %v17635_v51, %s13636_s22 }
 0x611   : > { %v6696_v29 = vadd.f32 %v20744_v42, %v6624_v10  ;;  %v6693_v10 = vadd.f32 %v20723_v22, %v6621_v1 }
 0x612   : > { %v17671_v27 = vpop.permute.xlu1 %7774  ;;  %v17673_v38 = vpop.permute.xlu0 %8703 }
 0x613   : > { %20776 = vst [vmem:[#allocation15_spill] sm:$0xff] %v17671_v27  ;;  %20777 = vst [vmem:[#allocation55_spill] sm:$0xff] %v17673_v38  ;;  %v6720_v14 = vmax.f32 %v6696_v29, 0.0  ;;  %v6717_v46 = vmax.f32 %v6693_v10, 0.0 }
 0x614   : > { %8691 = vrot.lane.b32.xlu1 %v17577_v49, %s13638_s24  ;;  %8699 = vrot.lane.b32.xlu0 %v17635_v51, %s13638_s24 }
 0x615   : > { %v17711_v42 = vmul.f32 %v6720_v14, %v20719_v48  ;;  %v17730_v22 = vmul.f32 %v6717_v46, %v20719_v48 }
 0x616   : > { %v17683_v55 = vpop.permute.xlu1 %8364  ;;  %v17685_v36 = vpop.permute.xlu0 %6866 }
 0x617   : > { %20779 = vst [vmem:[#allocation44_spill] sm:$0xff] %v17683_v55  ;;  %20783 = vst [vmem:[#allocation99_spill] sm:$0xff] %v17711_v42 }
 0x618   : > { %6882 = vrot.lane.b32.xlu1 %v17615_v26, %s13633_s19  ;;  %7194 = vrot.lane.b32.xlu0 %v17680_v40, %s13634_s20 }
 0x61a   : > { %v17692_v38 = vpop.permute.xlu1 %8354  ;;  %v17694_v27 = vpop.permute.xlu0 %6884 }
 0x61b   : > { %20780 = vst [vmem:[#allocation21_spill] sm:$0xff] %v17692_v38 }
 0x61c   : > { %7483 = vrot.lane.b32.xlu1 %v17615_v26, %s13635_s21  ;;  %8392 = vrot.lane.b32.xlu0 %v17680_v40, %s13637_s23 }
 0x61e   : > { %v17701_v63 = vpop.permute.xlu1 %8679  ;;  %v17703_v55 = vpop.permute.xlu0 %7467 }
 0x61f   : > { %20781 = vst [vmem:[#allocation84_spill] sm:$0xff] %v17701_v63  ;;  %20782 = vst [vmem:[#allocation13_spill] sm:$0xff] %v17703_v55  ;;  %v6495_v63 = vpop.f32.mrf.mxu1 }
 0x620   : > { %7798 = vrot.lane.b32.xlu1 %v17615_v26, %s13636_s22  ;;  %8707 = vrot.lane.b32.xlu0 %v17680_v40, %s13638_s24  ;;  %v6626_v1 = vadd.f32 %v6495_v63, %v17249_v11 }
 0x621   : > { %v6497_v10 = vpop.f32.mrf.mxu1 }
 0x622   : > { %v17713_v38 = vpop.permute.xlu1 %6864  ;;  %v17715_v19 = vpop.permute.xlu0 %7782  ;;  %v6627_v55 = vadd.f32 %v6497_v10, %v17257_v47 }
 0x623   : > { %20784 = vst [vmem:[#allocation54_spill] sm:$0xff] %v17715_v19 }
 0x624   : > { %8693 = vrot.lane.b32.xlu1 %v17615_v26, %s13638_s24  ;;  %6898 = vrot.lane.b32.xlu0 %v17711_v42, %s13633_s19  ;;  %v6699_v63 = vadd.f32 %v20740_v24, %v6627_v55 }
 0x626   : > { %v17721_v28 = vpop.permute.xlu1 %7190  ;;  %v17723_v29 = vpop.permute.xlu0 %7800 }
 0x627   : > { %20785 = vst [vmem:[#allocation103_spill] sm:$0xff] %v17723_v29  ;;  %v6698_v29 = vadd.f32 %v20740_v24, %v6626_v1  ;;  %v6723_v1 = vmax.f32 %v6699_v63, 0.0 }
 0x628   : > { %8384 = vrot.lane.b32.xlu1 %v17635_v51, %s13637_s23  ;;  %7499 = vrot.lane.b32.xlu0 %v17711_v42, %s13635_s21 }
 0x629   : > { %v6722_v11 = vmax.f32 %v6698_v29, 0.0  ;;  %v17772_v24 = vmul.f32 %v6723_v1, %v20719_v48 }
 0x62a   : > { %v17733_v14 = vpop.permute.xlu1 %7465  ;;  %v17735_v19 = vpop.permute.xlu0 %8362 }
 0x62b   : > { %20786 = vst [vmem:[#allocation92_spill] sm:$0xff] %v17733_v14  ;;  %20787 = vst [vmem:[#allocation69_spill] sm:$0xff] %v17735_v19  ;;  %v17761_v47 = vmul.f32 %v6722_v11, %v20700_v44 }
 0x62c   : > { %6890 = vrot.lane.b32.xlu1 %v17730_v22, %s13633_s19  ;;  %7814 = vrot.lane.b32.xlu0 %v17711_v42, %s13636_s22 }
 0x62e   : > { %v17743_v34 = vpop.permute.xlu1 %7493  ;;  %v17745_v46 = vpop.permute.xlu0 %8695 }
 0x62f   : > { %20788 = vst [vmem:[#allocation91_spill] sm:$0xff] %v17743_v34  ;;  %20789 = vst [vmem:[#allocation48_spill] sm:$0xff] %v17745_v46 }
 0x630   : > { %7188 = vrot.lane.b32.xlu1 %v17730_v22, %s13634_s20  ;;  %8394 = vrot.lane.b32.xlu0 %v17711_v42, %s13637_s23 }
 0x632   : > { %v17752_v19 = vpop.permute.xlu1 %7780  ;;  %v17754_v14 = vpop.permute.xlu0 %8677 }
 0x633   : > { %20790 = vst [vmem:[#allocation6_spill] sm:$0xff] %v17752_v19  ;;  %20791 = vst [vmem:[#allocation40_spill] sm:$0xff] %v17754_v14 }
 0x634   : > { %7491 = vrot.lane.b32.xlu1 %v17730_v22, %s13635_s21  ;;  %8709 = vrot.lane.b32.xlu0 %v17711_v42, %s13638_s24 }
 0x636   : > { %v17763_v10 = vpop.permute.xlu1 %7808  ;;  %v17765_v46 = vpop.permute.xlu0 %6872 }
 0x637   : > { %20792 = vst [vmem:[#allocation80_spill] sm:$0xff] %v17763_v10 }
 0x638   : > { %7806 = vrot.lane.b32.xlu1 %v17730_v22, %s13636_s22  ;;  %7202 = vrot.lane.b32.xlu0 %v17761_v47, %s13634_s20 }
 0x63a   : > { %v17774_v55 = vpop.permute.xlu1 %7164  ;;  %v17776_v29 = vpop.permute.xlu0 %6908 }
 0x63b   : > { %20793 = vst [vmem:[#allocation59_spill] sm:$0xff] %v17774_v55 }
 0x63c   : > { %8386 = vrot.lane.b32.xlu1 %v17730_v22, %s13637_s23  ;;  %6906 = vrot.lane.b32.xlu0 %v17772_v24, %s13633_s19 }
 0x63e   : > { %v17782_v11 = vpop.permute.xlu1 %7182  ;;  %v17784_v63 = vpop.permute.xlu0 %8404 }
 0x63f   : > { %20794 = vst [vmem:[#allocation23_spill] sm:$0xff] %v17784_v63  ;;  %v20798_v63 = vmov 0.0  }
 0x640   : > { %8701 = vrot.lane.b32.xlu1 %v17730_v22, %s13638_s24  ;;  %8675 = vrot.lane.b32.xlu0 %v17385_v8, %s13638_s24 }
 0x642   : > { %v17790_v1 = vpop.permute.xlu1 %7485  ;;  %v17792_v48 = vpop.permute.xlu0 %7172 }
 0x643   : > { %20795 = vst [vmem:[#allocation93_spill] sm:$0xff] %v17790_v1  ;;  %20796 = vst [vmem:[#allocation81_spill] sm:$0xff] %v17792_v48 }
 0x644   : > { %6896 = vrot.lane.b32.xlu1 %v17680_v40, %s13633_s19  ;;  %8671 = vrot.lane.b32.xlu0 %v17269_v53, %s13638_s24 }
 0x646   : > { %v17798_v44 = vpop.permute.xlu1 %8380  ;;  %v17800_v14 = vpop.permute.xlu0 %7198 }
 0x647   : > { %20797 = vst [vmem:[#allocation107_spill] sm:$0xff] %v17798_v44 }
 0x648   : > { %7497 = vrot.lane.b32.xlu1 %v17680_v40, %s13635_s21  ;;  %13506 = vrot.lane.b32.xlu0 %v20798_v63, %s13638_s24 }
 0x64a   : > { %v17806_v19 = vpop.permute.xlu1 %7170  ;;  %v17808_v10 = vpop.permute.xlu0 %7475 }
 0x64b   : > { %20799 = vst [vmem:[#allocation77_spill] sm:$0xff] %v17806_v19  ;;  %20800 = vst [vmem:[#allocation10_spill] sm:$0xff] %v17808_v10 }
 0x64c   : > { %7812 = vrot.lane.b32.xlu1 %v17680_v40, %s13636_s22  ;;  %8663 = vrot.lane.b32.xlu0 %v17281_v15, %s13638_s24 }
 0x64e   : > { %v17814_v1 = vpop.permute.xlu1 %7206  ;;  %v17816_v44 = vpop.permute.xlu0 %7501 }
 0x64f   : > { %20801 = vst [vmem:[#allocation29_spill] sm:$0xff] %v17816_v44 }
 0x650   : > { %7196 = vrot.lane.b32.xlu1 %v17711_v42, %s13634_s20  ;;  %13511 = vrot.lane.b32.xlu0 %v20798_v63, %s13638_s24 }
 0x652   : > { %v17822_v34 = vpop.permute.xlu1 %7473  ;;  %v17824_v59 = vpop.permute.xlu0 %7790 }
 0x653   : > { %20802 = vst [vmem:[#allocation86_spill] sm:$0xff] %v17822_v34  ;;  %20803 = vst [vmem:[#allocation62_spill] sm:$0xff] %v17824_v59 }
 0x654   : > { %6904 = vrot.lane.b32.xlu1 %v17761_v47, %s13633_s19  ;;  %9024 = vrot.lane.b32.xlu0 %v17711_v42, %s13639_s25 }
 0x656   : > { %v17830_v10 = vpop.permute.xlu1 %7509  ;;  %v17832_v13 = vpop.permute.xlu0 %7816 }
 0x657   : > { %20804 = vst [vmem:[#allocation101_spill] sm:$0xff] %v17830_v10  ;;  %20805 = vst [vmem:[#allocation73_spill] sm:$0xff] %v17832_v13  ;;  %v17853_v13 = vld [vmem:[%s20028_s3 + $0x20] sm:$0xff] }
 0x658   : > { %7505 = vrot.lane.b32.xlu1 %v17761_v47, %s13635_s21  ;;  %9022 = vrot.lane.b32.xlu0 %v17680_v40, %s13639_s25 }
 0x659   : > { %12939 = vmatprep.mubr.msk.f32.mxu1 %vm3371_vm10, %v17853_v13 }
 0x65a   : > { %v17838_v44 = vpop.permute.xlu1 %7788  ;;  %v17840_v34 = vpop.permute.xlu0 %8685 }
 0x65b   : > { %20806 = vst [vmem:[#allocation27_spill] sm:$0xff] %v17838_v44  ;;  %20807 = vst [vmem:[#allocation4_spill] sm:$0xff] %v17840_v34 }
 0x65c   : > { %7820 = vrot.lane.b32.xlu1 %v17761_v47, %s13636_s22  ;;  %7507 = vrot.lane.b32.xlu0 %v17772_v24, %s13635_s21 }
 0x65e   : > { %v17846_v59 = vpop.permute.xlu1 %7824  ;;  %v17848_v10 = vpop.permute.xlu0 %6880 }
 0x65f   : > { %20808 = vst [vmem:[#allocation43_spill] sm:$0xff] %v17846_v59 }
 0x660   : > { %8400 = vrot.lane.b32.xlu1 %v17761_v47, %s13637_s23  ;;  %9018 = vrot.lane.b32.xlu0 %v17378_v25, %s13639_s25 }
 0x662   : > { %v17861_v34 = vpop.permute.xlu1 %8368  ;;  %v17863_v44 = vpop.permute.xlu0 %7481 }
 0x663   : > { %20809 = vst [vmem:[#allocation63_spill] sm:$0xff] %v17861_v34  ;;  %20810 = vst [vmem:[#allocation33_spill] sm:$0xff] %v17863_v44 }
 0x664   : > { %8715 = vrot.lane.b32.xlu1 %v17761_v47, %s13638_s24  ;;  %9014 = vrot.lane.b32.xlu0 %v17635_v51, %s13639_s25 }
 0x666   : > { %v17869_v59 = vpop.permute.xlu1 %8719  ;;  %v17871_v16 = vpop.permute.xlu0 %7796 }
 0x667   : > { %20811 = vst [vmem:[#allocation52_spill] sm:$0xff] %v17869_v59  ;;  %20812 = vst [vmem:[#allocation88_spill] sm:$0xff] %v17871_v16 }
 0x668   : > { %8669 = vrot.lane.b32.xlu1 %v17347_v33, %s13638_s24  ;;  %9010 = vrot.lane.b32.xlu0 %v17428_v31, %s13639_s25 }
 0x66a   : > { %v17877_v0 = vpop.permute.xlu1 %8683  ;;  %v17879_v34 = vpop.permute.xlu0 %8376 }
 0x66b   : > { %20813 = vst [vmem:[#allocation71_spill] sm:$0xff] %v17877_v0  ;;  %20814 = vst [vmem:[#allocation38_spill] sm:$0xff] %v17879_v34 }
 0x66c   : > { %7204 = vrot.lane.b32.xlu1 %v17772_v24, %s13634_s20  ;;  %7822 = vrot.lane.b32.xlu0 %v17772_v24, %s13636_s22 }
 0x66e   : > { %v17885_v44 = vpop.permute.xlu1 %6874  ;;  %v17887_v59 = vpop.permute.xlu0 %7180 }
 0x670   : > { %8667 = vrot.lane.b32.xlu1 %v17308_v52, %s13638_s24  ;;  %9000 = vrot.lane.b32.xlu0 %v17513_v60, %s13639_s25 }
 0x672   : > { %v17893_v16 = vpop.permute.xlu1 %6900  ;;  %v17895_v0 = vpop.permute.xlu0 %8378 }
 0x673   : > { %20815 = vst [vmem:[#allocation95_spill] sm:$0xff] %v17895_v0 }
 0x674   : > { %8661 = vrot.lane.b32.xlu1 %v17305_v56, %s13638_s24  ;;  %13521 = vrot.lane.b32.xlu0 %v20798_v63, %s13638_s24 }
 0x676   : > { %v17901_v34 = vpop.permute.xlu1 %8396  ;;  %v17903_v4 = vpop.permute.xlu0 %6888 }
 0x677   : > { %20816 = vst [vmem:[#allocation30_spill] sm:$0xff] %v17901_v34 }
 0x678   : > { %8659 = vrot.lane.b32.xlu1 %v17201_v58, %s13638_s24  ;;  %8992 = vrot.lane.b32.xlu0 %v17417_v6, %s13639_s25 }
 0x67a   : > { %v17909_v41 = vpop.permute.xlu1 %8370  ;;  %v17911_v61 = vpop.permute.xlu0 %7186 }
 0x67b   : > { %20817 = vst [vmem:[#allocation53_spill] sm:$0xff] %v17909_v41 }
 0x67c   : > { %9034 = vrot.lane.b32.xlu1 %v17492_v43, %s13639_s25  ;;  %8990 = vrot.lane.b32.xlu0 %v17385_v8, %s13639_s25 }
 0x67e   : > { %v17917_v0 = vpop.permute.xlu1 %8711  ;;  %v17919_v34 = vpop.permute.xlu0 %7489 }
 0x67f   : > { %20818 = vst [vmem:[#allocation106_spill] sm:$0xff] %v17917_v0  ;;  %20819 = vst [vmem:[#allocation72_spill] sm:$0xff] %v17919_v34 }
 0x680   : > { %9030 = vrot.lane.b32.xlu1 %v17761_v47, %s13639_s25  ;;  %8986 = vrot.lane.b32.xlu0 %v17269_v53, %s13639_s25 }
 0x682   : > { %v17925_v55 = vpop.permute.xlu1 %7178  ;;  %v17927_v41 = vpop.permute.xlu0 %7804 }
 0x683   : > { %20820 = vst [vmem:[#allocation70_spill] sm:$0xff] %v17927_v41 }
 0x684   : > { %9026 = vrot.lane.b32.xlu1 %v17524_v9, %s13639_s25  ;;  %13526 = vrot.lane.b32.xlu0 %v20798_v63, %s13639_s25 }
 0x686   : > { %v17933_v50 = vpop.permute.xlu1 %8691  ;;  %v17935_v0 = vpop.permute.xlu0 %8699 }
 0x687   : > { %20821 = vst [vmem:[#allocation19_spill] sm:$0xff] %v17933_v50  ;;  %20822 = vst [vmem:[#allocation57_spill] sm:$0xff] %v17935_v0 }
 0x688   : > { %9016 = vrot.lane.b32.xlu1 %v17730_v22, %s13639_s25  ;;  %8978 = vrot.lane.b32.xlu0 %v17281_v15, %s13639_s25 }
 0x68a   : > { %v17941_v34 = vpop.permute.xlu1 %6882  ;;  %v17943_v19 = vpop.permute.xlu0 %7194 }
 0x68c   : > { %13516 = vrot.lane.b32.xlu1 %v20798_v63, %s13638_s24  ;;  %13531 = vrot.lane.b32.xlu0 %v20798_v63, %s13639_s25 }
 0x68e   : > { %v17949_v41 = vpop.permute.xlu1 %7483  ;;  %v17951_v50 = vpop.permute.xlu0 %8392 }
 0x68f   : > { %20823 = vst [vmem:[#allocation12_spill] sm:$0xff] %v17949_v41  ;;  %20824 = vst [vmem:[#allocation83_spill] sm:$0xff] %v17951_v50 }
 0x690   : > { %9008 = vrot.lane.b32.xlu1 %v17615_v26, %s13639_s25  ;;  %9339 = vrot.lane.b32.xlu0 %v17711_v42, %s13640_s26 }
 0x692   : > { %v17957_v0 = vpop.permute.xlu1 %7798  ;;  %v17959_v48 = vpop.permute.xlu0 %8707 }
 0x693   : > { %20825 = vst [vmem:[#allocation78_spill] sm:$0xff] %v17957_v0  ;;  %20826 = vst [vmem:[#allocation110_spill] sm:$0xff] %v17959_v48 }
 0x694   : > { %9006 = vrot.lane.b32.xlu1 %v17577_v49, %s13639_s25  ;;  %9337 = vrot.lane.b32.xlu0 %v17680_v40, %s13640_s26 }
 0x696   : > { %v17965_v39 = vpop.permute.xlu1 %8693  ;;  %v17967_v41 = vpop.permute.xlu0 %6898 }
 0x697   : > { %20827 = vst [vmem:[#allocation111_spill] sm:$0xff] %v17965_v39 }
 0x698   : > { %9002 = vrot.lane.b32.xlu1 %v17298_v12, %s13639_s25  ;;  %9333 = vrot.lane.b32.xlu0 %v17378_v25, %s13640_s26 }
 0x69a   : > { %v17973_v50 = vpop.permute.xlu1 %8384  ;;  %v17975_v42 = vpop.permute.xlu0 %7499 }
 0x69b   : > { %20828 = vst [vmem:[#allocation112_spill] sm:$0xff] %v17973_v50 }
 0x69c   : > { %8998 = vrot.lane.b32.xlu1 %v17481_v21, %s13639_s25  ;;  %8717 = vrot.lane.b32.xlu0 %v17772_v24, %s13638_s24 }
 0x69e   : > { %v17981_v48 = vpop.permute.xlu1 %6890  ;;  %v17983_v39 = vpop.permute.xlu0 %7814 }
 0x69f   : > { %20829 = vst [vmem:[#allocation113_spill] sm:$0xff] %v17983_v39 }
 0x6a0   : > { %8994 = vrot.lane.b32.xlu1 %v17356_v37, %s13639_s25  ;;  %9329 = vrot.lane.b32.xlu0 %v17635_v51, %s13640_s26 }
 0x6a2   : > { %v17989_v25 = vpop.permute.xlu1 %7188  ;;  %v17991_v50 = vpop.permute.xlu0 %8394 }
 0x6a3   : > { %20830 = vst [vmem:[#allocation114_spill] sm:$0xff] %v17991_v50 }
 0x6a4   : > { %8984 = vrot.lane.b32.xlu1 %v17347_v33, %s13639_s25  ;;  %9325 = vrot.lane.b32.xlu0 %v17428_v31, %s13640_s26 }
 0x6a6   : > { %v17997_v40 = vpop.permute.xlu1 %7491  ;;  %v17999_v0 = vpop.permute.xlu0 %8709 }
 0x6a7   : > { %20831 = vst [vmem:[#allocation115_spill] sm:$0xff] %v17997_v40  ;;  %20832 = vst [vmem:[#allocation116_spill] sm:$0xff] %v17999_v0 }
 0x6a8   : > { %8982 = vrot.lane.b32.xlu1 %v17308_v52, %s13639_s25  ;;  %9315 = vrot.lane.b32.xlu0 %v17513_v60, %s13640_s26 }
 0x6aa   : > { %v18005_v51 = vpop.permute.xlu1 %7806  ;;  %v18007_v39 = vpop.permute.xlu0 %7202 }
 0x6ab   : > { %20833 = vst [vmem:[#allocation117_spill] sm:$0xff] %v18005_v51  ;;  %v6930_v51 = vsel %vm424_vm0, %v17967_v41, %v17893_v16  ;;  %v6924_v16 = vsel %vm424_vm0, %v17941_v34, %v17694_v27  ;;  %v6918_v27 = vsel %vm424_vm0, %v17685_v36, %v17645_v18  ;;  %v6912_v18 = vsel %vm424_vm0, %v17542_v35, %v17506_v23 }
 0x6ac   : > { %8402 = vrot.lane.b32.xlu1 %v17772_v24, %s13637_s23  ;;  %9032 = vrot.lane.b32.xlu0 %v17772_v24, %s13639_s25 }
 0x6ae   : > { %v18013_v50 = vpop.permute.xlu1 %8386  ;;  %v6907_v31 = vpop.permute.xlu0 %6906 }
 0x6af   : > { %20834 = vst [vmem:[#allocation118_spill] sm:$0xff] %v18013_v50  ;;  %v6933_v0 = vsel %vm424_vm0, %v6907_v31, %v17776_v29  ;;  %v6927_v29 = vsel %vm424_vm0, %v17981_v48, %v17639_v3  ;;  %v6921_v3 = vsel %vm424_vm0, %v17885_v44, %v17536_v7  ;;  %v6915_v7 = vsel %vm424_vm0, %v17599_v62, %v17495_v2  ;;  %v18082_v2 = vld [vmem:[%s20028_s3 + $0x30] sm:$0xff] }
 0x6b0   : > { %8976 = vrot.lane.b32.xlu1 %v17305_v56, %s13639_s25  ;;  %13541 = vrot.lane.b32.xlu0 %v20798_v63, %s13639_s25 }
 0x6b1   : > { %12923 = vmatprep.subr.mxu1 %v6933_v0 }
 0x6b2   : > { %12924 = vmatpush3.msra.mxu1 %v6933_v0  ;;  %v18021_v60 = vpop.permute.xlu1 %8701  ;;  %v18026_v40 = vpop.permute.xlu0 %8675 }
 0x6b3   : > { %20835 = vst [vmem:[#allocation119_spill] sm:$0xff] %v18021_v60  ;;  %20836 = vst [vmem:[#allocation120_spill] sm:$0xff] %v18026_v40  ;;  %12925 = vmatprep.subr.mxu1 %v6930_v51 }
 0x6b4   : > { %12926 = vmatpush3.msra.mxu1 %v6930_v51  ;;  %8974 = vrot.lane.b32.xlu1 %v17201_v58, %s13639_s25 }
 0x6b5   : > { %9307 = vrot.lane.b32.xlu0 %v17417_v6, %s13640_s26  ;;  %12927 = vmatprep.subr.mxu1 %v6927_v29 }
 0x6b6   : > { %12928 = vmatpush3.msra.mxu1 %v6927_v29  ;;  %v6897_v0 = vpop.permute.xlu1 %6896  ;;  %v18038_v40 = vpop.permute.xlu0 %8671 }
 0x6b7   : > { %20837 = vst [vmem:[#allocation121_spill] sm:$0xff] %v18038_v40  ;;  %12929 = vmatprep.subr.mxu1 %v6924_v16  ;;  %v13419_v40 = vunpack.i.h.bf16 %v17407_v54 }
 0x6b8   : > { %12930 = vmatpush3.msra.mxu1 %v6924_v16  ;;  %9349 = vrot.lane.b32.xlu1 %v17492_v43, %s13640_s26 }
 0x6b9   : > { %9305 = vrot.lane.b32.xlu0 %v17385_v8, %s13640_s26  ;;  %12931 = vmatprep.subr.mxu1 %v6921_v3  ;;  %v13424_v8 = vunpack.i.h.bf16 %v17419_v17 }
 0x6ba   : > { %12932 = vmatpush3.msra.mxu1 %v6921_v3  ;;  %v18047_v51 = vpop.permute.xlu1 %7497  ;;  %v18052_v29 = vpop.permute.xlu0 %13506 }
 0x6bb   : > { %20838 = vst [vmem:[#allocation122_spill] sm:$0xff] %v18052_v29  ;;  %12933 = vmatprep.subr.mxu1 %v6918_v27 }
 0x6bc   : > { %12934 = vmatpush3.msra.mxu1 %v6918_v27  ;;  %9345 = vrot.lane.b32.xlu1 %v17761_v47, %s13640_s26  ;;  %v18071_v27 = vld [vmem:[%s20028_s3 + $0x28] sm:$0xff] }
 0x6bd   : > { %9347 = vrot.lane.b32.xlu0 %v17772_v24, %s13640_s26  ;;  %12935 = vmatprep.subr.mxu1 %v6915_v7 }
 0x6be   : > { %12936 = vmatpush3.msra.mxu1 %v6915_v7  ;;  %v18061_v16 = vpop.permute.xlu1 %7812  ;;  %v18066_v3 = vpop.permute.xlu0 %8663 }
 0x6bf   : > { %20839 = vst [vmem:[#allocation123_spill] sm:$0xff] %v18066_v3  ;;  %12937 = vmatprep.subr.mxu1 %v6912_v18  ;;  %v18098_v3 = vld [vmem:[%s20028_s3] sm:$0xff] }
 0x6c0   : > { %12938 = vmatpush3.msra.mxu1 %v6912_v18  ;;  %9341 = vrot.lane.b32.xlu1 %v17524_v9, %s13640_s26  ;;  %v18093_v18 = vld [vmem:[%s20028_s3 + $0x38] sm:$0xff] }
 0x6c1   : > { %9301 = vrot.lane.b32.xlu0 %v17269_v53, %s13640_s26  ;;  %12940 = vmatmul.mubr.msk.f32.vlgmr.msra.gmra.mxu1 %vm3371_vm10, %v18071_v27  ;;  %v13423_v53 = vunpack.i.l.bf16 %v17419_v17 }
 0x6c2   : > { %v18084_v23 = vpop.permute.xlu1 %7196  ;;  %v18086_v7 = vpop.permute.xlu0 %13511  ;;  %12942 = vmatprep.mubr.msk.f32.mxu1 %vm3371_vm10, %v18082_v2 }
 0x6c3   : > { %20840 = vst [vmem:[#allocation124_spill] sm:$0xff] %v18086_v7 }
 0x6c4   : > { %9331 = vrot.lane.b32.xlu1 %v17730_v22, %s13640_s26 }
 0x6c5   : > { %9351 = vrot.lane.b32.xlu0 %v20798_v63, %s13640_s26  ;;  %12943 = vmatmul.mubr.msk.f32.gmra.mxu1 %vm3371_vm10, %v18093_v18 }
 0x6c6   : > { %v6905_v60 = vpop.permute.xlu1 %6904  ;;  %v18107_v7 = vpop.permute.xlu0 %9024  ;;  %12961 = vmatprep.mubr.msk.f32.mxu1 %vm3371_vm10, %v18098_v3 }
 0x6c7   : > { %20841 = vst [vmem:[#allocation125_spill] sm:$0xff] %v18107_v7  ;;  %v6932_v29 = vsel %vm424_vm0, %v6905_v60, %v6907_v31  ;;  %v6931_v50 = vsel %vm424_vm0, %v13419_v40, %v6905_v60  ;;  %v6929_v7 = vsel %vm424_vm0, %v6897_v0, %v17967_v41  ;;  %v6928_v31 = vsel %vm424_vm0, %v13423_v53, %v6897_v0 }
 0x6c8   : > { %13536 = vrot.lane.b32.xlu1 %v20798_v63, %s13639_s25  ;;  %6986 = vmatprep.subr.mxu0 %v6932_v29  ;;  %v6926_v60 = vsel %vm424_vm0, %v17903_v4, %v17981_v48  ;;  %v13418_v40 = vunpack.i.l.bf16 %v17407_v54  ;;  %v6925_v41 = vsel %vm424_vm0, %v13424_v8, %v17903_v4  ;;  %v6923_v53 = vsel %vm424_vm0, %v17848_v10, %v17941_v34 }
 0x6c9   : > { %9293 = vrot.lane.b32.xlu0 %v17281_v15, %s13640_s26  ;;  %6987 = vmatpush1.msra.mxu0 %v6931_v50  ;;  %v13414_v48 = vunpack.i.h.bf16 %v17314_v20  ;;  %v6920_v4 = vsel %vm424_vm0, %v17765_v46, %v17885_v44  ;;  %v13413_v8 = vunpack.i.l.bf16 %v17314_v20  ;;  %v6917_v34 = vsel %vm424_vm0, %v17713_v38, %v17685_v36 }
 0x6ca   : > { %v18121_v6 = vpop.permute.xlu1 %7505  ;;  %6988 = vmatprep.subr.mxu0 %v6929_v7  ;;  %v18128_v29 = vpop.permute.xlu0 %9022  ;;  %v6922_v17 = vsel %vm424_vm0, %v13418_v40, %v17848_v10  ;;  %v13409_v10 = vunpack.i.h.bf16 %v17394_v57  ;;  %v13408_v44 = vunpack.i.l.bf16 %v17394_v57  ;;  %v6914_v7 = vsel %vm424_vm0, %v17606_v45, %v17599_v62 }
 0x6cb   : > { %6989 = vmatpush1.msra.mxu0 %v6928_v31  ;;  %v6919_v50 = vsel %vm424_vm0, %v13414_v48, %v17765_v46  ;;  %v6916_v46 = vsel %vm424_vm0, %v13413_v8, %v17713_v38  ;;  %v6911_v38 = vsel %vm424_vm0, %v17444_v30, %v17542_v35  ;;  %v13428_v40 = vunpack.i.l.bf16 %v17434_v32 }
 0x6cc   : > { %9323 = vrot.lane.b32.xlu1 %v17615_v26, %s13640_s26  ;;  %6990 = vmatprep.subr.mxu0 %v6926_v60  ;;  %v6913_v36 = vsel %vm424_vm0, %v13409_v10, %v17606_v45  ;;  %v6910_v62 = vsel %vm424_vm0, %v13408_v44, %v17444_v30  ;;  %v9601_v30 = vld [vmem:[%s20032_s7 + $0x10] sm:$0xff]  ;;  %v9599_v60 = vld [vmem:[%s20032_s7] sm:$0xff]  ;;  %v13433_v8 = vunpack.i.l.bf16 %v17320_v5  ;;  %v7221_v10 = vsel %vm686_vm3, %v17925_v55, %v17887_v59 }
 0x6cd   : > { %9343 = vrot.lane.b32.xlu0 %v20798_v63, %s13640_s26  ;;  %6991 = vmatpush1.msra.mxu0 %v6925_v41  ;;  %v7229_v48 = vsel %vm686_vm3, %v13428_v40, %v18007_v39 }
 0x6ce   : > { %v18140_v54 = vpop.permute.xlu1 %7820  ;;  %6992 = vmatprep.subr.mxu0 %v6923_v53  ;;  %v18159_v20 = vpop.permute.xlu0 %7507 }
 0x6cf   : > { %6993 = vmatpush1.msra.mxu0 %v6922_v17 }
 0x6d0   : > { %9321 = vrot.lane.b32.xlu1 %v17577_v49, %s13640_s26  ;;  %6994 = vmatprep.subr.mxu0 %v6920_v4  ;;  %v7227_v4 = vsel %vm686_vm3, %v17943_v19, %v18084_v23 }
 0x6d1   : > { %9327 = vrot.lane.b32.xlu0 %v20798_v63, %s13640_s26  ;;  %6995 = vmatpush1.msra.mxu0 %v6919_v50  ;;  %v7224_v50 = vsel %vm686_vm3, %v17911_v61, %v17989_v25 }
 0x6d2   : > { %v18161_v0 = vpop.permute.xlu1 %8400  ;;  %6996 = vmatprep.subr.mxu0 %v6917_v34  ;;  %v18181_v31 = vpop.permute.xlu0 %9018  ;;  %v13434_v34 = vunpack.i.h.bf16 %v17320_v5  ;;  %v7222_v5 = vsel %vm686_vm3, %v17887_v59, %v17782_v11  ;;  %v20845_v59 = vld [vmem:[#allocation89_spill] sm:$0xff] }
 0x6d3   : > { %6997 = vmatpush1.msra.mxu0 %v6916_v46  ;;  %v20844_v46 = vld [vmem:[#allocation77_spill] sm:$0xff] }
 0x6d4   : > { %9317 = vrot.lane.b32.xlu1 %v17298_v12, %s13640_s26  ;;  %6998 = vmatprep.subr.mxu0 %v6914_v7 }
 0x6d5   : > { %9311 = vrot.lane.b32.xlu0 %v20798_v63, %s13640_s26  ;;  %6999 = vmatpush1.msra.mxu0 %v6913_v36 }
 0x6d6   : > { %v18177_v57 = vpop.permute.xlu1 %8715  ;;  %7000 = vmatprep.subr.mxu0 %v6911_v38 }
 0x6d7   : > { %7001 = vmatpush1.msra.mxu0 %v6910_v62 }
 0x6d8   : > { %9313 = vrot.lane.b32.xlu1 %v17481_v21, %s13640_s26  ;;  %12039 = vmatmul.mubr.msk.f32.vlgmr.msra.gmra.mxu0 %vm3371_vm10, %v17853_v13  ;;  %v18200_v13 = vpop.permute.xlu0 %9014 }
 0x6d9   : > { %9295 = vrot.lane.b32.xlu0 %v20798_v63, %s13640_s26  ;;  %7040 = vmatprep.mubr.f32.mxu0 %v20798_v63 }
 0x6da   : > { %v18190_v45 = vpop.permute.xlu1 %8669 }
 0x6dc   : > { %9309 = vrot.lane.b32.xlu1 %v17356_v37, %s13640_s26  ;;  %12040 = vmatmul.mubr.msk.f32.gmra.mxu0 %vm3371_vm10, %v18071_v27  ;;  %v13429_v27 = vunpack.i.h.bf16 %v17434_v32 }
 0x6dd   : > { %9615 = vperm.xlu0 %13243, %v9601_v30   ;;  %7046 = vmatprep.mubr.f32.mxu0 %v20798_v63  ;;  %v20846_v30 = vld [vmem:[#allocation59_spill] sm:$0xff] }
 0x6de   : > { %v7205_v35 = vpop.permute.xlu1 %7204  ;;  %v7226_v32 = vsel %vm686_vm3, %v13429_v27, %v17943_v19  ;;  %v7223_v19 = vsel %vm686_vm3, %v13433_v8, %v17911_v61  ;;  %v20843_v61 = vld [vmem:[#allocation81_spill] sm:$0xff]  ;;  %v20851_v8 = vld [vmem:[#allocation100_spill] sm:$0xff] }
 0x6df   : > { %v7230_v41 = vsel %vm686_vm3, %v18007_v39, %v7205_v35  ;;  %v7231_v53 = vsel %vm686_vm3, %v7205_v35, %v17814_v1  ;;  %v7228_v1 = vsel %vm686_vm3, %v18084_v23, %v17800_v14  ;;  %v18226_v39 = vpop.permute.xlu0 %9010  ;;  %v7225_v14 = vsel %vm686_vm3, %v17989_v25, %v17721_v28  ;;  %v20842_v28 = vld [vmem:[#allocation16_spill] sm:$0xff]  ;;  %v20847_v35 = vld [vmem:[#allocation5_spill] sm:$0xff] }
 0x6e0   : > { %9299 = vrot.lane.b32.xlu1 %v17347_v33, %s13640_s26  ;;  %7284 = vmatprep.subr.mxu0 %v7230_v41  ;;  %v7220_v25 = vsel %vm686_vm3, %v13434_v34, %v17925_v55  ;;  %v13438_v44 = vunpack.i.l.bf16 %v20842_v28  ;;  %v7218_v7 = vsel %vm686_vm3, %v20844_v46, %v20843_v61  ;;  %v7219_v55 = vsel %vm686_vm3, %v20843_v61, %v20845_v59  ;;  %v6806_v61 = vld [vmem:[%s20028_s3 + $0x8] sm:$0xff] }
 0x6e1   : > { %9605 = vperm.xlu0 %13243, %v9599_v60   ;;  %12945 = vmatprep.subr.mxu1 %v7231_v53  ;;  %v13439_v62 = vunpack.i.h.bf16 %v20842_v28  ;;  %v7215_v60 = vsel %vm686_vm3, %v20847_v35, %v20846_v30 }
 0x6e2   : > { %7285 = vmatpush1.msra.mxu0 %v7229_v48  ;;  %12946 = vmatpush3.msra.mxu1 %v7231_v53  ;;  %v18215_v17 = vpop.permute.xlu1 %8667  ;;  %v7217_v11 = vsel %vm686_vm3, %v13438_v44, %v20844_v46  ;;  %v20849_v53 = vld [vmem:[#allocation32_spill] sm:$0xff] }
 0x6e3   : > { %7286 = vmatprep.subr.mxu0 %v7227_v4  ;;  %12947 = vmatprep.subr.mxu1 %v7228_v1  ;;  %v18255_v36 = vpop.permute.xlu0 %7822  ;;  %v7214_v41 = vsel %vm686_vm3, %v13439_v62, %v20847_v35  ;;  %v13444_v27 = vunpack.i.h.bf16 %v20849_v53  ;;  %v13443_v48 = vunpack.i.l.bf16 %v20849_v53  ;;  %v20859_v53 = vld [vmem:[#allocation37_spill] sm:$0xff] }
 0x6e4   : > { %7287 = vmatpush1.msra.mxu0 %v7226_v32  ;;  %12948 = vmatpush3.msra.mxu1 %v7228_v1  ;;  %v20850_v1 = vld [vmem:[#allocation61_spill] sm:$0xff] }
 0x6e5   : > { %9297 = vrot.lane.b32.xlu1 %v17308_v52, %s13640_s26  ;;  %7288 = vmatprep.subr.mxu0 %v7224_v50  ;;  %v7212_v32 = vsel %vm686_vm3, %v20851_v8, %v20850_v1  ;;  %v20852_v50 = vld [vmem:[#allocation49_spill] sm:$0xff] }
 0x6e6   : > { %12949 = vmatprep.subr.mxu1 %v7225_v14  ;;  %7289 = vmatpush1.msra.mxu0 %v7223_v19  ;;  %v18239_v23 = vpop.permute.xlu1 %8661  ;;  %v7213_v34 = vsel %vm686_vm3, %v20850_v1, %v20852_v50  ;;  %v7211_v19 = vsel %vm686_vm3, %v13443_v48, %v20851_v8  ;;  %v20861_v48 = vld [vmem:[#allocation72_spill] sm:$0xff]  ;;  %v13454_v50 = vunpack.i.h.bf16 %v20859_v53 }
 0x6e7   : > { %12950 = vmatpush3.msra.mxu1 %v7225_v14  ;;  %7290 = vmatprep.subr.mxu0 %v7221_v10  ;;  %v18290_v14 = vpop.permute.xlu0 %9000  ;;  %v20853_v10 = vld [vmem:[#allocation94_spill] sm:$0xff] }
 0x6e8   : > { %12951 = vmatprep.subr.mxu1 %v7222_v5  ;;  %7291 = vmatpush1.msra.mxu0 %v7220_v25  ;;  %v20855_v25 = vld [vmem:[#allocation79_spill] sm:$0xff] }
 0x6e9   : > { %12952 = vmatpush3.msra.mxu1 %v7222_v5  ;;  %9291 = vrot.lane.b32.xlu1 %v17305_v56, %s13640_s26  ;;  %v20854_v5 = vld [vmem:[#allocation85_spill] sm:$0xff]  ;;  %v7210_v28 = vsel %vm686_vm3, %v20853_v10, %v20855_v25 }
 0x6ea   : > { %12041 = vmatmul.mubr.msk.f32.gmra.mxu0 %vm3371_vm10, %v18082_v2  ;;  %7292 = vmatprep.subr.mxu0 %v7218_v7  ;;  %v18264_v38 = vpop.permute.xlu1 %8659  ;;  %v20848_v2 = vld [vmem:[#allocation90_spill] sm:$0xff]  ;;  %v7208_v44 = vsel %vm686_vm3, %v13444_v27, %v20854_v5  ;;  %v20856_v7 = vld [vmem:[#allocation35_spill] sm:$0xff]  ;;  %v13453_v27 = vunpack.i.l.bf16 %v20859_v53  ;;  %v20871_v53 = vld [vmem:[#allocation92_spill] sm:$0xff] }
 0x6eb   : > { %12953 = vmatprep.subr.mxu1 %v7219_v55  ;;  %7293 = vmatpush1.msra.mxu0 %v7217_v11  ;;  %v7216_v40 = vsel %vm686_vm3, %v20846_v30, %v20848_v2  ;;  %v13448_v59 = vunpack.i.l.bf16 %v20856_v7  ;;  %v20857_v11 = vld [vmem:[#allocation101_spill] sm:$0xff]  ;;  %v13449_v30 = vunpack.i.h.bf16 %v20856_v7  ;;  %v18321_v35 = vpop.permute.xlu0 %13521  ;;  %v7530_v2 = vsel %vm961_vm4, %v18047_v51, %v17975_v42  ;;  %v20866_v7 = vld [vmem:[#allocation20_spill] sm:$0xff] }
 0x6ec   : > { %12954 = vmatpush3.msra.mxu1 %v7219_v55  ;;  %7294 = vmatprep.subr.mxu0 %v7215_v60  ;;  %v7533_v55 = vsel %vm961_vm4, %v18121_v6, %v18159_v20  ;;  %v7534_v62 = vsel %vm961_vm4, %v18159_v20, %v20857_v11  ;;  %v20868_v11 = vld [vmem:[#allocation86_spill] sm:$0xff] }
 0x6ed   : > { %12955 = vmatprep.subr.mxu1 %v7216_v40  ;;  %7052 = vmatprep.mubr.f32.mxu0 %v20798_v63  ;;  %v7532_v60 = vsel %vm961_vm4, %v13448_v59, %v18121_v6  ;;  %v20860_v6 = vld [vmem:[#allocation115_spill] sm:$0xff]  ;;  %v13458_v59 = vunpack.i.l.bf16 %v20866_v7 }
 0x6ee   : > { %7295 = vmatpush1.msra.mxu0 %v7214_v41  ;;  %12956 = vmatpush3.msra.mxu1 %v7216_v40  ;;  %v18278_v4 = vpop.permute.xlu1 %9034  ;;  %v20858_v40 = vld [vmem:[#allocation29_spill] sm:$0xff]  ;;  %v7529_v41 = vsel %vm961_vm4, %v13449_v30, %v18047_v51  ;;  %v7527_v1 = vsel %vm961_vm4, %v20861_v48, %v20860_v6  ;;  %v20869_v30 = vld [vmem:[#allocation108_spill] sm:$0xff] }
 0x6ef   : > { %9289 = vrot.lane.b32.xlu1 %v17201_v58, %s13640_s26  ;;  %12042 = vmatmul.mubr.msk.f32.gmra.mxu0 %vm3371_vm10, %v18093_v18  ;;  %v7209_v18 = vsel %vm686_vm3, %v20854_v5, %v20853_v10  ;;  %v7531_v20 = vsel %vm961_vm4, %v17975_v42, %v20858_v40  ;;  %v20862_v42 = vld [vmem:[#allocation91_spill] sm:$0xff]  ;;  %v20864_v10 = vld [vmem:[#allocation33_spill] sm:$0xff]  ;;  %v13459_v40 = vunpack.i.h.bf16 %v20866_v7 }
 0x6f0   : > { %7296 = vmatprep.subr.mxu0 %v7212_v32  ;;  %12957 = vmatprep.subr.mxu1 %v7213_v34  ;;  %v7528_v51 = vsel %vm961_vm4, %v20860_v6, %v20862_v42  ;;  %v7526_v32 = vsel %vm961_vm4, %v13453_v27, %v20861_v48  ;;  %v6808_v6 = vld [vmem:[%s20028_s3 + $0x18] sm:$0xff] }
 0x6f1   : > { %7297 = vmatpush1.msra.mxu0 %v7211_v19  ;;  %12958 = vmatpush3.msra.mxu1 %v7213_v34  ;;  %v18351_v34 = vpop.permute.xlu0 %8992  ;;  %v20863_v19 = vld [vmem:[#allocation12_spill] sm:$0xff] }
 0x6f2   : > { %7298 = vmatprep.subr.mxu0 %v7209_v18  ;;  %12959 = vmatprep.subr.mxu1 %v7210_v28  ;;  %v18305_v46 = vpop.permute.xlu1 %9030  ;;  %v7524_v5 = vsel %vm961_vm4, %v20864_v10, %v20863_v19  ;;  %v20865_v18 = vld [vmem:[#allocation93_spill] sm:$0xff] }
 0x6f3   : > { %7299 = vmatpush1.msra.mxu0 %v7208_v44  ;;  %7332 = vmatprep.mubr.f32.mxu0 %v20798_v63  ;;  %v7525_v25 = vsel %vm961_vm4, %v20863_v19, %v20865_v18  ;;  %v7523_v44 = vsel %vm961_vm4, %v13454_v50, %v20864_v10  ;;  %v20873_v50 = vld [vmem:[#allocation31_spill] sm:$0xff]  ;;  %v20875_v18 = vld [vmem:[#allocation76_spill] sm:$0xff] }
 0x6f4   : > { %12960 = vmatpush3.msra.mxu1 %v7210_v28  ;;  %9335 = vrot.lane.b32.xlu1 %v20798_v63, %s13640_s26  ;;  %v6807_v28 = vld [vmem:[%s20028_s3 + $0x10] sm:$0xff]  ;;  %v13464_v19 = vunpack.i.h.bf16 %v20873_v50  ;;  %v13463_v10 = vunpack.i.l.bf16 %v20873_v50 }
 0x6f5   : > { %12047 = vmatmul.mubr.msk.f32.vlgmr.msra.gmra.mxu0 %vm3371_vm10, %v18098_v3  ;;  %12962 = vmatmul.mubr.msk.f32.vlgmr.msra.gmra.mxu1 %vm3371_vm10, %v6806_v61 }
 0x6f6   : > { %7587 = vmatprep.subr.mxu0 %v7533_v55  ;;  %12967 = vmatprep.subr.mxu1 %v7534_v62  ;;  %v18325_v3 = vpop.permute.xlu1 %9026  ;;  %v20867_v55 = vld [vmem:[#allocation10_spill] sm:$0xff] }
 0x6f7   : > { %7588 = vmatpush1.msra.mxu0 %v7532_v60  ;;  %12968 = vmatpush3.msra.mxu1 %v7534_v62  ;;  %v7521_v62 = vsel %vm961_vm4, %v20868_v11, %v20867_v55  ;;  %v7522_v60 = vsel %vm961_vm4, %v20867_v55, %v20869_v30 }
 0x6f8   : > { %7589 = vmatprep.subr.mxu0 %v7530_v2  ;;  %12969 = vmatprep.subr.mxu1 %v7531_v20  ;;  %v7520_v2 = vsel %vm961_vm4, %v13458_v59, %v20868_v11  ;;  %v7514_v59 = vsel %vm961_vm4, %v13463_v10, %v20875_v18  ;;  %v20877_v11 = vld [vmem:[#allocation109_spill] sm:$0xff] }
 0x6f9   : > { %7338 = vmatprep.mubr.f32.mxu0 %v20798_v63  ;;  %7590 = vmatpush1.msra.mxu0 %v7529_v41  ;;  %v20870_v41 = vld [vmem:[#allocation13_spill] sm:$0xff] }
 0x6fa   : > { %12970 = vmatpush3.msra.mxu1 %v7531_v20  ;;  %9319 = vrot.lane.b32.xlu1 %v20798_v63, %s13640_s26  ;;  %v18342_v8 = vpop.permute.xlu1 %9016  ;;  %v18380_v20 = vpop.permute.xlu0 %8990  ;;  %v7518_v27 = vsel %vm961_vm4, %v20871_v53, %v20870_v41 }
 0x6fb   : > { %12048 = vmatmul.mubr.msk.f32.gmra.mxu0 %vm3371_vm10, %v6806_v61  ;;  %7591 = vmatprep.subr.mxu0 %v7527_v1  ;;  %v20872_v1 = vld [vmem:[#allocation34_spill] sm:$0xff] }
 0x6fc   : > { %12971 = vmatprep.subr.mxu1 %v7528_v51  ;;  %7592 = vmatpush1.msra.mxu0 %v7526_v32  ;;  %v7519_v42 = vsel %vm961_vm4, %v20870_v41, %v20872_v1  ;;  %v7517_v32 = vsel %vm961_vm4, %v13459_v40, %v20871_v53  ;;  %v12055_v41 = vld [vmem:[%s20028_s3 + $0x40] sm:$0xff]  ;;  %v9600_v53 = vld [vmem:[%s20032_s7 + $0x8] sm:$0xff]  ;;  %v20880_v1 = vld [vmem:[#allocation7_spill] sm:$0xff] }
 0x6fd   : > { %12972 = vmatpush3.msra.mxu1 %v7528_v51  ;;  %7593 = vmatprep.subr.mxu0 %v7524_v5  ;;  %v9602_v51 = vld [vmem:[%s20032_s7 + $0x18] sm:$0xff]  ;;  %v20874_v5 = vld [vmem:[#allocation18_spill] sm:$0xff] }
 0x6fe   : > { %12973 = vmatprep.subr.mxu1 %v7525_v25  ;;  %7344 = vmatprep.mubr.f32.mxu0 %v20798_v63  ;;  %v18365_v61 = vpop.permute.xlu1 %13516  ;;  %v18414_v55 = vpop.permute.xlu0 %8986 }
 0x6ff   : > { %7594 = vmatpush1.msra.mxu0 %v7523_v44  ;;  %12974 = vmatpush3.msra.mxu1 %v7525_v25  ;;  %v7515_v25 = vsel %vm961_vm4, %v20875_v18, %v20874_v5  ;;  %v20876_v44 = vld [vmem:[#allocation60_spill] sm:$0xff] }
 0x700   : > { %9303 = vrot.lane.b32.xlu1 %v20798_v63, %s13640_s26  ;;  %12049 = vmatmul.mubr.msk.f32.gmra.mxu0 %vm3371_vm10, %v6807_v28  ;;  %v7516_v7 = vsel %vm961_vm4, %v20874_v5, %v20876_v44  ;;  %v12057_v5 = vld [vmem:[%s20028_s3 + $0x50] sm:$0xff]  ;;  %v20882_v44 = vld [vmem:[#allocation113_spill] sm:$0xff] }
 0x701   : > { %7595 = vmatprep.subr.mxu0 %v7521_v62  ;;  %12975 = vmatprep.subr.mxu1 %v7522_v60  ;;  %v20878_v62 = vld [vmem:[#allocation97_spill] sm:$0xff] }
 0x702   : > { %7596 = vmatpush1.msra.mxu0 %v7520_v2  ;;  %12976 = vmatpush3.msra.mxu1 %v7522_v60  ;;  %v18388_v48 = vpop.permute.xlu1 %9008  ;;  %v7512_v30 = vsel %vm961_vm4, %v20878_v62, %v20877_v11  ;;  %v20879_v60 = vld [vmem:[#allocation96_spill] sm:$0xff]  ;;  %v7511_v40 = vsel %vm961_vm4, %v13464_v19, %v20878_v62  ;;  %v18446_v19 = vpop.permute.xlu0 %13526 }
 0x703   : > { %12964 = vmatprep.mubr.msk.f32.mxu1 %vm3371_vm10, %v6807_v28  ;;  %7597 = vmatprep.subr.mxu0 %v7518_v27  ;;  %v7513_v2 = vsel %vm961_vm4, %v20877_v11, %v20879_v60  ;;  %v12056_v27 = vld [vmem:[%s20028_s3 + $0x48] sm:$0xff]  ;;  %v20884_v62 = vld [vmem:[#allocation28_spill] sm:$0xff] }
 0x704   : > { %12977 = vmatprep.subr.mxu1 %v7519_v42  ;;  %7350 = vmatprep.mubr.f32.mxu0 %v20798_v63 }
 0x705   : > { %12965 = vmatmul.mubr.msk.f32.gmra.mxu1 %vm3371_vm10, %v6808_v6  ;;  %7598 = vmatpush1.msra.mxu0 %v7517_v32  ;;  %v20881_v32 = vld [vmem:[#allocation43_spill] sm:$0xff] }
 0x706   : > { %12978 = vmatpush3.msra.mxu1 %v7519_v42  ;;  %9620 = vperm.xlu1 %13244, %v9602_v51   ;;  %v18406_v28 = vpop.permute.xlu1 %9006  ;;  %v13468_v42 = vunpack.i.l.bf16 %v20880_v1  ;;  %v7848_v51 = vsel %vm1260_vm5, %v18140_v54, %v18255_v36  ;;  %v7849_v50 = vsel %vm1260_vm5, %v18255_v36, %v20881_v32  ;;  %v7845_v36 = vsel %vm1260_vm5, %v18061_v16, %v20882_v44  ;;  %v20889_v32 = vld [vmem:[#allocation88_spill] sm:$0xff] }
 0x707   : > { %12050 = vmatmul.mubr.msk.f32.gmra.mxu0 %vm3371_vm10, %v6808_v6  ;;  %7599 = vmatprep.subr.mxu0 %v7515_v25  ;;  %v13469_v25 = vunpack.i.h.bf16 %v20880_v1 }
 0x708   : > { %12979 = vmatprep.subr.mxu1 %v7516_v7  ;;  %7600 = vmatpush1.msra.mxu0 %v7514_v59  ;;  %v7847_v10 = vsel %vm1260_vm5, %v13468_v42, %v18140_v54  ;;  %v12058_v54 = vld [vmem:[%s20028_s3 + $0x58] sm:$0xff]  ;;  %v18481_v42 = vpop.permute.xlu0 %8978 }
 0x709   : > { %12980 = vmatpush3.msra.mxu1 %v7516_v7  ;;  %7601 = vmatprep.subr.mxu0 %v7512_v30  ;;  %v20883_v7 = vld [vmem:[#allocation73_spill] sm:$0xff]  ;;  %v7844_v11 = vsel %vm1260_vm5, %v13469_v25, %v18061_v16  ;;  %v13473_v30 = vunpack.i.l.bf16 %v20884_v62  ;;  %v13474_v16 = vunpack.i.h.bf16 %v20884_v62  ;;  %v20893_v62 = vld [vmem:[#allocation27_spill] sm:$0xff] }
 0x70a   : > { %12981 = vmatprep.subr.mxu1 %v7513_v2  ;;  %7602 = vmatpush1.msra.mxu0 %v7511_v40  ;;  %v18433_v6 = vpop.permute.xlu1 %9002  ;;  %v7846_v59 = vsel %vm1260_vm5, %v20882_v44, %v20883_v7  ;;  %v20886_v40 = vld [vmem:[#allocation70_spill] sm:$0xff]  ;;  %v20891_v7 = vld [vmem:[#allocation8_spill] sm:$0xff] }
 0x70b   : > { %7635 = vmatprep.mubr.f32.mxu0 %v20798_v63  ;;  %12982 = vmatpush3.msra.mxu1 %v7513_v2  ;;  %v20885_v2 = vld [vmem:[#allocation117_spill] sm:$0xff]  ;;  %v7838_v44 = vsel %vm1260_vm5, %v13474_v16, %v20889_v32  ;;  %v20896_v16 = vld [vmem:[#allocation6_spill] sm:$0xff] }
 0x70c   : > { %12983 = vmatprep.mubr.msk.f32.mxu1 %vm3371_vm10, %v12055_v41  ;;  %9610 = vperm.xlu1 %13244, %v9600_v53   ;;  %v20887_v53 = vld [vmem:[#allocation80_spill] sm:$0xff] }
 0x70d   : > { %12059 = vmatmul.mubr.msk.f32.vlgmr.msra.gmra.mxu0 %vm3371_vm10, %v12055_v41  ;;  %12984 = vmatmul.mubr.msk.f32.vlgmr.msra.gmra.mxu1 %vm3371_vm10, %v12056_v27  ;;  %v7842_v41 = vsel %vm1260_vm5, %v20886_v40, %v20885_v2  ;;  %v7843_v1 = vsel %vm1260_vm5, %v20885_v2, %v20887_v53  ;;  %v20894_v2 = vld [vmem:[#allocation67_spill] sm:$0xff] }
 0x70e   : > { %7902 = vmatprep.subr.mxu0 %v7848_v51  ;;  %12989 = vmatprep.subr.mxu1 %v7849_v50  ;;  %v18453_v18 = vpop.permute.xlu1 %8998  ;;  %v7841_v51 = vsel %vm1260_vm5, %v13473_v30, %v20886_v40 }
 0x70f   : > { %7903 = vmatpush1.msra.mxu0 %v7847_v10  ;;  %12990 = vmatpush3.msra.mxu1 %v7849_v50  ;;  %v20890_v10 = vld [vmem:[#allocation103_spill] sm:$0xff] }
 0x710   : > { %7904 = vmatprep.subr.mxu0 %v7845_v36  ;;  %12991 = vmatprep.subr.mxu1 %v7846_v59 }
 0x711   : > { %7641 = vmatprep.mubr.f32.mxu0 %v20798_v63  ;;  %12986 = vmatprep.mubr.msk.f32.mxu1 %vm3371_vm10, %v12057_v5 }
 0x712   : > { %7905 = vmatpush1.msra.mxu0 %v7844_v11  ;;  %12992 = vmatpush3.msra.mxu1 %v7846_v59  ;;  %v18470_v60 = vpop.permute.xlu1 %8994  ;;  %v13478_v59 = vunpack.i.l.bf16 %v20891_v7  ;;  %v20892_v11 = vld [vmem:[#allocation62_spill] sm:$0xff] }
 0x713   : > { %12060 = vmatmul.mubr.msk.f32.gmra.mxu0 %vm3371_vm10, %v12056_v27  ;;  %12987 = vmatmul.mubr.msk.f32.gmra.mxu1 %vm3371_vm10, %v12058_v54  ;;  %v20888_v27 = vld [vmem:[#allocation78_spill] sm:$0xff]  ;;  %v7836_v30 = vsel %vm1260_vm5, %v20893_v62, %v20892_v11  ;;  %v7837_v40 = vsel %vm1260_vm5, %v20892_v11, %v20894_v2  ;;  %v20900_v11 = vld [vmem:[#allocation105_spill] sm:$0xff] }
 0x714   : > { %7906 = vmatprep.subr.mxu0 %v7842_v41  ;;  %12993 = vmatprep.subr.mxu1 %v7843_v1  ;;  %v7839_v50 = vsel %vm1260_vm5, %v20889_v32, %v20888_v27  ;;  %v7840_v25 = vsel %vm1260_vm5, %v20888_v27, %v20890_v10  ;;  %v13479_v41 = vunpack.i.h.bf16 %v20891_v7  ;;  %v7835_v53 = vsel %vm1260_vm5, %v13478_v59, %v20893_v62  ;;  %v20897_v27 = vld [vmem:[#allocation56_spill] sm:$0xff]  ;;  %v20899_v59 = vld [vmem:[#allocation15_spill] sm:$0xff] }
 0x715   : > { %7907 = vmatpush1.msra.mxu0 %v7841_v51  ;;  %12994 = vmatpush3.msra.mxu1 %v7843_v1  ;;  %v18507_v1 = vpop.permute.xlu0 %13531  ;;  %v7830_v62 = vsel %vm1260_vm5, %v20900_v11, %v20899_v59 }
 0x716   : > { %7908 = vmatprep.subr.mxu0 %v7839_v50  ;;  %12995 = vmatprep.subr.mxu1 %v7840_v25  ;;  %v18493_v36 = vpop.permute.xlu1 %8984  ;;  %v7832_v10 = vsel %vm1260_vm5, %v13479_v41, %v20896_v16 }
 0x717   : > { %7647 = vmatprep.mubr.f32.mxu0 %v20798_v63  ;;  %7909 = vmatpush1.msra.mxu0 %v7838_v44 }
 0x718   : > { %12996 = vmatpush3.msra.mxu1 %v7840_v25  ;;  %12061 = vmatmul.mubr.msk.f32.gmra.mxu0 %vm3371_vm10, %v12057_v5  ;;  %v20895_v5 = vld [vmem:[#allocation54_spill] sm:$0xff]  ;;  %v20898_v25 = vld [vmem:[#allocation41_spill] sm:$0xff] }
 0x719   : > { %7910 = vmatprep.subr.mxu0 %v7836_v30  ;;  %12997 = vmatprep.subr.mxu1 %v7837_v40  ;;  %v7833_v51 = vsel %vm1260_vm5, %v20896_v16, %v20895_v5  ;;  %v7834_v32 = vsel %vm1260_vm5, %v20895_v5, %v20897_v27  ;;  %v13484_v44 = vunpack.i.h.bf16 %v20898_v25  ;;  %v13483_v7 = vunpack.i.l.bf16 %v20898_v25  ;;  %v20901_v30 = vld [vmem:[#allocation58_spill] sm:$0xff]  ;;  %v20903_v5 = vld [vmem:[#allocation45_spill] sm:$0xff]  ;;  %v20904_v16 = vld [vmem:[#allocation47_spill] sm:$0xff] }
 0x71a   : > { %7911 = vmatpush1.msra.mxu0 %v7835_v53  ;;  %12998 = vmatpush3.msra.mxu1 %v7837_v40  ;;  %v18515_v50 = vpop.permute.xlu1 %8982  ;;  %v7831_v2 = vsel %vm1260_vm5, %v20899_v59, %v20901_v30  ;;  %v20902_v53 = vld [vmem:[#allocation102_spill] sm:$0xff]  ;;  %v12067_v27 = vld [vmem:[%s20028_s3 + $0x60] sm:$0xff]  ;;  %v12068_v25 = vld [vmem:[%s20028_s3 + $0x68] sm:$0xff] }
 0x71b   : > { %7912 = vmatprep.subr.mxu0 %v7833_v51  ;;  %12999 = vmatprep.subr.mxu1 %v7834_v32  ;;  %v7829_v40 = vsel %vm1260_vm5, %v13483_v7, %v20900_v11  ;;  %v7828_v51 = vsel %vm1260_vm5, %v20902_v53, %v20904_v16  ;;  %v20905_v11 = vld [vmem:[#allocation99_spill] sm:$0xff]  ;;  %v20906_v30 = vld [vmem:[#allocation24_spill] sm:$0xff] }
 0x71c   : > { %7653 = vmatprep.mubr.f32.mxu0 %v20798_v63  ;;  %7913 = vmatpush1.msra.mxu0 %v7832_v10  ;;  %v7826_v10 = vsel %vm1260_vm5, %v13484_v44, %v20903_v5  ;;  %v12069_v44 = vld [vmem:[%s20028_s3 + $0x70] sm:$0xff] }
 0x71d   : > { %13000 = vmatpush3.msra.mxu1 %v7834_v32  ;;  %12062 = vmatmul.mubr.msk.f32.gmra.mxu0 %vm3371_vm10, %v12058_v54  ;;  %v7827_v54 = vsel %vm1260_vm5, %v20903_v5, %v20902_v53  ;;  %v18542_v32 = vpop.permute.xlu0 %9339  ;;  %v20909_v53 = vld [vmem:[#allocation17_spill] sm:$0xff] }
 0x71e   : > { %7914 = vmatprep.subr.mxu0 %v7830_v62  ;;  %13001 = vmatprep.subr.mxu1 %v7831_v2  ;;  %v18531_v41 = vpop.permute.xlu1 %8402 }
 0x71f   : > { %7915 = vmatpush1.msra.mxu0 %v7829_v40  ;;  %13002 = vmatpush3.msra.mxu1 %v7831_v2  ;;  %v20908_v2 = vld [vmem:[#allocation26_spill] sm:$0xff] }
 0x720   : > { %7916 = vmatprep.subr.mxu0 %v7827_v54  ;;  %13003 = vmatprep.subr.mxu1 %v7828_v51  ;;  %v20913_v54 = vld [vmem:[#allocation25_spill] sm:$0xff] }
 0x721   : > { %7917 = vmatpush1.msra.mxu0 %v7826_v10  ;;  %7950 = vmatprep.mubr.f32.mxu0 %v20798_v63  ;;  %v18562_v59 = vpop.permute.xlu0 %9337 }
 0x722   : > { %13004 = vmatpush3.msra.mxu1 %v7828_v51  ;;  %13005 = vmatprep.mubr.msk.f32.mxu1 %vm3371_vm10, %v12067_v27  ;;  %v18551_v7 = vpop.permute.xlu1 %8976 }
 0x723   : > { %12071 = vmatmul.mubr.msk.f32.vlgmr.msra.gmra.mxu0 %vm3371_vm10, %v12067_v27  ;;  %13006 = vmatmul.mubr.msk.f32.vlgmr.msra.gmra.mxu1 %vm3371_vm10, %v12068_v25 }
 0x724   : > { %8105 = vmatprep.subr.mxu0 %v17772_v24  ;;  %13011 = vmatprep.subr.mxu1 %v17492_v43  ;;  %v12070_v24 = vld [vmem:[%s20028_s3 + $0x78] sm:$0xff] }
 0x725   : > { %8106 = vmatpush1.msra.mxu0 %v17761_v47  ;;  %13012 = vmatpush3.msra.mxu1 %v17492_v43  ;;  %v20907_v43 = vld [vmem:[#allocation46_spill] sm:$0xff]  ;;  %v18583_v40 = vpop.permute.xlu0 %9333 }
 0x726   : > { %8107 = vmatprep.subr.mxu0 %v20905_v11  ;;  %13013 = vmatprep.subr.mxu1 %v17524_v9  ;;  %v18569_v62 = vpop.permute.xlu1 %8974 }
 0x727   : > { %7956 = vmatprep.mubr.f32.mxu0 %v20798_v63  ;;  %13008 = vmatprep.mubr.msk.f32.mxu1 %vm3371_vm10, %v12069_v44 }
 0x728   : > { %8108 = vmatpush1.msra.mxu0 %v20906_v30  ;;  %13014 = vmatpush3.msra.mxu1 %v17524_v9  ;;  %v20910_v9 = vld [vmem:[#allocation36_spill] sm:$0xff]  ;;  %v20918_v30 = vld [vmem:[#allocation50_spill] sm:$0xff] }
 0x729   : > { %12072 = vmatmul.mubr.msk.f32.gmra.mxu0 %vm3371_vm10, %v12068_v25  ;;  %13009 = vmatmul.mubr.msk.f32.gmra.mxu1 %vm3371_vm10, %v12070_v24  ;;  %v18599_v5 = vpop.permute.xlu0 %8717  ;;  %v20916_v25 = vld [vmem:[#allocation30_spill] sm:$0xff] }
 0x72a   : > { %8109 = vmatprep.subr.mxu0 %v17730_v22  ;;  %13015 = vmatprep.subr.mxu1 %v20907_v43  ;;  %v18579_v47 = vpop.permute.xlu1 %9349 }
 0x72b   : > { %8110 = vmatpush1.msra.mxu0 %v20908_v2  ;;  %13016 = vmatpush3.msra.mxu1 %v20907_v43  ;;  %v13493_v43 = vunpack.i.l.bf16 %v20918_v30  ;;  %v20919_v2 = vld [vmem:[#allocation83_spill] sm:$0xff] }
 0x72c   : > { %8111 = vmatprep.subr.mxu0 %v17615_v26  ;;  %13017 = vmatprep.subr.mxu1 %v20909_v53  ;;  %v20911_v26 = vld [vmem:[#allocation51_spill] sm:$0xff] }
 0x72d   : > { %7962 = vmatprep.mubr.f32.mxu0 %v20798_v63  ;;  %8112 = vmatpush1.msra.mxu0 %v17577_v49  ;;  %v20912_v49 = vld [vmem:[#allocation14_spill] sm:$0xff]  ;;  %v18625_v27 = vpop.permute.xlu0 %9329 }
 0x72e   : > { %13018 = vmatpush3.msra.mxu1 %v20909_v53  ;;  %12073 = vmatmul.mubr.msk.f32.gmra.mxu0 %vm3371_vm10, %v12069_v44  ;;  %v18593_v22 = vpop.permute.xlu1 %9345  ;;  %v20917_v44 = vld [vmem:[#allocation114_spill] sm:$0xff] }
 0x72f   : > { %8113 = vmatprep.subr.mxu0 %v20910_v9  ;;  %13019 = vmatprep.subr.mxu1 %v17298_v12  ;;  %v8426_v53 = vsel %vm1845_vm6, %v20919_v2, %v20917_v44  ;;  %v20927_v2 = vld [vmem:[#allocation75_spill] sm:$0xff] }
 0x730   : > { %8114 = vmatpush1.msra.mxu0 %v17481_v21  ;;  %13020 = vmatpush3.msra.mxu1 %v17298_v12  ;;  %v12079_v12 = vld [vmem:[%s20028_s3 + $0x80] sm:$0xff] }
 0x731   : > { %8115 = vmatprep.subr.mxu0 %v20911_v26  ;;  %13021 = vmatprep.subr.mxu1 %v17356_v37  ;;  %v18656_v9 = vpop.permute.xlu0 %9325  ;;  %v13494_v26 = vunpack.i.h.bf16 %v20918_v30 }
 0x732   : > { %7968 = vmatprep.mubr.f32.mxu0 %v20798_v63  ;;  %8116 = vmatpush1.msra.mxu0 %v20912_v49  ;;  %v18612_v21 = vpop.permute.xlu1 %9341  ;;  %v20920_v49 = vld [vmem:[#allocation66_spill] sm:$0xff] }
 0x733   : > { %13022 = vmatpush3.msra.mxu1 %v17356_v37  ;;  %12074 = vmatmul.mubr.msk.f32.gmra.mxu0 %vm3371_vm10, %v12070_v24  ;;  %v20914_v37 = vld [vmem:[#allocation39_spill] sm:$0xff] }
 0x734   : > { %8117 = vmatprep.subr.mxu0 %v17347_v33  ;;  %13023 = vmatprep.subr.mxu1 %v20913_v54  ;;  %v12080_v33 = vld [vmem:[%s20028_s3 + $0x88] sm:$0xff]  ;;  %v13488_v16 = vunpack.i.l.bf16 %v20914_v37  ;;  %v13489_v10 = vunpack.i.h.bf16 %v20914_v37  ;;  %v12082_v24 = vld [vmem:[%s20028_s3 + $0x98] sm:$0xff]  ;;  %v8425_v37 = vsel %vm1845_vm6, %v20920_v49, %v13493_v43 }
 0x735   : > { %8118 = vmatpush1.msra.mxu0 %v17308_v52  ;;  %13024 = vmatpush3.msra.mxu1 %v20913_v54  ;;  %v20915_v52 = vld [vmem:[#allocation23_spill] sm:$0xff]  ;;  %v20921_v54 = vld [vmem:[#allocation118_spill] sm:$0xff]  ;;  %v18682_v43 = vpop.permute.xlu0 %9315 }
 0x736   : > { %8119 = vmatprep.subr.mxu0 %v17305_v56  ;;  %13025 = vmatprep.subr.mxu1 %v17281_v15  ;;  %v8430_v51 = vsel %vm1845_vm6, %v18531_v41, %v20915_v52  ;;  %v8429_v56 = vsel %vm1845_vm6, %v18161_v0, %v18531_v41  ;;  %v8427_v0 = vsel %vm1845_vm6, %v20917_v44, %v20916_v25  ;;  %v18645_v11 = vpop.permute.xlu1 %9331 }
 0x737   : > { %8120 = vmatpush1.msra.mxu0 %v17201_v58  ;;  %8153 = vmatprep.mubr.f32.mxu0 %v20798_v63  ;;  %v8431_v58 = vsel %vm1845_vm6, %v20915_v52, %v13488_v16  ;;  %v8428_v41 = vsel %vm1845_vm6, %v20916_v25, %v13489_v10  ;;  %v20922_v16 = vld [vmem:[#allocation112_spill] sm:$0xff]  ;;  %v20925_v25 = vld [vmem:[#allocation74_spill] sm:$0xff] }
 0x738   : > { %13026 = vmatpush3.msra.mxu1 %v17281_v15  ;;  %13027 = vmatprep.mubr.msk.f32.mxu1 %vm3371_vm10, %v12079_v12  ;;  %v12081_v15 = vld [vmem:[%s20028_s3 + $0x90] sm:$0xff]  ;;  %v8423_v52 = vsel %vm1845_vm6, %v20922_v16, %v20921_v54  ;;  %v13498_v44 = vunpack.i.l.bf16 %v20925_v25  ;;  %v13499_v30 = vunpack.i.h.bf16 %v20925_v25 }
 0x739   : > { %12083 = vmatmul.mubr.msk.f32.vlgmr.msra.gmra.mxu0 %vm3371_vm10, %v12079_v12  ;;  %13028 = vmatmul.mubr.msk.f32.vlgmr.msra.gmra.mxu1 %vm3371_vm10, %v12080_v33  ;;  %v8424_v12 = vsel %vm1845_vm6, %v20921_v54, %v20920_v49  ;;  %v20929_v54 = vld [vmem:[#allocation11_spill] sm:$0xff] }
 0x73a   : > { %8484 = vmatprep.subr.mxu0 %v8430_v51  ;;  %13033 = vmatprep.subr.mxu1 %v8431_v58  ;;  %v20923_v51 = vld [vmem:[#allocation107_spill] sm:$0xff]  ;;  %v8419_v49 = vsel %vm1845_vm6, %v20927_v2, %v13498_v44 }
 0x73b   : > { %8485 = vmatpush1.msra.mxu0 %v8429_v56  ;;  %13034 = vmatpush3.msra.mxu1 %v8431_v58  ;;  %v20924_v56 = vld [vmem:[#allocation95_spill] sm:$0xff]  ;;  %v8422_v10 = vsel %vm1845_vm6, %v20923_v51, %v13494_v26  ;;  %v18674_v58 = vpop.permute.xlu1 %13536 }
 0x73c   : > { %8486 = vmatprep.subr.mxu0 %v8427_v0  ;;  %13035 = vmatprep.subr.mxu1 %v8428_v41  ;;  %v20926_v0 = vld [vmem:[#allocation38_spill] sm:$0xff] }
 0x73d   : > { %8159 = vmatprep.mubr.f32.mxu0 %v20798_v63  ;;  %13030 = vmatprep.mubr.msk.f32.mxu1 %vm3371_vm10, %v12081_v15 }
 0x73e   : > { %8487 = vmatpush1.msra.mxu0 %v8426_v53  ;;  %13036 = vmatpush3.msra.mxu1 %v8428_v41  ;;  %v8420_v41 = vsel %vm1845_vm6, %v20926_v0, %v20924_v56  ;;  %v20928_v53 = vld [vmem:[#allocation53_spill] sm:$0xff]  ;;  %v20934_v0 = vld [vmem:[#allocation82_spill] sm:$0xff] }
 0x73f   : > { %12084 = vmatmul.mubr.msk.f32.gmra.mxu0 %vm3371_vm10, %v12080_v33  ;;  %13031 = vmatmul.mubr.msk.f32.gmra.mxu1 %vm3371_vm10, %v12082_v24  ;;  %v8421_v33 = vsel %vm1845_vm6, %v20924_v56, %v20923_v51  ;;  %v8418_v26 = vsel %vm1845_vm6, %v20928_v53, %v20927_v2  ;;  %v20932_v51 = vld [vmem:[#allocation69_spill] sm:$0xff]  ;;  %v18703_v44 = vpop.permute.xlu1 %9323 }
 0x740   : > { %8488 = vmatprep.subr.mxu0 %v8424_v12  ;;  %13037 = vmatprep.subr.mxu1 %v8425_v37  ;;  %v13503_v12 = vunpack.i.l.bf16 %v20929_v54 }
 0x741   : > { %8489 = vmatpush1.msra.mxu0 %v8423_v52  ;;  %13038 = vmatpush3.msra.mxu1 %v8425_v37  ;;  %v20930_v37 = vld [vmem:[#allocation63_spill] sm:$0xff]  ;;  %v20931_v52 = vld [vmem:[#allocation44_spill] sm:$0xff] }
 0x742   : > { %8490 = vmatprep.subr.mxu0 %v8421_v33  ;;  %13039 = vmatprep.subr.mxu1 %v8422_v10  ;;  %v8417_v16 = vsel %vm1845_vm6, %v20930_v37, %v20928_v53  ;;  %v8416_v56 = vsel %vm1845_vm6, %v20931_v52, %v13499_v30  ;;  %v13504_v33 = vunpack.i.h.bf16 %v20929_v54  ;;  %v8413_v2 = vsel %vm1845_vm6, %v20934_v0, %v13503_v12  ;;  %v18712_v53 = vpop.permute.xlu0 %9032  ;;  %v20937_v54 = vld [vmem:[#allocation122_spill] sm:$0xff]  ;;  %v12091_v12 = vld [vmem:[%s20028_s3 + $0xa0] sm:$0xff] }
 0x743   : > { %8165 = vmatprep.mubr.f32.mxu0 %v20798_v63  ;;  %8491 = vmatpush1.msra.mxu0 %v8420_v41  ;;  %v20935_v41 = vld [vmem:[#allocation21_spill] sm:$0xff]  ;;  %v13508_v37 = vunpack.i.l.bf16 %v20937_v54 }
 0x744   : > { %13040 = vmatpush3.msra.mxu1 %v8422_v10  ;;  %12085 = vmatmul.mubr.msk.f32.gmra.mxu0 %vm3371_vm10, %v12081_v15  ;;  %v8415_v15 = vsel %vm1845_vm6, %v20932_v51, %v20931_v52  ;;  %v20933_v10 = vld [vmem:[#allocation22_spill] sm:$0xff]  ;;  %v8412_v30 = vsel %vm1845_vm6, %v20935_v41, %v20934_v0  ;;  %v20941_v0 = vld [vmem:[#allocation52_spill] sm:$0xff] }
 0x745   : > { %8492 = vmatprep.subr.mxu0 %v8418_v26  ;;  %13041 = vmatprep.subr.mxu1 %v8419_v49  ;;  %v8414_v25 = vsel %vm1845_vm6, %v20933_v10, %v20932_v51  ;;  %v20936_v26 = vld [vmem:[#allocation9_spill] sm:$0xff] }
 0x746   : > { %8493 = vmatpush1.msra.mxu0 %v8417_v16  ;;  %13042 = vmatpush3.msra.mxu1 %v8419_v49  ;;  %v8411_v49 = vsel %vm1845_vm6, %v20936_v26, %v20935_v41  ;;  %v20939_v16 = vld [vmem:[#allocation98_spill] sm:$0xff]  ;;  %v12092_v10 = vld [vmem:[%s20028_s3 + $0xa8] sm:$0xff]  ;;  %v8745_v41 = vsel %vm2144_vm7, %v18599_v5, %v20941_v0  ;;  %v8744_v26 = vsel %vm2144_vm7, %v18177_v57, %v18599_v5  ;;  %v12094_v57 = vld [vmem:[%s20028_s3 + $0xb8] sm:$0xff] }
 0x747   : > { %8494 = vmatprep.subr.mxu0 %v8415_v15  ;;  %13043 = vmatprep.subr.mxu1 %v8416_v56  ;;  %v20940_v15 = vld [vmem:[#allocation104_spill] sm:$0xff] }
 0x748   : > { %8171 = vmatprep.mubr.f32.mxu0 %v20798_v63  ;;  %8495 = vmatpush1.msra.mxu0 %v8414_v25  ;;  %v13509_v25 = vunpack.i.h.bf16 %v20937_v54  ;;  %v20942_v54 = vld [vmem:[#allocation124_spill] sm:$0xff] }
 0x749   : > { %13044 = vmatpush3.msra.mxu1 %v8416_v56  ;;  %12086 = vmatmul.mubr.msk.f32.gmra.mxu0 %vm3371_vm10, %v12082_v24  ;;  %v20938_v24 = vld [vmem:[#allocation87_spill] sm:$0xff]  ;;  %v8408_v56 = vsel %vm1845_vm6, %v20940_v15, %v20939_v16  ;;  %v13514_v5 = vunpack.i.h.bf16 %v20942_v54 }
 0x74a   : > { %8496 = vmatprep.subr.mxu0 %v8412_v30  ;;  %13045 = vmatprep.subr.mxu1 %v8413_v2  ;;  %v8409_v52 = vsel %vm1845_vm6, %v20939_v16, %v20938_v24  ;;  %v8410_v51 = vsel %vm1845_vm6, %v20938_v24, %v13504_v33  ;;  %v18734_v33 = vpop.permute.xlu1 %9321  ;;  %v8746_v30 = vsel %vm2144_vm7, %v20941_v0, %v13508_v37  ;;  %v13513_v24 = vunpack.i.l.bf16 %v20942_v54  ;;  %v20943_v16 = vld [vmem:[#allocation106_spill] sm:$0xff]  ;;  %v20947_v0 = vld [vmem:[#allocation119_spill] sm:$0xff] }
 0x74b   : > { %8497 = vmatpush1.msra.mxu0 %v8411_v49  ;;  %13046 = vmatpush3.msra.mxu1 %v8413_v2  ;;  %v18744_v2 = vpop.permute.xlu0 %13541  ;;  %v12093_v49 = vld [vmem:[%s20028_s3 + $0xb0] sm:$0xff] }
 0x74c   : > { %8498 = vmatprep.subr.mxu0 %v8409_v52  ;;  %13047 = vmatprep.subr.mxu1 %v8410_v51  ;;  %v20944_v52 = vld [vmem:[#allocation116_spill] sm:$0xff] }
 0x74d   : > { %8499 = vmatpush1.msra.mxu0 %v8408_v56  ;;  %8532 = vmatprep.mubr.f32.mxu0 %v20798_v63  ;;  %v8742_v37 = vsel %vm2144_vm7, %v20944_v52, %v20943_v16 }
 0x74e   : > { %13048 = vmatpush3.msra.mxu1 %v8410_v51  ;;  %13049 = vmatprep.mubr.msk.f32.mxu1 %vm3371_vm10, %v12091_v12  ;;  %v8743_v51 = vsel %vm2144_vm7, %v20943_v16, %v13509_v25  ;;  %v18767_v56 = vpop.permute.xlu1 %9317  ;;  %v20946_v25 = vld [vmem:[#allocation55_spill] sm:$0xff]  ;;  %v20948_v16 = vld [vmem:[#allocation57_spill] sm:$0xff] }
 0x74f   : > { %12095 = vmatmul.mubr.msk.f32.vlgmr.msra.gmra.mxu0 %vm3371_vm10, %v12091_v12  ;;  %13050 = vmatmul.mubr.msk.f32.vlgmr.msra.gmra.mxu1 %vm3371_vm10, %v12092_v10  ;;  %v20945_v12 = vld [vmem:[#allocation110_spill] sm:$0xff]  ;;  %v18777_v54 = vpop.permute.xlu0 %9307 }
 0x750   : > { %8799 = vmatprep.subr.mxu0 %v8745_v41  ;;  %13055 = vmatprep.subr.mxu1 %v8746_v30  ;;  %v8741_v15 = vsel %vm2144_vm7, %v20945_v12, %v20944_v52  ;;  %v8739_v41 = vsel %vm2144_vm7, %v20947_v0, %v20946_v25  ;;  %v8738_v52 = vsel %vm2144_vm7, %v20948_v16, %v20947_v0  ;;  %v20954_v16 = vld [vmem:[#allocation71_spill] sm:$0xff] }
 0x751   : > { %8800 = vmatpush1.msra.mxu0 %v8744_v26  ;;  %13056 = vmatpush3.msra.mxu1 %v8746_v30  ;;  %v8740_v30 = vsel %vm2144_vm7, %v20946_v25, %v13513_v24  ;;  %v13518_v26 = vunpack.i.l.bf16 %v18365_v61  ;;  %v13519_v24 = vunpack.i.h.bf16 %v18365_v61 }
 0x752   : > { %8801 = vmatprep.subr.mxu0 %v8742_v37  ;;  %13057 = vmatprep.subr.mxu1 %v8743_v51  ;;  %v20950_v37 = vld [vmem:[#allocation111_spill] sm:$0xff]  ;;  %v18792_v0 = vpop.permute.xlu1 %9313 }
 0x753   : > { %8538 = vmatprep.mubr.f32.mxu0 %v20798_v63  ;;  %13052 = vmatprep.mubr.msk.f32.mxu1 %vm3371_vm10, %v12093_v49 }
 0x754   : > { %8802 = vmatpush1.msra.mxu0 %v8741_v15  ;;  %13058 = vmatpush3.msra.mxu1 %v8743_v51  ;;  %v20951_v15 = vld [vmem:[#allocation19_spill] sm:$0xff] }
 0x755   : > { %12096 = vmatmul.mubr.msk.f32.gmra.mxu0 %vm3371_vm10, %v12092_v10  ;;  %13053 = vmatmul.mubr.msk.f32.gmra.mxu1 %vm3371_vm10, %v12094_v57  ;;  %v20949_v10 = vld [vmem:[#allocation48_spill] sm:$0xff]  ;;  %v8735_v25 = vsel %vm2144_vm7, %v20951_v15, %v20950_v37 }
 0x756   : > { %8803 = vmatprep.subr.mxu0 %v8739_v41  ;;  %13059 = vmatprep.subr.mxu1 %v8740_v30  ;;  %v8736_v51 = vsel %vm2144_vm7, %v20950_v37, %v20949_v10  ;;  %v8737_v12 = vsel %vm2144_vm7, %v20949_v10, %v13514_v5  ;;  %v20952_v41 = vld [vmem:[#allocation42_spill] sm:$0xff]  ;;  %v13523_v10 = vunpack.i.l.bf16 %v18321_v35  ;;  %v18804_v37 = vpop.permute.xlu0 %9305 }
 0x757   : > { %8804 = vmatpush1.msra.mxu0 %v8738_v52  ;;  %13060 = vmatpush3.msra.mxu1 %v8740_v30  ;;  %v20953_v30 = vld [vmem:[#allocation4_spill] sm:$0xff]  ;;  %v8734_v61 = vsel %vm2144_vm7, %v20952_v41, %v13518_v26 }
 0x758   : > { %8805 = vmatprep.subr.mxu0 %v8736_v51  ;;  %13061 = vmatprep.subr.mxu1 %v8737_v12  ;;  %v8733_v5 = vsel %vm2144_vm7, %v20953_v30, %v20952_v41  ;;  %v8732_v52 = vsel %vm2144_vm7, %v20954_v16, %v20953_v30  ;;  %v20956_v51 = vld [vmem:[#allocation40_spill] sm:$0xff]  ;;  %v13524_v41 = vunpack.i.h.bf16 %v18321_v35  ;;  %v20958_v30 = vld [vmem:[#allocation121_spill] sm:$0xff]  ;;  %v8726_v35 = vsel %vm2144_vm7, %v18215_v17, %v18190_v45 }
 0x759   : > { %8544 = vmatprep.mubr.f32.mxu0 %v20798_v63  ;;  %8806 = vmatpush1.msra.mxu0 %v8735_v25  ;;  %v20957_v26 = vld [vmem:[#allocation120_spill] sm:$0xff]  ;;  %v13528_v16 = vunpack.i.l.bf16 %v18446_v19 }
 0x75a   : > { %13062 = vmatpush3.msra.mxu1 %v8737_v12  ;;  %12097 = vmatmul.mubr.msk.f32.gmra.mxu0 %vm3371_vm10, %v12093_v49  ;;  %v20955_v49 = vld [vmem:[#allocation84_spill] sm:$0xff]  ;;  %v8729_v25 = vsel %vm2144_vm7, %v20957_v26, %v20956_v51  ;;  %v18839_v17 = vpop.permute.xlu0 %9347  ;;  %v12105_v26 = vld [vmem:[%s20028_s3 + $0xd0] sm:$0xff] }
 0x75b   : > { %8807 = vmatprep.subr.mxu0 %v8733_v5  ;;  %13063 = vmatprep.subr.mxu1 %v8734_v61  ;;  %v8730_v12 = vsel %vm2144_vm7, %v20956_v51, %v20955_v49  ;;  %v8731_v15 = vsel %vm2144_vm7, %v20955_v49, %v13519_v24  ;;  %v8727_v5 = vsel %vm2144_vm7, %v18190_v45, %v20958_v30  ;;  %v12104_v51 = vld [vmem:[%s20028_s3 + $0xc8] sm:$0xff] }
 0x75c   : > { %8808 = vmatpush1.msra.mxu0 %v8732_v52  ;;  %13064 = vmatpush3.msra.mxu1 %v8734_v61  ;;  %v8728_v24 = vsel %vm2144_vm7, %v20958_v30, %v13523_v10  ;;  %v18822_v61 = vpop.permute.xlu1 %9309  ;;  %v12103_v10 = vld [vmem:[%s20028_s3 + $0xc0] sm:$0xff]  ;;  %v8723_v45 = vsel %vm2144_vm7, %v18264_v38, %v18239_v23  ;;  %v9061_v38 = vsel %vm2443_vm8, %v18278_v4, %v13528_v16 }
 0x75d   : > { %8809 = vmatprep.subr.mxu0 %v8730_v12  ;;  %13065 = vmatprep.subr.mxu1 %v8731_v15  ;;  %v13529_v12 = vunpack.i.h.bf16 %v18446_v19  ;;  %v9059_v19 = vsel %vm2443_vm8, %v18305_v46, %v18712_v53  ;;  %v12106_v46 = vld [vmem:[%s20028_s3 + $0xd8] sm:$0xff]  ;;  %v9053_v16 = vsel %vm2443_vm8, %v18200_v13, %v18342_v8  ;;  %v9048_v13 = vsel %vm2443_vm8, %v18290_v14, %v18433_v6 }
 0x75e   : > { %8550 = vmatprep.mubr.f32.mxu0 %v20798_v63  ;;  %8810 = vmatpush1.msra.mxu0 %v8729_v25  ;;  %v13533_v25 = vunpack.i.l.bf16 %v18507_v1 }
 0x75f   : > { %13066 = vmatpush3.msra.mxu1 %v8731_v15  ;;  %12098 = vmatmul.mubr.msk.f32.gmra.mxu0 %vm3371_vm10, %v12094_v57  ;;  %v20959_v57 = vld [vmem:[#allocation123_spill] sm:$0xff]  ;;  %v9058_v30 = vsel %vm2443_vm8, %v18325_v3, %v13529_v12  ;;  %v12115_v12 = vld [vmem:[%s20028_s3 + $0xe0] sm:$0xff] }
 0x760   : > { %8811 = vmatprep.subr.mxu0 %v8727_v5  ;;  %13067 = vmatprep.subr.mxu1 %v8728_v24  ;;  %v8724_v52 = vsel %vm2144_vm7, %v18239_v23, %v20959_v57  ;;  %v8725_v49 = vsel %vm2144_vm7, %v20959_v57, %v13524_v41  ;;  %v9060_v23 = vsel %vm2443_vm8, %v18712_v53, %v18278_v4  ;;  %v18854_v15 = vpop.permute.xlu1 %9299  ;;  %v20960_v41 = vld [vmem:[#allocation125_spill] sm:$0xff]  ;;  %v18868_v5 = vpop.permute.xlu0 %9301 }
 0x761   : > { %8812 = vmatpush1.msra.mxu0 %v8726_v35  ;;  %13068 = vmatpush3.msra.mxu1 %v8728_v24  ;;  %v9057_v4 = vsel %vm2443_vm8, %v20960_v41, %v18325_v3  ;;  %v9056_v53 = vsel %vm2443_vm8, %v18128_v29, %v20960_v41  ;;  %v13534_v24 = vunpack.i.h.bf16 %v18507_v1  ;;  %v9054_v3 = vsel %vm2443_vm8, %v18342_v8, %v18181_v31 }
 0x762   : > { %8813 = vmatprep.subr.mxu0 %v8724_v52  ;;  %13069 = vmatprep.subr.mxu1 %v8725_v49  ;;  %v9055_v35 = vsel %vm2443_vm8, %v18181_v31, %v13533_v25  ;;  %v13538_v1 = vunpack.i.l.bf16 %v18674_v58  ;;  %v9051_v57 = vsel %vm2443_vm8, %v18388_v48, %v18226_v39  ;;  %v9050_v31 = vsel %vm2443_vm8, %v18406_v28, %v18388_v48 }
 0x763   : > { %8814 = vmatpush1.msra.mxu0 %v8723_v45  ;;  %8847 = vmatprep.mubr.f32.mxu0 %v20798_v63  ;;  %v9052_v52 = vsel %vm2443_vm8, %v18226_v39, %v13534_v24  ;;  %v9047_v8 = vsel %vm2443_vm8, %v18453_v18, %v18290_v14  ;;  %v13543_v48 = vunpack.i.l.bf16 %v18744_v2  ;;  %v13544_v14 = vunpack.i.h.bf16 %v18744_v2 }
 0x764   : > { %13070 = vmatpush3.msra.mxu1 %v8725_v49  ;;  %13071 = vmatprep.mubr.msk.f32.mxu1 %vm3371_vm10, %v12103_v10  ;;  %v18886_v29 = vpop.permute.xlu1 %9297  ;;  %v9352_v49 = vpop.permute.xlu0 %9351  ;;  %v9049_v39 = vsel %vm2443_vm8, %v18433_v6, %v13538_v1  ;;  %v9044_v6 = vsel %vm2443_vm8, %v18380_v20, %v18351_v34  ;;  %v9039_v20 = vsel %vm2443_vm8, %v18551_v7, %v18481_v42 }
 0x765   : > { %12107 = vmatmul.mubr.msk.f32.vlgmr.msra.gmra.mxu0 %vm3371_vm10, %v12103_v10  ;;  %13072 = vmatmul.mubr.msk.f32.vlgmr.msra.gmra.mxu1 %vm3371_vm10, %v12104_v51  ;;  %v13539_v10 = vunpack.i.h.bf16 %v18674_v58  ;;  %v9045_v58 = vsel %vm2443_vm8, %v18351_v34, %v18470_v60  ;;  %v9041_v34 = vsel %vm2443_vm8, %v18515_v50, %v18493_v36  ;;  %v9040_v2 = vsel %vm2443_vm8, %v18481_v42, %v13544_v14  ;;  %v12116_v50 = vld [vmem:[%s20028_s3 + $0xe8] sm:$0xff] }
 0x766   : > { %9114 = vmatprep.subr.mxu0 %v9060_v23  ;;  %13077 = vmatprep.subr.mxu1 %v9061_v38  ;;  %v9374_v23 = vsel %vm2742_vm9, %v18593_v22, %v18839_v17  ;;  %v12118_v22 = vld [vmem:[%s20028_s3 + $0xf8] sm:$0xff]  ;;  %v9369_v41 = vsel %vm2742_vm9, %v18645_v11, %v18583_v40 }
 0x767   : > { %9115 = vmatpush1.msra.mxu0 %v9059_v19  ;;  %13078 = vmatpush3.msra.mxu1 %v9061_v38  ;;  %v9046_v45 = vsel %vm2443_vm8, %v18470_v60, %v13539_v10  ;;  %v9042_v60 = vsel %vm2443_vm8, %v18493_v36, %v18414_v55  ;;  %v9038_v36 = vsel %vm2443_vm8, %v18569_v62, %v18551_v7  ;;  %v12117_v38 = vld [vmem:[%s20028_s3 + $0xf0] sm:$0xff] }
 0x768   : > { %9116 = vmatprep.subr.mxu0 %v9057_v4  ;;  %13079 = vmatprep.subr.mxu1 %v9058_v30  ;;  %v18912_v28 = vpop.permute.xlu1 %9291  ;;  %v18923_v18 = vpop.permute.xlu0 %9293  ;;  %v9375_v7 = vsel %vm2742_vm9, %v18839_v17, %v18579_v47  ;;  %v9376_v62 = vsel %vm2742_vm9, %v18579_v47, %v9352_v49  ;;  %v9372_v19 = vsel %vm2742_vm9, %v18542_v32, %v18612_v21 }
 0x769   : > { %8853 = vmatprep.mubr.f32.mxu0 %v20798_v63  ;;  %13074 = vmatprep.mubr.msk.f32.mxu1 %vm3371_vm10, %v12105_v26  ;;  %v9371_v17 = vsel %vm2742_vm9, %v18562_v59, %v18542_v32  ;;  %v9368_v32 = vsel %vm2742_vm9, %v18625_v27, %v18645_v11  ;;  %v9366_v59 = vsel %vm2742_vm9, %v18703_v44, %v18656_v9 }
 0x76a   : > { %9117 = vmatpush1.msra.mxu0 %v9056_v53  ;;  %13080 = vmatpush3.msra.mxu1 %v9058_v30  ;;  %v9365_v30 = vsel %vm2742_vm9, %v18734_v33, %v18703_v44  ;;  %v9363_v27 = vsel %vm2742_vm9, %v18682_v43, %v18767_v56  ;;  %v9362_v11 = vsel %vm2742_vm9, %v18792_v0, %v18682_v43  ;;  %v12127_v53 = vld [vmem:[%s20028_s3 + $0x100] sm:$0xff] }
 0x76b   : > { %12108 = vmatmul.mubr.msk.f32.gmra.mxu0 %vm3371_vm10, %v12104_v51  ;;  %13075 = vmatmul.mubr.msk.f32.gmra.mxu1 %vm3371_vm10, %v12106_v46  ;;  %v9043_v51 = vsel %vm2443_vm8, %v18414_v55, %v13543_v48  ;;  %v9357_v43 = vsel %vm2742_vm9, %v18854_v15, %v18868_v5  ;;  %v9356_v0 = vsel %vm2742_vm9, %v18886_v29, %v18854_v15  ;;  %v12130_v29 = vld [vmem:[%s20028_s3 + $0x118] sm:$0xff] }
 0x76c   : > { %9118 = vmatprep.subr.mxu0 %v9054_v3  ;;  %13081 = vmatprep.subr.mxu1 %v9055_v35  ;;  %v18943_v55 = vpop.permute.xlu1 %9289  ;;  %v9344_v42 = vpop.permute.xlu0 %9343 }
 0x76d   : > { %9119 = vmatpush1.msra.mxu0 %v9053_v16  ;;  %13082 = vmatpush3.msra.mxu1 %v9055_v35  ;;  %v12128_v35 = vld [vmem:[%s20028_s3 + $0x108] sm:$0xff] }
 0x76e   : > { %9120 = vmatprep.subr.mxu0 %v9051_v57  ;;  %13083 = vmatprep.subr.mxu1 %v9052_v52 }
 0x76f   : > { %8859 = vmatprep.mubr.f32.mxu0 %v20798_v63  ;;  %9121 = vmatpush1.msra.mxu0 %v9050_v31 }
 0x770   : > { %13084 = vmatpush3.msra.mxu1 %v9052_v52  ;;  %12109 = vmatmul.mubr.msk.f32.gmra.mxu0 %vm3371_vm10, %v12105_v26  ;;  %v9373_v26 = vsel %vm2742_vm9, %v18612_v21, %v9344_v42  ;;  %v9336_v47 = vpop.permute.xlu1 %9335  ;;  %v9328_v25 = vpop.permute.xlu0 %9327 }
 0x771   : > { %9122 = vmatprep.subr.mxu0 %v9048_v13  ;;  %13085 = vmatprep.subr.mxu1 %v9049_v39  ;;  %v9370_v21 = vsel %vm2742_vm9, %v18583_v40, %v9336_v47  ;;  %v9367_v40 = vsel %vm2742_vm9, %v18656_v9, %v9328_v25  ;;  %v9360_v9 = vsel %vm2742_vm9, %v18777_v54, %v18822_v61 }
 0x772   : > { %9123 = vmatpush1.msra.mxu0 %v9047_v8  ;;  %13086 = vmatpush3.msra.mxu1 %v9049_v39 }
 0x773   : > { %9124 = vmatprep.subr.mxu0 %v9045_v58  ;;  %13087 = vmatprep.subr.mxu1 %v9046_v45 }
 0x774   : > { %8865 = vmatprep.mubr.f32.mxu0 %v20798_v63  ;;  %9125 = vmatpush1.msra.mxu0 %v9044_v6  ;;  %v9320_v4 = vpop.permute.xlu1 %9319  ;;  %v9312_v33 = vpop.permute.xlu0 %9311 }
 0x775   : > { %13088 = vmatpush3.msra.mxu1 %v9046_v45  ;;  %12110 = vmatmul.mubr.msk.f32.gmra.mxu0 %vm3371_vm10, %v12106_v46  ;;  %v9364_v44 = vsel %vm2742_vm9, %v18767_v56, %v9320_v4  ;;  %v9359_v46 = vsel %vm2742_vm9, %v18804_v37, %v18777_v54  ;;  %v9353_v54 = vsel %vm2742_vm9, %v18943_v55, %v18912_v28 }
 0x776   : > { %9126 = vmatprep.subr.mxu0 %v9042_v60  ;;  %13089 = vmatprep.subr.mxu1 %v9043_v51  ;;  %v9354_v37 = vsel %vm2742_vm9, %v18912_v28, %v18923_v18  ;;  %v9361_v15 = vsel %vm2742_vm9, %v18822_v61, %v9312_v33 }
 0x777   : > { %9127 = vmatpush1.msra.mxu0 %v9041_v34  ;;  %13090 = vmatpush3.msra.mxu1 %v9043_v51 }
 0x778   : > { %9128 = vmatprep.subr.mxu0 %v9039_v20  ;;  %13091 = vmatprep.subr.mxu1 %v9040_v2  ;;  %v9304_v56 = vpop.permute.xlu1 %9303  ;;  %v9296_v3 = vpop.permute.xlu0 %9295 }
 0x779   : > { %9129 = vmatpush1.msra.mxu0 %v9038_v36  ;;  %9162 = vmatprep.mubr.f32.mxu0 %v20798_v63  ;;  %v9358_v24 = vsel %vm2742_vm9, %v18868_v5, %v9304_v56  ;;  %v9355_v61 = vsel %vm2742_vm9, %v18923_v18, %v9296_v3  ;;  %v12129_v5 = vld [vmem:[%s20028_s3 + $0x110] sm:$0xff] }
 0x77a   : > { %13092 = vmatpush3.msra.mxu1 %v9040_v2  ;;  %13093 = vmatprep.mubr.msk.f32.mxu1 %vm3371_vm10, %v12115_v12 }
 0x77b   : > { %12119 = vmatmul.mubr.msk.f32.vlgmr.msra.gmra.mxu0 %vm3371_vm10, %v12115_v12  ;;  %13094 = vmatmul.mubr.msk.f32.vlgmr.msra.gmra.mxu1 %vm3371_vm10, %v12116_v50 }
 0x77c   : > { %9429 = vmatprep.subr.mxu0 %v9375_v7  ;;  %13099 = vmatprep.subr.mxu1 %v9376_v62 }
 0x77d   : > { %9430 = vmatpush1.msra.mxu0 %v9374_v23  ;;  %13100 = vmatpush3.msra.mxu1 %v9376_v62 }
 0x77e   : > { %9431 = vmatprep.subr.mxu0 %v9372_v19  ;;  %13101 = vmatprep.subr.mxu1 %v9373_v26 }
 0x77f   : > { %9168 = vmatprep.mubr.f32.mxu0 %v20798_v63  ;;  %13096 = vmatprep.mubr.msk.f32.mxu1 %vm3371_vm10, %v12117_v38 }
 0x780   : > { %9432 = vmatpush1.msra.mxu0 %v9371_v17  ;;  %13102 = vmatpush3.msra.mxu1 %v9373_v26 }
 0x781   : > { %12120 = vmatmul.mubr.msk.f32.gmra.mxu0 %vm3371_vm10, %v12116_v50  ;;  %13097 = vmatmul.mubr.msk.f32.gmra.mxu1 %vm3371_vm10, %v12118_v22  ;;  %v19063_v10 = vpop.f32.mrf.mxu1 }
 0x782   : > { %9433 = vmatprep.subr.mxu0 %v9369_v41  ;;  %9174 = vmatprep.mubr.f32.mxu0 %v20798_v63 }
 0x783   : > { %9434 = vmatpush1.msra.mxu0 %v9368_v32  ;;  %13103 = vmatprep.subr.mxu1 %v9370_v21  ;;  %v19065_v8 = vpop.f32.mrf.mxu1 }
 0x784   : > { %9435 = vmatprep.subr.mxu0 %v9366_v59  ;;  %13104 = vmatpush3.msra.mxu1 %v9370_v21 }
 0x785   : > { %9436 = vmatpush1.msra.mxu0 %v9365_v30  ;;  %13105 = vmatprep.subr.mxu1 %v9367_v40  ;;  %v12944_v58 = vpop.f32.mrf.mxu1 }
 0x786   : > { %12121 = vmatmul.mubr.msk.f32.gmra.mxu0 %vm3371_vm10, %v12117_v38  ;;  %9437 = vmatprep.subr.mxu0 %v9363_v27 }
 0x787   : > { %9438 = vmatpush1.msra.mxu0 %v9362_v11  ;;  %9180 = vmatprep.mubr.f32.mxu0 %v20798_v63  ;;  %v7135_v14 = vpop.f32.mrf.mxu1 }
 0x788   : > { %9439 = vmatprep.subr.mxu0 %v9360_v9  ;;  %13106 = vmatpush3.msra.mxu1 %v9367_v40 }
 0x789   : > { %9440 = vmatpush1.msra.mxu0 %v9359_v46  ;;  %13107 = vmatprep.subr.mxu1 %v9364_v44 }
 0x78a   : > { %12122 = vmatmul.mubr.msk.f32.gmra.mxu0 %vm3371_vm10, %v12118_v22  ;;  %9441 = vmatprep.subr.mxu0 %v9357_v43 }
 0x78b   : > { %9442 = vmatpush1.msra.mxu0 %v9356_v0  ;;  %9477 = vmatprep.mubr.f32.mxu0 %v20798_v63 }
 0x78c   : > { %9443 = vmatprep.subr.mxu0 %v9354_v37  ;;  %13108 = vmatpush3.msra.mxu1 %v9364_v44 }
 0x78d   : > { %9444 = vmatpush1.msra.mxu0 %v9353_v54  ;;  %13109 = vmatprep.subr.mxu1 %v9361_v15 }
 0x78e   : > { %12131 = vmatmul.mubr.msk.f32.vlgmr.msra.gmra.mxu0 %vm3371_vm10, %v12127_v53  ;;  %13110 = vmatpush3.msra.mxu1 %v9361_v15 }
 0x78f   : > { %9483 = vmatprep.mubr.f32.mxu0 %v20798_v63  ;;  %13111 = vmatprep.subr.mxu1 %v9358_v24 }
 0x790   : > { %13112 = vmatpush3.msra.mxu1 %v9358_v24  ;;  %13115 = vmatprep.mubr.msk.f32.mxu1 %vm3371_vm10, %v12127_v53 }
 0x791   : > { %13113 = vmatprep.subr.mxu1 %v9355_v61  ;;  %13121 = vmatprep.subr.mxu0 %v20798_v63 }
 0x792   : > { %12132 = vmatmul.mubr.msk.f32.gmra.mxu0 %vm3371_vm10, %v12128_v35  ;;  %13114 = vmatpush3.msra.mxu1 %v9355_v61 }
 0x793   : > { %9489 = vmatprep.mubr.f32.mxu0 %v20798_v63  ;;  %13116 = vmatmul.mubr.msk.f32.vlgmr.msra.gmra.mxu1 %vm3371_vm10, %v12128_v35 }
 0x794   : > { %13118 = vmatprep.mubr.msk.f32.mxu1 %vm3371_vm10, %v12129_v5  ;;  %13546 = vrot.lane.b32.xlu1 %v20798_v63, %s13633_s19 }
 0x795   : > { %13591 = vrot.lane.b32.xlu0 %v20798_v63, %s13637_s23 }
 0x796   : > { %12133 = vmatmul.mubr.msk.f32.gmra.mxu0 %vm3371_vm10, %v12129_v5 }
 0x797   : > { %9495 = vmatprep.mubr.f32.mxu0 %v20798_v63  ;;  %13119 = vmatmul.mubr.msk.f32.gmra.mxu1 %vm3371_vm10, %v12130_v29 }
 0x798   : > { %9830 = vmatprep.mubr.f32.mxu1 %v20798_v63  ;;  %v7036_v1 = vpop.f32.mrf.mxu0  ;;  %13551 = vrot.lane.b32.xlu1 %v20798_v63, %s13633_s19 }
 0x79a   : > { %12134 = vmatmul.mubr.msk.f32.gmra.mxu0 %vm3371_vm10, %v12130_v29  ;;  %v7038_v16 = vpop.f32.mrf.mxu0 }
 0x79b   : > { %13129 = vmatprep.mubr.msk.f32.mxu0 %vm13642_vm11, %v20798_v63 }
 0x79c   : > { %v7042_v57 = vpop.f32.mrf.mxu0  ;;  %13556 = vrot.lane.b32.xlu1 %v20798_v63, %s13634_s20 }
 0x79e   : > { %v7044_v52 = vpop.f32.mrf.mxu0 }
 0x7a0   : > { %13561 = vrot.lane.b32.xlu1 %v20798_v63, %s13634_s20 }
 0x7a4   : > { %13566 = vrot.lane.b32.xlu1 %v20798_v63, %s13635_s21 }
 0x7a8   : > { %13571 = vrot.lane.b32.xlu1 %v20798_v63, %s13635_s21 }
 0x7aa   : > { %v7048_v31 = vpop.f32.mrf.mxu0 }
 0x7ac   : > { %v7050_v49 = vpop.f32.mrf.mxu0  ;;  %13576 = vrot.lane.b32.xlu1 %v20798_v63, %s13636_s22 }
 0x7af   : > { %v7054_v13 = vpop.f32.mrf.mxu0 }
 0x7b0   : > { %13581 = vrot.lane.b32.xlu1 %v20798_v63, %s13636_s22 }
 0x7b1   : > { %v7056_v39 = vpop.f32.mrf.mxu0 }
 0x7b4   : > { %13586 = vrot.lane.b32.xlu1 %v20798_v63, %s13637_s23 }
 0x7b5   : > { %v7334_v48 = vpop.f32.mrf.mxu0  ;;  %v19073_v20 = vpop.f32.mrf.mxu1 }
 0x7b6   : > { %v7335_v28 = vadd.f32 %v7334_v48, %v7036_v1 }
 0x7b7   : > { %v7336_v45 = vpop.f32.mrf.mxu0  ;;  %v19075_v36 = vpop.f32.mrf.mxu1 }
 0x7b8   : > { %v7337_v6 = vadd.f32 %v7336_v45, %v7038_v16  ;;  %13596 = vrot.lane.b32.xlu1 %v20798_v63, %s13638_s24 }
 0x7bb   : > { %v7340_v18 = vpop.f32.mrf.mxu0 }
 0x7bc   : > { %v7341_v60 = vadd.f32 %v7340_v18, %v7042_v57 }
 0x7bd   : > { %v7342_v51 = vpop.f32.mrf.mxu0 }
 0x7be   : > { %v7343_v34 = vadd.f32 %v7342_v51, %v7044_v52 }
 0x7c0   : > { %v7346_v2 = vpop.f32.mrf.mxu0 }
 0x7c1   : > { %v7347_v12 = vadd.f32 %v7346_v2, %v7048_v31 }
 0x7c2   : > { %v7348_v55 = vpop.f32.mrf.mxu0 }
 0x7c3   : > { %v7349_v50 = vadd.f32 %v7348_v55, %v7050_v49 }
 0x7c5   : > { %v12966_v42 = vpop.f32.mrf.mxu1 }
 0x7c6   : > { %v7439_v7 = vadd.f32 %v12966_v42, %v12944_v58 }
 0x7c7   : > { %v7352_v62 = vpop.f32.mrf.mxu0  ;;  %v7433_v23 = vpop.f32.mrf.mxu1 }
 0x7c8   : > { %v7353_v38 = vadd.f32 %v7352_v62, %v7054_v13  ;;  %v7434_v19 = vadd.f32 %v7433_v23, %v7135_v14 }
 0x7c9   : > { %v7354_v26 = vpop.f32.mrf.mxu0 }
 0x7ca   : > { %v7355_v47 = vadd.f32 %v7354_v26, %v7056_v39 }
 0x7cd   : > { %v7637_v22 = vpop.f32.mrf.mxu0  ;;  %v19083_v17 = vpop.f32.mrf.mxu1 }
 0x7ce   : > { %v7745_v21 = vadd.f32 %v7637_v22, %v7335_v28 }
 0x7cf   : > { %v7639_v25 = vpop.f32.mrf.mxu0  ;;  %v19085_v41 = vpop.f32.mrf.mxu1 }
 0x7d0   : > { %v7746_v32 = vadd.f32 %v7639_v25, %v7337_v6 }
 0x7d3   : > { %v7643_v59 = vpop.f32.mrf.mxu0  ;;  %v12988_v4 = vpop.f32.mrf.mxu1 }
 0x7d4   : > { %v7748_v30 = vadd.f32 %v7643_v59, %v7341_v60  ;;  %v19089_v40 = vadd.f32 %v12988_v4, %v7439_v7 }
 0x7d5   : > { %v7645_v27 = vpop.f32.mrf.mxu0  ;;  %v7736_v11 = vpop.f32.mrf.mxu1 }
 0x7d6   : > { %v7749_v44 = vadd.f32 %v7645_v27, %v7343_v34  ;;  %v7753_v33 = vadd.f32 %v7736_v11, %v7434_v19 }
 0x7d8   : > { %v7649_v9 = vpop.f32.mrf.mxu0 }
 0x7d9   : > { %v7751_v46 = vadd.f32 %v7649_v9, %v7347_v12 }
 0x7da   : > { %v7651_v43 = vpop.f32.mrf.mxu0 }
 0x7db   : > { %v7752_v56 = vadd.f32 %v7651_v43, %v7349_v50 }
 0x7dd   : > { %v7655_v0 = vpop.f32.mrf.mxu0 }
 0x7de   : > { %v7754_v54 = vadd.f32 %v7655_v0, %v7353_v38 }
 0x7df   : > { %v7657_v37 = vpop.f32.mrf.mxu0 }
 0x7e0   : > { %v7755_v53 = vadd.f32 %v7657_v37, %v7355_v47 }
 0x7e3   : > { %v7952_v15 = vpop.f32.mrf.mxu0  ;;  %v19095_v24 = vpop.f32.mrf.mxu1 }
 0x7e4   : > { %v19097_v3 = vadd.f32 %v7952_v15, %v7745_v21 }
 0x7e5   : > { %v7954_v35 = vpop.f32.mrf.mxu0  ;;  %v19099_v61 = vpop.f32.mrf.mxu1 }
 0x7e6   : > { %v19101_v5 = vadd.f32 %v7954_v35, %v7746_v32 }
 0x7e9   : > { %v7958_v29 = vpop.f32.mrf.mxu0  ;;  %v19103_v1 = vpop.f32.mrf.mxu1 }
 0x7ea   : > { %v8063_v16 = vadd.f32 %v7958_v29, %v7748_v30 }
 0x7eb   : > { %v7960_v57 = vpop.f32.mrf.mxu0  ;;  %v8051_v52 = vpop.f32.mrf.mxu1 }
 0x7ec   : > { %v8064_v31 = vadd.f32 %v7960_v57, %v7749_v44  ;;  %v8068_v49 = vadd.f32 %v8051_v52, %v7753_v33 }
 0x7ee   : > { %v7964_v13 = vpop.f32.mrf.mxu0 }
 0x7ef   : > { %v8066_v39 = vadd.f32 %v7964_v13, %v7751_v46 }
 0x7f0   : > { %v7966_v48 = vpop.f32.mrf.mxu0 }
 0x7f1   : > { %v8067_v28 = vadd.f32 %v7966_v48, %v7752_v56 }
 0x7f3   : > { %v7970_v58 = vpop.f32.mrf.mxu0 }
 0x7f4   : > { %v8069_v45 = vadd.f32 %v7970_v58, %v7754_v54 }
 0x7f5   : > { %v7972_v6 = vpop.f32.mrf.mxu0 }
 0x7f6   : > { %v8070_v14 = vadd.f32 %v7972_v6, %v7755_v53 }
 0x7f9   : > { %v19105_v18 = vpop.f32.mrf.mxu0  ;;  %v19107_v60 = vpop.f32.mrf.mxu1 }
 0x7fb   : > { %v19109_v51 = vpop.f32.mrf.mxu0  ;;  %v19111_v34 = vpop.f32.mrf.mxu1 }
 0x7ff   : > { %v8161_v2 = vpop.f32.mrf.mxu0  ;;  %v19113_v12 = vpop.f32.mrf.mxu1 }
 0x800   : > { %v8266_v55 = vadd.f32 %v8161_v2, %v8063_v16 }
 0x801   : > { %v8163_v50 = vpop.f32.mrf.mxu0  ;;  %v8254_v42 = vpop.f32.mrf.mxu1 }
 0x802   : > { %v8267_v7 = vadd.f32 %v8163_v50, %v8064_v31  ;;  %v8271_v62 = vadd.f32 %v8254_v42, %v8068_v49 }
 0x804   : > { %v8167_v23 = vpop.f32.mrf.mxu0 }
 0x805   : > { %v8269_v38 = vadd.f32 %v8167_v23, %v8066_v39 }
 0x806   : > { %v8169_v19 = vpop.f32.mrf.mxu0 }
 0x807   : > { %v8270_v26 = vadd.f32 %v8169_v19, %v8067_v28 }
 0x809   : > { %v8173_v47 = vpop.f32.mrf.mxu0 }
 0x80a   : > { %v8272_v22 = vadd.f32 %v8173_v47, %v8069_v45 }
 0x80b   : > { %v8175_v21 = vpop.f32.mrf.mxu0 }
 0x80c   : > { %v8273_v25 = vadd.f32 %v8175_v21, %v8070_v14 }
 0x80f   : > { %v8534_v32 = vpop.f32.mrf.mxu0  ;;  %v19115_v59 = vpop.f32.mrf.mxu1 }
 0x811   : > { %v8536_v4 = vpop.f32.mrf.mxu0  ;;  %v19117_v30 = vpop.f32.mrf.mxu1 }
 0x815   : > { %v8540_v27 = vpop.f32.mrf.mxu0  ;;  %v19119_v11 = vpop.f32.mrf.mxu1 }
 0x816   : > { %v8645_v44 = vadd.f32 %v8540_v27, %v8266_v55 }
 0x817   : > { %v8542_v33 = vpop.f32.mrf.mxu0  ;;  %v8633_v9 = vpop.f32.mrf.mxu1 }
 0x818   : > { %v8646_v46 = vadd.f32 %v8542_v33, %v8267_v7  ;;  %v19121_v43 = vadd.f32 %v8633_v9, %v8271_v62 }
 0x81a   : > { %v8546_v56 = vpop.f32.mrf.mxu0 }
 0x81b   : > { %v8648_v0 = vadd.f32 %v8546_v56, %v8269_v38 }
 0x81c   : > { %v8548_v54 = vpop.f32.mrf.mxu0 }
 0x81d   : > { %v8649_v37 = vadd.f32 %v8548_v54, %v8270_v26 }
 0x81f   : > { %v8552_v53 = vpop.f32.mrf.mxu0 }
 0x820   : > { %v8651_v15 = vadd.f32 %v8552_v53, %v8272_v22  ;;  %v7429_v22 = vadd.f32 %v19073_v20, %v19063_v10  ;;  %v19146_v10 = vpop.permute.xlu0 %9615 }
 0x821   : > { %v8554_v35 = vpop.f32.mrf.mxu0 }
 0x822   : > { %v8652_v29 = vadd.f32 %v8554_v35, %v8273_v25  ;;  %v8263_v25 = vadd.f32 %v19105_v18, %v19097_v3  ;;  %v7750_v33 = vadd.f32 %v19083_v17, %v7429_v22 }
 0x824   : > { %v8642_v56 = vadd.f32 %v8534_v32, %v8263_v25  ;;  %v8065_v3 = vadd.f32 %v19095_v24, %v7750_v33 }
 0x825   : > { %v8849_v16 = vpop.f32.mrf.mxu0  ;;  %v13073_v14 = vpop.f32.mrf.mxu1 }
 0x826   : > { %v8957_v53 = vadd.f32 %v8849_v16, %v8642_v56  ;;  %v8268_v17 = vadd.f32 %v19107_v60, %v8065_v3  ;;  %v8071_v56 = vadd.f32 %v19103_v1, %v19089_v40 }
 0x827   : > { %v8851_v57 = vpop.f32.mrf.mxu0  ;;  %v8938_v50 = vpop.f32.mrf.mxu1 }
 0x82b   : > { %v8855_v52 = vpop.f32.mrf.mxu0  ;;  %v19125_v62 = vpop.f32.mrf.mxu1 }
 0x82c   : > { %v19123_v31 = vadd.f32 %v8855_v52, %v8645_v44  ;;  %v7424_v44 = vadd.f32 %v19075_v36, %v19065_v8  ;;  %v19158_v52 = vpop.permute.xlu1 %9620 }
 0x82d   : > { %v8857_v49 = vpop.f32.mrf.mxu0  ;;  %v19129_v38 = vpop.f32.mrf.mxu1 }
 0x82e   : > { %v8961_v13 = vadd.f32 %v8857_v49, %v8646_v46  ;;  %v8264_v46 = vadd.f32 %v19109_v51, %v19101_v5  ;;  %v7747_v20 = vadd.f32 %v19085_v41, %v7424_v44  ;;  %v8647_v41 = vadd.f32 %v19115_v59, %v8268_v17  ;;  %v9606_v49 = vpop.permute.xlu0 %9605  ;;  %v20965_v44 = vld [vmem:[#allocation68_spill] sm:$0xff] }
 0x82f   : > { %v8965_v17 = vadd.f32 %v19129_v38, %v19121_v43 }
 0x830   : > { %v8861_v39 = vpop.f32.mrf.mxu0  ;;  %v8062_v36 = vadd.f32 %v19099_v61, %v7747_v20 }
 0x831   : > { %v8963_v48 = vadd.f32 %v8861_v39, %v8648_v0 }
 0x832   : > { %v8863_v28 = vpop.f32.mrf.mxu0 }
 0x833   : > { %v8964_v58 = vadd.f32 %v8863_v28, %v8649_v37  ;;  %v8643_v37 = vadd.f32 %v8536_v4, %v8264_v46 }
 0x835   : > { %v8867_v45 = vpop.f32.mrf.mxu0  ;;  %v8958_v51 = vadd.f32 %v8851_v57, %v8643_v37 }
 0x836   : > { %v8966_v6 = vadd.f32 %v8867_v45, %v8651_v15 }
 0x837   : > { %v8869_v2 = vpop.f32.mrf.mxu0 }
 0x838   : > { %v8967_v55 = vadd.f32 %v8869_v2, %v8652_v29  ;;  %v8265_v29 = vadd.f32 %v19111_v34, %v8062_v36 }
 0x83a   : > { %v8644_v61 = vadd.f32 %v19117_v30, %v8265_v29 }
 0x83b   : > { %v9164_v42 = vpop.f32.mrf.mxu0  ;;  %v13095_v47 = vpop.f32.mrf.mxu1 }
 0x83c   : > { %v9272_v32 = vadd.f32 %v9164_v42, %v8957_v53  ;;  %v8959_v28 = vadd.f32 %v8938_v50, %v8644_v61  ;;  %v20961_v42 = vld [vmem:[#allocation64_spill] sm:$0xff] }
 0x83d   : > { %v9166_v7 = vpop.f32.mrf.mxu0  ;;  %v9253_v0 = vpop.f32.mrf.mxu1 }
 0x83e   : > { %v9273_v4 = vadd.f32 %v9166_v7, %v8958_v51  ;;  %v9274_v59 = vadd.f32 %v9253_v0, %v8959_v28  ;;  %v8274_v0 = vadd.f32 %v19113_v12, %v8071_v56 }
 0x840   : > { %v8653_v20 = vadd.f32 %v19119_v11, %v8274_v0 }
 0x841   : > { %v19127_v23 = vpop.f32.mrf.mxu0  ;;  %v13098_v15 = vpop.f32.mrf.mxu1 }
 0x842   : > { %v8968_v3 = vadd.f32 %v19125_v62, %v8653_v20  ;;  %v9275_v11 = vadd.f32 %v19127_v23, %v19123_v31 }
 0x843   : > { %v9172_v19 = vpop.f32.mrf.mxu0  ;;  %v19161_v39 = vpop.f32.mrf.mxu1 }
 0x844   : > { %v19131_v26 = vadd.f32 %v9172_v19, %v8961_v13  ;;  %v8962_v13 = vadd.f32 %v13073_v14, %v8647_v41  ;;  %v9283_v40 = vadd.f32 %v13098_v15, %v8968_v3  ;;  %v9280_v15 = vadd.f32 %v19161_v39, %v8965_v17 }
 0x846   : > { %v9176_v21 = vpop.f32.mrf.mxu0 }
 0x847   : > { %v19137_v27 = vadd.f32 %v9176_v21, %v8963_v48  ;;  %v20963_v21 = vld [vmem:[#allocation65_spill] sm:$0xff] }
 0x848   : > { %v9178_v9 = vpop.f32.mrf.mxu0 }
 0x849   : > { %v19144_v54 = vadd.f32 %v9178_v9, %v8964_v58  ;;  %v9277_v58 = vadd.f32 %v13095_v47, %v8962_v13 }
 0x84a   : > { %v9182_v18 = vpop.f32.mrf.mxu0 }
 0x84b   : > { %v19150_v8 = vadd.f32 %v9182_v18, %v8966_v6 }
 0x84c   : > { %v9184_v5 = vpop.f32.mrf.mxu0 }
 0x84d   : > { %v19154_v35 = vadd.f32 %v9184_v5, %v8967_v55  ;;  %v19163_v55 = vpop.permute.xlu1 %9610 }
 0x84e   : > { %v9479_v24 = vpop.f32.mrf.mxu0 }
 0x84f   : > { %v9587_v16 = vadd.f32 %v9479_v24, %v9272_v32 }
 0x850   : > { %v9481_v60 = vpop.f32.mrf.mxu0 }
 0x851   : > { %v9623_v57 = vadd.f32 %v9606_v49, %v9587_v16  ;;  %v9588_v48 = vadd.f32 %v9481_v60, %v9273_v4 }
 0x852   : > { %v9485_v12 = vpop.f32.mrf.mxu0 }
 0x853   : > { %v9635_v45 = vmax.f32 %v9623_v57, 0.0  ;;  %v9624_v34 = vadd.f32 %v9606_v49, %v9588_v48  ;;  %v13117_v6 = vpop.f32.mrf.mxu1  ;;  %v9590_v37 = vadd.f32 %v9485_v12, %v9275_v11 }
 0x854   : > { %v9592_v2 = vadd.f32 %v13117_v6, %v9277_v58  ;;  %v9487_v51 = vpop.f32.mrf.mxu0 }
 0x855   : > { %v19166_v7 = vmul.f32 %v9635_v45, %v20961_v42  ;;  %v9636_v19 = vmax.f32 %v9624_v34, 0.0  ;;  %v9568_v30 = vpop.f32.mrf.mxu1  ;;  %v9626_v36 = vadd.f32 %v19163_v55, %v9590_v37  ;;  %v9591_v24 = vadd.f32 %v9487_v51, %v19131_v26 }
 0x856   : > { %v9628_v14 = vadd.f32 %v19163_v55, %v9592_v2  ;;  %v9589_v22 = vadd.f32 %v9568_v30, %v9274_v59  ;;  %v9491_v41 = vpop.f32.mrf.mxu0 }
 0x857   : > { %20962 = vst [vmem:[#allocation16_spill] sm:$0xff] %v19166_v7  ;;  %v19170_v25 = vmul.f32 %v9636_v19, %v20963_v21  ;;  %9708 = vrot.lane.b32.xlu1 %v19166_v7, %s13633_s19  ;;  %v13120_v18 = vpop.f32.mrf.mxu1  ;;  %v9638_v23 = vmax.f32 %v9626_v36, 0.0  ;;  %v9627_v61 = vadd.f32 %v19163_v55, %v9591_v24  ;;  %v9593_v19 = vadd.f32 %v9491_v41, %v19137_v27 }
 0x858   : > { %v9640_v50 = vmax.f32 %v9628_v14, 0.0  ;;  %v9625_v47 = vadd.f32 %v9606_v49, %v9589_v22  ;;  %v9598_v1 = vadd.f32 %v13120_v18, %v9283_v40  ;;  %v9493_v38 = vpop.f32.mrf.mxu0  ;;  %v19255_v49 = vpop.permute.xlu1 %13546 }
 0x859   : > { %20964 = vst [vmem:[#allocation81_spill] sm:$0xff] %v19170_v25  ;;  %9710 = vrot.lane.b32.xlu0 %v19170_v25, %s13633_s19  ;;  %v19235_v5 = vmul.f32 %v9638_v23, %v20961_v42  ;;  %v9578_v32 = vpop.f32.mrf.mxu1  ;;  %v9594_v4 = vadd.f32 %v9493_v38, %v19144_v54  ;;  %v9639_v54 = vmax.f32 %v9627_v61, 0.0  ;;  %v9629_v14 = vadd.f32 %v19146_v10, %v9593_v19 }
 0x85a   : > { %v19177_v33 = vmul.f32 %v9640_v50, %v20965_v44  ;;  %v9637_v9 = vmax.f32 %v9625_v47, 0.0  ;;  %v9634_v62 = vadd.f32 %v19158_v52, %v9598_v1  ;;  %v9595_v29 = vadd.f32 %v9578_v32, %v9280_v15  ;;  %v9497_v58 = vpop.f32.mrf.mxu0 }
 0x85b   : > { %20969 = vst [vmem:[#allocation5_spill] sm:$0xff] %v19235_v5  ;;  %v9630_v13 = vadd.f32 %v19146_v10, %v9594_v4  ;;  %v19273_v57 = vmul.f32 %v9639_v54, %v20963_v21  ;;  %v9596_v45 = vadd.f32 %v9497_v58, %v19150_v8  ;;  %v9641_v22 = vmax.f32 %v9629_v14, 0.0 }
 0x85c   : > { %20966 = vst [vmem:[#allocation77_spill] sm:$0xff] %v19177_v33  ;;  %v19180_v46 = vmul.f32 %v9637_v9, %v20965_v44  ;;  %9720 = vrot.lane.b32.xlu1 %v19177_v33, %s13633_s19  ;;  %v9646_v53 = vmax.f32 %v9634_v62, 0.0  ;;  %v9631_v43 = vadd.f32 %v19146_v10, %v9595_v29  ;;  %v19268_v60 = vpop.permute.xlu1 %13551  ;;  %v9499_v27 = vpop.f32.mrf.mxu0 }
 0x85d   : > { %v9642_v39 = vmax.f32 %v9630_v13, 0.0  ;;  %20971 = vst [vmem:[#allocation32_spill] sm:$0xff] %v19273_v57  ;;  %v9632_v6 = vadd.f32 %v19158_v52, %v9596_v45  ;;  %v19334_v47 = vmul.f32 %v9641_v22, %v20961_v42  ;;  %v9597_v10 = vadd.f32 %v9499_v27, %v19154_v35  ;;  %v19352_v35 = vpop.permute.xlu0 %13591 }
 0x85e   : > { %20967 = vst [vmem:[#allocation89_spill] sm:$0xff] %v19180_v46  ;;  %9712 = vrot.lane.b32.xlu0 %v19180_v46, %s13633_s19  ;;  %v19224_v31 = vmul.f32 %v9646_v53, %v20965_v44  ;;  %v9643_v16 = vmax.f32 %v9631_v43, 0.0  ;;  %20977 = vst [vmem:[#allocation79_spill] sm:$0xff] %v19352_v35 }
 0x85f   : > { %v19278_v48 = vmul.f32 %v9642_v39, %v20963_v21  ;;  %v9644_v59 = vmax.f32 %v9632_v6, 0.0  ;;  %20974 = vst [vmem:[#allocation49_spill] sm:$0xff] %v19334_v47  ;;  %v9633_v9 = vadd.f32 %v19158_v52, %v9597_v10 }
 0x860   : > { %9909 = vrot.lane.b32.xlu1 %v19166_v7, %s13634_s20  ;;  %20968 = vst [vmem:[#allocation59_spill] sm:$0xff] %v19224_v31  ;;  %v19262_v26 = vmul.f32 %v9643_v16, %v20965_v44  ;;  %v19282_v28 = vpop.permute.xlu1 %13556 }
 0x861   : > { %20972 = vst [vmem:[#allocation61_spill] sm:$0xff] %v19278_v48  ;;  %v19305_v2 = vmul.f32 %v9644_v59, %v20961_v42  ;;  %v9645_v56 = vmax.f32 %v9633_v9, 0.0 }
 0x862   : > { %9911 = vrot.lane.b32.xlu0 %v19170_v25, %s13634_s20  ;;  %20970 = vst [vmem:[#allocation90_spill] sm:$0xff] %v19262_v26 }
 0x863   : > { %20973 = vst [vmem:[#allocation100_spill] sm:$0xff] %v19305_v2  ;;  %v19359_v0 = vmul.f32 %v9645_v56, %v20963_v21 }
 0x864   : > { %9921 = vrot.lane.b32.xlu1 %v19177_v33, %s13634_s20  ;;  %v19291_v34 = vpop.permute.xlu1 %13561 }
 0x866   : > { %9913 = vrot.lane.b32.xlu0 %v19180_v46, %s13634_s20 }
 0x868   : > { %10111 = vrot.lane.b32.xlu1 %v19166_v7, %s13635_s21  ;;  %v19300_v8 = vpop.permute.xlu1 %13566 }
 0x86a   : > { %10113 = vrot.lane.b32.xlu0 %v19170_v25, %s13635_s21 }
 0x86c   : > { %10123 = vrot.lane.b32.xlu1 %v19177_v33, %s13635_s21  ;;  %v19309_v55 = vpop.permute.xlu1 %13571 }
 0x86e   : > { %10115 = vrot.lane.b32.xlu0 %v19180_v46, %s13635_s21 }
 0x870   : > { %10316 = vrot.lane.b32.xlu1 %v19166_v7, %s13636_s22  ;;  %v19318_v30 = vpop.permute.xlu1 %13576 }
 0x872   : > { %10318 = vrot.lane.b32.xlu0 %v19170_v25, %s13636_s22 }
 0x874   : > { %10328 = vrot.lane.b32.xlu1 %v19177_v33, %s13636_s22  ;;  %v19327_v50 = vpop.permute.xlu1 %13581 }
 0x876   : > { %10320 = vrot.lane.b32.xlu0 %v19180_v46, %s13636_s22 }
 0x878   : > { %10712 = vrot.lane.b32.xlu1 %v19177_v33, %s13637_s23  ;;  %v19339_v44 = vpop.permute.xlu1 %13586 }
 0x879   : > { %20975 = vst [vmem:[#allocation94_spill] sm:$0xff] %v19339_v44 }
 0x87a   : > { %10704 = vrot.lane.b32.xlu0 %v19180_v46, %s13637_s23 }
 0x87c   : > { %10700 = vrot.lane.b32.xlu1 %v19166_v7, %s13637_s23  ;;  %v19348_v42 = vpop.permute.xlu1 %13596 }
 0x87d   : > { %20976 = vst [vmem:[#allocation85_spill] sm:$0xff] %v19348_v42 }
 0x87e   : > { %9736 = vrot.lane.b32.xlu0 %v19224_v31, %s13633_s19 }
 0x880   : > { %10702 = vrot.lane.b32.xlu1 %v19170_v25, %s13637_s23 }
 0x882   : > { %9937 = vrot.lane.b32.xlu0 %v19224_v31, %s13634_s20 }
 0x884   : > { %9716 = vrot.lane.b32.xlu1 %v19235_v5, %s13633_s19 }
 0x886   : > { %10139 = vrot.lane.b32.xlu0 %v19224_v31, %s13635_s21 }
 0x888   : > { %9917 = vrot.lane.b32.xlu1 %v19235_v5, %s13634_s20 }
 0x88a   : > { %10344 = vrot.lane.b32.xlu0 %v19224_v31, %s13636_s22 }
 0x88c   : > { %10119 = vrot.lane.b32.xlu1 %v19235_v5, %s13635_s21 }
 0x88e   : > { %10728 = vrot.lane.b32.xlu0 %v19224_v31, %s13637_s23 }
 0x890   : > { %10324 = vrot.lane.b32.xlu1 %v19235_v5, %s13636_s22 }
 0x892   : > { %10708 = vrot.lane.b32.xlu0 %v19235_v5, %s13637_s23 }
 0x894   : > { %10720 = vrot.lane.b32.xlu1 %v19262_v26, %s13637_s23 }
 0x896   : > { %10933 = vrot.lane.b32.xlu0 %v19224_v31, %s13638_s24 }
 0x898   : > { %10925 = vrot.lane.b32.xlu1 %v19262_v26, %s13638_s24 }
 0x89a   : > { %9718 = vrot.lane.b32.xlu0 %v19273_v57, %s13633_s19 }
 0x89c   : > { %9726 = vrot.lane.b32.xlu1 %v19278_v48, %s13633_s19 }
 0x89e   : > { %9728 = vrot.lane.b32.xlu0 %v19262_v26, %s13633_s19 }
 0x8a0   : > { %9927 = vrot.lane.b32.xlu1 %v19278_v48, %s13634_s20 }
 0x8a2   : > { %9919 = vrot.lane.b32.xlu0 %v19273_v57, %s13634_s20 }
 0x8a4   : > { %10129 = vrot.lane.b32.xlu1 %v19278_v48, %s13635_s21 }
 0x8a6   : > { %9929 = vrot.lane.b32.xlu0 %v19262_v26, %s13634_s20 }
 0x8a8   : > { %10334 = vrot.lane.b32.xlu1 %v19278_v48, %s13636_s22 }
 0x8aa   : > { %10121 = vrot.lane.b32.xlu0 %v19273_v57, %s13635_s21 }
 0x8ac   : > { %9732 = vrot.lane.b32.xlu1 %v19305_v2, %s13633_s19 }
 0x8ae   : > { %10131 = vrot.lane.b32.xlu0 %v19262_v26, %s13635_s21 }
 0x8b0   : > { %10724 = vrot.lane.b32.xlu1 %v19305_v2, %s13637_s23 }
 0x8b2   : > { %10326 = vrot.lane.b32.xlu0 %v19273_v57, %s13636_s22 }
 0x8b4   : > { %10929 = vrot.lane.b32.xlu1 %v19305_v2, %s13638_s24 }
 0x8b6   : > { %10336 = vrot.lane.b32.xlu0 %v19262_v26, %s13636_s22 }
 0x8b8   : > { %10917 = vrot.lane.b32.xlu1 %v19177_v33, %s13638_s24 }
 0x8ba   : > { %10710 = vrot.lane.b32.xlu0 %v19273_v57, %s13637_s23 }
 0x8bc   : > { %10907 = vrot.lane.b32.xlu1 %v19170_v25, %s13638_s24 }
 0x8be   : > { %9724 = vrot.lane.b32.xlu0 %v19334_v47, %s13633_s19 }
 0x8c0   : > { %10905 = vrot.lane.b32.xlu1 %v19166_v7, %s13638_s24 }
 0x8c2   : > { %9925 = vrot.lane.b32.xlu0 %v19334_v47, %s13634_s20 }
 0x8c4   : > { %11134 = vrot.lane.b32.xlu1 %v19305_v2, %s13639_s25 }
 0x8c6   : > { %10127 = vrot.lane.b32.xlu0 %v19334_v47, %s13635_s21 }
 0x8c8   : > { %11130 = vrot.lane.b32.xlu1 %v19262_v26, %s13639_s25 }
 0x8c9   : > { %v19361_v52 = vpop.permute.xlu1 %9708 }
 0x8ca   : > { %10332 = vrot.lane.b32.xlu0 %v19334_v47, %s13636_s22 }
 0x8cb   : > { %v19365_v20 = vpop.permute.xlu0 %9710 }
 0x8cc   : > { %9935 = vrot.lane.b32.xlu1 %v19359_v0, %s13634_s20 }
 0x8ce   : > { %v19369_v3 = vpop.permute.xlu1 %9720  ;;  %10716 = vrot.lane.b32.xlu0 %v19334_v47, %s13637_s23 }
 0x8d0   : > { %v19373_v18 = vpop.permute.xlu0 %9712  ;;  %13606 = vrot.lane.b32.xlu1 %v20798_v63, %s13639_s25 }
 0x8d2   : > { %v19377_v21 = vpop.permute.xlu1 %9909  ;;  %10921 = vrot.lane.b32.xlu0 %v19334_v47, %s13638_s24 }
 0x8d4   : > { %v19381_v40 = vpop.permute.xlu0 %9911  ;;  %10137 = vrot.lane.b32.xlu1 %v19359_v0, %s13635_s21 }
 0x8d6   : > { %v19385_v1 = vpop.permute.xlu1 %9921  ;;  %10718 = vrot.lane.b32.xlu0 %v19278_v48, %s13637_s23 }
 0x8d8   : > { %v19389_v12 = vpop.permute.xlu0 %9913  ;;  %11122 = vrot.lane.b32.xlu1 %v19177_v33, %s13639_s25 }
 0x8da   : > { %v19393_v11 = vpop.permute.xlu1 %10111  ;;  %10923 = vrot.lane.b32.xlu0 %v19278_v48, %s13638_s24 }
 0x8dc   : > { %v19397_v62 = vpop.permute.xlu0 %10113  ;;  %10342 = vrot.lane.b32.xlu1 %v19359_v0, %s13636_s22 }
 0x8de   : > { %v19401_v37 = vpop.permute.xlu1 %10123  ;;  %9933 = vrot.lane.b32.xlu0 %v19305_v2, %s13634_s20 }
 0x8e0   : > { %v19405_v53 = vpop.permute.xlu0 %10115  ;;  %11112 = vrot.lane.b32.xlu1 %v19170_v25, %s13639_s25 }
 0x8e2   : > { %v19409_v36 = vpop.permute.xlu1 %10316  ;;  %10135 = vrot.lane.b32.xlu0 %v19305_v2, %s13635_s21  ;;  %s13223_s21 = smul.u32 24, %s21037_s14 }
 0x8e4   : > { %v19413_v23 = vpop.permute.xlu0 %10318  ;;  %11110 = vrot.lane.b32.xlu1 %v19166_v7, %s13639_s25 }
 0x8e6   : > { %v19417_v17 = vpop.permute.xlu1 %10328  ;;  %10340 = vrot.lane.b32.xlu0 %v19305_v2, %s13636_s22 }
 0x8e8   : > { %v19423_v51 = vpop.permute.xlu0 %10320  ;;  %11339 = vrot.lane.b32.xlu1 %v19305_v2, %s13640_s26 }
 0x8ea   : > { %v19427_v32 = vpop.permute.xlu1 %10712  ;;  %9734 = vrot.lane.b32.xlu0 %v19359_v0, %s13633_s19 }
 0x8eb   : > { %20978 = vst [vmem:[#allocation35_spill] sm:$0xff] %v19427_v32 }
 0x8ec   : > { %v19431_v15 = vpop.permute.xlu0 %10704  ;;  %10726 = vrot.lane.b32.xlu1 %v19359_v0, %s13637_s23 }
 0x8ed   : > { %20979 = vst [vmem:[#allocation101_spill] sm:$0xff] %v19431_v15 }
 0x8ee   : > { %v10701_v29 = vpop.permute.xlu1 %10700  ;;  %10915 = vrot.lane.b32.xlu0 %v19273_v57, %s13638_s24 }
 0x8f0   : > { %v19437_v41 = vpop.permute.xlu0 %9736  ;;  %11335 = vrot.lane.b32.xlu1 %v19262_v26, %s13640_s26 }
 0x8f2   : > { %v10703_v43 = vpop.permute.xlu1 %10702  ;;  %10913 = vrot.lane.b32.xlu0 %v19235_v5, %s13638_s24 }
 0x8f3   : > { %v19444_v38 = vsel %vm1845_vm6, %v10701_v29, %v10703_v43  ;;  %v19448_v24 = vsel %vm1845_vm6, %v10703_v43, %v19431_v15 }
 0x8f4   : > { %20980 = vst [vmem:[#allocation29_spill] sm:$0xff] %v19444_v38  ;;  %20981 = vst [vmem:[#allocation37_spill] sm:$0xff] %v19448_v24  ;;  %v19450_v4 = vpop.permute.xlu0 %9937  ;;  %10931 = vrot.lane.b32.xlu1 %v19359_v0, %s13638_s24 }
 0x8f6   : > { %v19454_v16 = vpop.permute.xlu1 %9716  ;;  %10909 = vrot.lane.b32.xlu0 %v19180_v46, %s13638_s24 }
 0x8f8   : > { %v19458_v61 = vpop.permute.xlu0 %10139  ;;  %13616 = vrot.lane.b32.xlu1 %v20798_v63, %s13640_s26 }
 0x8fa   : > { %v19462_v13 = vpop.permute.xlu1 %9917  ;;  %13601 = vrot.lane.b32.xlu0 %v20798_v63, %s13638_s24  ;;  %s359_s24 = scalar_lea.vmem %s20035_s10, %s13223_s21 }
 0x8fc   : > { %v19466_v54 = vpop.permute.xlu0 %10344  ;;  %11136 = vrot.lane.b32.xlu1 %v19359_v0, %s13639_s25 }
 0x8fe   : > { %v19470_v39 = vpop.permute.xlu1 %10119  ;;  %11138 = vrot.lane.b32.xlu0 %v19224_v31, %s13639_s25 }
 0x900   : > { %v19474_v58 = vpop.permute.xlu0 %10728  ;;  %11327 = vrot.lane.b32.xlu1 %v19177_v33, %s13640_s26 }
 0x901   : > { %20982 = vst [vmem:[#allocation115_spill] sm:$0xff] %v19474_v58 }
 0x902   : > { %v19478_v45 = vpop.permute.xlu1 %10324  ;;  %11128 = vrot.lane.b32.xlu0 %v19278_v48, %s13639_s25 }
 0x904   : > { %v10709_v6 = vpop.permute.xlu0 %10708  ;;  %11341 = vrot.lane.b32.xlu1 %v19359_v0, %s13640_s26 }
 0x906   : > { %v19484_v59 = vpop.permute.xlu1 %10720  ;;  %11126 = vrot.lane.b32.xlu0 %v19334_v47, %s13639_s25 }
 0x907   : > { %20983 = vst [vmem:[#allocation72_spill] sm:$0xff] %v19484_v59 }
 0x908   : > { %v19488_v19 = vpop.permute.xlu0 %10933  ;;  %11317 = vrot.lane.b32.xlu1 %v19170_v25, %s13640_s26  ;;  %v11518_v25 = vld [vmem:[%s20033_s8] sm:$0xff] }
 0x909   : > { %20984 = vst [vmem:[#allocation91_spill] sm:$0xff] %v19488_v19 }
 0x90a   : > { %v19492_v14 = vpop.permute.xlu1 %10925  ;;  %11120 = vrot.lane.b32.xlu0 %v19273_v57, %s13639_s25 }
 0x90b   : > { %20985 = vst [vmem:[#allocation12_spill] sm:$0xff] %v19492_v14 }
 0x90c   : > { %v9719_v22 = vpop.permute.xlu0 %9718  ;;  %11315 = vrot.lane.b32.xlu1 %v19166_v7, %s13640_s26 }
 0x90d   : > { %v19500_v27 = vsel %vm424_vm0, %v9719_v22, %v19369_v3  ;;  %v19504_v10 = vsel %vm424_vm0, %v19454_v16, %v9719_v22 }
 0x90e   : > { %v19506_v9 = vpop.permute.xlu1 %9726  ;;  %11118 = vrot.lane.b32.xlu0 %v19235_v5, %s13639_s25 }
 0x910   : > { %v19510_v56 = vpop.permute.xlu0 %9728  ;;  %11321 = vrot.lane.b32.xlu1 %v20798_v63, %s13640_s26 }
 0x912   : > { %v19514_v29 = vpop.permute.xlu1 %9927  ;;  %11114 = vrot.lane.b32.xlu0 %v19180_v46, %s13639_s25 }
 0x914   : > { %v9920_v3 = vpop.permute.xlu0 %9919 }
 0x915   : > { %v19520_v43 = vsel %vm686_vm3, %v9920_v3, %v19385_v1  ;;  %v19524_v22 = vsel %vm686_vm3, %v19462_v13, %v9920_v3 }
 0x916   : > { %v19526_v14 = vpop.permute.xlu1 %10129  ;;  %13611 = vrot.lane.b32.xlu0 %v20798_v63, %s13639_s25 }
 0x918   : > { %v19530_v19 = vpop.permute.xlu0 %9929 }
 0x91a   : > { %v19532_v38 = vpop.permute.xlu1 %10334  ;;  %11343 = vrot.lane.b32.xlu0 %v19224_v31, %s13640_s26  ;;  %v13548_v31 = vunpack.i.l.bf16 %v19255_v49 }
 0x91c   : > { %v10122_v42 = vpop.permute.xlu0 %10121 }
 0x91d   : > { %v19538_v1 = vsel %vm961_vm4, %v10122_v42, %v19401_v37  ;;  %v19542_v3 = vsel %vm961_vm4, %v19470_v39, %v10122_v42 }
 0x91e   : > { %v9733_v24 = vpop.permute.xlu1 %9732  ;;  %11333 = vrot.lane.b32.xlu0 %v19278_v48, %s13640_s26 }
 0x920   : > { %v19546_v15 = vpop.permute.xlu0 %10131 }
 0x922   : > { %v19548_v32 = vpop.permute.xlu1 %10724  ;;  %11331 = vrot.lane.b32.xlu0 %v19334_v47, %s13640_s26 }
 0x923   : > { %20986 = vst [vmem:[#allocation33_spill] sm:$0xff] %v19548_v32 }
 0x924   : > { %v10327_v59 = vpop.permute.xlu0 %10326 }
 0x925   : > { %v19554_v37 = vsel %vm1260_vm5, %v10327_v59, %v19417_v17  ;;  %v19558_v42 = vsel %vm1260_vm5, %v19478_v45, %v10327_v59 }
 0x926   : > { %v19560_v35 = vpop.permute.xlu1 %10929  ;;  %11325 = vrot.lane.b32.xlu0 %v19273_v57, %s13640_s26 }
 0x927   : > { %20987 = vst [vmem:[#allocation93_spill] sm:$0xff] %v19560_v35 }
 0x928   : > { %v19564_v58 = vpop.permute.xlu0 %10336 }
 0x92a   : > { %v19566_v32 = vpop.permute.xlu1 %10917  ;;  %11323 = vrot.lane.b32.xlu0 %v19235_v5, %s13640_s26 }
 0x92b   : > { %20988 = vst [vmem:[#allocation20_spill] sm:$0xff] %v19566_v32 }
 0x92c   : > { %v19570_v7 = vpop.permute.xlu0 %10710 }
 0x92d   : > { %20989 = vst [vmem:[#allocation10_spill] sm:$0xff] %v19570_v7  ;;  %v19574_v17 = vsel %vm1845_vm6, %v10709_v6, %v19570_v7 }
 0x92e   : > { %20990 = vst [vmem:[#allocation86_spill] sm:$0xff] %v19574_v17  ;;  %v19576_v59 = vpop.permute.xlu1 %10907  ;;  %11319 = vrot.lane.b32.xlu0 %v19180_v46, %s13640_s26 }
 0x92f   : > { %20991 = vst [vmem:[#allocation108_spill] sm:$0xff] %v19576_v59 }
 0x930   : > { %v9725_v35 = vpop.permute.xlu0 %9724 }
 0x932   : > { %v10906_v44 = vpop.permute.xlu1 %10905  ;;  %11329 = vrot.lane.b32.xlu0 %v20798_v63, %s13640_s26 }
 0x933   : > { %v19584_v32 = vsel %vm2144_vm7, %v10906_v44, %v19576_v59 }
 0x934   : > { %20992 = vst [vmem:[#allocation13_spill] sm:$0xff] %v19584_v32  ;;  %v19589_v6 = vpop.permute.xlu0 %9925 }
 0x936   : > { %11521 = vperm.xlu0 %13243, %v11518_v25   ;;  %v19595_v46 = vpop.permute.xlu1 %11134 }
 0x937   : > { %20993 = vst [vmem:[#allocation92_spill] sm:$0xff] %v19595_v46 }
 0x938   : > { %v19591_v17 = vpop.permute.xlu0 %10127 }
 0x93a   : > { %v19597_v57 = vpop.permute.xlu1 %11130 }
 0x93b   : > { %20994 = vst [vmem:[#allocation34_spill] sm:$0xff] %v19597_v57 }
 0x93c   : > { %v19593_v7 = vpop.permute.xlu0 %10332 }
 0x93e   : > { %v9936_v32 = vpop.permute.xlu1 %9935 }
 0x940   : > { %v10717_v5 = vpop.permute.xlu0 %10716 }
 0x942   : > { %v19611_v48 = vpop.permute.xlu1 %13606 }
 0x943   : > { %20999 = vst [vmem:[#allocation109_spill] sm:$0xff] %v19611_v48  ;;  %v9746_v48 = vsel %vm424_vm0, %v19506_v9, %v19510_v56 }
 0x944   : > { %v10922_v33 = vpop.permute.xlu0 %10921 }
 0x946   : > { %v19615_v2 = vpop.permute.xlu1 %10137 }
 0x948   : > { %v19599_v47 = vpop.permute.xlu0 %10718 }
 0x949   : > { %20995 = vst [vmem:[#allocation31_spill] sm:$0xff] %v19599_v47  ;;  %v19603_v44 = vsel %vm1845_vm6, %v10717_v5, %v19599_v47 }
 0x94a   : > { %20996 = vst [vmem:[#allocation18_spill] sm:$0xff] %v19603_v44 }
 0x94c   : > { %v19605_v59 = vpop.permute.xlu0 %10923 }
 0x94d   : > { %20997 = vst [vmem:[#allocation76_spill] sm:$0xff] %v19605_v59  ;;  %v19609_v25 = vsel %vm2144_vm7, %v10922_v33, %v19605_v59  ;;  %v13549_v33 = vunpack.i.h.bf16 %v19255_v49  ;;  %v19625_v59 = vpop.permute.xlu1 %11122  ;;  %v13553_v49 = vunpack.i.l.bf16 %v19268_v60 }
 0x94e   : > { %20998 = vst [vmem:[#allocation60_spill] sm:$0xff] %v19609_v25  ;;  %v9747_v25 = vsel %vm424_vm0, %v13548_v31, %v9733_v24 }
 0x94f   : > { %v9744_v31 = vsel %vm424_vm0, %v13549_v33, %v9725_v35 }
 0x950   : > { %v9934_v26 = vpop.permute.xlu0 %9933 }
 0x954   : > { %v19613_v46 = vpop.permute.xlu0 %10135 }
 0x958   : > { %v19617_v57 = vpop.permute.xlu0 %10340 }
 0x95c   : > { %v9735_v5 = vpop.permute.xlu0 %9734 }
 0x95d   : > { %v9749_v44 = vsel %vm424_vm0, %v9735_v5, %v19437_v41  ;;  %v9748_v47 = vsel %vm424_vm0, %v9733_v24, %v9735_v5  ;;  %v9745_v41 = vsel %vm424_vm0, %v9725_v35, %v19506_v9  ;;  %v13554_v5 = vunpack.i.h.bf16 %v19268_v60  ;;  %v12139_v35 = vld [vmem:[%s20029_s4 + $0x8] sm:$0xff] }
 0x95e   : > { %9790 = vmatprep.subr.mxu1 %v9748_v47  ;;  %13122 = vmatpush3.msra.mxu0 %v9749_v44  ;;  %v9741_v24 = vsel %vm424_vm0, %v13553_v49, %v19454_v16  ;;  %v9740_v60 = vsel %vm424_vm0, %v19365_v20, %v19373_v18  ;;  %v9950_v9 = vsel %vm686_vm3, %v9936_v32, %v19450_v4 }
 0x95f   : > { %9791 = vmatpush1.msra.mxu1 %v9747_v25  ;;  %13123 = vmatprep.subr.mxu0 %v20798_v63  ;;  %v9738_v16 = vsel %vm424_vm0, %v13554_v5, %v19361_v52  ;;  %v9947_v44 = vsel %vm686_vm3, %v19514_v29, %v19530_v19  ;;  %v13569_v5 = vunpack.i.h.bf16 %v19300_v8 }
 0x960   : > { %9792 = vmatprep.subr.mxu1 %v9745_v41  ;;  %13124 = vmatpush3.msra.mxu0 %v9746_v48  ;;  %v19636_v47 = vpop.permute.xlu0 %10915  ;;  %v9739_v48 = vsel %vm424_vm0, %v19361_v52, %v19365_v20  ;;  %v9949_v20 = vsel %vm686_vm3, %v9934_v26, %v9936_v32  ;;  %v13559_v52 = vunpack.i.h.bf16 %v19282_v28  ;;  %v9946_v32 = vsel %vm686_vm3, %v19589_v6, %v19514_v29 }
 0x961   : > { %9793 = vmatpush1.msra.mxu1 %v9744_v31  ;;  %13125 = vmatprep.subr.mxu0 %v20798_v63  ;;  %v9940_v29 = vsel %vm686_vm3, %v19377_v21, %v19381_v40  ;;  %v13574_v31 = vunpack.i.h.bf16 %v19309_v55 }
 0x962   : > { %9794 = vmatprep.subr.mxu1 %v19504_v10  ;;  %13126 = vmatpush3.msra.mxu0 %v19500_v27  ;;  %v19655_v27 = vpop.permute.xlu1 %10342  ;;  %v13558_v10 = vunpack.i.l.bf16 %v19282_v28  ;;  %v13564_v28 = vunpack.i.h.bf16 %v19291_v34  ;;  %v9945_v25 = vsel %vm686_vm3, %v13559_v52, %v19589_v6 }
 0x963   : > { %9795 = vmatpush1.msra.mxu1 %v9741_v24  ;;  %13127 = vmatprep.subr.mxu0 %v20798_v63 }
 0x964   : > { %9796 = vmatprep.subr.mxu1 %v9739_v48  ;;  %13128 = vmatpush3.msra.mxu0 %v9740_v60  ;;  %v19657_v18 = vpop.permute.xlu0 %10913  ;;  %v9948_v56 = vsel %vm686_vm3, %v13558_v10, %v9934_v26  ;;  %v13563_v26 = vunpack.i.l.bf16 %v19291_v34  ;;  %v9941_v34 = vsel %vm686_vm3, %v19381_v40, %v19389_v12  ;;  %v13568_v12 = vunpack.i.l.bf16 %v19300_v8 }
 0x965   : > { %9797 = vmatpush1.msra.mxu1 %v9738_v16  ;;  %13132 = vmatprep.subr.mxu0 %v20798_v63  ;;  %v13573_v8 = vunpack.i.l.bf16 %v19309_v55  ;;  %v10143_v55 = vsel %vm961_vm4, %v19397_v62, %v19405_v53  ;;  %v13579_v60 = vunpack.i.h.bf16 %v19318_v30  ;;  %v10353_v16 = vsel %vm1260_vm5, %v19593_v7, %v19532_v38 }
 0x966   : > { %13130 = vmatmul.mubr.msk.f32.vlgmr.msra.gmra.mxu0 %vm9762_vm12, %v12139_v35  ;;  %9990 = vmatprep.subr.mxu1 %v9949_v20  ;;  %v19681_v33 = vpop.permute.xlu1 %11112  ;;  %v9942_v19 = vsel %vm686_vm3, %v13563_v26, %v19462_v13  ;;  %v9939_v13 = vsel %vm686_vm3, %v13564_v28, %v19377_v21  ;;  %v10152_v21 = vsel %vm961_vm4, %v19615_v2, %v19458_v61  ;;  %v21002_v20 = vld [vmem:[#allocation61_spill] sm:$0xff]  ;;  %v12150_v26 = vld [vmem:[%s20029_s4 + $0x20] sm:$0xff] }
 0x967   : > { %13133 = vmatpush3.msra.mxu0 %v9950_v9  ;;  %12140 = vmatmul.mubr.msk.f32.vlgmr.msra.gmra.mxu1 %vm9762_vm12, %v12139_v35  ;;  %v10150_v49 = vsel %vm961_vm4, %v13568_v12, %v19613_v46  ;;  %v10149_v61 = vsel %vm961_vm4, %v19526_v14, %v19546_v15  ;;  %v10144_v24 = vsel %vm961_vm4, %v13573_v8, %v19470_v39  ;;  %v12144_v39 = vld [vmem:[%s20029_s4 + $0x10] sm:$0xff]  ;;  %v21007_v28 = vld [vmem:[#allocation5_spill] sm:$0xff] }
 0x968   : > { %9991 = vmatpush1.msra.mxu1 %v9948_v56  ;;  %13134 = vmatprep.subr.mxu0 %v20798_v63  ;;  %v19675_v4 = vpop.permute.xlu0 %10909  ;;  %v10354_v35 = vsel %vm1260_vm5, %v19532_v38, %v19564_v58  ;;  %v10352_v10 = vsel %vm1260_vm5, %v13579_v60, %v19593_v7  ;;  %v10348_v38 = vsel %vm1260_vm5, %v19413_v23, %v19423_v51  ;;  %v21001_v51 = vld [vmem:[#allocation100_spill] sm:$0xff]  ;;  %v21003_v9 = vld [vmem:[#allocation90_spill] sm:$0xff]  ;;  %v21004_v56 = vld [vmem:[#allocation49_spill] sm:$0xff] }
 0x969   : > { %9992 = vmatprep.subr.mxu1 %v9946_v32  ;;  %13135 = vmatpush3.msra.mxu0 %v9947_v44  ;;  %v10347_v7 = vsel %vm1260_vm5, %v19409_v36, %v19413_v23  ;;  %v21005_v32 = vld [vmem:[#allocation32_spill] sm:$0xff]  ;;  %v21019_v60 = vld [vmem:[#allocation10_spill] sm:$0xff] }
 0x96a   : > { %9993 = vmatpush1.msra.mxu1 %v9945_v25  ;;  %13136 = vmatprep.subr.mxu0 %v20798_v63  ;;  %v19710_v40 = vpop.permute.xlu1 %11110  ;;  %v21008_v25 = vld [vmem:[#allocation81_spill] sm:$0xff] }
 0x96b   : > { %9994 = vmatprep.subr.mxu1 %v19524_v22  ;;  %13137 = vmatpush3.msra.mxu0 %v19520_v43  ;;  %v9687_v43 = vld [vmem:[%s20029_s4] sm:$0xff]  ;;  %v10151_v22 = vsel %vm961_vm4, %v19613_v46, %v19615_v2  ;;  %v10148_v2 = vsel %vm961_vm4, %v19591_v17, %v19526_v14  ;;  %v10147_v46 = vsel %vm961_vm4, %v13569_v5, %v19591_v17 }
 0x96c   : > { %9995 = vmatpush1.msra.mxu1 %v9942_v19  ;;  %13138 = vmatprep.subr.mxu0 %v20798_v63  ;;  %v19695_v6 = vpop.permute.xlu0 %13601  ;;  %v10142_v17 = vsel %vm961_vm4, %v19393_v11, %v19397_v62  ;;  %v10357_v62 = vsel %vm1260_vm5, %v19655_v27, %v19466_v54  ;;  %v21009_v19 = vld [vmem:[#allocation89_spill] sm:$0xff] }
 0x96d   : > { %9996 = vmatprep.subr.mxu1 %v9940_v29  ;;  %13139 = vmatpush3.msra.mxu0 %v9941_v34  ;;  %v21010_v34 = vld [vmem:[#allocation94_spill] sm:$0xff] }
 0x96e   : > { %9997 = vmatpush1.msra.mxu1 %v9939_v13  ;;  %10030 = vmatprep.mubr.f32.mxu1 %v20798_v63  ;;  %v19743_v14 = vpop.permute.xlu1 %11339  ;;  %v13588_v29 = vunpack.i.l.bf16 %v21010_v34  ;;  %v21011_v13 = vld [vmem:[#allocation16_spill] sm:$0xff]  ;;  %v13589_v12 = vunpack.i.h.bf16 %v21010_v34 }
 0x96f   : > { %13140 = vmatprep.mubr.msk.f32.mxu0 %vm13642_vm11, %v20798_v63  ;;  %13143 = vmatprep.subr.mxu0 %v20798_v63 }
 0x970   : > { %12142 = vmatmul.mubr.msk.f32.vlgmr.msra.gmra.mxu1 %vm9762_vm12, %v9687_v43  ;;  %13141 = vmatmul.mubr.msk.f32.vlgmr.msra.gmra.mxu0 %vm9762_vm12, %v9687_v43  ;;  %v19717_v41 = vpop.permute.xlu0 %11138 }
 0x971   : > { %10192 = vmatprep.subr.mxu1 %v10151_v22  ;;  %13144 = vmatpush3.msra.mxu0 %v10152_v21  ;;  %v21012_v21 = vld [vmem:[#allocation115_spill] sm:$0xff] }
 0x972   : > { %10193 = vmatpush1.msra.mxu1 %v10150_v49  ;;  %13145 = vmatprep.subr.mxu0 %v20798_v63  ;;  %v10727_v54 = vpop.permute.xlu1 %10726  ;;  %v10743_v22 = vsel %vm1845_vm6, %v21012_v21, %v13588_v29  ;;  %v13604_v29 = vunpack.i.h.bf16 %v19695_v6 }
 0x973   : > { %10194 = vmatprep.subr.mxu1 %v10148_v2  ;;  %13146 = vmatpush3.msra.mxu0 %v10149_v61  ;;  %v10742_v49 = vsel %vm1845_vm6, %v10727_v54, %v21012_v21  ;;  %v21013_v61 = vld [vmem:[#allocation33_spill] sm:$0xff] }
 0x974   : > { %10195 = vmatpush1.msra.mxu1 %v10147_v46  ;;  %13147 = vmatprep.subr.mxu0 %v20798_v63  ;;  %v19734_v15 = vpop.permute.xlu0 %11128  ;;  %v10741_v2 = vsel %vm1845_vm6, %v21013_v61, %v10727_v54  ;;  %v21015_v46 = vld [vmem:[#allocation72_spill] sm:$0xff]  ;;  %v12156_v61 = vld [vmem:[%s20029_s4 + $0x30] sm:$0xff] }
 0x975   : > { %10196 = vmatprep.subr.mxu1 %v19542_v3  ;;  %13148 = vmatpush3.msra.mxu0 %v19538_v1  ;;  %v10141_v1 = vsel %vm961_vm4, %v13574_v31, %v19393_v11  ;;  %v13578_v3 = vunpack.i.l.bf16 %v19318_v30  ;;  %v10356_v11 = vsel %vm1260_vm5, %v19617_v57, %v19655_v27  ;;  %v13584_v30 = vunpack.i.h.bf16 %v19327_v50  ;;  %v21014_v31 = vld [vmem:[#allocation79_spill] sm:$0xff] }
 0x976   : > { %10197 = vmatpush1.msra.mxu1 %v10144_v24  ;;  %13149 = vmatprep.subr.mxu0 %v20798_v63  ;;  %v13593_v8 = vunpack.i.l.bf16 %v21014_v31  ;;  %v10740_v24 = vsel %vm1845_vm6, %v21015_v46, %v13589_v12 }
 0x977   : > { %10198 = vmatprep.subr.mxu1 %v10142_v17  ;;  %13150 = vmatpush3.msra.mxu0 %v10143_v55  ;;  %v10355_v48 = vsel %vm1260_vm5, %v13578_v3, %v19617_v57  ;;  %v13583_v57 = vunpack.i.l.bf16 %v19327_v50  ;;  %v12147_v50 = vld [vmem:[%s20029_s4 + $0x18] sm:$0xff] }
 0x978   : > { %13151 = vmatprep.mubr.msk.f32.mxu0 %vm13642_vm11, %v20798_v63  ;;  %10199 = vmatpush1.msra.mxu1 %v10141_v1  ;;  %v19756_v53 = vpop.permute.xlu0 %11126  ;;  %v21016_v55 = vld [vmem:[#allocation31_spill] sm:$0xff]  ;;  %v13594_v1 = vunpack.i.h.bf16 %v21014_v31 }
 0x979   : > { %10232 = vmatprep.mubr.f32.mxu1 %v20798_v63  ;;  %13152 = vmatmul.mubr.msk.f32.vlgmr.msra.gmra.mxu0 %vm9762_vm12, %v12144_v39  ;;  %v10349_v58 = vsel %vm1260_vm5, %v13583_v57, %v19478_v45  ;;  %v10739_v17 = vsel %vm1845_vm6, %v21016_v55, %v21015_v46  ;;  %v21017_v3 = vld [vmem:[#allocation35_spill] sm:$0xff]  ;;  %v12153_v57 = vld [vmem:[%s20029_s4 + $0x28] sm:$0xff] }
 0x97a   : > { %13154 = vmatprep.subr.mxu0 %v20798_v63  ;;  %12145 = vmatmul.mubr.msk.f32.vlgmr.msra.gmra.mxu1 %vm9762_vm12, %v12144_v39  ;;  %v21033_v46 = vld [vmem:[#allocation13_spill] sm:$0xff] }
 0x97b   : > { %10397 = vmatprep.subr.mxu1 %v10356_v11  ;;  %13155 = vmatpush3.msra.mxu0 %v10357_v62  ;;  %v10737_v62 = vsel %vm1845_vm6, %v21017_v3, %v13593_v8  ;;  %v21018_v11 = vld [vmem:[#allocation18_spill] sm:$0xff] }
 0x97c   : > { %10398 = vmatpush1.msra.mxu1 %v10355_v48  ;;  %13156 = vmatprep.subr.mxu0 %v20798_v63  ;;  %v19779_v27 = vpop.permute.xlu0 %11120  ;;  %v10736_v48 = vsel %vm1845_vm6, %v21019_v60, %v21017_v3 }
 0x97d   : > { %10399 = vmatprep.subr.mxu1 %v10353_v16  ;;  %13157 = vmatpush3.msra.mxu0 %v10354_v35  ;;  %v21020_v35 = vld [vmem:[#allocation101_spill] sm:$0xff] }
 0x97e   : > { %10400 = vmatpush1.msra.mxu1 %v10352_v10  ;;  %13158 = vmatprep.subr.mxu0 %v20798_v63  ;;  %v10734_v54 = vsel %vm1845_vm6, %v21020_v35, %v13594_v1  ;;  %v21034_v1 = vld [vmem:[#allocation92_spill] sm:$0xff] }
 0x97f   : > { %10401 = vmatprep.subr.mxu1 %v19558_v42  ;;  %13159 = vmatpush3.msra.mxu0 %v19554_v37  ;;  %v10346_v37 = vsel %vm1260_vm5, %v13584_v30, %v19409_v36  ;;  %v19804_v42 = vpop.permute.xlu1 %11335  ;;  %v21000_v36 = vld [vmem:[#allocation59_spill] sm:$0xff]  ;;  %v21021_v30 = vld [vmem:[#allocation86_spill] sm:$0xff] }
 0x980   : > { %10402 = vmatpush1.msra.mxu1 %v10349_v58  ;;  %13160 = vmatprep.subr.mxu0 %v20798_v63  ;;  %v19800_v45 = vpop.permute.xlu0 %11118  ;;  %v21022_v58 = vld [vmem:[#allocation37_spill] sm:$0xff] }
 0x981   : > { %10403 = vmatprep.subr.mxu1 %v10347_v7  ;;  %13161 = vmatpush3.msra.mxu0 %v10348_v38  ;;  %v21023_v38 = vld [vmem:[#allocation85_spill] sm:$0xff] }
 0x982   : > { %13162 = vmatprep.mubr.msk.f32.mxu0 %vm13642_vm11, %v20798_v63  ;;  %10404 = vmatpush1.msra.mxu1 %v10346_v37  ;;  %v13598_v7 = vunpack.i.l.bf16 %v21023_v38  ;;  %v13599_v37 = vunpack.i.h.bf16 %v21023_v38 }
 0x983   : > { %10437 = vmatprep.mubr.f32.mxu1 %v20798_v63  ;;  %13163 = vmatmul.mubr.msk.f32.vlgmr.msra.gmra.mxu0 %vm9762_vm12, %v12147_v50  ;;  %v10932_v52 = vpop.permute.xlu1 %10931 }
 0x984   : > { %13165 = vmatprep.subr.mxu0 %v20798_v63  ;;  %12148 = vmatmul.mubr.msk.f32.vlgmr.msra.gmra.mxu1 %vm9762_vm12, %v12147_v50  ;;  %v19812_v23 = vpop.permute.xlu0 %11114  ;;  %v21024_v50 = vld [vmem:[#allocation29_spill] sm:$0xff] }
 0x985   : > { %10546 = vmatprep.subr.mxu1 %v19359_v0  ;;  %13166 = vmatpush3.msra.mxu0 %v21000_v36  ;;  %v21006_v0 = vld [vmem:[#allocation77_spill] sm:$0xff]  ;;  %v21025_v36 = vld [vmem:[#allocation91_spill] sm:$0xff] }
 0x986   : > { %10547 = vmatpush1.msra.mxu1 %v21001_v51  ;;  %13167 = vmatprep.subr.mxu0 %v20798_v63  ;;  %v10948_v51 = vsel %vm2144_vm7, %v21025_v36, %v13598_v7 }
 0x987   : > { %10548 = vmatprep.subr.mxu1 %v21002_v20  ;;  %13168 = vmatpush3.msra.mxu0 %v21003_v9  ;;  %v19844_v5 = vpop.permute.xlu1 %13616  ;;  %v13603_v20 = vunpack.i.l.bf16 %v19695_v6  ;;  %v10947_v9 = vsel %vm2144_vm7, %v10932_v52, %v21025_v36  ;;  %v21031_v6 = vld [vmem:[#allocation108_spill] sm:$0xff] }
 0x988   : > { %10549 = vmatpush1.msra.mxu1 %v21004_v56  ;;  %13169 = vmatprep.subr.mxu0 %v20798_v63  ;;  %v19822_v44 = vpop.permute.xlu0 %13611  ;;  %v21026_v56 = vld [vmem:[#allocation93_spill] sm:$0xff] }
 0x989   : > { %10550 = vmatprep.subr.mxu1 %v21005_v32  ;;  %13170 = vmatpush3.msra.mxu0 %v21006_v0  ;;  %v10946_v32 = vsel %vm2144_vm7, %v21026_v56, %v10932_v52  ;;  %v21027_v0 = vld [vmem:[#allocation12_spill] sm:$0xff] }
 0x98a   : > { %10551 = vmatpush1.msra.mxu1 %v21007_v28  ;;  %13171 = vmatprep.subr.mxu0 %v20798_v63  ;;  %v10945_v28 = vsel %vm2144_vm7, %v21027_v0, %v13599_v37  ;;  %v21029_v52 = vld [vmem:[#allocation60_spill] sm:$0xff] }
 0x98b   : > { %10552 = vmatprep.subr.mxu1 %v21008_v25  ;;  %13172 = vmatpush3.msra.mxu0 %v21009_v19  ;;  %v11137_v16 = vpop.permute.xlu1 %11136  ;;  %v21028_v25 = vld [vmem:[#allocation76_spill] sm:$0xff] }
 0x98c   : > { %13173 = vmatprep.mubr.msk.f32.mxu0 %vm13642_vm11, %v20798_v63  ;;  %10553 = vmatpush1.msra.mxu1 %v21011_v13  ;;  %v19837_v43 = vpop.permute.xlu0 %11343  ;;  %v10944_v19 = vsel %vm2144_vm7, %v21028_v25, %v21027_v0  ;;  %v21030_v13 = vld [vmem:[#allocation20_spill] sm:$0xff]  ;;  %v11151_v3 = vsel %vm2443_vm8, %v21034_v1, %v11137_v16 }
 0x98d   : > { %10586 = vmatprep.mubr.f32.mxu1 %v20798_v63  ;;  %13174 = vmatmul.mubr.msk.f32.vlgmr.msra.gmra.mxu0 %vm9762_vm12, %v12150_v26  ;;  %v10941_v12 = vsel %vm2144_vm7, %v19636_v47, %v21030_v13  ;;  %v10942_v21 = vsel %vm2144_vm7, %v21030_v13, %v13603_v20 }
 0x98e   : > { %13176 = vmatprep.subr.mxu0 %v20798_v63  ;;  %12151 = vmatmul.mubr.msk.f32.vlgmr.msra.gmra.mxu1 %vm9762_vm12, %v12150_v26 }
 0x98f   : > { %10783 = vmatprep.subr.mxu1 %v10742_v49  ;;  %13177 = vmatpush3.msra.mxu0 %v10743_v22  ;;  %v19897_v26 = vpop.permute.xlu1 %11327  ;;  %v10940_v22 = vsel %vm2144_vm7, %v19657_v18, %v19636_v47  ;;  %v10938_v49 = vsel %vm2144_vm7, %v21031_v6, %v19675_v4  ;;  %v10939_v47 = vsel %vm2144_vm7, %v19675_v4, %v13604_v29  ;;  %v21032_v18 = vld [vmem:[#allocation109_spill] sm:$0xff] }
 0x990   : > { %10784 = vmatpush1.msra.mxu1 %v10741_v2  ;;  %13178 = vmatprep.subr.mxu0 %v20798_v63  ;;  %v19859_v39 = vpop.permute.xlu0 %11333  ;;  %v13609_v2 = vunpack.i.h.bf16 %v21032_v18  ;;  %v13608_v31 = vunpack.i.l.bf16 %v21032_v18  ;;  %v11152_v4 = vsel %vm2443_vm8, %v11137_v16, %v19717_v41 }
 0x991   : > { %10785 = vmatprep.subr.mxu1 %v10739_v17  ;;  %13179 = vmatpush3.msra.mxu0 %v10740_v24  ;;  %v13613_v17 = vunpack.i.l.bf16 %v19822_v44  ;;  %v11354_v38 = vsel %vm2742_vm9, %v19859_v39, %v19804_v42 }
 0x992   : > { %10786 = vmatpush1.msra.mxu1 %v21018_v11  ;;  %13180 = vmatprep.subr.mxu0 %v20798_v63  ;;  %v11153_v55 = vsel %vm2443_vm8, %v19717_v41, %v13608_v31  ;;  %v21035_v11 = vld [vmem:[#allocation34_spill] sm:$0xff]  ;;  %v11148_v41 = vsel %vm2443_vm8, %v19756_v53, %v19734_v15  ;;  %v11143_v53 = vsel %vm2443_vm8, %v19681_v33, %v19812_v23 }
 0x993   : > { %10787 = vmatprep.subr.mxu1 %v10736_v48  ;;  %13181 = vmatpush3.msra.mxu0 %v10737_v62  ;;  %v11342_v8 = vpop.permute.xlu1 %11341  ;;  %v13614_v62 = vunpack.i.h.bf16 %v19822_v44  ;;  %v11149_v60 = vsel %vm2443_vm8, %v19734_v15, %v21035_v11  ;;  %v11150_v48 = vsel %vm2443_vm8, %v21035_v11, %v13609_v2  ;;  %v11146_v44 = vsel %vm2443_vm8, %v19779_v27, %v19625_v59 }
 0x994   : > { %10788 = vmatpush1.msra.mxu1 %v21021_v30  ;;  %13182 = vmatprep.subr.mxu0 %v20798_v63  ;;  %v19876_v10 = vpop.permute.xlu0 %11331  ;;  %v11145_v30 = vsel %vm2443_vm8, %v19800_v45, %v19779_v27  ;;  %v13618_v15 = vunpack.i.l.bf16 %v19844_v5  ;;  %v11142_v27 = vsel %vm2443_vm8, %v19710_v40, %v19681_v33  ;;  %v13619_v45 = vunpack.i.h.bf16 %v19844_v5 }
 0x995   : > { %10789 = vmatprep.subr.mxu1 %v21022_v58  ;;  %13183 = vmatpush3.msra.mxu0 %v10734_v54  ;;  %v11147_v54 = vsel %vm2443_vm8, %v19625_v59, %v13613_v17  ;;  %v12159_v59 = vld [vmem:[%s20029_s4 + $0x38] sm:$0xff]  ;;  %v11357_v33 = vsel %vm2742_vm9, %v11342_v8, %v19837_v43  ;;  %v11356_v5 = vsel %vm2742_vm9, %v19743_v14, %v11342_v8 }
 0x996   : > { %13184 = vmatprep.mubr.msk.f32.mxu0 %vm13642_vm11, %v20798_v63  ;;  %10790 = vmatpush1.msra.mxu1 %v21024_v50  ;;  %v11358_v58 = vsel %vm2742_vm9, %v19837_v43, %v13618_v15  ;;  %v11355_v7 = vsel %vm2742_vm9, %v19804_v42, %v13619_v45  ;;  %v11353_v43 = vsel %vm2742_vm9, %v19876_v10, %v19859_v39  ;;  %v12162_v10 = vld [vmem:[%s20029_s4 + $0x40] sm:$0xff] }
 0x997   : > { %10823 = vmatprep.mubr.f32.mxu1 %v20798_v63  ;;  %13185 = vmatmul.mubr.msk.f32.vlgmr.msra.gmra.mxu0 %vm9762_vm12, %v12153_v57  ;;  %v11318_v35 = vpop.permute.xlu1 %11317 }
 0x998   : > { %13187 = vmatprep.subr.mxu0 %v20798_v63  ;;  %12154 = vmatmul.mubr.msk.f32.vlgmr.msra.gmra.mxu1 %vm9762_vm12, %v12153_v57  ;;  %v19903_v34 = vpop.permute.xlu0 %11325  ;;  %v11144_v57 = vsel %vm2443_vm8, %v19812_v23, %v13614_v62 }
 0x999   : > { %10988 = vmatprep.subr.mxu1 %v10947_v9  ;;  %13188 = vmatpush3.msra.mxu0 %v10948_v51  ;;  %v11351_v37 = vsel %vm2742_vm9, %v19903_v34, %v19897_v26 }
 0x99a   : > { %10989 = vmatpush1.msra.mxu1 %v10946_v32  ;;  %13189 = vmatprep.subr.mxu0 %v20798_v63 }
 0x99b   : > { %10990 = vmatprep.subr.mxu1 %v10944_v19  ;;  %13190 = vmatpush3.msra.mxu0 %v10945_v28  ;;  %v11316_v23 = vpop.permute.xlu1 %11315 }
 0x99c   : > { %10991 = vmatpush1.msra.mxu1 %v21029_v52  ;;  %13191 = vmatprep.subr.mxu0 %v20798_v63  ;;  %v19930_v24 = vpop.permute.xlu0 %11323  ;;  %v11347_v36 = vsel %vm2742_vm9, %v11316_v23, %v11318_v35 }
 0x99d   : > { %10992 = vmatprep.subr.mxu1 %v10941_v12  ;;  %13192 = vmatpush3.msra.mxu0 %v10942_v21  ;;  %v11350_v42 = vsel %vm2742_vm9, %v19930_v24, %v19903_v34 }
 0x99e   : > { %10993 = vmatpush1.msra.mxu1 %v10940_v22  ;;  %13193 = vmatprep.subr.mxu0 %v20798_v63 }
 0x99f   : > { %10994 = vmatprep.subr.mxu1 %v10938_v49  ;;  %13195 = vmatprep.mubr.msk.f32.mxu0 %vm13642_vm11, %v20798_v63  ;;  %v11322_v50 = vpop.permute.xlu1 %11321 }
 0x9a0   : > { %13194 = vmatpush3.msra.mxu0 %v10939_v47  ;;  %10995 = vmatpush1.msra.mxu1 %v21033_v46  ;;  %v11320_v16 = vpop.permute.xlu0 %11319 }
 0x9a1   : > { %11028 = vmatprep.mubr.f32.mxu1 %v20798_v63  ;;  %13196 = vmatmul.mubr.msk.f32.vlgmr.msra.gmra.mxu0 %vm9762_vm12, %v12156_v61  ;;  %v11348_v39 = vsel %vm2742_vm9, %v11318_v35, %v11320_v16  ;;  %v11349_v51 = vsel %vm2742_vm9, %v11320_v16, %v11322_v50 }
 0x9a2   : > { %13198 = vmatprep.subr.mxu0 %v20798_v63  ;;  %12157 = vmatmul.mubr.msk.f32.vlgmr.msra.gmra.mxu1 %vm9762_vm12, %v12156_v61 }
 0x9a3   : > { %11193 = vmatprep.subr.mxu1 %v11152_v4  ;;  %13199 = vmatpush3.msra.mxu0 %v11153_v55 }
 0x9a4   : > { %11194 = vmatpush1.msra.mxu1 %v11151_v3  ;;  %13200 = vmatprep.subr.mxu0 %v20798_v63  ;;  %v11330_v40 = vpop.permute.xlu0 %11329 }
 0x9a5   : > { %11195 = vmatprep.subr.mxu1 %v11149_v60  ;;  %13201 = vmatpush3.msra.mxu0 %v11150_v48  ;;  %v11352_v14 = vsel %vm2742_vm9, %v19897_v26, %v11330_v40 }
 0x9a6   : > { %11196 = vmatpush1.msra.mxu1 %v11148_v41  ;;  %13202 = vmatprep.subr.mxu0 %v20798_v63 }
 0x9a7   : > { %11197 = vmatprep.subr.mxu1 %v11146_v44  ;;  %13203 = vmatpush3.msra.mxu0 %v11147_v54 }
 0x9a8   : > { %11198 = vmatpush1.msra.mxu1 %v11145_v30  ;;  %13204 = vmatprep.subr.mxu0 %v20798_v63 }
 0x9a9   : > { %11199 = vmatprep.subr.mxu1 %v11143_v53  ;;  %13205 = vmatpush3.msra.mxu0 %v11144_v57 }
 0x9aa   : > { %13206 = vmatprep.mubr.msk.f32.mxu0 %vm13642_vm11, %v20798_v63  ;;  %11200 = vmatpush1.msra.mxu1 %v11142_v27 }
 0x9ab   : > { %11233 = vmatprep.mubr.f32.mxu1 %v20798_v63  ;;  %13207 = vmatmul.mubr.msk.f32.vlgmr.msra.gmra.mxu0 %vm9762_vm12, %v12159_v59 }
 0x9ac   : > { %13209 = vmatprep.subr.mxu0 %v20798_v63  ;;  %12160 = vmatmul.mubr.msk.f32.vlgmr.msra.gmra.mxu1 %vm9762_vm12, %v12159_v59 }
 0x9ad   : > { %11398 = vmatprep.subr.mxu1 %v11357_v33  ;;  %13210 = vmatpush3.msra.mxu0 %v11358_v58 }
 0x9ae   : > { %11399 = vmatpush1.msra.mxu1 %v11356_v5  ;;  %13211 = vmatprep.subr.mxu0 %v20798_v63 }
 0x9af   : > { %11400 = vmatprep.subr.mxu1 %v11354_v38  ;;  %13212 = vmatpush3.msra.mxu0 %v11355_v7 }
 0x9b0   : > { %11401 = vmatpush1.msra.mxu1 %v11353_v43  ;;  %11438 = vmatprep.mubr.f32.mxu1 %v20798_v63 }
 0x9b1   : > { %11402 = vmatprep.subr.mxu1 %v11351_v37  ;;  %13213 = vmatprep.subr.mxu0 %v20798_v63 }
 0x9b2   : > { %11403 = vmatpush1.msra.mxu1 %v11350_v42  ;;  %13214 = vmatpush3.msra.mxu0 %v11352_v14  ;;  %v11522_v14 = vpop.permute.xlu0 %11521 }
 0x9b3   : > { %11404 = vmatprep.subr.mxu1 %v11348_v39  ;;  %13215 = vmatprep.subr.mxu0 %v20798_v63 }
 0x9b4   : > { %11405 = vmatpush1.msra.mxu1 %v11347_v36  ;;  %13216 = vmatpush3.msra.mxu0 %v11349_v51 }
 0x9b5   : > { %12163 = vmatmul.mubr.msk.f32.vlgmr.msra.gmra.mxu1 %vm9762_vm12, %v12162_v10  ;;  %13217 = vmatprep.mubr.msk.f32.mxu0 %vm13642_vm11, %v20798_v63 }
 0x9b6   : > { %13218 = vmatmul.mubr.msk.f32.vlgmr.msra.gmra.mxu0 %vm9762_vm12, %v12162_v10 }
 0xa26   : > { %v9903_v20 = vpop.f32.mrf.mxu0 }
 0xa27   : > { %v9832_v25 = vpop.f32.mrf.mxu1 }
 0xa28   : > { %v13131_v9 = vpop.f32.mrf.mxu0 }
 0xa29   : > { %v9834_v34 = vpop.f32.mrf.mxu1 }
 0xa30   : > { %v10103_v56 = vpop.f32.mrf.mxu0  ;;  %v10032_v29 = vpop.f32.mrf.mxu1 }
 0xa31   : > { %v10033_v24 = vadd.f32 %v10032_v29, %v9832_v25  ;;  %v10104_v55 = vadd.f32 %v10103_v56, %v9903_v20 }
 0xa32   : > { %v13142_v32 = vpop.f32.mrf.mxu0  ;;  %v10034_v13 = vpop.f32.mrf.mxu1 }
 0xa33   : > { %v10035_v4 = vadd.f32 %v10034_v13, %v9834_v34 }
 0xa39   : > { %v10305_v0 = vpop.f32.mrf.mxu0 }
 0xa3a   : > { %v10234_v21 = vpop.f32.mrf.mxu1  ;;  %v10311_v3 = vadd.f32 %v10305_v0, %v10104_v55 }
 0xa3b   : > { %v13153_v28 = vpop.f32.mrf.mxu0  ;;  %v10309_v1 = vadd.f32 %v10234_v21, %v10033_v24 }
 0xa3c   : > { %v10236_v22 = vpop.f32.mrf.mxu1 }
 0xa3d   : > { %v10310_v11 = vadd.f32 %v10236_v22, %v10035_v4 }
 0xa43   : > { %v10510_v26 = vpop.f32.mrf.mxu0 }
 0xa44   : > { %v10439_v6 = vpop.f32.mrf.mxu1  ;;  %v10516_v48 = vadd.f32 %v10510_v26, %v10311_v3 }
 0xa45   : > { %v13164_v19 = vpop.f32.mrf.mxu0  ;;  %v10514_v60 = vadd.f32 %v10439_v6, %v10309_v1 }
 0xa46   : > { %v10441_v61 = vpop.f32.mrf.mxu1 }
 0xa47   : > { %v10515_v44 = vadd.f32 %v10441_v61, %v10310_v11 }
 0xa4d   : > { %v10659_v52 = vpop.f32.mrf.mxu0 }
 0xa4e   : > { %v10588_v47 = vpop.f32.mrf.mxu1  ;;  %v10665_v16 = vadd.f32 %v10659_v52, %v10516_v48 }
 0xa4f   : > { %v13175_v12 = vpop.f32.mrf.mxu0  ;;  %v10663_v54 = vadd.f32 %v10588_v47, %v10514_v60 }
 0xa50   : > { %v10590_v18 = vpop.f32.mrf.mxu1 }
 0xa51   : > { %v10664_v15 = vadd.f32 %v10590_v18, %v10515_v44 }
 0xa57   : > { %v10896_v63 = vpop.f32.mrf.mxu0 }
 0xa58   : > { %v10825_v31 = vpop.f32.mrf.mxu1  ;;  %v10902_v57 = vadd.f32 %v10896_v63, %v10665_v16 }
 0xa59   : > { %v13186_v49 = vpop.f32.mrf.mxu0  ;;  %v10900_v53 = vadd.f32 %v10825_v31, %v10663_v54 }
 0xa5a   : > { %v10827_v46 = vpop.f32.mrf.mxu1 }
 0xa5b   : > { %v10901_v59 = vadd.f32 %v10827_v46, %v10664_v15 }
 0xa61   : > { %v11101_v2 = vpop.f32.mrf.mxu0 }
 0xa62   : > { %v11030_v17 = vpop.f32.mrf.mxu1  ;;  %v11107_v45 = vadd.f32 %v11101_v2, %v10902_v57 }
 0xa63   : > { %v13197_v8 = vpop.f32.mrf.mxu0  ;;  %v11105_v27 = vadd.f32 %v11030_v17, %v10900_v53 }
 0xa64   : > { %v11032_v41 = vpop.f32.mrf.mxu1 }
 0xa65   : > { %v11106_v58 = vadd.f32 %v11032_v41, %v10901_v59 }
 0xa6b   : > { %v11306_v62 = vpop.f32.mrf.mxu0 }
 0xa6c   : > { %v11235_v30 = vpop.f32.mrf.mxu1  ;;  %v11312_v40 = vadd.f32 %v11306_v62, %v11107_v45 }
 0xa6d   : > { %v13208_v35 = vpop.f32.mrf.mxu0  ;;  %v11310_v33 = vadd.f32 %v11235_v30, %v11105_v27 }
 0xa6e   : > { %v11237_v23 = vpop.f32.mrf.mxu1 }
 0xa6f   : > { %v11311_v38 = vadd.f32 %v11237_v23, %v11106_v58 }
 0xa75   : > { %v11440_v5 = vpop.f32.mrf.mxu1 }
 0xa76   : > { %v11515_v7 = vadd.f32 %v11440_v5, %v11310_v33  ;;  %v11511_v43 = vpop.f32.mrf.mxu0 }
 0xa77   : > { %v11442_v50 = vpop.f32.mrf.mxu1  ;;  %v11517_v37 = vadd.f32 %v11511_v43, %v11312_v40 }
 0xa78   : > { %v11524_v42 = vadd.f32 %v11522_v14, %v11515_v7  ;;  %v11516_v39 = vadd.f32 %v11442_v50, %v11311_v38  ;;  %v13219_v10 = vpop.f32.mrf.mxu0 }
 0xa79   : > { %v11526_v36 = vadd.f32 %v11522_v14, %v11517_v37 }
 0xa7a   : > { %11527 = vst [vmem:[%s359_s24] sm:$0xff] %v11524_v42  ;;  %v11525_v51 = vadd.f32 %v11522_v14, %v11516_v39 }
 0xa7b   : > { %11529 = vst [vmem:[%s359_s24 + $0x10] sm:$0xff] %v11526_v36 }
 0xa7c   : > { %11528 = vst [vmem:[%s359_s24 + $0x8] sm:$0xff] %v11525_v51 }
 0xa7d PF: > { %s20_s13 = sadd.s32 1, %s13630_s13  }
 0xa7e   : > { %p17_p4 = scmp.ge.s32.totalorder %s20_s13, 4  }
 0xa80   :  { %19 = sbr.rel (!%p17_p4) target bundleno = 1 (0x1), region = 122 }

</bundles_post_ra>
